<compile_context>
chip_gen: v7x
topology: tpu7x:2x2x1
jax: 0.10.0
libtpu: 0.0.40
codegen_flags: <defaults>
</compile_context>

<pallas_src>
import numpy as np

import jax
import jax.numpy as jnp
from jax import lax
from jax.experimental import pallas as pl
from jax.experimental.pallas import tpu as pltpu

jax.config.update("jax_default_matmul_precision", "highest")

STRIDES = (1, 2, 2, 2)  # W_Module stage strides (fixed by the PyTorch module)
_HI = lax.Precision.HIGHEST


def _dot(a, b):
    return jnp.dot(a, b, preferred_element_type=jnp.float32, precision=_HI)


# ----------------------------------------------------------------------------
# Constant matrices built once at pack time (static, float32 0/1)
# ----------------------------------------------------------------------------
def _conv_select(n, t_in, t_out, stride):
    """G[k]: (n*t_in, n*t_out) selection matrix for tap k of a 1x3, pad-1 conv."""
    g = np.zeros((3, n * t_in, n * t_out), np.float32)
    for k in range(3):
        for node in range(n):
            for j in range(t_out):
                src = stride * j + k - 1
                if 0 <= src < t_in:
                    g[k, node * t_in + src, node * t_out + j] = 1.0
    return jnp.asarray(g)


def _place(n, t_src, t_dst, off):
    """Placement matrix (n*t_src, n*t_dst): per-node copy into time slots
    [off, off+t_src) of the destination -- implements the decoder concat."""
    p = np.zeros((n * t_src, n * t_dst), np.float32)
    for node in range(n):
        for j in range(t_src):
            p[node * t_src + j, node * t_dst + off + j] = 1.0
    return jnp.asarray(p)


# ----------------------------------------------------------------------------
# Parameter packing: lay weights out once for the fused kernel
# ----------------------------------------------------------------------------
def pack_params(params):
    wb = params["wblocks"]
    hidden, n, seq = wb[0]["ln_w"].shape
    out_dim = params["fc2_w"].shape[0]

    flat = []
    t_in = seq
    t_outs = []
    for i, p in enumerate(wb):
        cout, _, t_out = p["ln_w"].shape
        flat += [
            _conv_select(n, t_in, t_out, STRIDES[i]),   # (3, n*t_in, n*t_out)
            jnp.transpose(p["w1"], (2, 0, 1)),          # (3, cout, cin)
            p["b1"].reshape(cout, 1),
            jnp.transpose(p["w2"], (2, 0, 1)),          # (3, cout, cin)
            p["b2"].reshape(cout, 1),
            p["ln_w"].reshape(cout, n * t_out),
            p["ln_b"].reshape(cout, n * t_out),
        ]
        t_outs.append(t_out)
        t_in = t_out

    # The PyTorch decoder concat only lines up when l4 == 1 (seq_length == 8).
    assert t_outs[-1] == 1 and 1 + t_outs[3] + t_outs[2] + t_outs[1] == seq

    es = params["es"]
    cp = es["stcc_w"].shape[0]
    flat += [
        es["stcc_w"],                                   # (cp, hidden)
        es["stcc_b"].reshape(cp, 1),
        jnp.transpose(es["gcn_w"], (1, 2, 0)),          # (c_out, c_in, n)
        es["gcn_b"].T,                                  # (c_out, n)
    ]
    flat += [
        params["ce_w"],                                 # (hidden, hidden)
        params["ce_b"].reshape(hidden, 1),
        jnp.stack(params["ci_w"]),                      # (4, hidden, hidden)
        jnp.stack([b.reshape(hidden, 1) for b in params["ci_b"]]),
    ]
    flat += [
        _place(n, 1, seq, 0),                           # Ce(Fg)   -> slot 0
        _place(n, t_outs[3], seq, 1),                   # Ci3 cats3 -> slot 1
        _place(n, t_outs[2], seq, 1 + t_outs[3]),       # Ci2 cats2 -> slots 2..3
        _place(n, t_outs[1], seq, 1 + t_outs[3] + t_outs[2]),  # Ci1 -> slots 4..7
    ]
    flat += [
        params["fc1_w"],
        params["fc1_b"].reshape(hidden, 1),
        params["fc2_w"],
        params["fc2_b"].reshape(out_dim, 1),
    ]
    return dict(flat=flat, n=int(n), seq=int(seq), hidden=int(hidden),
                out_dim=int(out_dim))


# ----------------------------------------------------------------------------
# The fused kernel: one grid step == one batch element
# ----------------------------------------------------------------------------
def _esgcn_kernel(*refs):
    it = iter(refs)
    x_ref = next(it)
    stage_refs = [tuple(next(it) for _ in range(7)) for _ in range(4)]
    stcc_w, stcc_b, gcn_w, gcn_b = (next(it) for _ in range(4))
    ce_w, ce_b, ci_w, ci_b = (next(it) for _ in range(4))
    p_refs = [next(it) for _ in range(4)]
    fc1_w, fc1_b, fc2_w, fc2_b = (next(it) for _ in range(4))
    o_ref = next(it)

    # ---------------- W_Module: 4 gated-conv + LayerNorm stages --------------
    a = x_ref[0]                                  # (c_in=1, n*seq), lane-dense
    cats = []
    for g_ref, w1_ref, b1_ref, w2_ref, b2_ref, lnw_ref, lnb_ref in stage_refs:
        cout = w1_ref.shape[1]
        nt_out = g_ref.shape[2]
        y1 = jnp.zeros((cout, nt_out), jnp.float32)
        y2 = jnp.zeros((cout, nt_out), jnp.float32)
        for k in range(3):                        # 1x3 conv as 3 tap matmuls
            tap = _dot(a, g_ref[k])               # (c_in, n*t_out)
            y1 = y1 + _dot(w1_ref[k], tap)
            y2 = y2 + _dot(w2_ref[k], tap)
        g = jax.nn.sigmoid(y1 + b1_ref[...]) * jnp.tanh(y2 + b2_ref[...])
        # LayerNorm over the full (c, n, t) extent of this batch element
        cnt = float(g.shape[0] * g.shape[1])
        mean = jnp.sum(g, keepdims=True) / cnt
        d = g - mean
        var = jnp.sum(d * d, keepdims=True) / cnt
        a = d * lax.rsqrt(var + 1e-5) * lnw_ref[...] + lnb_ref[...]
        cats.append(a)

    # ---------------- ES module (l4 == 1) ------------------------------------
    f4 = cats[3]                                  # (c4, n)
    fcx = _dot(stcc_w[...], f4) + stcc_b[...]     # (cp, n)   STCC 1x1 conv
    fl = fcx                                      # last (and only) timestep
    xx = jnp.sum(fl * fl, axis=1, keepdims=True)  # (cp, 1)
    yy = jnp.sum(fcx * fcx, axis=1, keepdims=True)
    l2 = jnp.sum(jnp.sqrt(xx) * jnp.sqrt(yy), keepdims=True)   # (1, 1)
    dn = (((0,), (0,)), ((), ()))                 # contract channel dim of both
    s = lax.dot_general(fl, fcx, dn, preferred_element_type=jnp.float32,
                        precision=_HI) / l2       # S[k, m]
    st = lax.dot_general(fcx, fl, dn, preferred_element_type=jnp.float32,
                         precision=_HI) / l2      # S[m, k], laid out as [k, m]
    # rt[c, k, m]  == spec R[c, m, k] = F4[c, m] * S[k, m]
    rt = f4[:, None, :] * s[None, :, :]           # (c4, n, n)
    # rt2[c, k, m] == spec R[c, k, m] = F4[c, k] * S[m, k]
    rt2 = f4[:, :, None] * st[None, :, :]         # (c4, n, n)
    mx = rt2[0]
    for c in range(1, rt2.shape[0]):
        mx = jnp.maximum(mx, rt2[c])
    a_km = jnp.maximum(jnp.tanh(mx), 0.0)         # spec A[k, m]
    # spec X[k, c] = sum_m R[c, m, k] * A[k, m]  -> stored as x2[c, k]
    x2 = jnp.sum(rt * a_km[None, :, :], axis=2)   # (c4, n)
    # per-node GCN linear: Fg[o, k] = sum_c gcn_w[k, o, c] * X[k, c] + gcn_b[k, o]
    w = gcn_w[...]                                # (c_out, c_in, n)
    fg = gcn_b[...]                               # (c_out, n)
    for c in range(w.shape[1]):
        fg = fg + w[:, c, :] * x2[c:c + 1, :]

    # ---------------- Decoder: Ce + Ci residuals + time concat ---------------
    out = _dot(ce_w[...], fg) + ce_b[...]         # (c4, n)  -> time slot 0
    out = _dot(out, p_refs[0][...])               # scatter into (c4, n*seq)
    for idx, pref in zip((3, 2, 1), p_refs[1:]):
        res = _dot(ci_w[idx], cats[idx]) + ci_b[idx]
        out = out + _dot(res, pref[...])
    out = out + _dot(ci_w[0], cats[0]) + ci_b[0]  # residual add over full t

    # ---------------- FC head ------------------------------------------------
    h = jnp.maximum(_dot(fc1_w[...], out) + fc1_b[...], 0.0)
    o_ref[0] = _dot(fc2_w[...], h) + fc2_b[...]   # (out_dim, n*seq), lane-dense


# ----------------------------------------------------------------------------
# Forward wrapper: one pallas_call for the full network
# ----------------------------------------------------------------------------
def esgcn_forward(kp, x):
    # x: (b, t, n, 1)
    b, t, n, _ = x.shape
    assert t == kp["seq"] and n == kp["n"]
    nt = n * t
    out_dim = kp["out_dim"]
    flat = kp["flat"]

    # single layout change at the model boundary: (b, t, n, 1) -> (b, 1, n*t)
    xk = jnp.transpose(x[..., 0], (0, 2, 1)).reshape(b, 1, nt)

    def rep(arr):
        nd = arr.ndim
        return pl.BlockSpec(arr.shape, lambda i, _n=nd: (0,) * _n)

    in_specs = [pl.BlockSpec((1, 1, nt), lambda i: (i, 0, 0))]
    in_specs += [rep(a) for a in flat]
    out_spec = pl.BlockSpec((1, out_dim, nt), lambda i: (i, 0, 0))

    y = pl.pallas_call(
        _esgcn_kernel,
        out_shape=jax.ShapeDtypeStruct((b, out_dim, nt), jnp.float32),
        grid=(b,),
        in_specs=in_specs,
        out_specs=out_spec,
        compiler_params=pltpu.CompilerParams(dimension_semantics=("parallel",)),
    )(xk, *flat)

    # (b, out_dim, n*t) -> (b, t, n, out_dim)
    return jnp.transpose(y.reshape(b, out_dim, n, t), (0, 3, 2, 1))


# ----------------------------------------------------------------------------
# Pure-JAX reference (mirrors the PyTorch forward) for self-checking
# ----------------------------------------------------------------------------
def _conv1x3_ref(x, w, b, stride):
    out = jax.lax.conv_general_dilated(
        x,
        w[:, :, None, :],
        window_strides=(1, stride),
        padding=((0, 0), (1, 1)),
        dimension_numbers=("NCHW", "OIHW", "NCHW"),
    )
    return out + b[None, :, None, None]


def reference_forward(params, x):
    out = jnp.transpose(x, (0, 3, 2, 1))
    cats = []
    for i, p in enumerate(params["wblocks"]):
        sig = jax.nn.sigmoid(_conv1x3_ref(out, p["w1"], p["b1"], STRIDES[i]))
        tan = jnp.tanh(_conv1x3_ref(out, p["w2"], p["b2"], STRIDES[i]))
        g = sig * tan
        mean = jnp.mean(g, axis=(1, 2, 3), keepdims=True)
        var = jnp.mean((g - mean) ** 2, axis=(1, 2, 3), keepdims=True)
        out = (g - mean) / jnp.sqrt(var + 1e-5) * p["ln_w"][None] + p["ln_b"][None]
        cats.append(out)
    F4 = out
    es = params["es"]
    Fc = jnp.einsum("pc,bcnt->bpnt", es["stcc_w"], F4) + es["stcc_b"][None, :, None, None]
    Fl = Fc[:, :, :, -1]
    xy = jnp.einsum("bcn,bcmt->bnmt", Fl, Fc)
    xx = jnp.sqrt(jnp.einsum("bcn,bcn->bc", Fl, Fl))
    yy = jnp.sqrt(jnp.einsum("bcnt,bcnt->bc", Fc, Fc))
    l2 = jnp.einsum("bc,bc->b", xx, yy)[:, None, None, None]
    S = xy / l2
    R = jnp.einsum("bkmj,bcmj->bcmk", S, F4)
    A = jax.nn.relu(jnp.tanh(jnp.max(R, axis=1)))
    X = jnp.einsum("bcmk,bkm->bkc", R, A)
    Fg = jnp.einsum("bkc,koc->bko", X, es["gcn_w"]) + es["gcn_b"][None]
    Fg = jnp.transpose(Fg, (0, 2, 1))[..., None]
    out2 = jnp.einsum("oc,bcnt->bont", params["ce_w"], Fg) + params["ce_b"][None, :, None, None]
    for i in range(4):
        idx = 4 - i - 1
        res = (
            jnp.einsum("oc,bcnt->bont", params["ci_w"][idx], cats[idx])
            + params["ci_b"][idx][None, :, None, None]
        )
        if idx != 0:
            out2 = jnp.concatenate([out2, res], axis=-1)
        else:
            out2 = out2 + res
    xp = jnp.transpose(out2, (0, 3, 2, 1))
    h = jax.nn.relu(xp @ params["fc1_w"].T + params["fc1_b"])
    return h @ params["fc2_w"].T + params["fc2_b"]


# ----------------------------------------------------------------------------
# Deterministic parameter init (shapes from the PyTorch __init__)
# ----------------------------------------------------------------------------
def init_params(key, n, hidden, seq, out_dim):
    kit = iter(jax.random.split(key, 64))

    def rnd(shape, scale=0.4):
        return scale * jax.random.uniform(next(kit), shape, jnp.float32, -1.0, 1.0)

    dims = [(1, hidden), (hidden, hidden), (hidden, hidden), (hidden, hidden)]
    wblocks = []
    l = seq
    for i, (cin, cout) in enumerate(dims):
        l_out = (l + 2 - 3) // STRIDES[i] + 1
        wblocks.append(
            dict(
                w1=rnd((cout, cin, 3)),
                b1=rnd((cout,)),
                w2=rnd((cout, cin, 3)),
                b2=rnd((cout,)),
                ln_w=1.0 + rnd((cout, n, l_out), 0.1),
                ln_b=rnd((cout, n, l_out), 0.1),
            )
        )
        l = l_out
    cp = hidden // 4
    es = dict(
        stcc_w=rnd((cp, hidden)),
        stcc_b=rnd((cp,)),
        gcn_w=rnd((n, hidden, hidden)),
        gcn_b=rnd((n, hidden)),
    )
    return dict(
        wblocks=wblocks,
        es=es,
        ce_w=rnd((hidden, hidden)),
        ce_b=rnd((hidden,)),
        ci_w=[rnd((hidden, hidden)) for _ in range(4)],
        ci_b=[rnd((hidden,)) for _ in range(4)],
        fc1_w=rnd((hidden, hidden)),
        fc1_b=rnd((hidden,)),
        fc2_w=rnd((out_dim, hidden)),
        fc2_b=rnd((out_dim,)),
    )


if __name__ == "__main__":
    # ESGCN architecture constraints: input channels = 1, hidden = 4,
    # seq_length = 8 (so the Ce/Cis concat lengths line up exactly).
    B, T, N, HID, OUT = 2, 8, 16, 4, 2
    key = jax.random.PRNGKey(0)
    pkey, xkey = jax.random.split(key)
    params = init_params(pkey, N, HID, T, OUT)
    x = jax.random.normal(xkey, (B, T, N, 1), jnp.float32)

    kp = pack_params(params)
    y = esgcn_forward(kp, x)
    y = jax.block_until_ready(y)
    assert y.shape == (B, T, N, OUT), y.shape

    y_ref = reference_forward(params, x)
    err = float(jnp.max(jnp.abs(y - y_ref)))
    assert err < 2e-3, f"mismatch vs jnp reference: {err}"
    print("KERNEL_OK")
</pallas_src>

<mosaic_0001>
module attributes {stable_mosaic.version = 11 : i64} {
  func.func @_esgcn_kernel(%arg0: i32, %arg1: memref<1x1x128xf32, #tpu.memory_space<vmem>>, %arg2: memref<3x128x128xf32, #tpu.memory_space<vmem>>, %arg3: memref<3x4x1xf32, #tpu.memory_space<vmem>>, %arg4: memref<4x1xf32, #tpu.memory_space<vmem>>, %arg5: memref<3x4x1xf32, #tpu.memory_space<vmem>>, %arg6: memref<4x1xf32, #tpu.memory_space<vmem>>, %arg7: memref<4x128xf32, #tpu.memory_space<vmem>>, %arg8: memref<4x128xf32, #tpu.memory_space<vmem>>, %arg9: memref<3x128x64xf32, #tpu.memory_space<vmem>>, %arg10: memref<3x4x4xf32, #tpu.memory_space<vmem>>, %arg11: memref<4x1xf32, #tpu.memory_space<vmem>>, %arg12: memref<3x4x4xf32, #tpu.memory_space<vmem>>, %arg13: memref<4x1xf32, #tpu.memory_space<vmem>>, %arg14: memref<4x64xf32, #tpu.memory_space<vmem>>, %arg15: memref<4x64xf32, #tpu.memory_space<vmem>>, %arg16: memref<3x64x32xf32, #tpu.memory_space<vmem>>, %arg17: memref<3x4x4xf32, #tpu.memory_space<vmem>>, %arg18: memref<4x1xf32, #tpu.memory_space<vmem>>, %arg19: memref<3x4x4xf32, #tpu.memory_space<vmem>>, %arg20: memref<4x1xf32, #tpu.memory_space<vmem>>, %arg21: memref<4x32xf32, #tpu.memory_space<vmem>>, %arg22: memref<4x32xf32, #tpu.memory_space<vmem>>, %arg23: memref<3x32x16xf32, #tpu.memory_space<vmem>>, %arg24: memref<3x4x4xf32, #tpu.memory_space<vmem>>, %arg25: memref<4x1xf32, #tpu.memory_space<vmem>>, %arg26: memref<3x4x4xf32, #tpu.memory_space<vmem>>, %arg27: memref<4x1xf32, #tpu.memory_space<vmem>>, %arg28: memref<4x16xf32, #tpu.memory_space<vmem>>, %arg29: memref<4x16xf32, #tpu.memory_space<vmem>>, %arg30: memref<1x4xf32, #tpu.memory_space<vmem>>, %arg31: memref<1x1xf32, #tpu.memory_space<vmem>>, %arg32: memref<4x4x16xf32, #tpu.memory_space<vmem>>, %arg33: memref<4x16xf32, #tpu.memory_space<vmem>>, %arg34: memref<4x4xf32, #tpu.memory_space<vmem>>, %arg35: memref<4x1xf32, #tpu.memory_space<vmem>>, %arg36: memref<4x4x4xf32, #tpu.memory_space<vmem>>, %arg37: memref<4x4x1xf32, #tpu.memory_space<vmem>>, %arg38: memref<16x128xf32, #tpu.memory_space<vmem>>, %arg39: memref<16x128xf32, #tpu.memory_space<vmem>>, %arg40: memref<32x128xf32, #tpu.memory_space<vmem>>, %arg41: memref<64x128xf32, #tpu.memory_space<vmem>>, %arg42: memref<4x4xf32, #tpu.memory_space<vmem>>, %arg43: memref<4x1xf32, #tpu.memory_space<vmem>>, %arg44: memref<2x4xf32, #tpu.memory_space<vmem>>, %arg45: memref<2x1xf32, #tpu.memory_space<vmem>>, %arg46: memref<1x2x128xf32, #tpu.memory_space<vmem>>) attributes {dimension_semantics = [#tpu.dimension_semantics<parallel>], iteration_bounds = array<i64: 2>, scalar_prefetch = 0 : i64, scratch_operands = 0 : i64, tpu.core_type = #tpu.core_type<tc>, window_params = [{transform_indices = @transform_0, window_bounds = array<i64: 1, 1, 128>}, {pipeline_mode = #tpu.pipeline_mode<synchronous>, transform_indices = @transform_1, window_bounds = array<i64: 3, 128, 128>}, {pipeline_mode = #tpu.pipeline_mode<synchronous>, transform_indices = @transform_2, window_bounds = array<i64: 3, 4, 1>}, {pipeline_mode = #tpu.pipeline_mode<synchronous>, transform_indices = @transform_3, window_bounds = array<i64: 4, 1>}, {pipeline_mode = #tpu.pipeline_mode<synchronous>, transform_indices = @transform_4, window_bounds = array<i64: 3, 4, 1>}, {pipeline_mode = #tpu.pipeline_mode<synchronous>, transform_indices = @transform_5, window_bounds = array<i64: 4, 1>}, {pipeline_mode = #tpu.pipeline_mode<synchronous>, transform_indices = @transform_6, window_bounds = array<i64: 4, 128>}, {pipeline_mode = #tpu.pipeline_mode<synchronous>, transform_indices = @transform_7, window_bounds = array<i64: 4, 128>}, {pipeline_mode = #tpu.pipeline_mode<synchronous>, transform_indices = @transform_8, window_bounds = array<i64: 3, 128, 64>}, {pipeline_mode = #tpu.pipeline_mode<synchronous>, transform_indices = @transform_9, window_bounds = array<i64: 3, 4, 4>}, {pipeline_mode = #tpu.pipeline_mode<synchronous>, transform_indices = @transform_10, window_bounds = array<i64: 4, 1>}, {pipeline_mode = #tpu.pipeline_mode<synchronous>, transform_indices = @transform_11, window_bounds = array<i64: 3, 4, 4>}, {pipeline_mode = #tpu.pipeline_mode<synchronous>, transform_indices = @transform_12, window_bounds = array<i64: 4, 1>}, {pipeline_mode = #tpu.pipeline_mode<synchronous>, transform_indices = @transform_13, window_bounds = array<i64: 4, 64>}, {pipeline_mode = #tpu.pipeline_mode<synchronous>, transform_indices = @transform_14, window_bounds = array<i64: 4, 64>}, {pipeline_mode = #tpu.pipeline_mode<synchronous>, transform_indices = @transform_15, window_bounds = array<i64: 3, 64, 32>}, {pipeline_mode = #tpu.pipeline_mode<synchronous>, transform_indices = @transform_16, window_bounds = array<i64: 3, 4, 4>}, {pipeline_mode = #tpu.pipeline_mode<synchronous>, transform_indices = @transform_17, window_bounds = array<i64: 4, 1>}, {pipeline_mode = #tpu.pipeline_mode<synchronous>, transform_indices = @transform_18, window_bounds = array<i64: 3, 4, 4>}, {pipeline_mode = #tpu.pipeline_mode<synchronous>, transform_indices = @transform_19, window_bounds = array<i64: 4, 1>}, {pipeline_mode = #tpu.pipeline_mode<synchronous>, transform_indices = @transform_20, window_bounds = array<i64: 4, 32>}, {pipeline_mode = #tpu.pipeline_mode<synchronous>, transform_indices = @transform_21, window_bounds = array<i64: 4, 32>}, {pipeline_mode = #tpu.pipeline_mode<synchronous>, transform_indices = @transform_22, window_bounds = array<i64: 3, 32, 16>}, {pipeline_mode = #tpu.pipeline_mode<synchronous>, transform_indices = @transform_23, window_bounds = array<i64: 3, 4, 4>}, {pipeline_mode = #tpu.pipeline_mode<synchronous>, transform_indices = @transform_24, window_bounds = array<i64: 4, 1>}, {pipeline_mode = #tpu.pipeline_mode<synchronous>, transform_indices = @transform_25, window_bounds = array<i64: 3, 4, 4>}, {pipeline_mode = #tpu.pipeline_mode<synchronous>, transform_indices = @transform_26, window_bounds = array<i64: 4, 1>}, {pipeline_mode = #tpu.pipeline_mode<synchronous>, transform_indices = @transform_27, window_bounds = array<i64: 4, 16>}, {pipeline_mode = #tpu.pipeline_mode<synchronous>, transform_indices = @transform_28, window_bounds = array<i64: 4, 16>}, {pipeline_mode = #tpu.pipeline_mode<synchronous>, transform_indices = @transform_29, window_bounds = array<i64: 1, 4>}, {pipeline_mode = #tpu.pipeline_mode<synchronous>, transform_indices = @transform_30, window_bounds = array<i64: 1, 1>}, {pipeline_mode = #tpu.pipeline_mode<synchronous>, transform_indices = @transform_31, window_bounds = array<i64: 4, 4, 16>}, {pipeline_mode = #tpu.pipeline_mode<synchronous>, transform_indices = @transform_32, window_bounds = array<i64: 4, 16>}, {pipeline_mode = #tpu.pipeline_mode<synchronous>, transform_indices = @transform_33, window_bounds = array<i64: 4, 4>}, {pipeline_mode = #tpu.pipeline_mode<synchronous>, transform_indices = @transform_34, window_bounds = array<i64: 4, 1>}, {pipeline_mode = #tpu.pipeline_mode<synchronous>, transform_indices = @transform_35, window_bounds = array<i64: 4, 4, 4>}, {pipeline_mode = #tpu.pipeline_mode<synchronous>, transform_indices = @transform_36, window_bounds = array<i64: 4, 4, 1>}, {pipeline_mode = #tpu.pipeline_mode<synchronous>, transform_indices = @transform_37, window_bounds = array<i64: 16, 128>}, {pipeline_mode = #tpu.pipeline_mode<synchronous>, transform_indices = @transform_38, window_bounds = array<i64: 16, 128>}, {pipeline_mode = #tpu.pipeline_mode<synchronous>, transform_indices = @transform_39, window_bounds = array<i64: 32, 128>}, {pipeline_mode = #tpu.pipeline_mode<synchronous>, transform_indices = @transform_40, window_bounds = array<i64: 64, 128>}, {pipeline_mode = #tpu.pipeline_mode<synchronous>, transform_indices = @transform_41, window_bounds = array<i64: 4, 4>}, {pipeline_mode = #tpu.pipeline_mode<synchronous>, transform_indices = @transform_42, window_bounds = array<i64: 4, 1>}, {pipeline_mode = #tpu.pipeline_mode<synchronous>, transform_indices = @transform_43, window_bounds = array<i64: 2, 4>}, {pipeline_mode = #tpu.pipeline_mode<synchronous>, transform_indices = @transform_44, window_bounds = array<i64: 2, 1>}, {transform_indices = @transform_45, window_bounds = array<i64: 1, 2, 128>}]} {
    %c0 = arith.constant 0 : index
    %c0_0 = arith.constant 0 : index
    %c0_1 = arith.constant 0 : index
    %0 = vector.load %arg1[%c0, %c0_0, %c0_1] : memref<1x1x128xf32, #tpu.memory_space<vmem>>, vector<1x1x128xf32>
    %1 = vector.shape_cast %0 : vector<1x1x128xf32> to vector<1x128xf32>
    %cst = arith.constant 0.000000e+00 : f32
    %2 = vector.broadcast %cst : f32 to vector<4x128xf32>
    %cst_2 = arith.constant 0.000000e+00 : f32
    %3 = vector.broadcast %cst_2 : f32 to vector<4x128xf32>
    %c0_3 = arith.constant 0 : index
    %c0_4 = arith.constant 0 : index
    %c0_5 = arith.constant 0 : index
    %4 = vector.load %arg2[%c0_3, %c0_4, %c0_5] : memref<3x128x128xf32, #tpu.memory_space<vmem>>, vector<1x128x128xf32>
    %5 = vector.shape_cast %4 : vector<1x128x128xf32> to vector<128x128xf32>
    %cst_6 = arith.constant dense<0.000000e+00> : vector<1x128xf32>
    %6 = tpu.matmul %1, %5, %cst_6 {dimension_numbers = #tpu.dot_dimension_numbers<[1], [0], [0], [1], [0, 0, 1, 1], [], []>, precision = #tpu.contract_precision<fp32>} : vector<1x128xf32>, vector<128x128xf32>, vector<1x128xf32> -> vector<1x128xf32>
    %c0_7 = arith.constant 0 : index
    %c0_8 = arith.constant 0 : index
    %c0_9 = arith.constant 0 : index
    %7 = vector.load %arg3[%c0_7, %c0_8, %c0_9] : memref<3x4x1xf32, #tpu.memory_space<vmem>>, vector<1x4x1xf32>
    %8 = vector.shape_cast %7 : vector<1x4x1xf32> to vector<4x1xf32>
    %cst_10 = arith.constant dense<0.000000e+00> : vector<4x128xf32>
    %9 = tpu.matmul %8, %6, %cst_10 {dimension_numbers = #tpu.dot_dimension_numbers<[1], [0], [0], [1], [0, 0, 1, 1], [], []>, precision = #tpu.contract_precision<fp32>} : vector<4x1xf32>, vector<1x128xf32>, vector<4x128xf32> -> vector<4x128xf32>
    %10 = arith.addf %2, %9 : vector<4x128xf32>
    %c0_11 = arith.constant 0 : index
    %c0_12 = arith.constant 0 : index
    %c0_13 = arith.constant 0 : index
    %11 = vector.load %arg5[%c0_11, %c0_12, %c0_13] : memref<3x4x1xf32, #tpu.memory_space<vmem>>, vector<1x4x1xf32>
    %12 = vector.shape_cast %11 : vector<1x4x1xf32> to vector<4x1xf32>
    %cst_14 = arith.constant dense<0.000000e+00> : vector<4x128xf32>
    %13 = tpu.matmul %12, %6, %cst_14 {dimension_numbers = #tpu.dot_dimension_numbers<[1], [0], [0], [1], [0, 0, 1, 1], [], []>, precision = #tpu.contract_precision<fp32>} : vector<4x1xf32>, vector<1x128xf32>, vector<4x128xf32> -> vector<4x128xf32>
    %14 = arith.addf %3, %13 : vector<4x128xf32>
    %c1 = arith.constant 1 : index
    %c0_15 = arith.constant 0 : index
    %c0_16 = arith.constant 0 : index
    %15 = vector.load %arg2[%c1, %c0_15, %c0_16] : memref<3x128x128xf32, #tpu.memory_space<vmem>>, vector<1x128x128xf32>
    %16 = vector.shape_cast %15 : vector<1x128x128xf32> to vector<128x128xf32>
    %cst_17 = arith.constant dense<0.000000e+00> : vector<1x128xf32>
    %17 = tpu.matmul %1, %16, %cst_17 {dimension_numbers = #tpu.dot_dimension_numbers<[1], [0], [0], [1], [0, 0, 1, 1], [], []>, precision = #tpu.contract_precision<fp32>} : vector<1x128xf32>, vector<128x128xf32>, vector<1x128xf32> -> vector<1x128xf32>
    %c1_18 = arith.constant 1 : index
    %c0_19 = arith.constant 0 : index
    %c0_20 = arith.constant 0 : index
    %18 = vector.load %arg3[%c1_18, %c0_19, %c0_20] : memref<3x4x1xf32, #tpu.memory_space<vmem>>, vector<1x4x1xf32>
    %19 = vector.shape_cast %18 : vector<1x4x1xf32> to vector<4x1xf32>
    %cst_21 = arith.constant dense<0.000000e+00> : vector<4x128xf32>
    %20 = tpu.matmul %19, %17, %cst_21 {dimension_numbers = #tpu.dot_dimension_numbers<[1], [0], [0], [1], [0, 0, 1, 1], [], []>, precision = #tpu.contract_precision<fp32>} : vector<4x1xf32>, vector<1x128xf32>, vector<4x128xf32> -> vector<4x128xf32>
    %21 = arith.addf %10, %20 : vector<4x128xf32>
    %c1_22 = arith.constant 1 : index
    %c0_23 = arith.constant 0 : index
    %c0_24 = arith.constant 0 : index
    %22 = vector.load %arg5[%c1_22, %c0_23, %c0_24] : memref<3x4x1xf32, #tpu.memory_space<vmem>>, vector<1x4x1xf32>
    %23 = vector.shape_cast %22 : vector<1x4x1xf32> to vector<4x1xf32>
    %cst_25 = arith.constant dense<0.000000e+00> : vector<4x128xf32>
    %24 = tpu.matmul %23, %17, %cst_25 {dimension_numbers = #tpu.dot_dimension_numbers<[1], [0], [0], [1], [0, 0, 1, 1], [], []>, precision = #tpu.contract_precision<fp32>} : vector<4x1xf32>, vector<1x128xf32>, vector<4x128xf32> -> vector<4x128xf32>
    %25 = arith.addf %14, %24 : vector<4x128xf32>
    %c2 = arith.constant 2 : index
    %c0_26 = arith.constant 0 : index
    %c0_27 = arith.constant 0 : index
    %26 = vector.load %arg2[%c2, %c0_26, %c0_27] : memref<3x128x128xf32, #tpu.memory_space<vmem>>, vector<1x128x128xf32>
    %27 = vector.shape_cast %26 : vector<1x128x128xf32> to vector<128x128xf32>
    %cst_28 = arith.constant dense<0.000000e+00> : vector<1x128xf32>
    %28 = tpu.matmul %1, %27, %cst_28 {dimension_numbers = #tpu.dot_dimension_numbers<[1], [0], [0], [1], [0, 0, 1, 1], [], []>, precision = #tpu.contract_precision<fp32>} : vector<1x128xf32>, vector<128x128xf32>, vector<1x128xf32> -> vector<1x128xf32>
    %c2_29 = arith.constant 2 : index
    %c0_30 = arith.constant 0 : index
    %c0_31 = arith.constant 0 : index
    %29 = vector.load %arg3[%c2_29, %c0_30, %c0_31] : memref<3x4x1xf32, #tpu.memory_space<vmem>>, vector<1x4x1xf32>
    %30 = vector.shape_cast %29 : vector<1x4x1xf32> to vector<4x1xf32>
    %cst_32 = arith.constant dense<0.000000e+00> : vector<4x128xf32>
    %31 = tpu.matmul %30, %28, %cst_32 {dimension_numbers = #tpu.dot_dimension_numbers<[1], [0], [0], [1], [0, 0, 1, 1], [], []>, precision = #tpu.contract_precision<fp32>} : vector<4x1xf32>, vector<1x128xf32>, vector<4x128xf32> -> vector<4x128xf32>
    %32 = arith.addf %21, %31 : vector<4x128xf32>
    %c2_33 = arith.constant 2 : index
    %c0_34 = arith.constant 0 : index
    %c0_35 = arith.constant 0 : index
    %33 = vector.load %arg5[%c2_33, %c0_34, %c0_35] : memref<3x4x1xf32, #tpu.memory_space<vmem>>, vector<1x4x1xf32>
    %34 = vector.shape_cast %33 : vector<1x4x1xf32> to vector<4x1xf32>
    %cst_36 = arith.constant dense<0.000000e+00> : vector<4x128xf32>
    %35 = tpu.matmul %34, %28, %cst_36 {dimension_numbers = #tpu.dot_dimension_numbers<[1], [0], [0], [1], [0, 0, 1, 1], [], []>, precision = #tpu.contract_precision<fp32>} : vector<4x1xf32>, vector<1x128xf32>, vector<4x128xf32> -> vector<4x128xf32>
    %36 = arith.addf %25, %35 : vector<4x128xf32>
    %c0_37 = arith.constant 0 : index
    %c0_38 = arith.constant 0 : index
    %37 = vector.load %arg4[%c0_37, %c0_38] : memref<4x1xf32, #tpu.memory_space<vmem>>, vector<4x1xf32>
    %38 = vector.broadcast %37 : vector<4x1xf32> to vector<4x128xf32>
    %39 = arith.addf %32, %38 : vector<4x128xf32>
    %40 = arith.negf %39 : vector<4x128xf32>
    %41 = math.exp %40 : vector<4x128xf32>
    %cst_39 = arith.constant 1.000000e+00 : f32
    %42 = vector.broadcast %cst_39 : f32 to vector<4x128xf32>
    %43 = arith.addf %42, %41 : vector<4x128xf32>
    %44 = arith.divf %42, %43 : vector<4x128xf32>
    %c0_40 = arith.constant 0 : index
    %c0_41 = arith.constant 0 : index
    %45 = vector.load %arg6[%c0_40, %c0_41] : memref<4x1xf32, #tpu.memory_space<vmem>>, vector<4x1xf32>
    %46 = vector.broadcast %45 : vector<4x1xf32> to vector<4x128xf32>
    %47 = arith.addf %36, %46 : vector<4x128xf32>
    %48 = math.tanh %47 : vector<4x128xf32>
    %49 = arith.mulf %44, %48 : vector<4x128xf32>
    %50 = vector.shape_cast %49 : vector<4x128xf32> to vector<1x4x128xf32>
    %cst_42 = arith.constant dense<0.000000e+00> : vector<1xf32>
    %51 = vector.multi_reduction <add>, %50, %cst_42 [1, 2] : vector<1x4x128xf32> to vector<1xf32>
    %52 = vector.shape_cast %51 : vector<1xf32> to vector<1x1x1xf32>
    %53 = vector.extract %52[0, 0, 0] : f32 from vector<1x1x1xf32>
    %54 = vector.broadcast %53 : f32 to vector<1x1xf32>
    %cst_43 = arith.constant 5.120000e+02 : f32
    %55 = vector.broadcast %cst_43 : f32 to vector<1x1xf32>
    %56 = arith.divf %54, %55 : vector<1x1xf32>
    %57 = vector.broadcast %56 : vector<1x1xf32> to vector<4x128xf32>
    %58 = arith.subf %49, %57 : vector<4x128xf32>
    %59 = arith.mulf %58, %58 : vector<4x128xf32>
    %60 = vector.shape_cast %59 : vector<4x128xf32> to vector<1x4x128xf32>
    %cst_44 = arith.constant dense<0.000000e+00> : vector<1xf32>
    %61 = vector.multi_reduction <add>, %60, %cst_44 [1, 2] : vector<1x4x128xf32> to vector<1xf32>
    %62 = vector.shape_cast %61 : vector<1xf32> to vector<1x1x1xf32>
    %63 = vector.extract %62[0, 0, 0] : f32 from vector<1x1x1xf32>
    %64 = vector.broadcast %63 : f32 to vector<1x1xf32>
    %cst_45 = arith.constant 5.120000e+02 : f32
    %65 = vector.broadcast %cst_45 : f32 to vector<1x1xf32>
    %66 = arith.divf %64, %65 : vector<1x1xf32>
    %cst_46 = arith.constant 9.99999974E-6 : f32
    %67 = vector.broadcast %cst_46 : f32 to vector<1x1xf32>
    %68 = arith.addf %66, %67 : vector<1x1xf32>
    %69 = math.rsqrt %68 : vector<1x1xf32>
    %70 = vector.broadcast %69 : vector<1x1xf32> to vector<4x128xf32>
    %71 = arith.mulf %58, %70 : vector<4x128xf32>
    %c0_47 = arith.constant 0 : index
    %c0_48 = arith.constant 0 : index
    %72 = vector.load %arg7[%c0_47, %c0_48] : memref<4x128xf32, #tpu.memory_space<vmem>>, vector<4x128xf32>
    %73 = arith.mulf %71, %72 : vector<4x128xf32>
    %c0_49 = arith.constant 0 : index
    %c0_50 = arith.constant 0 : index
    %74 = vector.load %arg8[%c0_49, %c0_50] : memref<4x128xf32, #tpu.memory_space<vmem>>, vector<4x128xf32>
    %75 = arith.addf %73, %74 : vector<4x128xf32>
    %cst_51 = arith.constant 0.000000e+00 : f32
    %76 = vector.broadcast %cst_51 : f32 to vector<4x64xf32>
    %cst_52 = arith.constant 0.000000e+00 : f32
    %77 = vector.broadcast %cst_52 : f32 to vector<4x64xf32>
    %c0_53 = arith.constant 0 : index
    %c0_54 = arith.constant 0 : index
    %c0_55 = arith.constant 0 : index
    %78 = vector.load %arg9[%c0_53, %c0_54, %c0_55] : memref<3x128x64xf32, #tpu.memory_space<vmem>>, vector<1x128x64xf32>
    %79 = vector.shape_cast %78 : vector<1x128x64xf32> to vector<128x64xf32>
    %cst_56 = arith.constant dense<0.000000e+00> : vector<4x64xf32>
    %80 = tpu.matmul %75, %79, %cst_56 {dimension_numbers = #tpu.dot_dimension_numbers<[1], [0], [0], [1], [0, 0, 1, 1], [], []>, precision = #tpu.contract_precision<fp32>} : vector<4x128xf32>, vector<128x64xf32>, vector<4x64xf32> -> vector<4x64xf32>
    %c0_57 = arith.constant 0 : index
    %c0_58 = arith.constant 0 : index
    %c0_59 = arith.constant 0 : index
    %81 = vector.load %arg10[%c0_57, %c0_58, %c0_59] : memref<3x4x4xf32, #tpu.memory_space<vmem>>, vector<1x4x4xf32>
    %82 = vector.shape_cast %81 : vector<1x4x4xf32> to vector<4x4xf32>
    %cst_60 = arith.constant dense<0.000000e+00> : vector<4x64xf32>
    %83 = tpu.matmul %82, %80, %cst_60 {dimension_numbers = #tpu.dot_dimension_numbers<[1], [0], [0], [1], [0, 0, 1, 1], [], []>, precision = #tpu.contract_precision<fp32>} : vector<4x4xf32>, vector<4x64xf32>, vector<4x64xf32> -> vector<4x64xf32>
    %84 = arith.addf %76, %83 : vector<4x64xf32>
    %c0_61 = arith.constant 0 : index
    %c0_62 = arith.constant 0 : index
    %c0_63 = arith.constant 0 : index
    %85 = vector.load %arg12[%c0_61, %c0_62, %c0_63] : memref<3x4x4xf32, #tpu.memory_space<vmem>>, vector<1x4x4xf32>
    %86 = vector.shape_cast %85 : vector<1x4x4xf32> to vector<4x4xf32>
    %cst_64 = arith.constant dense<0.000000e+00> : vector<4x64xf32>
    %87 = tpu.matmul %86, %80, %cst_64 {dimension_numbers = #tpu.dot_dimension_numbers<[1], [0], [0], [1], [0, 0, 1, 1], [], []>, precision = #tpu.contract_precision<fp32>} : vector<4x4xf32>, vector<4x64xf32>, vector<4x64xf32> -> vector<4x64xf32>
    %88 = arith.addf %77, %87 : vector<4x64xf32>
    %c1_65 = arith.constant 1 : index
    %c0_66 = arith.constant 0 : index
    %c0_67 = arith.constant 0 : index
    %89 = vector.load %arg9[%c1_65, %c0_66, %c0_67] : memref<3x128x64xf32, #tpu.memory_space<vmem>>, vector<1x128x64xf32>
    %90 = vector.shape_cast %89 : vector<1x128x64xf32> to vector<128x64xf32>
    %cst_68 = arith.constant dense<0.000000e+00> : vector<4x64xf32>
    %91 = tpu.matmul %75, %90, %cst_68 {dimension_numbers = #tpu.dot_dimension_numbers<[1], [0], [0], [1], [0, 0, 1, 1], [], []>, precision = #tpu.contract_precision<fp32>} : vector<4x128xf32>, vector<128x64xf32>, vector<4x64xf32> -> vector<4x64xf32>
    %c1_69 = arith.constant 1 : index
    %c0_70 = arith.constant 0 : index
    %c0_71 = arith.constant 0 : index
    %92 = vector.load %arg10[%c1_69, %c0_70, %c0_71] : memref<3x4x4xf32, #tpu.memory_space<vmem>>, vector<1x4x4xf32>
    %93 = vector.shape_cast %92 : vector<1x4x4xf32> to vector<4x4xf32>
    %cst_72 = arith.constant dense<0.000000e+00> : vector<4x64xf32>
    %94 = tpu.matmul %93, %91, %cst_72 {dimension_numbers = #tpu.dot_dimension_numbers<[1], [0], [0], [1], [0, 0, 1, 1], [], []>, precision = #tpu.contract_precision<fp32>} : vector<4x4xf32>, vector<4x64xf32>, vector<4x64xf32> -> vector<4x64xf32>
    %95 = arith.addf %84, %94 : vector<4x64xf32>
    %c1_73 = arith.constant 1 : index
    %c0_74 = arith.constant 0 : index
    %c0_75 = arith.constant 0 : index
    %96 = vector.load %arg12[%c1_73, %c0_74, %c0_75] : memref<3x4x4xf32, #tpu.memory_space<vmem>>, vector<1x4x4xf32>
    %97 = vector.shape_cast %96 : vector<1x4x4xf32> to vector<4x4xf32>
    %cst_76 = arith.constant dense<0.000000e+00> : vector<4x64xf32>
    %98 = tpu.matmul %97, %91, %cst_76 {dimension_numbers = #tpu.dot_dimension_numbers<[1], [0], [0], [1], [0, 0, 1, 1], [], []>, precision = #tpu.contract_precision<fp32>} : vector<4x4xf32>, vector<4x64xf32>, vector<4x64xf32> -> vector<4x64xf32>
    %99 = arith.addf %88, %98 : vector<4x64xf32>
    %c2_77 = arith.constant 2 : index
    %c0_78 = arith.constant 0 : index
    %c0_79 = arith.constant 0 : index
    %100 = vector.load %arg9[%c2_77, %c0_78, %c0_79] : memref<3x128x64xf32, #tpu.memory_space<vmem>>, vector<1x128x64xf32>
    %101 = vector.shape_cast %100 : vector<1x128x64xf32> to vector<128x64xf32>
    %cst_80 = arith.constant dense<0.000000e+00> : vector<4x64xf32>
    %102 = tpu.matmul %75, %101, %cst_80 {dimension_numbers = #tpu.dot_dimension_numbers<[1], [0], [0], [1], [0, 0, 1, 1], [], []>, precision = #tpu.contract_precision<fp32>} : vector<4x128xf32>, vector<128x64xf32>, vector<4x64xf32> -> vector<4x64xf32>
    %c2_81 = arith.constant 2 : index
    %c0_82 = arith.constant 0 : index
    %c0_83 = arith.constant 0 : index
    %103 = vector.load %arg10[%c2_81, %c0_82, %c0_83] : memref<3x4x4xf32, #tpu.memory_space<vmem>>, vector<1x4x4xf32>
    %104 = vector.shape_cast %103 : vector<1x4x4xf32> to vector<4x4xf32>
    %cst_84 = arith.constant dense<0.000000e+00> : vector<4x64xf32>
    %105 = tpu.matmul %104, %102, %cst_84 {dimension_numbers = #tpu.dot_dimension_numbers<[1], [0], [0], [1], [0, 0, 1, 1], [], []>, precision = #tpu.contract_precision<fp32>} : vector<4x4xf32>, vector<4x64xf32>, vector<4x64xf32> -> vector<4x64xf32>
    %106 = arith.addf %95, %105 : vector<4x64xf32>
    %c2_85 = arith.constant 2 : index
    %c0_86 = arith.constant 0 : index
    %c0_87 = arith.constant 0 : index
    %107 = vector.load %arg12[%c2_85, %c0_86, %c0_87] : memref<3x4x4xf32, #tpu.memory_space<vmem>>, vector<1x4x4xf32>
    %108 = vector.shape_cast %107 : vector<1x4x4xf32> to vector<4x4xf32>
    %cst_88 = arith.constant dense<0.000000e+00> : vector<4x64xf32>
    %109 = tpu.matmul %108, %102, %cst_88 {dimension_numbers = #tpu.dot_dimension_numbers<[1], [0], [0], [1], [0, 0, 1, 1], [], []>, precision = #tpu.contract_precision<fp32>} : vector<4x4xf32>, vector<4x64xf32>, vector<4x64xf32> -> vector<4x64xf32>
    %110 = arith.addf %99, %109 : vector<4x64xf32>
    %c0_89 = arith.constant 0 : index
    %c0_90 = arith.constant 0 : index
    %111 = vector.load %arg11[%c0_89, %c0_90] : memref<4x1xf32, #tpu.memory_space<vmem>>, vector<4x1xf32>
    %112 = vector.broadcast %111 : vector<4x1xf32> to vector<4x64xf32>
    %113 = arith.addf %106, %112 : vector<4x64xf32>
    %114 = arith.negf %113 : vector<4x64xf32>
    %115 = math.exp %114 : vector<4x64xf32>
    %cst_91 = arith.constant 1.000000e+00 : f32
    %116 = vector.broadcast %cst_91 : f32 to vector<4x64xf32>
    %117 = arith.addf %116, %115 : vector<4x64xf32>
    %118 = arith.divf %116, %117 : vector<4x64xf32>
    %c0_92 = arith.constant 0 : index
    %c0_93 = arith.constant 0 : index
    %119 = vector.load %arg13[%c0_92, %c0_93] : memref<4x1xf32, #tpu.memory_space<vmem>>, vector<4x1xf32>
    %120 = vector.broadcast %119 : vector<4x1xf32> to vector<4x64xf32>
    %121 = arith.addf %110, %120 : vector<4x64xf32>
    %122 = math.tanh %121 : vector<4x64xf32>
    %123 = arith.mulf %118, %122 : vector<4x64xf32>
    %124 = vector.shape_cast %123 : vector<4x64xf32> to vector<1x4x64xf32>
    %cst_94 = arith.constant dense<0.000000e+00> : vector<1xf32>
    %125 = vector.multi_reduction <add>, %124, %cst_94 [1, 2] : vector<1x4x64xf32> to vector<1xf32>
    %126 = vector.shape_cast %125 : vector<1xf32> to vector<1x1x1xf32>
    %127 = vector.extract %126[0, 0, 0] : f32 from vector<1x1x1xf32>
    %128 = vector.broadcast %127 : f32 to vector<1x1xf32>
    %cst_95 = arith.constant 2.560000e+02 : f32
    %129 = vector.broadcast %cst_95 : f32 to vector<1x1xf32>
    %130 = arith.divf %128, %129 : vector<1x1xf32>
    %131 = vector.broadcast %130 : vector<1x1xf32> to vector<4x64xf32>
    %132 = arith.subf %123, %131 : vector<4x64xf32>
    %133 = arith.mulf %132, %132 : vector<4x64xf32>
    %134 = vector.shape_cast %133 : vector<4x64xf32> to vector<1x4x64xf32>
    %cst_96 = arith.constant dense<0.000000e+00> : vector<1xf32>
    %135 = vector.multi_reduction <add>, %134, %cst_96 [1, 2] : vector<1x4x64xf32> to vector<1xf32>
    %136 = vector.shape_cast %135 : vector<1xf32> to vector<1x1x1xf32>
    %137 = vector.extract %136[0, 0, 0] : f32 from vector<1x1x1xf32>
    %138 = vector.broadcast %137 : f32 to vector<1x1xf32>
    %cst_97 = arith.constant 2.560000e+02 : f32
    %139 = vector.broadcast %cst_97 : f32 to vector<1x1xf32>
    %140 = arith.divf %138, %139 : vector<1x1xf32>
    %cst_98 = arith.constant 9.99999974E-6 : f32
    %141 = vector.broadcast %cst_98 : f32 to vector<1x1xf32>
    %142 = arith.addf %140, %141 : vector<1x1xf32>
    %143 = math.rsqrt %142 : vector<1x1xf32>
    %144 = vector.broadcast %143 : vector<1x1xf32> to vector<4x64xf32>
    %145 = arith.mulf %132, %144 : vector<4x64xf32>
    %c0_99 = arith.constant 0 : index
    %c0_100 = arith.constant 0 : index
    %146 = vector.load %arg14[%c0_99, %c0_100] : memref<4x64xf32, #tpu.memory_space<vmem>>, vector<4x64xf32>
    %147 = arith.mulf %145, %146 : vector<4x64xf32>
    %c0_101 = arith.constant 0 : index
    %c0_102 = arith.constant 0 : index
    %148 = vector.load %arg15[%c0_101, %c0_102] : memref<4x64xf32, #tpu.memory_space<vmem>>, vector<4x64xf32>
    %149 = arith.addf %147, %148 : vector<4x64xf32>
    %cst_103 = arith.constant 0.000000e+00 : f32
    %150 = vector.broadcast %cst_103 : f32 to vector<4x32xf32>
    %cst_104 = arith.constant 0.000000e+00 : f32
    %151 = vector.broadcast %cst_104 : f32 to vector<4x32xf32>
    %c0_105 = arith.constant 0 : index
    %c0_106 = arith.constant 0 : index
    %c0_107 = arith.constant 0 : index
    %152 = vector.load %arg16[%c0_105, %c0_106, %c0_107] : memref<3x64x32xf32, #tpu.memory_space<vmem>>, vector<1x64x32xf32>
    %153 = vector.shape_cast %152 : vector<1x64x32xf32> to vector<64x32xf32>
    %cst_108 = arith.constant dense<0.000000e+00> : vector<4x32xf32>
    %154 = tpu.matmul %149, %153, %cst_108 {dimension_numbers = #tpu.dot_dimension_numbers<[1], [0], [0], [1], [0, 0, 1, 1], [], []>, precision = #tpu.contract_precision<fp32>} : vector<4x64xf32>, vector<64x32xf32>, vector<4x32xf32> -> vector<4x32xf32>
    %c0_109 = arith.constant 0 : index
    %c0_110 = arith.constant 0 : index
    %c0_111 = arith.constant 0 : index
    %155 = vector.load %arg17[%c0_109, %c0_110, %c0_111] : memref<3x4x4xf32, #tpu.memory_space<vmem>>, vector<1x4x4xf32>
    %156 = vector.shape_cast %155 : vector<1x4x4xf32> to vector<4x4xf32>
    %cst_112 = arith.constant dense<0.000000e+00> : vector<4x32xf32>
    %157 = tpu.matmul %156, %154, %cst_112 {dimension_numbers = #tpu.dot_dimension_numbers<[1], [0], [0], [1], [0, 0, 1, 1], [], []>, precision = #tpu.contract_precision<fp32>} : vector<4x4xf32>, vector<4x32xf32>, vector<4x32xf32> -> vector<4x32xf32>
    %158 = arith.addf %150, %157 : vector<4x32xf32>
    %c0_113 = arith.constant 0 : index
    %c0_114 = arith.constant 0 : index
    %c0_115 = arith.constant 0 : index
    %159 = vector.load %arg19[%c0_113, %c0_114, %c0_115] : memref<3x4x4xf32, #tpu.memory_space<vmem>>, vector<1x4x4xf32>
    %160 = vector.shape_cast %159 : vector<1x4x4xf32> to vector<4x4xf32>
    %cst_116 = arith.constant dense<0.000000e+00> : vector<4x32xf32>
    %161 = tpu.matmul %160, %154, %cst_116 {dimension_numbers = #tpu.dot_dimension_numbers<[1], [0], [0], [1], [0, 0, 1, 1], [], []>, precision = #tpu.contract_precision<fp32>} : vector<4x4xf32>, vector<4x32xf32>, vector<4x32xf32> -> vector<4x32xf32>
    %162 = arith.addf %151, %161 : vector<4x32xf32>
    %c1_117 = arith.constant 1 : index
    %c0_118 = arith.constant 0 : index
    %c0_119 = arith.constant 0 : index
    %163 = vector.load %arg16[%c1_117, %c0_118, %c0_119] : memref<3x64x32xf32, #tpu.memory_space<vmem>>, vector<1x64x32xf32>
    %164 = vector.shape_cast %163 : vector<1x64x32xf32> to vector<64x32xf32>
    %cst_120 = arith.constant dense<0.000000e+00> : vector<4x32xf32>
    %165 = tpu.matmul %149, %164, %cst_120 {dimension_numbers = #tpu.dot_dimension_numbers<[1], [0], [0], [1], [0, 0, 1, 1], [], []>, precision = #tpu.contract_precision<fp32>} : vector<4x64xf32>, vector<64x32xf32>, vector<4x32xf32> -> vector<4x32xf32>
    %c1_121 = arith.constant 1 : index
    %c0_122 = arith.constant 0 : index
    %c0_123 = arith.constant 0 : index
    %166 = vector.load %arg17[%c1_121, %c0_122, %c0_123] : memref<3x4x4xf32, #tpu.memory_space<vmem>>, vector<1x4x4xf32>
    %167 = vector.shape_cast %166 : vector<1x4x4xf32> to vector<4x4xf32>
    %cst_124 = arith.constant dense<0.000000e+00> : vector<4x32xf32>
    %168 = tpu.matmul %167, %165, %cst_124 {dimension_numbers = #tpu.dot_dimension_numbers<[1], [0], [0], [1], [0, 0, 1, 1], [], []>, precision = #tpu.contract_precision<fp32>} : vector<4x4xf32>, vector<4x32xf32>, vector<4x32xf32> -> vector<4x32xf32>
    %169 = arith.addf %158, %168 : vector<4x32xf32>
    %c1_125 = arith.constant 1 : index
    %c0_126 = arith.constant 0 : index
    %c0_127 = arith.constant 0 : index
    %170 = vector.load %arg19[%c1_125, %c0_126, %c0_127] : memref<3x4x4xf32, #tpu.memory_space<vmem>>, vector<1x4x4xf32>
    %171 = vector.shape_cast %170 : vector<1x4x4xf32> to vector<4x4xf32>
    %cst_128 = arith.constant dense<0.000000e+00> : vector<4x32xf32>
    %172 = tpu.matmul %171, %165, %cst_128 {dimension_numbers = #tpu.dot_dimension_numbers<[1], [0], [0], [1], [0, 0, 1, 1], [], []>, precision = #tpu.contract_precision<fp32>} : vector<4x4xf32>, vector<4x32xf32>, vector<4x32xf32> -> vector<4x32xf32>
    %173 = arith.addf %162, %172 : vector<4x32xf32>
    %c2_129 = arith.constant 2 : index
    %c0_130 = arith.constant 0 : index
    %c0_131 = arith.constant 0 : index
    %174 = vector.load %arg16[%c2_129, %c0_130, %c0_131] : memref<3x64x32xf32, #tpu.memory_space<vmem>>, vector<1x64x32xf32>
    %175 = vector.shape_cast %174 : vector<1x64x32xf32> to vector<64x32xf32>
    %cst_132 = arith.constant dense<0.000000e+00> : vector<4x32xf32>
    %176 = tpu.matmul %149, %175, %cst_132 {dimension_numbers = #tpu.dot_dimension_numbers<[1], [0], [0], [1], [0, 0, 1, 1], [], []>, precision = #tpu.contract_precision<fp32>} : vector<4x64xf32>, vector<64x32xf32>, vector<4x32xf32> -> vector<4x32xf32>
    %c2_133 = arith.constant 2 : index
    %c0_134 = arith.constant 0 : index
    %c0_135 = arith.constant 0 : index
    %177 = vector.load %arg17[%c2_133, %c0_134, %c0_135] : memref<3x4x4xf32, #tpu.memory_space<vmem>>, vector<1x4x4xf32>
    %178 = vector.shape_cast %177 : vector<1x4x4xf32> to vector<4x4xf32>
    %cst_136 = arith.constant dense<0.000000e+00> : vector<4x32xf32>
    %179 = tpu.matmul %178, %176, %cst_136 {dimension_numbers = #tpu.dot_dimension_numbers<[1], [0], [0], [1], [0, 0, 1, 1], [], []>, precision = #tpu.contract_precision<fp32>} : vector<4x4xf32>, vector<4x32xf32>, vector<4x32xf32> -> vector<4x32xf32>
    %180 = arith.addf %169, %179 : vector<4x32xf32>
    %c2_137 = arith.constant 2 : index
    %c0_138 = arith.constant 0 : index
    %c0_139 = arith.constant 0 : index
    %181 = vector.load %arg19[%c2_137, %c0_138, %c0_139] : memref<3x4x4xf32, #tpu.memory_space<vmem>>, vector<1x4x4xf32>
    %182 = vector.shape_cast %181 : vector<1x4x4xf32> to vector<4x4xf32>
    %cst_140 = arith.constant dense<0.000000e+00> : vector<4x32xf32>
    %183 = tpu.matmul %182, %176, %cst_140 {dimension_numbers = #tpu.dot_dimension_numbers<[1], [0], [0], [1], [0, 0, 1, 1], [], []>, precision = #tpu.contract_precision<fp32>} : vector<4x4xf32>, vector<4x32xf32>, vector<4x32xf32> -> vector<4x32xf32>
    %184 = arith.addf %173, %183 : vector<4x32xf32>
    %c0_141 = arith.constant 0 : index
    %c0_142 = arith.constant 0 : index
    %185 = vector.load %arg18[%c0_141, %c0_142] : memref<4x1xf32, #tpu.memory_space<vmem>>, vector<4x1xf32>
    %186 = vector.broadcast %185 : vector<4x1xf32> to vector<4x32xf32>
    %187 = arith.addf %180, %186 : vector<4x32xf32>
    %188 = arith.negf %187 : vector<4x32xf32>
    %189 = math.exp %188 : vector<4x32xf32>
    %cst_143 = arith.constant 1.000000e+00 : f32
    %190 = vector.broadcast %cst_143 : f32 to vector<4x32xf32>
    %191 = arith.addf %190, %189 : vector<4x32xf32>
    %192 = arith.divf %190, %191 : vector<4x32xf32>
    %c0_144 = arith.constant 0 : index
    %c0_145 = arith.constant 0 : index
    %193 = vector.load %arg20[%c0_144, %c0_145] : memref<4x1xf32, #tpu.memory_space<vmem>>, vector<4x1xf32>
    %194 = vector.broadcast %193 : vector<4x1xf32> to vector<4x32xf32>
    %195 = arith.addf %184, %194 : vector<4x32xf32>
    %196 = math.tanh %195 : vector<4x32xf32>
    %197 = arith.mulf %192, %196 : vector<4x32xf32>
    %198 = vector.shape_cast %197 : vector<4x32xf32> to vector<1x4x32xf32>
    %cst_146 = arith.constant dense<0.000000e+00> : vector<1xf32>
    %199 = vector.multi_reduction <add>, %198, %cst_146 [1, 2] : vector<1x4x32xf32> to vector<1xf32>
    %200 = vector.shape_cast %199 : vector<1xf32> to vector<1x1x1xf32>
    %201 = vector.extract %200[0, 0, 0] : f32 from vector<1x1x1xf32>
    %202 = vector.broadcast %201 : f32 to vector<1x1xf32>
    %cst_147 = arith.constant 1.280000e+02 : f32
    %203 = vector.broadcast %cst_147 : f32 to vector<1x1xf32>
    %204 = arith.divf %202, %203 : vector<1x1xf32>
    %205 = vector.broadcast %204 : vector<1x1xf32> to vector<4x32xf32>
    %206 = arith.subf %197, %205 : vector<4x32xf32>
    %207 = arith.mulf %206, %206 : vector<4x32xf32>
    %208 = vector.shape_cast %207 : vector<4x32xf32> to vector<1x4x32xf32>
    %cst_148 = arith.constant dense<0.000000e+00> : vector<1xf32>
    %209 = vector.multi_reduction <add>, %208, %cst_148 [1, 2] : vector<1x4x32xf32> to vector<1xf32>
    %210 = vector.shape_cast %209 : vector<1xf32> to vector<1x1x1xf32>
    %211 = vector.extract %210[0, 0, 0] : f32 from vector<1x1x1xf32>
    %212 = vector.broadcast %211 : f32 to vector<1x1xf32>
    %cst_149 = arith.constant 1.280000e+02 : f32
    %213 = vector.broadcast %cst_149 : f32 to vector<1x1xf32>
    %214 = arith.divf %212, %213 : vector<1x1xf32>
    %cst_150 = arith.constant 9.99999974E-6 : f32
    %215 = vector.broadcast %cst_150 : f32 to vector<1x1xf32>
    %216 = arith.addf %214, %215 : vector<1x1xf32>
    %217 = math.rsqrt %216 : vector<1x1xf32>
    %218 = vector.broadcast %217 : vector<1x1xf32> to vector<4x32xf32>
    %219 = arith.mulf %206, %218 : vector<4x32xf32>
    %c0_151 = arith.constant 0 : index
    %c0_152 = arith.constant 0 : index
    %220 = vector.load %arg21[%c0_151, %c0_152] : memref<4x32xf32, #tpu.memory_space<vmem>>, vector<4x32xf32>
    %221 = arith.mulf %219, %220 : vector<4x32xf32>
    %c0_153 = arith.constant 0 : index
    %c0_154 = arith.constant 0 : index
    %222 = vector.load %arg22[%c0_153, %c0_154] : memref<4x32xf32, #tpu.memory_space<vmem>>, vector<4x32xf32>
    %223 = arith.addf %221, %222 : vector<4x32xf32>
    %cst_155 = arith.constant 0.000000e+00 : f32
    %224 = vector.broadcast %cst_155 : f32 to vector<4x16xf32>
    %cst_156 = arith.constant 0.000000e+00 : f32
    %225 = vector.broadcast %cst_156 : f32 to vector<4x16xf32>
    %c0_157 = arith.constant 0 : index
    %c0_158 = arith.constant 0 : index
    %c0_159 = arith.constant 0 : index
    %226 = vector.load %arg23[%c0_157, %c0_158, %c0_159] : memref<3x32x16xf32, #tpu.memory_space<vmem>>, vector<1x32x16xf32>
    %227 = vector.shape_cast %226 : vector<1x32x16xf32> to vector<32x16xf32>
    %cst_160 = arith.constant dense<0.000000e+00> : vector<4x16xf32>
    %228 = tpu.matmul %223, %227, %cst_160 {dimension_numbers = #tpu.dot_dimension_numbers<[1], [0], [0], [1], [0, 0, 1, 1], [], []>, precision = #tpu.contract_precision<fp32>} : vector<4x32xf32>, vector<32x16xf32>, vector<4x16xf32> -> vector<4x16xf32>
    %c0_161 = arith.constant 0 : index
    %c0_162 = arith.constant 0 : index
    %c0_163 = arith.constant 0 : index
    %229 = vector.load %arg24[%c0_161, %c0_162, %c0_163] : memref<3x4x4xf32, #tpu.memory_space<vmem>>, vector<1x4x4xf32>
    %230 = vector.shape_cast %229 : vector<1x4x4xf32> to vector<4x4xf32>
    %cst_164 = arith.constant dense<0.000000e+00> : vector<4x16xf32>
    %231 = tpu.matmul %230, %228, %cst_164 {dimension_numbers = #tpu.dot_dimension_numbers<[1], [0], [0], [1], [0, 0, 1, 1], [], []>, precision = #tpu.contract_precision<fp32>} : vector<4x4xf32>, vector<4x16xf32>, vector<4x16xf32> -> vector<4x16xf32>
    %232 = arith.addf %224, %231 : vector<4x16xf32>
    %c0_165 = arith.constant 0 : index
    %c0_166 = arith.constant 0 : index
    %c0_167 = arith.constant 0 : index
    %233 = vector.load %arg26[%c0_165, %c0_166, %c0_167] : memref<3x4x4xf32, #tpu.memory_space<vmem>>, vector<1x4x4xf32>
    %234 = vector.shape_cast %233 : vector<1x4x4xf32> to vector<4x4xf32>
    %cst_168 = arith.constant dense<0.000000e+00> : vector<4x16xf32>
    %235 = tpu.matmul %234, %228, %cst_168 {dimension_numbers = #tpu.dot_dimension_numbers<[1], [0], [0], [1], [0, 0, 1, 1], [], []>, precision = #tpu.contract_precision<fp32>} : vector<4x4xf32>, vector<4x16xf32>, vector<4x16xf32> -> vector<4x16xf32>
    %236 = arith.addf %225, %235 : vector<4x16xf32>
    %c1_169 = arith.constant 1 : index
    %c0_170 = arith.constant 0 : index
    %c0_171 = arith.constant 0 : index
    %237 = vector.load %arg23[%c1_169, %c0_170, %c0_171] : memref<3x32x16xf32, #tpu.memory_space<vmem>>, vector<1x32x16xf32>
    %238 = vector.shape_cast %237 : vector<1x32x16xf32> to vector<32x16xf32>
    %cst_172 = arith.constant dense<0.000000e+00> : vector<4x16xf32>
    %239 = tpu.matmul %223, %238, %cst_172 {dimension_numbers = #tpu.dot_dimension_numbers<[1], [0], [0], [1], [0, 0, 1, 1], [], []>, precision = #tpu.contract_precision<fp32>} : vector<4x32xf32>, vector<32x16xf32>, vector<4x16xf32> -> vector<4x16xf32>
    %c1_173 = arith.constant 1 : index
    %c0_174 = arith.constant 0 : index
    %c0_175 = arith.constant 0 : index
    %240 = vector.load %arg24[%c1_173, %c0_174, %c0_175] : memref<3x4x4xf32, #tpu.memory_space<vmem>>, vector<1x4x4xf32>
    %241 = vector.shape_cast %240 : vector<1x4x4xf32> to vector<4x4xf32>
    %cst_176 = arith.constant dense<0.000000e+00> : vector<4x16xf32>
    %242 = tpu.matmul %241, %239, %cst_176 {dimension_numbers = #tpu.dot_dimension_numbers<[1], [0], [0], [1], [0, 0, 1, 1], [], []>, precision = #tpu.contract_precision<fp32>} : vector<4x4xf32>, vector<4x16xf32>, vector<4x16xf32> -> vector<4x16xf32>
    %243 = arith.addf %232, %242 : vector<4x16xf32>
    %c1_177 = arith.constant 1 : index
    %c0_178 = arith.constant 0 : index
    %c0_179 = arith.constant 0 : index
    %244 = vector.load %arg26[%c1_177, %c0_178, %c0_179] : memref<3x4x4xf32, #tpu.memory_space<vmem>>, vector<1x4x4xf32>
    %245 = vector.shape_cast %244 : vector<1x4x4xf32> to vector<4x4xf32>
    %cst_180 = arith.constant dense<0.000000e+00> : vector<4x16xf32>
    %246 = tpu.matmul %245, %239, %cst_180 {dimension_numbers = #tpu.dot_dimension_numbers<[1], [0], [0], [1], [0, 0, 1, 1], [], []>, precision = #tpu.contract_precision<fp32>} : vector<4x4xf32>, vector<4x16xf32>, vector<4x16xf32> -> vector<4x16xf32>
    %247 = arith.addf %236, %246 : vector<4x16xf32>
    %c2_181 = arith.constant 2 : index
    %c0_182 = arith.constant 0 : index
    %c0_183 = arith.constant 0 : index
    %248 = vector.load %arg23[%c2_181, %c0_182, %c0_183] : memref<3x32x16xf32, #tpu.memory_space<vmem>>, vector<1x32x16xf32>
    %249 = vector.shape_cast %248 : vector<1x32x16xf32> to vector<32x16xf32>
    %cst_184 = arith.constant dense<0.000000e+00> : vector<4x16xf32>
    %250 = tpu.matmul %223, %249, %cst_184 {dimension_numbers = #tpu.dot_dimension_numbers<[1], [0], [0], [1], [0, 0, 1, 1], [], []>, precision = #tpu.contract_precision<fp32>} : vector<4x32xf32>, vector<32x16xf32>, vector<4x16xf32> -> vector<4x16xf32>
    %c2_185 = arith.constant 2 : index
    %c0_186 = arith.constant 0 : index
    %c0_187 = arith.constant 0 : index
    %251 = vector.load %arg24[%c2_185, %c0_186, %c0_187] : memref<3x4x4xf32, #tpu.memory_space<vmem>>, vector<1x4x4xf32>
    %252 = vector.shape_cast %251 : vector<1x4x4xf32> to vector<4x4xf32>
    %cst_188 = arith.constant dense<0.000000e+00> : vector<4x16xf32>
    %253 = tpu.matmul %252, %250, %cst_188 {dimension_numbers = #tpu.dot_dimension_numbers<[1], [0], [0], [1], [0, 0, 1, 1], [], []>, precision = #tpu.contract_precision<fp32>} : vector<4x4xf32>, vector<4x16xf32>, vector<4x16xf32> -> vector<4x16xf32>
    %254 = arith.addf %243, %253 : vector<4x16xf32>
    %c2_189 = arith.constant 2 : index
    %c0_190 = arith.constant 0 : index
    %c0_191 = arith.constant 0 : index
    %255 = vector.load %arg26[%c2_189, %c0_190, %c0_191] : memref<3x4x4xf32, #tpu.memory_space<vmem>>, vector<1x4x4xf32>
    %256 = vector.shape_cast %255 : vector<1x4x4xf32> to vector<4x4xf32>
    %cst_192 = arith.constant dense<0.000000e+00> : vector<4x16xf32>
    %257 = tpu.matmul %256, %250, %cst_192 {dimension_numbers = #tpu.dot_dimension_numbers<[1], [0], [0], [1], [0, 0, 1, 1], [], []>, precision = #tpu.contract_precision<fp32>} : vector<4x4xf32>, vector<4x16xf32>, vector<4x16xf32> -> vector<4x16xf32>
    %258 = arith.addf %247, %257 : vector<4x16xf32>
    %c0_193 = arith.constant 0 : index
    %c0_194 = arith.constant 0 : index
    %259 = vector.load %arg25[%c0_193, %c0_194] : memref<4x1xf32, #tpu.memory_space<vmem>>, vector<4x1xf32>
    %260 = vector.broadcast %259 : vector<4x1xf32> to vector<4x16xf32>
    %261 = arith.addf %254, %260 : vector<4x16xf32>
    %262 = arith.negf %261 : vector<4x16xf32>
    %263 = math.exp %262 : vector<4x16xf32>
    %cst_195 = arith.constant 1.000000e+00 : f32
    %264 = vector.broadcast %cst_195 : f32 to vector<4x16xf32>
    %265 = arith.addf %264, %263 : vector<4x16xf32>
    %266 = arith.divf %264, %265 : vector<4x16xf32>
    %c0_196 = arith.constant 0 : index
    %c0_197 = arith.constant 0 : index
    %267 = vector.load %arg27[%c0_196, %c0_197] : memref<4x1xf32, #tpu.memory_space<vmem>>, vector<4x1xf32>
    %268 = vector.broadcast %267 : vector<4x1xf32> to vector<4x16xf32>
    %269 = arith.addf %258, %268 : vector<4x16xf32>
    %270 = math.tanh %269 : vector<4x16xf32>
    %271 = arith.mulf %266, %270 : vector<4x16xf32>
    %272 = vector.shape_cast %271 : vector<4x16xf32> to vector<1x4x16xf32>
    %cst_198 = arith.constant dense<0.000000e+00> : vector<1xf32>
    %273 = vector.multi_reduction <add>, %272, %cst_198 [1, 2] : vector<1x4x16xf32> to vector<1xf32>
    %274 = vector.shape_cast %273 : vector<1xf32> to vector<1x1x1xf32>
    %275 = vector.extract %274[0, 0, 0] : f32 from vector<1x1x1xf32>
    %276 = vector.broadcast %275 : f32 to vector<1x1xf32>
    %cst_199 = arith.constant 6.400000e+01 : f32
    %277 = vector.broadcast %cst_199 : f32 to vector<1x1xf32>
    %278 = arith.divf %276, %277 : vector<1x1xf32>
    %279 = vector.broadcast %278 : vector<1x1xf32> to vector<4x16xf32>
    %280 = arith.subf %271, %279 : vector<4x16xf32>
    %281 = arith.mulf %280, %280 : vector<4x16xf32>
    %282 = vector.shape_cast %281 : vector<4x16xf32> to vector<1x4x16xf32>
    %cst_200 = arith.constant dense<0.000000e+00> : vector<1xf32>
    %283 = vector.multi_reduction <add>, %282, %cst_200 [1, 2] : vector<1x4x16xf32> to vector<1xf32>
    %284 = vector.shape_cast %283 : vector<1xf32> to vector<1x1x1xf32>
    %285 = vector.extract %284[0, 0, 0] : f32 from vector<1x1x1xf32>
    %286 = vector.broadcast %285 : f32 to vector<1x1xf32>
    %cst_201 = arith.constant 6.400000e+01 : f32
    %287 = vector.broadcast %cst_201 : f32 to vector<1x1xf32>
    %288 = arith.divf %286, %287 : vector<1x1xf32>
    %cst_202 = arith.constant 9.99999974E-6 : f32
    %289 = vector.broadcast %cst_202 : f32 to vector<1x1xf32>
    %290 = arith.addf %288, %289 : vector<1x1xf32>
    %291 = math.rsqrt %290 : vector<1x1xf32>
    %292 = vector.broadcast %291 : vector<1x1xf32> to vector<4x16xf32>
    %293 = arith.mulf %280, %292 : vector<4x16xf32>
    %c0_203 = arith.constant 0 : index
    %c0_204 = arith.constant 0 : index
    %294 = vector.load %arg28[%c0_203, %c0_204] : memref<4x16xf32, #tpu.memory_space<vmem>>, vector<4x16xf32>
    %295 = arith.mulf %293, %294 : vector<4x16xf32>
    %c0_205 = arith.constant 0 : index
    %c0_206 = arith.constant 0 : index
    %296 = vector.load %arg29[%c0_205, %c0_206] : memref<4x16xf32, #tpu.memory_space<vmem>>, vector<4x16xf32>
    %297 = arith.addf %295, %296 : vector<4x16xf32>
    %c0_207 = arith.constant 0 : index
    %c0_208 = arith.constant 0 : index
    %298 = vector.load %arg30[%c0_207, %c0_208] : memref<1x4xf32, #tpu.memory_space<vmem>>, vector<1x4xf32>
    %cst_209 = arith.constant dense<0.000000e+00> : vector<1x16xf32>
    %299 = tpu.matmul %298, %297, %cst_209 {dimension_numbers = #tpu.dot_dimension_numbers<[1], [0], [0], [1], [0, 0, 1, 1], [], []>, precision = #tpu.contract_precision<fp32>} : vector<1x4xf32>, vector<4x16xf32>, vector<1x16xf32> -> vector<1x16xf32>
    %c0_210 = arith.constant 0 : index
    %c0_211 = arith.constant 0 : index
    %300 = vector.load %arg31[%c0_210, %c0_211] : memref<1x1xf32, #tpu.memory_space<vmem>>, vector<1x1xf32>
    %301 = vector.broadcast %300 : vector<1x1xf32> to vector<1x16xf32>
    %302 = arith.addf %299, %301 : vector<1x16xf32>
    %303 = arith.mulf %302, %302 : vector<1x16xf32>
    %cst_212 = arith.constant dense<0.000000e+00> : vector<1xf32>
    %304 = vector.multi_reduction <add>, %303, %cst_212 [1] : vector<1x16xf32> to vector<1xf32>
    %305 = vector.shape_cast %304 : vector<1xf32> to vector<1x1xf32>
    %306 = arith.mulf %302, %302 : vector<1x16xf32>
    %cst_213 = arith.constant dense<0.000000e+00> : vector<1xf32>
    %307 = vector.multi_reduction <add>, %306, %cst_213 [1] : vector<1x16xf32> to vector<1xf32>
    %308 = vector.shape_cast %307 : vector<1xf32> to vector<1x1xf32>
    %309 = math.sqrt %305 : vector<1x1xf32>
    %310 = math.sqrt %308 : vector<1x1xf32>
    %311 = arith.mulf %309, %310 : vector<1x1xf32>
    %312 = vector.shape_cast %311 : vector<1x1xf32> to vector<1x1x1xf32>
    %cst_214 = arith.constant dense<0.000000e+00> : vector<1xf32>
    %313 = vector.multi_reduction <add>, %312, %cst_214 [1, 2] : vector<1x1x1xf32> to vector<1xf32>
    %314 = vector.shape_cast %313 : vector<1xf32> to vector<1x1x1xf32>
    %315 = vector.extract %314[0, 0, 0] : f32 from vector<1x1x1xf32>
    %316 = vector.broadcast %315 : f32 to vector<1x1xf32>
    %cst_215 = arith.constant dense<0.000000e+00> : vector<16x16xf32>
    %317 = tpu.matmul %302, %302, %cst_215 {dimension_numbers = #tpu.dot_dimension_numbers<[0], [0], [1], [1], [0, 1, 1, 1], [], []>, precision = #tpu.contract_precision<fp32>} : vector<1x16xf32>, vector<1x16xf32>, vector<16x16xf32> -> vector<16x16xf32>
    %318 = vector.broadcast %316 : vector<1x1xf32> to vector<16x16xf32>
    %319 = arith.divf %317, %318 : vector<16x16xf32>
    %cst_216 = arith.constant dense<0.000000e+00> : vector<16x16xf32>
    %320 = tpu.matmul %302, %302, %cst_216 {dimension_numbers = #tpu.dot_dimension_numbers<[0], [0], [1], [1], [0, 1, 1, 1], [], []>, precision = #tpu.contract_precision<fp32>} : vector<1x16xf32>, vector<1x16xf32>, vector<16x16xf32> -> vector<16x16xf32>
    %321 = vector.broadcast %316 : vector<1x1xf32> to vector<16x16xf32>
    %322 = arith.divf %320, %321 : vector<16x16xf32>
    %323 = vector.shape_cast %297 : vector<4x16xf32> to vector<4x1x16xf32>
    %324 = vector.shape_cast %319 : vector<16x16xf32> to vector<1x16x16xf32>
    %325 = vector.broadcast %323 : vector<4x1x16xf32> to vector<4x16x16xf32>
    %326 = vector.broadcast %324 : vector<1x16x16xf32> to vector<4x16x16xf32>
    %327 = arith.mulf %325, %326 : vector<4x16x16xf32>
    %328 = vector.shape_cast %297 : vector<4x16xf32> to vector<4x16x1xf32>
    %329 = vector.shape_cast %322 : vector<16x16xf32> to vector<1x16x16xf32>
    %330 = vector.broadcast %328 : vector<4x16x1xf32> to vector<4x16x16xf32>
    %331 = vector.broadcast %329 : vector<1x16x16xf32> to vector<4x16x16xf32>
    %332 = arith.mulf %330, %331 : vector<4x16x16xf32>
    %333 = vector.extract_strided_slice %332 {offsets = [0, 0, 0], sizes = [1, 16, 16], strides = [1, 1, 1]} : vector<4x16x16xf32> to vector<1x16x16xf32>
    %334 = vector.shape_cast %333 : vector<1x16x16xf32> to vector<16x16xf32>
    %335 = vector.extract_strided_slice %332 {offsets = [1, 0, 0], sizes = [1, 16, 16], strides = [1, 1, 1]} : vector<4x16x16xf32> to vector<1x16x16xf32>
    %336 = vector.shape_cast %335 : vector<1x16x16xf32> to vector<16x16xf32>
    %337 = arith.maximumf %334, %336 : vector<16x16xf32>
    %338 = vector.extract_strided_slice %332 {offsets = [2, 0, 0], sizes = [1, 16, 16], strides = [1, 1, 1]} : vector<4x16x16xf32> to vector<1x16x16xf32>
    %339 = vector.shape_cast %338 : vector<1x16x16xf32> to vector<16x16xf32>
    %340 = arith.maximumf %337, %339 : vector<16x16xf32>
    %341 = vector.extract_strided_slice %332 {offsets = [3, 0, 0], sizes = [1, 16, 16], strides = [1, 1, 1]} : vector<4x16x16xf32> to vector<1x16x16xf32>
    %342 = vector.shape_cast %341 : vector<1x16x16xf32> to vector<16x16xf32>
    %343 = arith.maximumf %340, %342 : vector<16x16xf32>
    %344 = math.tanh %343 : vector<16x16xf32>
    %cst_217 = arith.constant 0.000000e+00 : f32
    %345 = vector.broadcast %cst_217 : f32 to vector<16x16xf32>
    %346 = arith.maximumf %344, %345 : vector<16x16xf32>
    %347 = vector.shape_cast %346 : vector<16x16xf32> to vector<1x16x16xf32>
    %348 = vector.broadcast %347 : vector<1x16x16xf32> to vector<4x16x16xf32>
    %349 = arith.mulf %327, %348 : vector<4x16x16xf32>
    %cst_218 = arith.constant dense<0.000000e+00> : vector<4x16xf32>
    %350 = vector.multi_reduction <add>, %349, %cst_218 [2] : vector<4x16x16xf32> to vector<4x16xf32>
    %c0_219 = arith.constant 0 : index
    %c0_220 = arith.constant 0 : index
    %c0_221 = arith.constant 0 : index
    %351 = vector.load %arg32[%c0_219, %c0_220, %c0_221] : memref<4x4x16xf32, #tpu.memory_space<vmem>>, vector<4x4x16xf32>
    %c0_222 = arith.constant 0 : index
    %c0_223 = arith.constant 0 : index
    %352 = vector.load %arg33[%c0_222, %c0_223] : memref<4x16xf32, #tpu.memory_space<vmem>>, vector<4x16xf32>
    %353 = vector.extract_strided_slice %351 {offsets = [0, 0, 0], sizes = [4, 1, 16], strides = [1, 1, 1]} : vector<4x4x16xf32> to vector<4x1x16xf32>
    %354 = vector.shape_cast %353 : vector<4x1x16xf32> to vector<4x16xf32>
    %355 = vector.extract_strided_slice %350 {offsets = [0, 0], sizes = [1, 16], strides = [1, 1]} : vector<4x16xf32> to vector<1x16xf32>
    %356 = vector.broadcast %355 : vector<1x16xf32> to vector<4x16xf32>
    %357 = arith.mulf %354, %356 : vector<4x16xf32>
    %358 = arith.addf %352, %357 : vector<4x16xf32>
    %359 = vector.extract_strided_slice %351 {offsets = [0, 1, 0], sizes = [4, 1, 16], strides = [1, 1, 1]} : vector<4x4x16xf32> to vector<4x1x16xf32>
    %360 = vector.shape_cast %359 : vector<4x1x16xf32> to vector<4x16xf32>
    %361 = vector.extract_strided_slice %350 {offsets = [1, 0], sizes = [1, 16], strides = [1, 1]} : vector<4x16xf32> to vector<1x16xf32>
    %362 = vector.broadcast %361 : vector<1x16xf32> to vector<4x16xf32>
    %363 = arith.mulf %360, %362 : vector<4x16xf32>
    %364 = arith.addf %358, %363 : vector<4x16xf32>
    %365 = vector.extract_strided_slice %351 {offsets = [0, 2, 0], sizes = [4, 1, 16], strides = [1, 1, 1]} : vector<4x4x16xf32> to vector<4x1x16xf32>
    %366 = vector.shape_cast %365 : vector<4x1x16xf32> to vector<4x16xf32>
    %367 = vector.extract_strided_slice %350 {offsets = [2, 0], sizes = [1, 16], strides = [1, 1]} : vector<4x16xf32> to vector<1x16xf32>
    %368 = vector.broadcast %367 : vector<1x16xf32> to vector<4x16xf32>
    %369 = arith.mulf %366, %368 : vector<4x16xf32>
    %370 = arith.addf %364, %369 : vector<4x16xf32>
    %371 = vector.extract_strided_slice %351 {offsets = [0, 3, 0], sizes = [4, 1, 16], strides = [1, 1, 1]} : vector<4x4x16xf32> to vector<4x1x16xf32>
    %372 = vector.shape_cast %371 : vector<4x1x16xf32> to vector<4x16xf32>
    %373 = vector.extract_strided_slice %350 {offsets = [3, 0], sizes = [1, 16], strides = [1, 1]} : vector<4x16xf32> to vector<1x16xf32>
    %374 = vector.broadcast %373 : vector<1x16xf32> to vector<4x16xf32>
    %375 = arith.mulf %372, %374 : vector<4x16xf32>
    %376 = arith.addf %370, %375 : vector<4x16xf32>
    %c0_224 = arith.constant 0 : index
    %c0_225 = arith.constant 0 : index
    %377 = vector.load %arg34[%c0_224, %c0_225] : memref<4x4xf32, #tpu.memory_space<vmem>>, vector<4x4xf32>
    %cst_226 = arith.constant dense<0.000000e+00> : vector<4x16xf32>
    %378 = tpu.matmul %377, %376, %cst_226 {dimension_numbers = #tpu.dot_dimension_numbers<[1], [0], [0], [1], [0, 0, 1, 1], [], []>, precision = #tpu.contract_precision<fp32>} : vector<4x4xf32>, vector<4x16xf32>, vector<4x16xf32> -> vector<4x16xf32>
    %c0_227 = arith.constant 0 : index
    %c0_228 = arith.constant 0 : index
    %379 = vector.load %arg35[%c0_227, %c0_228] : memref<4x1xf32, #tpu.memory_space<vmem>>, vector<4x1xf32>
    %380 = vector.broadcast %379 : vector<4x1xf32> to vector<4x16xf32>
    %381 = arith.addf %378, %380 : vector<4x16xf32>
    %c0_229 = arith.constant 0 : index
    %c0_230 = arith.constant 0 : index
    %382 = vector.load %arg38[%c0_229, %c0_230] : memref<16x128xf32, #tpu.memory_space<vmem>>, vector<16x128xf32>
    %cst_231 = arith.constant dense<0.000000e+00> : vector<4x128xf32>
    %383 = tpu.matmul %381, %382, %cst_231 {dimension_numbers = #tpu.dot_dimension_numbers<[1], [0], [0], [1], [0, 0, 1, 1], [], []>, precision = #tpu.contract_precision<fp32>} : vector<4x16xf32>, vector<16x128xf32>, vector<4x128xf32> -> vector<4x128xf32>
    %c3 = arith.constant 3 : index
    %c0_232 = arith.constant 0 : index
    %c0_233 = arith.constant 0 : index
    %384 = vector.load %arg36[%c3, %c0_232, %c0_233] : memref<4x4x4xf32, #tpu.memory_space<vmem>>, vector<1x4x4xf32>
    %385 = vector.shape_cast %384 : vector<1x4x4xf32> to vector<4x4xf32>
    %cst_234 = arith.constant dense<0.000000e+00> : vector<4x16xf32>
    %386 = tpu.matmul %385, %297, %cst_234 {dimension_numbers = #tpu.dot_dimension_numbers<[1], [0], [0], [1], [0, 0, 1, 1], [], []>, precision = #tpu.contract_precision<fp32>} : vector<4x4xf32>, vector<4x16xf32>, vector<4x16xf32> -> vector<4x16xf32>
    %c3_235 = arith.constant 3 : index
    %c0_236 = arith.constant 0 : index
    %c0_237 = arith.constant 0 : index
    %387 = vector.load %arg37[%c3_235, %c0_236, %c0_237] : memref<4x4x1xf32, #tpu.memory_space<vmem>>, vector<1x4x1xf32>
    %388 = vector.shape_cast %387 : vector<1x4x1xf32> to vector<4x1xf32>
    %389 = vector.broadcast %388 : vector<4x1xf32> to vector<4x16xf32>
    %390 = arith.addf %386, %389 : vector<4x16xf32>
    %c0_238 = arith.constant 0 : index
    %c0_239 = arith.constant 0 : index
    %391 = vector.load %arg39[%c0_238, %c0_239] : memref<16x128xf32, #tpu.memory_space<vmem>>, vector<16x128xf32>
    %cst_240 = arith.constant dense<0.000000e+00> : vector<4x128xf32>
    %392 = tpu.matmul %390, %391, %cst_240 {dimension_numbers = #tpu.dot_dimension_numbers<[1], [0], [0], [1], [0, 0, 1, 1], [], []>, precision = #tpu.contract_precision<fp32>} : vector<4x16xf32>, vector<16x128xf32>, vector<4x128xf32> -> vector<4x128xf32>
    %393 = arith.addf %383, %392 : vector<4x128xf32>
    %c2_241 = arith.constant 2 : index
    %c0_242 = arith.constant 0 : index
    %c0_243 = arith.constant 0 : index
    %394 = vector.load %arg36[%c2_241, %c0_242, %c0_243] : memref<4x4x4xf32, #tpu.memory_space<vmem>>, vector<1x4x4xf32>
    %395 = vector.shape_cast %394 : vector<1x4x4xf32> to vector<4x4xf32>
    %cst_244 = arith.constant dense<0.000000e+00> : vector<4x32xf32>
    %396 = tpu.matmul %395, %223, %cst_244 {dimension_numbers = #tpu.dot_dimension_numbers<[1], [0], [0], [1], [0, 0, 1, 1], [], []>, precision = #tpu.contract_precision<fp32>} : vector<4x4xf32>, vector<4x32xf32>, vector<4x32xf32> -> vector<4x32xf32>
    %c2_245 = arith.constant 2 : index
    %c0_246 = arith.constant 0 : index
    %c0_247 = arith.constant 0 : index
    %397 = vector.load %arg37[%c2_245, %c0_246, %c0_247] : memref<4x4x1xf32, #tpu.memory_space<vmem>>, vector<1x4x1xf32>
    %398 = vector.shape_cast %397 : vector<1x4x1xf32> to vector<4x1xf32>
    %399 = vector.broadcast %398 : vector<4x1xf32> to vector<4x32xf32>
    %400 = arith.addf %396, %399 : vector<4x32xf32>
    %c0_248 = arith.constant 0 : index
    %c0_249 = arith.constant 0 : index
    %401 = vector.load %arg40[%c0_248, %c0_249] : memref<32x128xf32, #tpu.memory_space<vmem>>, vector<32x128xf32>
    %cst_250 = arith.constant dense<0.000000e+00> : vector<4x128xf32>
    %402 = tpu.matmul %400, %401, %cst_250 {dimension_numbers = #tpu.dot_dimension_numbers<[1], [0], [0], [1], [0, 0, 1, 1], [], []>, precision = #tpu.contract_precision<fp32>} : vector<4x32xf32>, vector<32x128xf32>, vector<4x128xf32> -> vector<4x128xf32>
    %403 = arith.addf %393, %402 : vector<4x128xf32>
    %c1_251 = arith.constant 1 : index
    %c0_252 = arith.constant 0 : index
    %c0_253 = arith.constant 0 : index
    %404 = vector.load %arg36[%c1_251, %c0_252, %c0_253] : memref<4x4x4xf32, #tpu.memory_space<vmem>>, vector<1x4x4xf32>
    %405 = vector.shape_cast %404 : vector<1x4x4xf32> to vector<4x4xf32>
    %cst_254 = arith.constant dense<0.000000e+00> : vector<4x64xf32>
    %406 = tpu.matmul %405, %149, %cst_254 {dimension_numbers = #tpu.dot_dimension_numbers<[1], [0], [0], [1], [0, 0, 1, 1], [], []>, precision = #tpu.contract_precision<fp32>} : vector<4x4xf32>, vector<4x64xf32>, vector<4x64xf32> -> vector<4x64xf32>
    %c1_255 = arith.constant 1 : index
    %c0_256 = arith.constant 0 : index
    %c0_257 = arith.constant 0 : index
    %407 = vector.load %arg37[%c1_255, %c0_256, %c0_257] : memref<4x4x1xf32, #tpu.memory_space<vmem>>, vector<1x4x1xf32>
    %408 = vector.shape_cast %407 : vector<1x4x1xf32> to vector<4x1xf32>
    %409 = vector.broadcast %408 : vector<4x1xf32> to vector<4x64xf32>
    %410 = arith.addf %406, %409 : vector<4x64xf32>
    %c0_258 = arith.constant 0 : index
    %c0_259 = arith.constant 0 : index
    %411 = vector.load %arg41[%c0_258, %c0_259] : memref<64x128xf32, #tpu.memory_space<vmem>>, vector<64x128xf32>
    %cst_260 = arith.constant dense<0.000000e+00> : vector<4x128xf32>
    %412 = tpu.matmul %410, %411, %cst_260 {dimension_numbers = #tpu.dot_dimension_numbers<[1], [0], [0], [1], [0, 0, 1, 1], [], []>, precision = #tpu.contract_precision<fp32>} : vector<4x64xf32>, vector<64x128xf32>, vector<4x128xf32> -> vector<4x128xf32>
    %413 = arith.addf %403, %412 : vector<4x128xf32>
    %c0_261 = arith.constant 0 : index
    %c0_262 = arith.constant 0 : index
    %c0_263 = arith.constant 0 : index
    %414 = vector.load %arg36[%c0_261, %c0_262, %c0_263] : memref<4x4x4xf32, #tpu.memory_space<vmem>>, vector<1x4x4xf32>
    %415 = vector.shape_cast %414 : vector<1x4x4xf32> to vector<4x4xf32>
    %cst_264 = arith.constant dense<0.000000e+00> : vector<4x128xf32>
    %416 = tpu.matmul %415, %75, %cst_264 {dimension_numbers = #tpu.dot_dimension_numbers<[1], [0], [0], [1], [0, 0, 1, 1], [], []>, precision = #tpu.contract_precision<fp32>} : vector<4x4xf32>, vector<4x128xf32>, vector<4x128xf32> -> vector<4x128xf32>
    %417 = arith.addf %413, %416 : vector<4x128xf32>
    %c0_265 = arith.constant 0 : index
    %c0_266 = arith.constant 0 : index
    %c0_267 = arith.constant 0 : index
    %418 = vector.load %arg37[%c0_265, %c0_266, %c0_267] : memref<4x4x1xf32, #tpu.memory_space<vmem>>, vector<1x4x1xf32>
    %419 = vector.shape_cast %418 : vector<1x4x1xf32> to vector<4x1xf32>
    %420 = vector.broadcast %419 : vector<4x1xf32> to vector<4x128xf32>
    %421 = arith.addf %417, %420 : vector<4x128xf32>
    %c0_268 = arith.constant 0 : index
    %c0_269 = arith.constant 0 : index
    %422 = vector.load %arg42[%c0_268, %c0_269] : memref<4x4xf32, #tpu.memory_space<vmem>>, vector<4x4xf32>
    %cst_270 = arith.constant dense<0.000000e+00> : vector<4x128xf32>
    %423 = tpu.matmul %422, %421, %cst_270 {dimension_numbers = #tpu.dot_dimension_numbers<[1], [0], [0], [1], [0, 0, 1, 1], [], []>, precision = #tpu.contract_precision<fp32>} : vector<4x4xf32>, vector<4x128xf32>, vector<4x128xf32> -> vector<4x128xf32>
    %c0_271 = arith.constant 0 : index
    %c0_272 = arith.constant 0 : index
    %424 = vector.load %arg43[%c0_271, %c0_272] : memref<4x1xf32, #tpu.memory_space<vmem>>, vector<4x1xf32>
    %425 = vector.broadcast %424 : vector<4x1xf32> to vector<4x128xf32>
    %426 = arith.addf %423, %425 : vector<4x128xf32>
    %cst_273 = arith.constant 0.000000e+00 : f32
    %427 = vector.broadcast %cst_273 : f32 to vector<4x128xf32>
    %428 = arith.maximumf %426, %427 : vector<4x128xf32>
    %c0_274 = arith.constant 0 : index
    %c0_275 = arith.constant 0 : index
    %429 = vector.load %arg44[%c0_274, %c0_275] : memref<2x4xf32, #tpu.memory_space<vmem>>, vector<2x4xf32>
    %cst_276 = arith.constant dense<0.000000e+00> : vector<2x128xf32>
    %430 = tpu.matmul %429, %428, %cst_276 {dimension_numbers = #tpu.dot_dimension_numbers<[1], [0], [0], [1], [0, 0, 1, 1], [], []>, precision = #tpu.contract_precision<fp32>} : vector<2x4xf32>, vector<4x128xf32>, vector<2x128xf32> -> vector<2x128xf32>
    %c0_277 = arith.constant 0 : index
    %c0_278 = arith.constant 0 : index
    %431 = vector.load %arg45[%c0_277, %c0_278] : memref<2x1xf32, #tpu.memory_space<vmem>>, vector<2x1xf32>
    %432 = vector.broadcast %431 : vector<2x1xf32> to vector<2x128xf32>
    %433 = arith.addf %430, %432 : vector<2x128xf32>
    %c0_279 = arith.constant 0 : index
    %c0_280 = arith.constant 0 : index
    %c0_281 = arith.constant 0 : index
    %434 = vector.load %arg46[%c0_279, %c0_280, %c0_281] : memref<1x2x128xf32, #tpu.memory_space<vmem>>, vector<1x2x128xf32>
    %435 = vector.shape_cast %434 : vector<1x2x128xf32> to vector<2x128xf32>
    %436 = vector.shape_cast %433 : vector<2x128xf32> to vector<1x2x128xf32>
    tpu.vector_store %arg46[%c0_279, %c0_280, %c0_281], %436 {strides = array<i32>} : memref<1x2x128xf32, #tpu.memory_space<vmem>>, vector<1x2x128xf32>,
    return
  }
  func.func @transform_0(%arg0: i32) -> (i32, i32, i32) {
    %c0_i32 = arith.constant 0 : i32
    %c0_i32_0 = arith.constant 0 : i32
    %c0_i32_1 = arith.constant 0 : i32
    return %arg0, %c0_i32, %c0_i32_0 : i32, i32, i32
  }
  func.func @transform_1(%arg0: i32) -> (i32, i32, i32) {
    %c0_i32 = arith.constant 0 : i32
    %c0_i32_0 = arith.constant 0 : i32
    %c0_i32_1 = arith.constant 0 : i32
    %c0_i32_2 = arith.constant 0 : i32
    return %c0_i32, %c0_i32_0, %c0_i32_1 : i32, i32, i32
  }
  func.func @transform_2(%arg0: i32) -> (i32, i32, i32) {
    %c0_i32 = arith.constant 0 : i32
    %c0_i32_0 = arith.constant 0 : i32
    %c0_i32_1 = arith.constant 0 : i32
    %c0_i32_2 = arith.constant 0 : i32
    return %c0_i32, %c0_i32_0, %c0_i32_1 : i32, i32, i32
  }
  func.func @transform_3(%arg0: i32) -> (i32, i32) {
    %c0_i32 = arith.constant 0 : i32
    %c0_i32_0 = arith.constant 0 : i32
    %c0_i32_1 = arith.constant 0 : i32
    return %c0_i32, %c0_i32_0 : i32, i32
  }
  func.func @transform_4(%arg0: i32) -> (i32, i32, i32) {
    %c0_i32 = arith.constant 0 : i32
    %c0_i32_0 = arith.constant 0 : i32
    %c0_i32_1 = arith.constant 0 : i32
    %c0_i32_2 = arith.constant 0 : i32
    return %c0_i32, %c0_i32_0, %c0_i32_1 : i32, i32, i32
  }
  func.func @transform_5(%arg0: i32) -> (i32, i32) {
    %c0_i32 = arith.constant 0 : i32
    %c0_i32_0 = arith.constant 0 : i32
    %c0_i32_1 = arith.constant 0 : i32
    return %c0_i32, %c0_i32_0 : i32, i32
  }
  func.func @transform_6(%arg0: i32) -> (i32, i32) {
    %c0_i32 = arith.constant 0 : i32
    %c0_i32_0 = arith.constant 0 : i32
    %c0_i32_1 = arith.constant 0 : i32
    return %c0_i32, %c0_i32_0 : i32, i32
  }
  func.func @transform_7(%arg0: i32) -> (i32, i32) {
    %c0_i32 = arith.constant 0 : i32
    %c0_i32_0 = arith.constant 0 : i32
    %c0_i32_1 = arith.constant 0 : i32
    return %c0_i32, %c0_i32_0 : i32, i32
  }
  func.func @transform_8(%arg0: i32) -> (i32, i32, i32) {
    %c0_i32 = arith.constant 0 : i32
    %c0_i32_0 = arith.constant 0 : i32
    %c0_i32_1 = arith.constant 0 : i32
    %c0_i32_2 = arith.constant 0 : i32
    return %c0_i32, %c0_i32_0, %c0_i32_1 : i32, i32, i32
  }
  func.func @transform_9(%arg0: i32) -> (i32, i32, i32) {
    %c0_i32 = arith.constant 0 : i32
    %c0_i32_0 = arith.constant 0 : i32
    %c0_i32_1 = arith.constant 0 : i32
    %c0_i32_2 = arith.constant 0 : i32
    return %c0_i32, %c0_i32_0, %c0_i32_1 : i32, i32, i32
  }
  func.func @transform_10(%arg0: i32) -> (i32, i32) {
    %c0_i32 = arith.constant 0 : i32
    %c0_i32_0 = arith.constant 0 : i32
    %c0_i32_1 = arith.constant 0 : i32
    return %c0_i32, %c0_i32_0 : i32, i32
  }
  func.func @transform_11(%arg0: i32) -> (i32, i32, i32) {
    %c0_i32 = arith.constant 0 : i32
    %c0_i32_0 = arith.constant 0 : i32
    %c0_i32_1 = arith.constant 0 : i32
    %c0_i32_2 = arith.constant 0 : i32
    return %c0_i32, %c0_i32_0, %c0_i32_1 : i32, i32, i32
  }
  func.func @transform_12(%arg0: i32) -> (i32, i32) {
    %c0_i32 = arith.constant 0 : i32
    %c0_i32_0 = arith.constant 0 : i32
    %c0_i32_1 = arith.constant 0 : i32
    return %c0_i32, %c0_i32_0 : i32, i32
  }
  func.func @transform_13(%arg0: i32) -> (i32, i32) {
    %c0_i32 = arith.constant 0 : i32
    %c0_i32_0 = arith.constant 0 : i32
    %c0_i32_1 = arith.constant 0 : i32
    return %c0_i32, %c0_i32_0 : i32, i32
  }
  func.func @transform_14(%arg0: i32) -> (i32, i32) {
    %c0_i32 = arith.constant 0 : i32
    %c0_i32_0 = arith.constant 0 : i32
    %c0_i32_1 = arith.constant 0 : i32
    return %c0_i32, %c0_i32_0 : i32, i32
  }
  func.func @transform_15(%arg0: i32) -> (i32, i32, i32) {
    %c0_i32 = arith.constant 0 : i32
    %c0_i32_0 = arith.constant 0 : i32
    %c0_i32_1 = arith.constant 0 : i32
    %c0_i32_2 = arith.constant 0 : i32
    return %c0_i32, %c0_i32_0, %c0_i32_1 : i32, i32, i32
  }
  func.func @transform_16(%arg0: i32) -> (i32, i32, i32) {
    %c0_i32 = arith.constant 0 : i32
    %c0_i32_0 = arith.constant 0 : i32
    %c0_i32_1 = arith.constant 0 : i32
    %c0_i32_2 = arith.constant 0 : i32
    return %c0_i32, %c0_i32_0, %c0_i32_1 : i32, i32, i32
  }
  func.func @transform_17(%arg0: i32) -> (i32, i32) {
    %c0_i32 = arith.constant 0 : i32
    %c0_i32_0 = arith.constant 0 : i32
    %c0_i32_1 = arith.constant 0 : i32
    return %c0_i32, %c0_i32_0 : i32, i32
  }
  func.func @transform_18(%arg0: i32) -> (i32, i32, i32) {
    %c0_i32 = arith.constant 0 : i32
    %c0_i32_0 = arith.constant 0 : i32
    %c0_i32_1 = arith.constant 0 : i32
    %c0_i32_2 = arith.constant 0 : i32
    return %c0_i32, %c0_i32_0, %c0_i32_1 : i32, i32, i32
  }
  func.func @transform_19(%arg0: i32) -> (i32, i32) {
    %c0_i32 = arith.constant 0 : i32
    %c0_i32_0 = arith.constant 0 : i32
    %c0_i32_1 = arith.constant 0 : i32
    return %c0_i32, %c0_i32_0 : i32, i32
  }
  func.func @transform_20(%arg0: i32) -> (i32, i32) {
    %c0_i32 = arith.constant 0 : i32
    %c0_i32_0 = arith.constant 0 : i32
    %c0_i32_1 = arith.constant 0 : i32
    return %c0_i32, %c0_i32_0 : i32, i32
  }
  func.func @transform_21(%arg0: i32) -> (i32, i32) {
    %c0_i32 = arith.constant 0 : i32
    %c0_i32_0 = arith.constant 0 : i32
    %c0_i32_1 = arith.constant 0 : i32
    return %c0_i32, %c0_i32_0 : i32, i32
  }
  func.func @transform_22(%arg0: i32) -> (i32, i32, i32) {
    %c0_i32 = arith.constant 0 : i32
    %c0_i32_0 = arith.constant 0 : i32
    %c0_i32_1 = arith.constant 0 : i32
    %c0_i32_2 = arith.constant 0 : i32
    return %c0_i32, %c0_i32_0, %c0_i32_1 : i32, i32, i32
  }
  func.func @transform_23(%arg0: i32) -> (i32, i32, i32) {
    %c0_i32 = arith.constant 0 : i32
    %c0_i32_0 = arith.constant 0 : i32
    %c0_i32_1 = arith.constant 0 : i32
    %c0_i32_2 = arith.constant 0 : i32
    return %c0_i32, %c0_i32_0, %c0_i32_1 : i32, i32, i32
  }
  func.func @transform_24(%arg0: i32) -> (i32, i32) {
    %c0_i32 = arith.constant 0 : i32
    %c0_i32_0 = arith.constant 0 : i32
    %c0_i32_1 = arith.constant 0 : i32
    return %c0_i32, %c0_i32_0 : i32, i32
  }
  func.func @transform_25(%arg0: i32) -> (i32, i32, i32) {
    %c0_i32 = arith.constant 0 : i32
    %c0_i32_0 = arith.constant 0 : i32
    %c0_i32_1 = arith.constant 0 : i32
    %c0_i32_2 = arith.constant 0 : i32
    return %c0_i32, %c0_i32_0, %c0_i32_1 : i32, i32, i32
  }
  func.func @transform_26(%arg0: i32) -> (i32, i32) {
    %c0_i32 = arith.constant 0 : i32
    %c0_i32_0 = arith.constant 0 : i32
    %c0_i32_1 = arith.constant 0 : i32
    return %c0_i32, %c0_i32_0 : i32, i32
  }
  func.func @transform_27(%arg0: i32) -> (i32, i32) {
    %c0_i32 = arith.constant 0 : i32
    %c0_i32_0 = arith.constant 0 : i32
    %c0_i32_1 = arith.constant 0 : i32
    return %c0_i32, %c0_i32_0 : i32, i32
  }
  func.func @transform_28(%arg0: i32) -> (i32, i32) {
    %c0_i32 = arith.constant 0 : i32
    %c0_i32_0 = arith.constant 0 : i32
    %c0_i32_1 = arith.constant 0 : i32
    return %c0_i32, %c0_i32_0 : i32, i32
  }
  func.func @transform_29(%arg0: i32) -> (i32, i32) {
    %c0_i32 = arith.constant 0 : i32
    %c0_i32_0 = arith.constant 0 : i32
    %c0_i32_1 = arith.constant 0 : i32
    return %c0_i32, %c0_i32_0 : i32, i32
  }
  func.func @transform_30(%arg0: i32) -> (i32, i32) {
    %c0_i32 = arith.constant 0 : i32
    %c0_i32_0 = arith.constant 0 : i32
    %c0_i32_1 = arith.constant 0 : i32
    return %c0_i32, %c0_i32_0 : i32, i32
  }
  func.func @transform_31(%arg0: i32) -> (i32, i32, i32) {
    %c0_i32 = arith.constant 0 : i32
    %c0_i32_0 = arith.constant 0 : i32
    %c0_i32_1 = arith.constant 0 : i32
    %c0_i32_2 = arith.constant 0 : i32
    return %c0_i32, %c0_i32_0, %c0_i32_1 : i32, i32, i32
  }
  func.func @transform_32(%arg0: i32) -> (i32, i32) {
    %c0_i32 = arith.constant 0 : i32
    %c0_i32_0 = arith.constant 0 : i32
    %c0_i32_1 = arith.constant 0 : i32
    return %c0_i32, %c0_i32_0 : i32, i32
  }
  func.func @transform_33(%arg0: i32) -> (i32, i32) {
    %c0_i32 = arith.constant 0 : i32
    %c0_i32_0 = arith.constant 0 : i32
    %c0_i32_1 = arith.constant 0 : i32
    return %c0_i32, %c0_i32_0 : i32, i32
  }
  func.func @transform_34(%arg0: i32) -> (i32, i32) {
    %c0_i32 = arith.constant 0 : i32
    %c0_i32_0 = arith.constant 0 : i32
    %c0_i32_1 = arith.constant 0 : i32
    return %c0_i32, %c0_i32_0 : i32, i32
  }
  func.func @transform_35(%arg0: i32) -> (i32, i32, i32) {
    %c0_i32 = arith.constant 0 : i32
    %c0_i32_0 = arith.constant 0 : i32
    %c0_i32_1 = arith.constant 0 : i32
    %c0_i32_2 = arith.constant 0 : i32
    return %c0_i32, %c0_i32_0, %c0_i32_1 : i32, i32, i32
  }
  func.func @transform_36(%arg0: i32) -> (i32, i32, i32) {
    %c0_i32 = arith.constant 0 : i32
    %c0_i32_0 = arith.constant 0 : i32
    %c0_i32_1 = arith.constant 0 : i32
    %c0_i32_2 = arith.constant 0 : i32
    return %c0_i32, %c0_i32_0, %c0_i32_1 : i32, i32, i32
  }
  func.func @transform_37(%arg0: i32) -> (i32, i32) {
    %c0_i32 = arith.constant 0 : i32
    %c0_i32_0 = arith.constant 0 : i32
    %c0_i32_1 = arith.constant 0 : i32
    return %c0_i32, %c0_i32_0 : i32, i32
  }
  func.func @transform_38(%arg0: i32) -> (i32, i32) {
    %c0_i32 = arith.constant 0 : i32
    %c0_i32_0 = arith.constant 0 : i32
    %c0_i32_1 = arith.constant 0 : i32
    return %c0_i32, %c0_i32_0 : i32, i32
  }
  func.func @transform_39(%arg0: i32) -> (i32, i32) {
    %c0_i32 = arith.constant 0 : i32
    %c0_i32_0 = arith.constant 0 : i32
    %c0_i32_1 = arith.constant 0 : i32
    return %c0_i32, %c0_i32_0 : i32, i32
  }
  func.func @transform_40(%arg0: i32) -> (i32, i32) {
    %c0_i32 = arith.constant 0 : i32
    %c0_i32_0 = arith.constant 0 : i32
    %c0_i32_1 = arith.constant 0 : i32
    return %c0_i32, %c0_i32_0 : i32, i32
  }
  func.func @transform_41(%arg0: i32) -> (i32, i32) {
    %c0_i32 = arith.constant 0 : i32
    %c0_i32_0 = arith.constant 0 : i32
    %c0_i32_1 = arith.constant 0 : i32
    return %c0_i32, %c0_i32_0 : i32, i32
  }
  func.func @transform_42(%arg0: i32) -> (i32, i32) {
    %c0_i32 = arith.constant 0 : i32
    %c0_i32_0 = arith.constant 0 : i32
    %c0_i32_1 = arith.constant 0 : i32
    return %c0_i32, %c0_i32_0 : i32, i32
  }
  func.func @transform_43(%arg0: i32) -> (i32, i32) {
    %c0_i32 = arith.constant 0 : i32
    %c0_i32_0 = arith.constant 0 : i32
    %c0_i32_1 = arith.constant 0 : i32
    return %c0_i32, %c0_i32_0 : i32, i32
  }
  func.func @transform_44(%arg0: i32) -> (i32, i32) {
    %c0_i32 = arith.constant 0 : i32
    %c0_i32_0 = arith.constant 0 : i32
    %c0_i32_1 = arith.constant 0 : i32
    return %c0_i32, %c0_i32_0 : i32, i32
  }
  func.func @transform_45(%arg0: i32) -> (i32, i32, i32) {
    %c0_i32 = arith.constant 0 : i32
    %c0_i32_0 = arith.constant 0 : i32
    %c0_i32_1 = arith.constant 0 : i32
    return %arg0, %c0_i32, %c0_i32_0 : i32, i32, i32
  }
}

</mosaic_0001>

<bundles_post_ra>
// kernel: tpu_custom_call.1
= control target key start
LH: loop header
LB: loop body
LE: loop exit
PB: predicated region body
PF: predicated region fallthrough
CT: control target
= control target key end

     0   :  { %s32398_s6 = smov 1   ;;  %s32399_s10 = smov 2   ;;  %s36598_s0 = inlined_call_operand.smem [shape: u32[46], index: -1, kind: input, shape index: {}] }
   0x1   :  { %s32457_s5 = sld [smem:[%s36598_s0]]   ;;  %s32400_s14 = smov 3  }
   0x2   :  { %s32462_s9 = sld [smem:[%s36598_s0 + %s32398_s6]]   ;;  %s32401_s18 = smov 4  }
   0x3   :  { %s32467_s13 = sld [smem:[%s36598_s0 + %s32399_s10]]   ;;  %s32402_s22 = smov 5  }
   0x4   :  { %s32472_s17 = sld [smem:[%s36598_s0 + %s32400_s14]]   ;;  %s32403_s26 = smov 6  }
   0x5   :  { %s32477_s21 = sld [smem:[%s36598_s0 + %s32401_s18]]   ;;  %s32404_s30 = smov 7  }
   0x6   :  { %s32482_s25 = sld [smem:[%s36598_s0 + %s32402_s22]]   ;;  %s32405_s4 = smov 8  }
   0x7   :  { %36752 = sst [smem:[#allocation6_spill]] %s32457_s5  ;;  %s32406_s10 = smov 9  }
   0x8   :  { %36753 = sst [smem:[#allocation7_spill]] %s32462_s9  ;;  %s32407_s15 = smov 10  }
   0x9   :  { %36754 = sst [smem:[#allocation8_spill]] %s32467_s13  ;;  %s32408_s20 = smov 11  }
   0xa   :  { %s32487_s29 = sld [smem:[%s36598_s0 + %s32403_s26]]   ;;  %s32409_s26 = smov 12  }
   0xb   :  { %s32492_s3 = sld [smem:[%s36598_s0 + %s32404_s30]]   ;;  %s32410_s1 = smov 13  }
   0xc   :  { %s32497_s8 = sld [smem:[%s36598_s0 + %s32405_s4]]   ;;  %s32411_s7 = smov 14  }
   0xd   :  { %s32502_s14 = sld [smem:[%s36598_s0 + %s32406_s10]]   ;;  %s32413_s22 = smov 16  }
   0xe   :  { %s32507_s19 = sld [smem:[%s36598_s0 + %s32407_s15]]   ;;  %s32412_s15 = smov 15  }
   0xf   :  { %s32512_s24 = sld [smem:[%s36598_s0 + %s32408_s20]]   ;;  %s32414_s28 = smov 17  }
  0x10   :  { %s32517_s30 = sld [smem:[%s36598_s0 + %s32409_s26]]   ;;  %s32428_s16 = smov 31  }
  0x11   :  { %36755 = sst [smem:[#allocation9_spill]] %s32492_s3  ;;  %s32429_s23 = smov 32  }
  0x12   :  { %36756 = sst [smem:[#allocation10_spill]] %s32497_s8  ;;  %s32431_s10 = smov 34  }
  0x13   :  { %36757 = sst [smem:[#allocation11_spill]] %s32502_s14 }
  0x14   :  { %s32522_s6 = sld [smem:[%s36598_s0 + %s32410_s1]]   ;;  %s32430_s1 = smov 33  }
  0x15   :  { %s32527_s12 = sld [smem:[%s36598_s0 + %s32411_s7]]   ;;  %s32415_s7 = smov 18  }
  0x16   :  { %s32532_s20 = sld [smem:[%s36598_s0 + %s32412_s15]]   ;;  %s32416_s15 = smov 19  }
  0x17   :  { %s32537_s27 = sld [smem:[%s36598_s0 + %s32413_s22]]   ;;  %s32417_s22 = smov 20  }
  0x18   :  { %s32542_s4 = sld [smem:[%s36598_s0 + %s32414_s28]]   ;;  %s32418_s28 = smov 21  }
  0x1a   :  { %36758 = sst [smem:[#allocation12_spill]] %s32522_s6 }
  0x1b   :  { %36759 = sst [smem:[#allocation13_spill]] %s32527_s12 }
  0x1c   :  { %36760 = sst [smem:[#allocation14_spill]] %s32532_s20 }
  0x1d   :  { %36761 = sst [smem:[#allocation15_spill]] %s32537_s27 }
  0x1e   :  { %36762 = sst [smem:[#allocation16_spill]] %s32542_s4 }
  0x1f   :  { %s32547_s12 = sld [smem:[%s36598_s0 + %s32415_s7]]   ;;  %s32419_s7 = smov 22  }
  0x20   :  { %s32552_s6 = sld [smem:[%s36598_s0 + %s32416_s15]]   ;;  %s32420_s15 = smov 23  }
  0x21   :  { %s32557_s27 = sld [smem:[%s36598_s0 + %s32417_s22]]   ;;  %s32421_s22 = smov 24  }
  0x22   :  { %s32562_s20 = sld [smem:[%s36598_s0 + %s32418_s28]]   ;;  %s32422_s28 = smov 25  }
  0x23   :  { %s32625_s4 = sld [smem:[%s36598_s0 + %s32431_s10]]   ;;  %s32435_s10 = smov 38  }
  0x25   :  { %36763 = sst [smem:[#allocation17_spill]] %s32547_s12 }
  0x26   :  { %36764 = sst [smem:[#allocation18_spill]] %s32552_s6 }
  0x27   :  { %36765 = sst [smem:[#allocation19_spill]] %s32557_s27 }
  0x28   :  { %36766 = sst [smem:[#allocation20_spill]] %s32562_s20 }
  0x29   :  { %s32567_s12 = sld [smem:[%s36598_s0 + %s32419_s7]]   ;;  %s32423_s7 = smov 26  }
  0x2a   :  { %s32572_s6 = sld [smem:[%s36598_s0 + %s32420_s15]]   ;;  %s32424_s15 = smov 27  }
  0x2b   :  { %s32577_s27 = sld [smem:[%s36598_s0 + %s32421_s22]]   ;;  %s32425_s22 = smov 28  }
  0x2c   :  { %s32582_s20 = sld [smem:[%s36598_s0 + %s32422_s28]]   ;;  %s32426_s28 = smov 29  }
  0x2d   :  { %36778 = sst [smem:[#allocation32_spill]] %s32625_s4  ;;  %s32440_s4 = smov 43  }
  0x2f   :  { %36767 = sst [smem:[#allocation21_spill]] %s32567_s12 }
  0x30   :  { %36768 = sst [smem:[#allocation22_spill]] %s32572_s6 }
  0x31   :  { %36769 = sst [smem:[#allocation23_spill]] %s32577_s27 }
  0x32   :  { %36770 = sst [smem:[#allocation24_spill]] %s32582_s20 }
  0x33   :  { %s32587_s12 = sld [smem:[%s36598_s0 + %s32423_s7]]   ;;  %s32427_s7 = smov 30  }
  0x34   :  { %s32592_s6 = sld [smem:[%s36598_s0 + %s32424_s15]]   ;;  %s32436_s15 = smov 39  }
  0x35   :  { %s32597_s27 = sld [smem:[%s36598_s0 + %s32425_s22]]  }
  0x36   :  { %s32602_s20 = sld [smem:[%s36598_s0 + %s32426_s28]]  }
  0x39   :  { %36771 = sst [smem:[#allocation25_spill]] %s32587_s12 }
  0x3a   :  { %36772 = sst [smem:[#allocation26_spill]] %s32592_s6 }
  0x3b   :  { %36773 = sst [smem:[#allocation27_spill]] %s32597_s27 }
  0x3c   :  { %36774 = sst [smem:[#allocation28_spill]] %s32602_s20 }
  0x3d   :  { %s26066_s12 = sld [smem:[%s36598_s0 + %s32427_s7]]  }
  0x3e   :  { %s32610_s6 = sld [smem:[%s36598_s0 + %s32428_s16]]   ;;  %s32432_s16 = smov 35  }
  0x3f   :  { %s32615_s27 = sld [smem:[%s36598_s0 + %s32429_s23]]   ;;  %s32433_s23 = smov 36  }
  0x40   :  { %s32620_s20 = sld [smem:[%s36598_s0 + %s32430_s1]]   ;;  %s32434_s1 = smov 37  }
  0x41   :  { %s32640_s7 = sld [smem:[%s36598_s0 + %s32434_s1]]   ;;  %s32438_s1 = smov 41  }
  0x43   :  { %v96_v0 = vstv %s26066_s12  ;;  %s32437_s12 = smov 40  }
  0x44   :  { %36775 = sst [smem:[#allocation29_spill]] %s32610_s6  ;;  %97 = vst [vmem:[#allocation2] sm:$0x1] %v96_v0 }
  0x45   :  { %36776 = sst [smem:[#allocation30_spill]] %s32615_s27 }
  0x46   :  { %36777 = sst [smem:[#allocation31_spill]] %s32620_s20  ;;  %s32439_s20 = smov 42  }
  0x47   :  { %s32630_s6 = sld [smem:[%s36598_s0 + %s32432_s16]]  }
  0x48   :  { %s32635_s27 = sld [smem:[%s36598_s0 + %s32433_s23]]  }
  0x49   :  { %36781 = sst [smem:[#allocation35_spill]] %s32640_s7  ;;  %s32442_s7 = smov 45  }
  0x4a   :  { %s32645_s16 = sld [smem:[%s36598_s0 + %s32435_s10]]  }
  0x4b   :  { %s32650_s23 = sld [smem:[%s36598_s0 + %s32436_s15]]  }
  0x4c   :  { %s32655_s28 = sld [smem:[%s36598_s0 + %s32437_s12]]   ;;  %s32441_s12 = smov 44  }
  0x4d   :  { %36779 = sst [smem:[#allocation33_spill]] %s32630_s6 }
  0x4e   :  { %36780 = sst [smem:[#allocation34_spill]] %s32635_s27 }
  0x4f   :  { %s32660_s27 = sld [smem:[%s36598_s0 + %s32438_s1]]  }
  0x50   :  { %36782 = sst [smem:[#allocation36_spill]] %s32645_s16 }
  0x51   :  { %36783 = sst [smem:[#allocation37_spill]] %s32650_s23 }
  0x52   :  { %36784 = sst [smem:[#allocation38_spill]] %s32655_s28 }
  0x53   :  { %s32665_s16 = sld [smem:[%s36598_s0 + %s32439_s20]]  }
  0x54   :  { %s32670_s23 = sld [smem:[%s36598_s0 + %s32440_s4]]  }
  0x55   :  { %36785 = sst [smem:[#allocation39_spill]] %s32660_s27 }
  0x56   :  { %s32675_s28 = sld [smem:[%s36598_s0 + %s32441_s12]]  }
  0x57   :  { %s32680_s27 = sld [smem:[%s36598_s0 + %s32442_s7]]  }
  0x58   :  { %98 = vsyncpa [#allocation4], 0 }
  0x59   :  { %100 = vsyncpa [#allocation4 + $0x1], 0  ;;  %s32682_s20 = smov 0   ;;  %s32684_s10 = smov 0  }
  0x5a   :  { %s32686_s11 = smov 0   ;;  %s32688_s4 = smov 0  }
  0x5b LB: > { %s36786_s14 = sld [smem:[#allocation11_spill]]  ;;  %s36787_s13 = sld [smem:[#allocation8_spill]]  ;;  %s32384_s20 = sphi %s32682_s20, %s37004_s20   ;;  %s32396_s4 = sphi %s32688_s4, %s37007_s4   ;;  %s32392_s11 = sphi %s32686_s11, %s37006_s11   ;;  %s32388_s10 = sphi %s32684_s10, %s37005_s10  }
  0x5c   : > { %s36788_s9 = sld [smem:[#allocation7_spill]]  ;;  %s36789_s6 = sld [smem:[#allocation33_spill]] }
  0x5d   : > { %s36790_s8 = sld [smem:[#allocation10_spill]]  ;;  %s32703_s0 = sadd.s32 4294967295, %s32396_s4  }
  0x5e   : > { %s26083_s15 = sadd.s32 4294967294, %s32396_s4   ;;  %s32707_s18 = sadd.s32 1, %s32396_s4  }
  0x5f   : > { %s1063_s12 = sadd.s32 1, %s32392_s11  ;;  %s1060_s22 = ssub.s32 %s32396_s4, %s32707_s18 }
  0x60   : > { %p1073_p0 = scmp.ne.s32.totalorder %s32392_s11, %s32388_s10  ;;  %p1061_p1 = scmp.eq.s32.totalorder %s1060_s22, 0 }
  0x61   : > { %p1074_p2 = scmp.eq.s32.totalorder %s32703_s0, 1  ;;  %p1079_p3 = scmp.ne.s32.totalorder %s32388_s10, %s32384_s20 }
  0x62   : > { %p1080_p4 = scmp.eq.s32.totalorder %s26083_s15, 1  ;;  %p26086_p7 = scmp.ge.s32.totalorder %s32396_s4, 1 }
  0x63   : > { %s32718_s26 = scalar_select %p1061_p1, %s32392_s11, %s1063_s12  }
  0x64   : > { %p32720_p5 = por %p1074_p2, %p1073_p0  ;;  %p32724_p6 = por %p1080_p4, %p1079_p3 }
  0x65   : > { %p1236_p8 = scmp.lt.s32.totalorder %s32396_s4, 3 }
  0x67   : > { %p1237_p9 = pnand %p26086_p7, %p1236_p8 }
  0x69   : > { %1240 = sbr.rel (%p1237_p9) target bundleno = 8284 (0x205c), region = 200 }
  0x70   : > { %v1346_v1 = vld [vmem:[%s36788_s9] sm:$0xff]  ;;  %v1347_v2 = vld [vmem:[%s36788_s9 + $0x8] sm:$0xff]  ;;  %v36613_v4 = vmov 0.0|0.0   ;;  %v1348_v9 = vld [vmem:[%s36788_s9 + $0x10] sm:$0xff]  ;;  %vm32444_vm0 = vmmov 0   ;;  %v36611_v17 = vmov 0.0  }
  0x71   : > { %v26088_v3 = vld [vmem:[%s36788_s9 + $0x80] sm:$0xff]  ;;  %30646 = vmatprep.subr.bf16.mxu0 %v36613_v4  ;;  %30790 = vmatprep.subr.bf16.mxu1 %v36613_v4  ;;  %v1363_v5 = vand.u32 4294901760, %v1346_v1  ;;  %v1366_v6 = vand.u32 4294901760, %v1347_v2  ;;  %v26089_v7 = vld [vmem:[%s36788_s9 + $0x88] sm:$0xff]  ;;  %v1349_v10 = vld [vmem:[%s36788_s9 + $0x18] sm:$0xff]  ;;  %v1369_v12 = vand.u32 4294901760, %v1348_v9 }
  0x72   : > { %v2023_v8 = vand.u32 4294901760, %v26088_v3  ;;  %v2026_v11 = vand.u32 4294901760, %v26089_v7  ;;  %v1372_v13 = vand.u32 4294901760, %v1349_v10  ;;  %v26090_v14 = vld [vmem:[%s36788_s9 + $0x90] sm:$0xff]  ;;  %v26091_v15 = vld [vmem:[%s36788_s9 + $0x98] sm:$0xff]  ;;  %v1350_v16 = vld [vmem:[%s36788_s9 + $0x20] sm:$0xff]  ;;  %27624 = vmatprep.mubr.msk.f32.mxu0 %vm32444_vm0, %v36611_v17  ;;  %27834 = vmatprep.mubr.msk.f32.mxu1 %vm32444_vm0, %v36611_v17 }
  0x73   : > { %v32745_v18 = vpack.c.bf16 %v1366_v6, %v1363_v5  ;;  %v1351_v19 = vld [vmem:[%s36788_s9 + $0x28] sm:$0xff]  ;;  %v26092_v20 = vld [vmem:[%s36788_s9 + $0xa0] sm:$0xff]  ;;  %v2029_v24 = vand.u32 4294901760, %v26090_v14  ;;  %v2032_v25 = vand.u32 4294901760, %v26091_v15  ;;  %v1375_v26 = vand.u32 4294901760, %v1350_v16  ;;  %v1352_v30 = vld [vmem:[%s36788_s9 + $0x30] sm:$0xff] }
  0x74   : > { %v26093_v21 = vld [vmem:[%s36788_s9 + $0xa8] sm:$0xff]  ;;  %v32750_v22 = vpack.c.bf16 %v2026_v11, %v2023_v8  ;;  %v32753_v23 = vpack.c.bf16 %v1372_v13, %v1369_v12  ;;  %v1378_v27 = vand.u32 4294901760, %v1351_v19  ;;  %v2035_v28 = vand.u32 4294901760, %v26092_v20  ;;  %v1353_v31 = vld [vmem:[%s36788_s9 + $0x38] sm:$0xff]  ;;  %p1342_p10 = scmp.lt.s32.totalorder %s32703_s0, 1  ;;  %v26094_v35 = vld [vmem:[%s36788_s9 + $0xb0] sm:$0xff] }
  0x75   : > { %36793 = vst [vmem:[#allocation40_spill] sm:$0xff] %v32745_v18  ;;  %30648 = vmatpush3.bf16.msra.mxu0 %v32745_v18  ;;  %v2038_v29 = vand.u32 4294901760, %v26093_v21  ;;  %v32760_v32 = vsub.f32 %v1346_v1, %v1363_v5  ;;  %v32762_v33 = vsub.f32 %v1347_v2, %v1366_v6  ;;  %v32765_v34 = vpack.c.bf16 %v2032_v25, %v2029_v24  ;;  %v26095_v36 = vld [vmem:[%s36788_s9 + $0xb8] sm:$0xff]  ;;  %v1354_v41 = vld [vmem:[%s36788_s9 + $0x40] sm:$0xff]  ;;  %v1355_v46 = vld [vmem:[%s36788_s9 + $0x48] sm:$0xff]  ;;  %s36799_s5 = sld [smem:[#allocation6_spill]] }
  0x76   : > { %36794 = vst [vmem:[#allocation41_spill] sm:$0xff] %v32750_v22  ;;  %36795 = vst [vmem:[#allocation42_spill] sm:$0xff] %v32753_v23  ;;  %30792 = vmatpush3.bf16.msra.mxu1 %v32750_v22  ;;  %30649 = vmatprep.subr.bf16.mxu0 %v36613_v4  ;;  %v32769_v37 = vsub.f32 %v26088_v3, %v2023_v8  ;;  %v32771_v38 = vsub.f32 %v26089_v7, %v2026_v11  ;;  %v1381_v44 = vand.u32 4294901760, %v1352_v30  ;;  %v26096_v47 = vld [vmem:[%s36788_s9 + $0xc0] sm:$0xff]  ;;  %v26097_v48 = vld [vmem:[%s36788_s9 + $0xc8] sm:$0xff]  ;;  %s32796_s2 = scalar_select %p1342_p10, %s32703_s0, 1 }
  0x77   : > { %30793 = vmatprep.subr.bf16.mxu1 %v36613_v4  ;;  %36796 = vst [vmem:[#allocation43_spill] sm:$0xff] %v32765_v34  ;;  %v32773_v39 = vsub.f32 %v1348_v9, %v1369_v12  ;;  %v32775_v40 = vsub.f32 %v1349_v10, %v1372_v13  ;;  %v32779_v42 = vsub.f32 %v26090_v14, %v2029_v24  ;;  %v1384_v45 = vand.u32 4294901760, %v1353_v31  ;;  %v1356_v53 = vld [vmem:[%s36788_s9 + $0x50] sm:$0xff]  ;;  %v1357_v58 = vld [vmem:[%s36788_s9 + $0x58] sm:$0xff]  ;;  %v1358_v1 = vld [vmem:[%s36788_s9 + $0x60] sm:$0xff]  ;;  %s36913_s3 = sld [smem:[#allocation9_spill]] }
  0x78   : > { %v32781_v43 = vpack.c.bf16 %v1378_v27, %v1375_v26  ;;  %v32787_v49 = vsub.f32 %v26091_v15, %v2032_v25  ;;  %v32790_v50 = vpack.c.bf16 %v2038_v29, %v2035_v28  ;;  %v2041_v51 = vand.u32 4294901760, %v26094_v35  ;;  %v26098_v59 = vld [vmem:[%s36788_s9 + $0xd0] sm:$0xff]  ;;  %v26099_v60 = vld [vmem:[%s36788_s9 + $0xd8] sm:$0xff]  ;;  %v1359_v2 = vld [vmem:[%s36788_s9 + $0x68] sm:$0xff] }
  0x79   : > { %30651 = vmatpush3.bf16.msra.mxu0 %v32753_v23  ;;  %v2044_v52 = vand.u32 4294901760, %v26095_v36  ;;  %v32799_v54 = vsub.f32 %v1350_v16, %v1375_v26  ;;  %v32801_v55 = vsub.f32 %v1351_v19, %v1378_v27  ;;  %v32803_v56 = vsub.f32 %v26092_v20, %v2035_v28  ;;  %v26100_v12 = vld [vmem:[%s36788_s9 + $0xe0] sm:$0xff]  ;;  %v26101_v13 = vld [vmem:[%s36788_s9 + $0xe8] sm:$0xff] }
  0x7a   : > { %36797 = vst [vmem:[#allocation44_spill] sm:$0xff] %v32781_v43  ;;  %30795 = vmatpush3.bf16.msra.mxu1 %v32765_v34  ;;  %30652 = vmatprep.subr.bf16.mxu0 %v36613_v4  ;;  %36798 = vst [vmem:[#allocation45_spill] sm:$0xff] %v32790_v50  ;;  %v32805_v57 = vsub.f32 %v26093_v21, %v2038_v29  ;;  %v1387_v61 = vand.u32 4294901760, %v1354_v41  ;;  %v1390_v62 = vand.u32 4294901760, %v1355_v46  ;;  %v2047_v63 = vand.u32 4294901760, %v26096_v47 }
  0x7b   : > { %30796 = vmatprep.subr.bf16.mxu1 %v36613_v4  ;;  %v2050_v0 = vand.u32 4294901760, %v26097_v48  ;;  %v32813_v3 = vpack.c.bf16 %v1384_v45, %v1381_v44  ;;  %v32815_v5 = vsub.f32 %v1352_v30, %v1381_v44  ;;  %v32817_v6 = vsub.f32 %v1353_v31, %v1384_v45  ;;  %s1344_s15 = scalar_lea.vmem %s36799_s5, %s32796_s2  ;;  %v1361_v44 = vld [vmem:[%s36788_s9 + $0x78] sm:$0xff]  ;;  %s36977_s2 = sld [smem:[#allocation16_spill]] }
  0x7c   : > { %v32819_v7 = vsub.f32 %v26094_v35, %v2041_v51  ;;  %v32823_v8 = vpack.c.bf16 %v2044_v52, %v2041_v51  ;;  %v32825_v9 = vsub.f32 %v26095_v36, %v2044_v52  ;;  %v1393_v10 = vand.u32 4294901760, %v1356_v53  ;;  %v1345_v30 = vld [vmem:[%s1344_s15] sm:$0x1]  ;;  %v26102_v51 = vld [vmem:[%s36788_s9 + $0xf0] sm:$0xff]  ;;  %v32866_v52 = vld [vmem:[%s36788_s9 + $0xf8] sm:$0xff]  ;;  %s36978_s15 = sld [smem:[#allocation18_spill]] }
  0x7d   : > { %30654 = vmatpush3.bf16.msra.mxu0 %v32781_v43  ;;  %36800 = vst [vmem:[#allocation46_spill] sm:$0xff] %v32813_v3  ;;  %v1396_v11 = vand.u32 4294901760, %v1357_v58  ;;  %v2053_v14 = vand.u32 4294901760, %v26098_v59  ;;  %v2056_v15 = vand.u32 4294901760, %v26099_v60  ;;  %v1399_v16 = vand.u32 4294901760, %v1358_v1 }
  0x7e   : > { %30798 = vmatpush3.bf16.msra.mxu1 %v32790_v50  ;;  %30655 = vmatprep.subr.bf16.mxu0 %v36613_v4  ;;  %36801 = vst [vmem:[#allocation47_spill] sm:$0xff] %v32823_v8  ;;  %v1402_v19 = vand.u32 4294901760, %v1359_v2  ;;  %v32832_v20 = vpack.c.bf16 %v1390_v62, %v1387_v61  ;;  %v32834_v21 = vsub.f32 %v1354_v41, %v1387_v61  ;;  %v2059_v28 = vand.u32 4294901760, %v26100_v12  ;;  %v1360_v41 = vld [vmem:[%s36788_s9 + $0x70] sm:$0xff] }
  0x7f   : > { %30799 = vmatprep.subr.bf16.mxu1 %v36613_v4  ;;  %v32836_v24 = vsub.f32 %v1355_v46, %v1390_v62  ;;  %v32838_v25 = vpack.c.bf16 %v2050_v0, %v2047_v63  ;;  %v32841_v26 = vsub.f32 %v26096_v47, %v2047_v63  ;;  %v32843_v27 = vsub.f32 %v26097_v48, %v2050_v0 }
  0x80   : > { %36802 = vst [vmem:[#allocation48_spill] sm:$0xff] %v32832_v20  ;;  %v2062_v29 = vand.u32 4294901760, %v26101_v13  ;;  %v32847_v31 = vpack.c.bf16 %v1396_v11, %v1393_v10  ;;  %v32849_v35 = vsub.f32 %v1356_v53, %v1393_v10  ;;  %v32851_v36 = vsub.f32 %v1357_v58, %v1396_v11 }
  0x81   : > { %36803 = vst [vmem:[#allocation49_spill] sm:$0xff] %v32838_v25  ;;  %30657 = vmatpush3.bf16.msra.mxu0 %v32813_v3  ;;  %v32856_v45 = vpack.c.bf16 %v2056_v15, %v2053_v14  ;;  %v32858_v46 = vsub.f32 %v26098_v59, %v2053_v14  ;;  %v32860_v47 = vsub.f32 %v26099_v60, %v2056_v15  ;;  %v32870_v53 = vand.u32 4294901760, %v1345_v30 }
  0x82   : > { %30801 = vmatpush3.bf16.msra.mxu1 %v32823_v8  ;;  %30658 = vmatprep.subr.bf16.mxu0 %v36613_v4  ;;  %36804 = vst [vmem:[#allocation50_spill] sm:$0xff] %v32847_v31  ;;  %v32862_v48 = vpack.c.bf16 %v1402_v19, %v1399_v16  ;;  %v32868_v61 = vsub.f32 %v1358_v1, %v1399_v16  ;;  %v36615_v58 = vand.u32 4294901760, %v32760_v32  ;;  %v36616_v62 = vand.u32 4294901760, %v32762_v33 }
  0x83   : > { %30802 = vmatprep.subr.bf16.mxu1 %v36613_v4  ;;  %36805 = vst [vmem:[#allocation51_spill] sm:$0xff] %v32856_v45  ;;  %v32875_v63 = vsub.f32 %v1359_v2, %v1402_v19  ;;  %v32877_v59 = vpack.c.bf16 %v2062_v29, %v2059_v28  ;;  %v1405_v60 = vand.u32 4294901760, %v1360_v41  ;;  %v1408_v0 = vand.u32 4294901760, %v1361_v44 }
  0x84   : > { %36806 = vst [vmem:[#allocation52_spill] sm:$0xff] %v32862_v48  ;;  %v2065_v1 = vand.u32 4294901760, %v26102_v51  ;;  %v32883_v11 = vsub.f32 %v1345_v30, %v32870_v53  ;;  %v36619_v14 = vand.u32 4294901760, %v32769_v37  ;;  %v1457_v2 = vsub.f32 %v32760_v32, %v36615_v58 }
  0x85   : > { %30660 = vmatpush3.bf16.msra.mxu0 %v32832_v20  ;;  %36807 = vst [vmem:[#allocation53_spill] sm:$0xff] %v32877_v59  ;;  %v36620_v15 = vand.u32 4294901760, %v32771_v38  ;;  %v32893_v17 = vsub.f32 %v26100_v12, %v2059_v28  ;;  %v1464_v30 = vsub.f32 %v32762_v33, %v36616_v62  ;;  %v32905_v58 = vsub.f32 %v26101_v13, %v2062_v29 }
  0x86   : > { %30804 = vmatpush3.bf16.msra.mxu1 %v32838_v25  ;;  %30661 = vmatprep.subr.bf16.mxu0 %v36613_v4  ;;  %36808 = vst [vmem:[#allocation54_spill] sm:$0xff] %v32883_v11  ;;  %v32896_v10 = vand.u32 4294901760, %v32883_v11  ;;  %v32907_v16 = vsub.f32 %v1360_v41, %v1405_v60  ;;  %v36810_v19 = vmov 0.0|0.0   ;;  %v32915_v62 = vpack.c.bf16 %v1408_v0, %v1405_v60 }
  0x87   : > { %30805 = vmatprep.subr.bf16.mxu1 %v36613_v4  ;;  %v2117_v4 = vsub.f32 %v32769_v37, %v36619_v14  ;;  %v2124_v12 = vsub.f32 %v32771_v38, %v36620_v15  ;;  %v32917_v25 = vsub.f32 %v1361_v44, %v1408_v0  ;;  %v36812_v14 = vand.u32 4294901760, %v32773_v39 }
  0x88   : > { %36809 = vst [vmem:[#allocation55_spill] sm:$0xff] %v32896_v10  ;;  %36811 = vst [vmem:[#allocation56_spill] sm:$0xff] %v32915_v62  ;;  %v36813_v41 = vand.u32 4294901760, %v32866_v52  ;;  %v32928_v28 = vsub.f32 %v26102_v51, %v2065_v1  ;;  %v36815_v60 = vand.u32 4294901760, %v32775_v40  ;;  %v1446_v0 = vsub.f32 %v32883_v11, %v32896_v10 }
  0x89   : > { %30663 = vmatpush3.bf16.msra.mxu0 %v32847_v31  ;;  %v1471_v13 = vsub.f32 %v32773_v39, %v36812_v14  ;;  %v1465_v31 = vand.u32 4294901760, %v1464_v30  ;;  %v2118_v14 = vand.u32 4294901760, %v2117_v4  ;;  %v2125_v20 = vand.u32 4294901760, %v2124_v12 }
  0x8a   : > { %30807 = vmatpush3.bf16.msra.mxu1 %v32856_v45  ;;  %30664 = vmatprep.subr.bf16.mxu0 %v36810_v19  ;;  %v32926_v15 = vpack.c.bf16 %v36813_v41, %v2065_v1  ;;  %v1458_v45 = vand.u32 4294901760, %v1457_v2  ;;  %v1478_v44 = vsub.f32 %v32775_v40, %v36815_v60  ;;  %v36816_v41 = vand.u32 4294901760, %v32779_v42 }
  0x8b   : > { %30808 = vmatprep.subr.bf16.mxu1 %v36810_v19  ;;  %v1472_v60 = vand.u32 4294901760, %v1471_v13  ;;  %v36817_v4 = vand.u32 4294901760, %v32787_v49  ;;  %v36818_v1 = vand.u32 4294901760, %v32799_v54  ;;  %v36819_v10 = vand.u32 4294901760, %v32801_v55 }
  0x8c   : > { %36814 = vst [vmem:[#allocation57_spill] sm:$0xff] %v32926_v15  ;;  %v2131_v51 = vsub.f32 %v32779_v42, %v36816_v41  ;;  %v1479_v41 = vand.u32 4294901760, %v1478_v44  ;;  %v36822_v12 = vand.u32 4294901760, %v32805_v57  ;;  %v36647_v8 = vand.u32 4294901760, %v32825_v9 }
  0x8d   : > { %30666 = vmatpush3.bf16.msra.mxu0 %v32862_v48  ;;  %v2138_v30 = vsub.f32 %v32787_v49, %v36817_v4  ;;  %v1485_v2 = vsub.f32 %v32799_v54, %v36818_v1  ;;  %v32957_v48 = vand.u32 4294901760, %v1446_v0  ;;  %v36821_v4 = vand.u32 4294901760, %v32803_v56 }
  0x8e   : > { %30810 = vmatpush3.bf16.msra.mxu1 %v32877_v59  ;;  %30667 = vmatprep.subr.bf16.mxu0 %v36810_v19  ;;  %v1492_v59 = vsub.f32 %v32801_v55, %v36819_v10  ;;  %v2152_v44 = vsub.f32 %v32805_v57, %v36822_v12  ;;  %v30671_v1 = vpack.c.bf16 %v1465_v31, %v1458_v45  ;;  %v2132_v3 = vand.u32 4294901760, %v2131_v51 }
  0x8f   : > { %30811 = vmatprep.subr.bf16.mxu1 %v36810_v19  ;;  %36820 = vst [vmem:[#allocation58_spill] sm:$0xff] %v32957_v48  ;;  %v2145_v29 = vsub.f32 %v32803_v56, %v36821_v4  ;;  %v36823_v10 = vand.u32 4294901760, %v32815_v5  ;;  %v36824_v0 = vand.u32 4294901760, %v32817_v6  ;;  %v30815_v4 = vpack.c.bf16 %v2125_v20, %v2118_v14 }
  0x90   : > { %v2139_v12 = vand.u32 4294901760, %v2138_v30  ;;  %v30674_v31 = vpack.c.bf16 %v1479_v41, %v1472_v60  ;;  %v1486_v45 = vand.u32 4294901760, %v1485_v2  ;;  %v1493_v51 = vand.u32 4294901760, %v1492_v59 }
  0x91   : > { %30669 = vmatpush3.bf16.msra.mxu0 %v32915_v62  ;;  %v1499_v13 = vsub.f32 %v32815_v5, %v36823_v10  ;;  %v1506_v50 = vsub.f32 %v32817_v6, %v36824_v0  ;;  %v36646_v10 = vand.u32 4294901760, %v32836_v24  ;;  %v2146_v0 = vand.u32 4294901760, %v2145_v29 }
  0x92   : > { %30813 = vmatpush3.bf16.msra.mxu1 %v32926_v15  ;;  %30670 = vmatprep.subr.bf16.mxu0 %v36810_v19  ;;  %v2153_v43 = vand.u32 4294901760, %v2152_v44  ;;  %v36825_v15 = vand.u32 4294901760, %v32819_v7  ;;  %v36645_v14 = vand.u32 4294901760, %v32841_v26  ;;  %v2166_v59 = vsub.f32 %v32825_v9, %v36647_v8 }
  0x93   : > { %30814 = vmatprep.subr.bf16.mxu1 %v36810_v19  ;;  %v1500_v30 = vand.u32 4294901760, %v1499_v13  ;;  %v1507_v62 = vand.u32 4294901760, %v1506_v50  ;;  %v36648_v2 = vand.u32 4294901760, %v32843_v27  ;;  %v30818_v29 = vpack.c.bf16 %v2139_v12, %v2132_v3 }
  0x94   : > { %27625 = vmatmul.mubr.f32.vlgmr.msra.gmra.mrb[0].mxu0 %v32957_v48  ;;  %v2159_v20 = vsub.f32 %v32819_v7, %v36825_v15  ;;  %v36826_v60 = vand.u32 4294901760, %v32834_v21  ;;  %v1520_v41 = vsub.f32 %v32836_v24, %v36646_v10  ;;  %v36827_v50 = vand.u32 4294901760, %v32866_v52 }
  0x95   : > { %30672 = vmatpush3.bf16.msra.mxu0 %v30671_v1  ;;  %27835 = vmatmul.mubr.f32.vlgmr.msra.gmra.mrb[0].mxu1 %v32957_v48  ;;  %v30677_v44 = vpack.c.bf16 %v1493_v51, %v1486_v45  ;;  %v2173_v3 = vsub.f32 %v32841_v26, %v36645_v14  ;;  %v2180_v12 = vsub.f32 %v32843_v27, %v36648_v2  ;;  %v2167_v10 = vand.u32 4294901760, %v2166_v59 }
  0x96   : > { %30816 = vmatpush3.bf16.msra.mxu1 %v30815_v4  ;;  %30673 = vmatprep.subr.bf16.mxu0 %v36810_v19  ;;  %v1513_v15 = vsub.f32 %v32834_v21, %v36826_v60  ;;  %v32999_v13 = vsub.f32 %v32866_v52, %v36827_v50  ;;  %v36828_v4 = vmov 0.0   ;;  %v30821_v45 = vpack.c.bf16 %v2153_v43, %v2146_v0 }
  0x97   : > { %30817 = vmatprep.subr.bf16.mxu1 %v36810_v19  ;;  %27659 = vmatprep.mubr.msk.f32.mxu0 %vm32444_vm0, %v36828_v4  ;;  %v30680_v51 = vpack.c.bf16 %v1507_v62, %v1500_v30  ;;  %v2160_v14 = vand.u32 4294901760, %v2159_v20  ;;  %v1521_v1 = vand.u32 4294901760, %v1520_v41  ;;  %v36649_v2 = vand.u32 4294901760, %v32868_v61 }
  0x98   : > { %27869 = vmatprep.mubr.msk.f32.mxu1 %vm32444_vm0, %v36828_v4  ;;  %v1514_v8 = vand.u32 4294901760, %v1513_v15  ;;  %v36650_v60 = vand.u32 4294901760, %v32875_v63  ;;  %v2174_v50 = vand.u32 4294901760, %v2173_v3  ;;  %v36829_v52 = vand.u32 4294901760, %v32849_v35 }
  0x99   : > { %30675 = vmatpush3.bf16.msra.mxu0 %v30674_v31  ;;  %v36654_v43 = vand.u32 4294901760, %v32893_v17  ;;  %v36659_v62 = vand.u32 4294901760, %v32905_v58  ;;  %v2181_v0 = vand.u32 4294901760, %v2180_v12  ;;  %v36830_v20 = vand.u32 4294901760, %v32851_v36 }
  0x9a   : > { %30819 = vmatpush3.bf16.msra.mxu1 %v30818_v29  ;;  %30676 = vmatprep.subr.bf16.mxu0 %v36810_v19  ;;  %v1527_v31 = vsub.f32 %v32849_v35, %v36829_v52  ;;  %v36831_v59 = vand.u32 4294901760, %v32858_v46  ;;  %v36832_v15 = vand.u32 4294901760, %v32860_v47  ;;  %v1541_v3 = vsub.f32 %v32868_v61, %v36649_v2 }
  0x9b   : > { %30820 = vmatprep.subr.bf16.mxu1 %v36810_v19  ;;  %v1534_v30 = vsub.f32 %v32851_v36, %v36830_v20  ;;  %v1548_v12 = vsub.f32 %v32875_v63, %v36650_v60  ;;  %v2201_v52 = vsub.f32 %v32893_v17, %v36654_v43  ;;  %v2208_v20 = vsub.f32 %v32905_v58, %v36659_v62 }
  0x9c   : > { %v2187_v29 = vsub.f32 %v32858_v46, %v36831_v59  ;;  %v2194_v41 = vsub.f32 %v32860_v47, %v36832_v15  ;;  %v1554_v59 = vand.u32 4294901760, %v32907_v16  ;;  %v1561_v15 = vand.u32 4294901760, %v32917_v25 }
  0x9d   : > { %30678 = vmatpush3.bf16.msra.mxu0 %v30677_v44  ;;  %v30824_v44 = vpack.c.bf16 %v2167_v10, %v2160_v14  ;;  %v2214_v2 = vand.u32 4294901760, %v32928_v28  ;;  %v30683_v60 = vpack.c.bf16 %v1521_v1, %v1514_v8  ;;  %v1528_v48 = vand.u32 4294901760, %v1527_v31 }
  0x9e   : > { %30822 = vmatpush3.bf16.msra.mxu1 %v30821_v45  ;;  %30679 = vmatprep.subr.bf16.mxu0 %v36810_v19  ;;  %v30827_v34 = vpack.c.bf16 %v2181_v0, %v2174_v50  ;;  %v1535_v43 = vand.u32 4294901760, %v1534_v30  ;;  %v2188_v23 = vand.u32 4294901760, %v2187_v29  ;;  %v2195_v22 = vand.u32 4294901760, %v2194_v41 }
  0x9f   : > { %30823 = vmatprep.subr.bf16.mxu1 %v36810_v19  ;;  %v1542_v62 = vand.u32 4294901760, %v1541_v3  ;;  %v1549_v45 = vand.u32 4294901760, %v1548_v12  ;;  %v2202_v18 = vand.u32 4294901760, %v2201_v52  ;;  %v2209_v11 = vand.u32 4294901760, %v2208_v20 }
  0xa0   : > { %v1555_v10 = vsub.f32 %v32907_v16, %v1554_v59  ;;  %v1562_v14 = vsub.f32 %v32917_v25, %v1561_v15  ;;  %v2215_v4 = vsub.f32 %v32928_v28, %v2214_v2  ;;  %v2221_v8 = vand.u32 4294901760, %v32999_v13 }
  0xa1   : > { %30681 = vmatpush3.bf16.msra.mxu0 %v30680_v51  ;;  %v30686_v1 = vpack.c.bf16 %v1535_v43, %v1528_v48  ;;  %v30830_v50 = vpack.c.bf16 %v2195_v22, %v2188_v23  ;;  %v30689_v51 = vpack.c.bf16 %v1549_v45, %v1542_v62  ;;  %v30833_v31 = vpack.c.bf16 %v2209_v11, %v2202_v18 }
  0xa2   : > { %30825 = vmatpush3.bf16.msra.mxu1 %v30824_v44  ;;  %30682 = vmatprep.subr.bf16.mxu0 %v36810_v19  ;;  %v1556_v0 = vand.u32 4294901760, %v1555_v10  ;;  %v1563_v30 = vand.u32 4294901760, %v1562_v14  ;;  %v2216_v29 = vand.u32 4294901760, %v2215_v4  ;;  %v2222_v41 = vsub.f32 %v32999_v13, %v2221_v8 }
  0xa3   : > { %30826 = vmatprep.subr.bf16.mxu1 %v36810_v19  ;;  %v36833_v3 = vand.u32 4294901760, %v32760_v32  ;;  %v36834_v12 = vand.u32 4294901760, %v32762_v33  ;;  %v36835_v22 = vand.u32 4294901760, %v32769_v37  ;;  %v36836_v18 = vand.u32 4294901760, %v32771_v38 }
  0xa4   : > { %v36838_v48 = vand.u32 4294901760, %v32775_v40  ;;  %v36839_v4 = vand.u32 4294901760, %v32779_v42  ;;  %v36841_v62 = vand.u32 4294901760, %v32799_v54  ;;  %v36842_v20 = vand.u32 4294901760, %v32801_v55 }
  0xa5   : > { %30684 = vmatpush3.bf16.msra.mxu0 %v30683_v60  ;;  %v33064_v52 = vpack.c.bf16 %v36834_v12, %v36833_v3  ;;  %v33070_v23 = vpack.c.bf16 %v36836_v18, %v36835_v22  ;;  %v36840_v60 = vand.u32 4294901760, %v32787_v49  ;;  %v36843_v45 = vand.u32 4294901760, %v32803_v56 }
  0xa6   : > { %30828 = vmatpush3.bf16.msra.mxu1 %v30827_v34  ;;  %30685 = vmatprep.subr.bf16.mxu0 %v36810_v19  ;;  %v36837_v34 = vand.u32 4294901760, %v32773_v39  ;;  %v33088_v44 = vpack.c.bf16 %v36842_v20, %v36841_v62  ;;  %v36844_v10 = vand.u32 4294901760, %v32805_v57  ;;  %v36845_v3 = vand.u32 4294901760, %v32815_v5 }
  0xa7   : > { %30829 = vmatprep.subr.bf16.mxu1 %v36810_v19  ;;  %v33082_v43 = vpack.c.bf16 %v36840_v60, %v36839_v4  ;;  %v36846_v12 = vand.u32 4294901760, %v32817_v6  ;;  %v36848_v18 = vand.u32 4294901760, %v32819_v7  ;;  %v36850_v4 = vand.u32 4294901760, %v32834_v21 }
  0xa8   : > { %v33076_v11 = vpack.c.bf16 %v36838_v48, %v36837_v34  ;;  %v33094_v14 = vpack.c.bf16 %v36844_v10, %v36843_v45  ;;  %v36849_v34 = vand.u32 4294901760, %v32825_v9  ;;  %v36851_v60 = vand.u32 4294901760, %v32836_v24 }
  0xa9   : > { %v33100_v22 = vpack.c.bf16 %v36846_v12, %v36845_v3  ;;  %30687 = vmatpush3.bf16.msra.mxu0 %v30686_v1  ;;  %v36852_v20 = vand.u32 4294901760, %v32841_v26  ;;  %v36853_v45 = vand.u32 4294901760, %v32843_v27  ;;  %v36855_v3 = vand.u32 4294901760, %v32849_v35 }
  0xaa   : > { %v33106_v48 = vpack.c.bf16 %v36849_v34, %v36848_v18  ;;  %v33112_v62 = vpack.c.bf16 %v36851_v60, %v36850_v4  ;;  %v36856_v12 = vand.u32 4294901760, %v32851_v36  ;;  %v36858_v1 = vand.u32 4294901760, %v32858_v46  ;;  %30831 = vmatpush3.bf16.msra.mxu1 %v30830_v50  ;;  %30688 = vmatprep.subr.bf16.mxu0 %v36810_v19 }
  0xab   : > { %36847 = vst [vmem:[#allocation59_spill] sm:$0xff] %v33100_v22  ;;  %v33118_v10 = vpack.c.bf16 %v36853_v45, %v36852_v20  ;;  %v36859_v18 = vand.u32 4294901760, %v32860_v47  ;;  %v2223_v4 = vand.u32 4294901760, %v2222_v41  ;;  %v36860_v60 = vand.u32 4294901760, %v32868_v61  ;;  %30832 = vmatprep.subr.bf16.mxu1 %v36810_v19 }
  0xac   : > { %v33124_v22 = vpack.c.bf16 %v36856_v12, %v36855_v3  ;;  %v36861_v20 = vand.u32 4294901760, %v32875_v63  ;;  %v36863_v3 = vand.u32 4294901760, %v32905_v58  ;;  %v33148_v50 = vpack.c.bf16 %v2221_v8, %v2214_v2 }
  0xad   : > { %36854 = vst [vmem:[#allocation60_spill] sm:$0xff] %v33118_v10  ;;  %v33130_v34 = vpack.c.bf16 %v36859_v18, %v36858_v1  ;;  %v36862_v10 = vand.u32 4294901760, %v32893_v17  ;;  %30690 = vmatpush3.bf16.msra.mxu0 %v30689_v51  ;;  %v30692_v41 = vpack.c.bf16 %v1563_v30, %v1556_v0  ;;  %v30836_v1 = vpack.c.bf16 %v2223_v4, %v2216_v29 }
  0xae   : > { %36857 = vst [vmem:[#allocation61_spill] sm:$0xff] %v33124_v22  ;;  %v33137_v45 = vpack.c.bf16 %v36861_v20, %v36860_v60  ;;  %v33145_v22 = vpack.c.bf16 %v1561_v15, %v1554_v59  ;;  %30834 = vmatpush3.bf16.msra.mxu1 %v30833_v31  ;;  %30691 = vmatprep.subr.bf16.mxu0 %v36810_v19  ;;  %v26104_v31 = vld [vmem:[%s36787_s13 + $0x4] sm:$0xf]  ;;  %vm2665_vm1 = vcmask 7168   ;;  %vm2669_vm2 = vcmask 1040384  }
  0xaf   : > { %v33143_v12 = vpack.c.bf16 %v36863_v3, %v36862_v10  ;;  %30835 = vmatprep.subr.bf16.mxu1 %v36810_v19  ;;  %v30695_v18 = vpack.c.bf16 %v32762_v33, %v32760_v32  ;;  %v30839_v59 = vpack.c.bf16 %v32771_v38, %v32769_v37  ;;  %v30698_v2 = vpack.c.bf16 %v32775_v40, %v32773_v39 }
  0xb0   : > { %v30842_v32 = vpack.c.bf16 %v32787_v49, %v32779_v42  ;;  %v36864_v33 = vmov 0.0   ;;  %v30701_v37 = vpack.c.bf16 %v32801_v55, %v32799_v54  ;;  %v30845_v38 = vpack.c.bf16 %v32805_v57, %v32803_v56 }
  0xb1   : > { %30693 = vmatpush3.bf16.msra.mxu0 %v30692_v41  ;;  %v30704_v39 = vpack.c.bf16 %v32817_v6, %v32815_v5  ;;  %v30848_v40 = vpack.c.bf16 %v32825_v9, %v32819_v7  ;;  %v30707_v42 = vpack.c.bf16 %v32836_v24, %v32834_v21  ;;  %v30851_v49 = vpack.c.bf16 %v32843_v27, %v32841_v26  ;;  %v36866_v7 = vld [vmem:[#allocation40_spill] sm:$0xff]  ;;  %v36867_v9 = vld [vmem:[#allocation41_spill] sm:$0xff]  ;;  %v36868_v21 = vld [vmem:[#allocation42_spill] sm:$0xff] }
  0xb2   : > { %30837 = vmatpush3.bf16.msra.mxu1 %v30836_v1  ;;  %30694 = vmatprep.subr.bf16.mxu0 %v36810_v19  ;;  %v30710_v54 = vpack.c.bf16 %v32851_v36, %v32849_v35  ;;  %v30854_v55 = vpack.c.bf16 %v32860_v47, %v32858_v46  ;;  %v30713_v56 = vpack.c.bf16 %v32875_v63, %v32868_v61  ;;  %v36869_v24 = vld [vmem:[#allocation43_spill] sm:$0xff]  ;;  %v36871_v26 = vld [vmem:[#allocation45_spill] sm:$0xff]  ;;  %v36872_v27 = vld [vmem:[#allocation46_spill] sm:$0xff]  ;;  %v2667_v0 = vsel %vm2665_vm1, %v26104_v31, 0 }
  0xb3   : > { %30838 = vmatprep.subr.bf16.mxu1 %v36810_v19  ;;  %v30857_v57 = vpack.c.bf16 %v32905_v58, %v32893_v17  ;;  %v30716_v5 = vpack.c.bf16 %v32917_v25, %v32907_v16  ;;  %v30860_v6 = vpack.c.bf16 %v32999_v13, %v32928_v28  ;;  %v36865_v17 = vld [vmem:[#allocation54_spill] sm:$0xff]  ;;  %v36870_v25 = vld [vmem:[#allocation44_spill] sm:$0xff]  ;;  %v36873_v35 = vld [vmem:[#allocation47_spill] sm:$0xff]  ;;  %v33330_v30 = vand.u32 4294901760, %v2667_v0 }
  0xb4   : > { %27660 = vmatmul.mubr.f32.vlgmr.msra.gmra.mrb[0].mxu0 %v32870_v53  ;;  %v36874_v36 = vld [vmem:[#allocation48_spill] sm:$0xff]  ;;  %v36875_v46 = vld [vmem:[#allocation49_spill] sm:$0xff]  ;;  %v36876_v47 = vld [vmem:[#allocation50_spill] sm:$0xff]  ;;  %vm6058_vm3 = vcmask 1043456   ;;  %vm7412_vm4 = vcmask 31744   ;;  %vm10804_vm5 = vcmask 519168  }
  0xb5   : > { %30696 = vmatpush3.bf16.msra.mxu0 %v30695_v18  ;;  %27870 = vmatmul.mubr.f32.vlgmr.msra.gmra.mrb[0].mxu1 %v32870_v53  ;;  %v36877_v61 = vld [vmem:[#allocation51_spill] sm:$0xff]  ;;  %v36878_v58 = vld [vmem:[#allocation52_spill] sm:$0xff]  ;;  %v36879_v63 = vld [vmem:[#allocation53_spill] sm:$0xff]  ;;  %v2740_v29 = vsub.f32 %v2667_v0, %v33330_v30  ;;  %vm10847_vm6 = vcmask 523264   ;;  %vm15217_vm7 = vcmask 257024   ;;  %vm15256_vm8 = vcmask 261120  }
  0xb6   : > { %30840 = vmatpush3.bf16.msra.mxu1 %v30839_v59  ;;  %30697 = vmatprep.subr.bf16.mxu0 %v36810_v19  ;;  %v36880_v16 = vld [vmem:[#allocation56_spill] sm:$0xff]  ;;  %v36881_v28 = vld [vmem:[#allocation57_spill] sm:$0xff]  ;;  %v36882_v13 = vld [vmem:[#allocation55_spill] sm:$0xff]  ;;  %vm19462_vm9 = vcmask 125952   ;;  %vm19961_vm10 = vcmask 122880   ;;  %vm20631_vm13 = vcmask 130048  }
  0xb7   : > { %30841 = vmatprep.subr.bf16.mxu1 %v36810_v19  ;;  %27694 = vmatprep.mubr.msk.f32.mxu0 %vm32444_vm0, %v36864_v33  ;;  %v36883_v15 = vld [vmem:[#allocation59_spill] sm:$0xff]  ;;  %v36884_v8 = vld [vmem:[#allocation60_spill] sm:$0xff]  ;;  %v36885_v51 = vld [vmem:[#allocation61_spill] sm:$0xff]  ;;  %vm20674_vm14 = vcmask 130112   ;;  %vm20686_vm15 = vcmask 1041409  }
  0xb8   : > { %27904 = vmatprep.mubr.msk.f32.mxu1 %vm32444_vm0, %v36864_v33  ;;  %v26113_v31 = vld [vmem:[%s36788_s9 + $0x138] sm:$0xff] }
  0xb9   : > { %30699 = vmatpush3.bf16.msra.mxu0 %v30698_v2 }
  0xba   : > { %30843 = vmatpush3.bf16.msra.mxu1 %v30842_v32  ;;  %30700 = vmatprep.subr.bf16.mxu0 %v36810_v19 }
  0xbb   : > { %30844 = vmatprep.subr.bf16.mxu1 %v36810_v19 }
  0xbd   : > { %30702 = vmatpush3.bf16.msra.mxu0 %v30701_v37 }
  0xbe   : > { %30846 = vmatpush3.bf16.msra.mxu1 %v30845_v38  ;;  %30703 = vmatprep.subr.bf16.mxu0 %v36810_v19 }
  0xbf   : > { %30847 = vmatprep.subr.bf16.mxu1 %v36810_v19 }
  0xc1   : > { %30705 = vmatpush3.bf16.msra.mxu0 %v30704_v39 }
  0xc2   : > { %30849 = vmatpush3.bf16.msra.mxu1 %v30848_v40  ;;  %30706 = vmatprep.subr.bf16.mxu0 %v36810_v19 }
  0xc3   : > { %30850 = vmatprep.subr.bf16.mxu1 %v36810_v19 }
  0xc5   : > { %30708 = vmatpush3.bf16.msra.mxu0 %v30707_v42 }
  0xc6   : > { %30852 = vmatpush3.bf16.msra.mxu1 %v30851_v49  ;;  %30709 = vmatprep.subr.bf16.mxu0 %v36810_v19  ;;  %v2004_v49 = vld [vmem:[%s32477_s21] sm:$0xf] }
  0xc7   : > { %30853 = vmatprep.subr.bf16.mxu1 %v36810_v19 }
  0xc9   : > { %30711 = vmatpush3.bf16.msra.mxu0 %v30710_v54 }
  0xca   : > { %30855 = vmatpush3.bf16.msra.mxu1 %v30854_v55  ;;  %30712 = vmatprep.subr.bf16.mxu0 %v36810_v19  ;;  %v4023_v55 = vsel %vm2665_vm1, %v2004_v49, 0 }
  0xcb   : > { %30856 = vmatprep.subr.bf16.mxu1 %v36810_v19 }
  0xcd   : > { %30714 = vmatpush3.bf16.msra.mxu0 %v30713_v56 }
  0xce   : > { %30858 = vmatpush3.bf16.msra.mxu1 %v30857_v57  ;;  %30715 = vmatprep.subr.bf16.mxu0 %v36810_v19 }
  0xcf   : > { %30859 = vmatprep.subr.bf16.mxu1 %v36810_v19 }
  0xd1   : > { %30717 = vmatpush3.bf16.msra.mxu0 %v30716_v5  ;;  %v33409_v5 = vand.u32 4294901760, %v4023_v55 }
  0xd2   : > { %30861 = vmatpush3.bf16.msra.mxu1 %v30860_v6  ;;  %30718 = vmatprep.subr.bf16.mxu0 %v36810_v19 }
  0xd3   : > { %30862 = vmatprep.subr.bf16.mxu1 %v36810_v19 }
  0xd4   : > { %27695 = vmatmul.mubr.f32.vlgmr.msra.gmra.mrb[0].mxu0 %v36865_v17 }
  0xd5   : > { %30720 = vmatpush3.bf16.msra.mxu0 %v36866_v7  ;;  %27905 = vmatmul.mubr.f32.vlgmr.msra.gmra.mrb[0].mxu1 %v36865_v17 }
  0xd6   : > { %30864 = vmatpush3.bf16.msra.mxu1 %v36867_v9  ;;  %30721 = vmatprep.subr.bf16.mxu0 %v36810_v19 }
  0xd7   : > { %30865 = vmatprep.subr.bf16.mxu1 %v36810_v19  ;;  %27729 = vmatprep.mubr.msk.f32.mxu0 %vm32444_vm0, %v36864_v33 }
  0xd8   : > { %27939 = vmatprep.mubr.msk.f32.mxu1 %vm32444_vm0, %v36864_v33 }
  0xd9   : > { %30723 = vmatpush3.bf16.msra.mxu0 %v36868_v21 }
  0xda   : > { %30867 = vmatpush3.bf16.msra.mxu1 %v36869_v24  ;;  %30724 = vmatprep.subr.bf16.mxu0 %v36810_v19 }
  0xdb   : > { %30868 = vmatprep.subr.bf16.mxu1 %v36810_v19 }
  0xdd   : > { %30726 = vmatpush3.bf16.msra.mxu0 %v36870_v25 }
  0xde   : > { %30870 = vmatpush3.bf16.msra.mxu1 %v36871_v26  ;;  %30727 = vmatprep.subr.bf16.mxu0 %v36810_v19 }
  0xdf   : > { %30871 = vmatprep.subr.bf16.mxu1 %v36810_v19 }
  0xe1   : > { %30729 = vmatpush3.bf16.msra.mxu0 %v36872_v27 }
  0xe2   : > { %30873 = vmatpush3.bf16.msra.mxu1 %v36873_v35  ;;  %30730 = vmatprep.subr.bf16.mxu0 %v36810_v19 }
  0xe3   : > { %30874 = vmatprep.subr.bf16.mxu1 %v36810_v19 }
  0xe5   : > { %30732 = vmatpush3.bf16.msra.mxu0 %v36874_v36 }
  0xe6   : > { %30876 = vmatpush3.bf16.msra.mxu1 %v36875_v46  ;;  %30733 = vmatprep.subr.bf16.mxu0 %v36810_v19 }
  0xe7   : > { %30877 = vmatprep.subr.bf16.mxu1 %v36810_v19 }
  0xe9   : > { %30735 = vmatpush3.bf16.msra.mxu0 %v36876_v47 }
  0xea   : > { %30879 = vmatpush3.bf16.msra.mxu1 %v36877_v61  ;;  %30736 = vmatprep.subr.bf16.mxu0 %v36810_v19 }
  0xeb   : > { %30880 = vmatprep.subr.bf16.mxu1 %v36810_v19 }
  0xed   : > { %30738 = vmatpush3.bf16.msra.mxu0 %v36878_v58 }
  0xee   : > { %30882 = vmatpush3.bf16.msra.mxu1 %v36879_v63  ;;  %30739 = vmatprep.subr.bf16.mxu0 %v36810_v19 }
  0xef   : > { %30883 = vmatprep.subr.bf16.mxu1 %v36810_v19 }
  0xf1   : > { %30741 = vmatpush3.bf16.msra.mxu0 %v36880_v16 }
  0xf2   : > { %30885 = vmatpush3.bf16.msra.mxu1 %v36881_v28  ;;  %30742 = vmatprep.subr.bf16.mxu0 %v36810_v19 }
  0xf3   : > { %30886 = vmatprep.subr.bf16.mxu1 %v36810_v19 }
  0xf4   : > { %27730 = vmatmul.mubr.f32.vlgmr.msra.gmra.mrb[0].mxu0 %v36882_v13 }
  0xf5   : > { %30744 = vmatpush3.bf16.msra.mxu0 %v33064_v52  ;;  %27940 = vmatmul.mubr.f32.vlgmr.msra.gmra.mrb[0].mxu1 %v36882_v13  ;;  %v2003_v52 = vld [vmem:[%s36787_s13] sm:$0xf] }
  0xf6   : > { %30888 = vmatpush3.bf16.msra.mxu1 %v33070_v23  ;;  %30745 = vmatprep.subr.bf16.mxu0 %v36810_v19  ;;  %v2741_v23 = vand.u32 4294901760, %v2740_v29 }
  0xf7   : > { %30889 = vmatprep.subr.bf16.mxu1 %v36810_v19  ;;  %27764 = vmatprep.mubr.msk.f32.mxu0 %vm32444_vm0, %v36864_v33 }
  0xf8   : > { %27974 = vmatprep.mubr.msk.f32.mxu1 %vm32444_vm0, %v36864_v33 }
  0xf9   : > { %30747 = vmatpush3.bf16.msra.mxu0 %v33076_v11  ;;  %v3120_v11 = vsel %vm2665_vm1, %v2003_v52, 0  ;;  %v26114_v52 = vld [vmem:[%s36788_s9 + $0x140] sm:$0xff] }
  0xfa   : > { %30891 = vmatpush3.bf16.msra.mxu1 %v33082_v43  ;;  %30748 = vmatprep.subr.bf16.mxu0 %v36810_v19  ;;  %v2742_v43 = vsub.f32 %v2740_v29, %v2741_v23 }
  0xfb   : > { %30892 = vmatprep.subr.bf16.mxu1 %v36810_v19 }
  0xfc   : > { %v2743_v4 = vand.u32 4294901760, %v2742_v43  ;;  %v4513_v43 = vand.u32 4294901760, %v26114_v52 }
  0xfd   : > { %30750 = vmatpush3.bf16.msra.mxu0 %v33088_v44  ;;  %v33335_v44 = vand.u32 4294901760, %v3120_v11 }
  0xfe   : > { %30894 = vmatpush3.bf16.msra.mxu1 %v33094_v14  ;;  %30751 = vmatprep.subr.bf16.mxu0 %v36810_v19 }
  0xff   : > { %30895 = vmatprep.subr.bf16.mxu1 %v36810_v19  ;;  %v33342_v20 = vsub.f32 %v3120_v11, %v33335_v44 }
 0x101   : > { %30753 = vmatpush3.bf16.msra.mxu0 %v36883_v15  ;;  %v3193_v41 = vand.u32 4294901760, %v33342_v20 }
 0x102   : > { %30897 = vmatpush3.bf16.msra.mxu1 %v33106_v48  ;;  %30754 = vmatprep.subr.bf16.mxu0 %v36810_v19 }
 0x103   : > { %30898 = vmatprep.subr.bf16.mxu1 %v36810_v19  ;;  %v3194_v32 = vsub.f32 %v33342_v20, %v3193_v41 }
 0x105   : > { %30756 = vmatpush3.bf16.msra.mxu0 %v33112_v62  ;;  %v3195_v39 = vand.u32 4294901760, %v3194_v32 }
 0x106   : > { %30900 = vmatpush3.bf16.msra.mxu1 %v36884_v8  ;;  %30757 = vmatprep.subr.bf16.mxu0 %v36810_v19 }
 0x107   : > { %30901 = vmatprep.subr.bf16.mxu1 %v36810_v19 }
 0x109   : > { %30759 = vmatpush3.bf16.msra.mxu0 %v36885_v51  ;;  %v26112_v51 = vld [vmem:[%s36788_s9 + $0x130] sm:$0xff] }
 0x10a   : > { %30903 = vmatpush3.bf16.msra.mxu1 %v33130_v34  ;;  %30760 = vmatprep.subr.bf16.mxu0 %v36810_v19 }
 0x10b   : > { %30904 = vmatprep.subr.bf16.mxu1 %v36810_v19 }
 0x10d   : > { %30762 = vmatpush3.bf16.msra.mxu0 %v33137_v45 }
 0x10e   : > { %30906 = vmatpush3.bf16.msra.mxu1 %v33143_v12  ;;  %30763 = vmatprep.subr.bf16.mxu0 %v36810_v19  ;;  %v26105_v12 = vld [vmem:[%s32477_s21 + $0x4] sm:$0xf] }
 0x10f   : > { %30907 = vmatprep.subr.bf16.mxu1 %v36810_v19  ;;  %v3574_v1 = vsel %vm2665_vm1, %v26105_v12, 0 }
 0x110   : > { %v33370_v37 = vand.u32 4294901760, %v3574_v1 }
 0x111   : > { %30765 = vmatpush3.bf16.msra.mxu0 %v33145_v22 }
 0x112   : > { %30909 = vmatpush3.bf16.msra.mxu1 %v33148_v50  ;;  %30766 = vmatprep.subr.bf16.mxu0 %v36810_v19  ;;  %v33381_v40 = vsub.f32 %v3574_v1, %v33370_v37 }
 0x113   : > { %30910 = vmatprep.subr.bf16.mxu1 %v36810_v19 }
 0x114   : > { %27765 = vmatmul.mubr.f32.vlgmr.msra.gmra.mrb[0].mxu0 %v32870_v53  ;;  %v3644_v54 = vand.u32 4294901760, %v33381_v40 }
 0x115   : > { %30768 = vmatpush3.bf16.msra.mxu0 %v36866_v7  ;;  %27975 = vmatmul.mubr.f32.vlgmr.msra.gmra.mrb[0].mxu1 %v32870_v53  ;;  %v33422_v7 = vsub.f32 %v4023_v55, %v33409_v5 }
 0x116   : > { %30912 = vmatpush3.bf16.msra.mxu1 %v36867_v9  ;;  %30769 = vmatprep.subr.bf16.mxu0 %v36810_v19  ;;  %v3645_v57 = vsub.f32 %v33381_v40, %v3644_v54 }
 0x117   : > { %30913 = vmatprep.subr.bf16.mxu1 %v36810_v19  ;;  %27799 = vmatprep.mubr.msk.f32.mxu0 %vm32444_vm0, %v36864_v33  ;;  %v4093_v9 = vand.u32 4294901760, %v33422_v7 }
 0x118   : > { %28009 = vmatprep.mubr.msk.f32.mxu1 %vm32444_vm0, %v36864_v33  ;;  %v3646_v6 = vand.u32 4294901760, %v3645_v57 }
 0x119   : > { %30771 = vmatpush3.bf16.msra.mxu0 %v36868_v21  ;;  %v4094_v21 = vsub.f32 %v33422_v7, %v4093_v9 }
 0x11a   : > { %30915 = vmatpush3.bf16.msra.mxu1 %v36869_v24  ;;  %30772 = vmatprep.subr.bf16.mxu0 %v36810_v19 }
 0x11b   : > { %30916 = vmatprep.subr.bf16.mxu1 %v36810_v19  ;;  %v4095_v24 = vand.u32 4294901760, %v4094_v21 }
 0x11d   : > { %30774 = vmatpush3.bf16.msra.mxu0 %v36870_v25  ;;  %v26106_v25 = vld [vmem:[%s36788_s9 + $0x100] sm:$0xff] }
 0x11e   : > { %30918 = vmatpush3.bf16.msra.mxu1 %v36871_v26  ;;  %30775 = vmatprep.subr.bf16.mxu0 %v36810_v19  ;;  %v26107_v26 = vld [vmem:[%s36788_s9 + $0x108] sm:$0xff] }
 0x11f   : > { %30919 = vmatprep.subr.bf16.mxu1 %v36810_v19 }
 0x121   : > { %30777 = vmatpush3.bf16.msra.mxu0 %v36872_v27  ;;  %v4489_v27 = vand.u32 4294901760, %v26106_v25 }
 0x122   : > { %30921 = vmatpush3.bf16.msra.mxu1 %v36873_v35  ;;  %30778 = vmatprep.subr.bf16.mxu0 %v36810_v19  ;;  %v4492_v35 = vand.u32 4294901760, %v26107_v26 }
 0x123   : > { %30922 = vmatprep.subr.bf16.mxu1 %v36810_v19 }
 0x125   : > { %30780 = vmatpush3.bf16.msra.mxu0 %v36874_v36  ;;  %v26108_v36 = vld [vmem:[%s36788_s9 + $0x110] sm:$0xff] }
 0x126   : > { %30924 = vmatpush3.bf16.msra.mxu1 %v36875_v46  ;;  %30781 = vmatprep.subr.bf16.mxu0 %v36810_v19  ;;  %v26109_v46 = vld [vmem:[%s36788_s9 + $0x118] sm:$0xff] }
 0x127   : > { %30925 = vmatprep.subr.bf16.mxu1 %v36810_v19 }
 0x129   : > { %30783 = vmatpush3.bf16.msra.mxu0 %v36876_v47  ;;  %v33478_v47 = vpack.c.bf16 %v4492_v35, %v4489_v27 }
 0x12a   : > { %30927 = vmatpush3.bf16.msra.mxu1 %v36877_v61  ;;  %30784 = vmatprep.subr.bf16.mxu0 %v36810_v19  ;;  %v4495_v61 = vand.u32 4294901760, %v26108_v36 }
 0x12b   : > { %30928 = vmatprep.subr.bf16.mxu1 %v36810_v19 }
 0x12d   : > { %30786 = vmatpush3.bf16.msra.mxu0 %v36878_v58  ;;  %v4498_v58 = vand.u32 4294901760, %v26109_v46 }
 0x12e   : > { %30930 = vmatpush3.bf16.msra.mxu1 %v36879_v63  ;;  %30787 = vmatprep.subr.bf16.mxu0 %v36810_v19  ;;  %v26110_v63 = vld [vmem:[%s36788_s9 + $0x120] sm:$0xff] }
 0x12f   : > { %30931 = vmatprep.subr.bf16.mxu1 %v36810_v19  ;;  %v4501_v15 = vand.u32 4294901760, %v26110_v63 }
 0x131   : > { %30789 = vmatpush3.bf16.msra.mxu0 %v36880_v16  ;;  %v26111_v16 = vld [vmem:[%s36788_s9 + $0x128] sm:$0xff]  ;;  %v33546_v32 = vsub.f32 %v26110_v63, %v4501_v15 }
 0x132   : > { %30933 = vmatpush3.bf16.msra.mxu1 %v36881_v28  ;;  %28012 = vmatprep.subr.mxu0 %v36864_v33  ;;  %v33492_v28 = vpack.c.bf16 %v4498_v58, %v4495_v61  ;;  %v4504_v8 = vand.u32 4294901760, %v26111_v16 }
 0x133   : > { %28017 = vmatprep.subr.mxu1 %v36864_v33 }
 0x134   : > { %27800 = vmatmul.mubr.f32.vlgmr.msra.gmra.mrb[0].mxu0 %v32870_v53  ;;  %v33504_v0 = vpack.c.bf16 %v4504_v8, %v4501_v15 }
 0x135   : > { %28010 = vmatmul.mubr.f32.vlgmr.msra.gmra.mrb[0].mxu1 %v32870_v53  ;;  %28014 = vmatprep.mubr.msk.f32.mxu0 %vm32444_vm0, %v36864_v33 }
 0x136   : > { %28019 = vmatprep.mubr.msk.f32.mxu1 %vm32444_vm0, %v36864_v33 }
 0x207   : > { %v1999_v14 = vpop.f32.mrb[0].mxu0 }
 0x208   : > { %v2659_v22 = vpop.f32.mrb[0].mxu1  ;;  %v27801_v48 = vpop.f32.mrb[1].mxu0  ;;  %v3123_v62 = vsel %vm2669_vm2, %v1999_v14, 0  ;;  %v26116_v14 = vld [vmem:[%s36788_s9 + $0x150] sm:$0xff] }
 0x209   : > { %v2671_v10 = vsel %vm2669_vm2, %v2659_v22, 0  ;;  %v28011_v34 = vpop.f32.mrb[1].mxu1  ;;  %v33344_v45 = vand.u32 4294901760, %v3123_v62  ;;  %v26117_v22 = vld [vmem:[%s36788_s9 + $0x158] sm:$0xff]  ;;  %v33519_v48 = vsub.f32 %v26106_v25, %v4489_v27 }
 0x20a   : > { %v33339_v60 = vand.u32 4294901760, %v2671_v10  ;;  %v4519_v34 = vand.u32 4294901760, %v26116_v14 }
 0x20b   : > { %v33362_v18 = vsub.f32 %v3123_v62, %v33344_v45  ;;  %v33521_v62 = vsub.f32 %v26107_v26, %v4492_v35  ;;  %v4582_v12 = vand.u32 4294901760, %v33519_v48  ;;  %v33579_v26 = vsub.f32 %v26114_v52, %v4513_v43 }
 0x20c   : > { %v33347_v3 = vsub.f32 %v2671_v10, %v33339_v60  ;;  %28013 = vmatpush3.msra.mxu0 %v33339_v60  ;;  %v33593_v15 = vsub.f32 %v26116_v14, %v4519_v34 }
 0x20d   : > { %28015 = vmatmul.mubr.f32.vlgmr.msra.gmra.mrb[2].mxu0 %v2743_v4  ;;  %28022 = vmatprep.subr.mxu0 %v36864_v33  ;;  %v33374_v38 = vand.u32 4294901760, %v33362_v18  ;;  %v4522_v4 = vand.u32 4294901760, %v26117_v22 }
 0x20e   : > { %28023 = vmatpush3.msra.mxu0 %v33347_v3  ;;  %28024 = vmatprep.mubr.msk.f32.mxu0 %vm32444_vm0, %v36864_v33  ;;  %v33356_v50 = vand.u32 4294901760, %v33347_v3 }
 0x20f   : > { %28032 = vmatprep.subr.mxu0 %v36864_v33  ;;  %v3205_v42 = vsub.f32 %v33362_v18, %v33374_v38 }
 0x210   : > { %v2753_v59 = vsub.f32 %v33347_v3, %v33356_v50 }
 0x211   : > { %28025 = vmatmul.mubr.f32.vlgmr.msra.gmra.mrb[4].mxu0 %v2740_v29  ;;  %v33402_v56 = vand.u32 4294901760, %v3205_v42  ;;  %v4510_v29 = vand.u32 4294901760, %v26113_v31  ;;  %v33556_v42 = vsub.f32 %v26111_v16, %v4504_v8  ;;  %v33595_v8 = vsub.f32 %v26117_v22, %v4522_v4 }
 0x212   : > { %28033 = vmatpush3.msra.mxu0 %v33356_v50  ;;  %v2754_v2 = vand.u32 4294901760, %v2753_v59  ;;  %28034 = vmatprep.mubr.msk.f32.mxu0 %vm32444_vm0, %v36864_v33  ;;  %v26120_v59 = vld [vmem:[%s36788_s9 + $0x170] sm:$0xff] }
 0x213   : > { %28042 = vmatprep.subr.mxu0 %v36864_v33  ;;  %v4617_v25 = vand.u32 4294901760, %v33556_v42 }
 0x214   : > { %28018 = vmatpush3.msra.mxu1 %v2754_v2 }
 0x215   : > { %28020 = vmatmul.mubr.f32.vlgmr.msra.gmra.mrb[2].mxu1 %v33330_v30  ;;  %28027 = vmatprep.subr.mxu1 %v36864_v33 }
 0x216   : > { %28035 = vmatmul.mubr.f32.vlgmr.msra.gmra.mrb[6].mxu0 %v33330_v30  ;;  %28028 = vmatpush3.msra.mxu1 %v33339_v60 }
 0x217   : > { %28043 = vmatpush3.msra.mxu0 %v33344_v45  ;;  %28029 = vmatprep.mubr.msk.f32.mxu1 %vm32444_vm0, %v36864_v33 }
 0x218   : > { %28037 = vmatprep.subr.mxu1 %v36864_v33  ;;  %28044 = vmatprep.mubr.msk.f32.mxu0 %vm32444_vm0, %v36864_v33 }
 0x219   : > { %28052 = vmatprep.subr.mxu0 %v36864_v33  ;;  %28030 = vmatmul.mubr.f32.vlgmr.msra.gmra.mrb[4].mxu1 %v2741_v23  ;;  %v26115_v23 = vld [vmem:[%s36788_s9 + $0x148] sm:$0xff] }
 0x21a   : > { %28038 = vmatpush3.msra.mxu1 %v33339_v60  ;;  %28045 = vmatmul.mubr.f32.vlgmr.msra.gmra.mrb[8].mxu0 %v3195_v39 }
 0x21b   : > { %28053 = vmatpush3.msra.mxu0 %v33362_v18  ;;  %28039 = vmatprep.mubr.msk.f32.mxu1 %vm32444_vm0, %v36864_v33 }
 0x21c   : > { %28047 = vmatprep.subr.mxu1 %v36864_v33  ;;  %28054 = vmatprep.mubr.msk.f32.mxu0 %vm32444_vm0, %v36864_v33 }
 0x21d   : > { %28062 = vmatprep.subr.mxu0 %v36864_v33  ;;  %28040 = vmatmul.mubr.f32.vlgmr.msra.gmra.mrb[6].mxu1 %v33330_v30  ;;  %v4507_v30 = vand.u32 4294901760, %v26112_v51 }
 0x21e   : > { %28048 = vmatpush3.msra.mxu1 %v33402_v56  ;;  %28055 = vmatmul.mubr.f32.vlgmr.msra.gmra.mrb[10].mxu0 %v33342_v20  ;;  %v33529_v20 = vld [vmem:[%s36788_s9 + $0x168] sm:$0xff] }
 0x21f   : > { %28063 = vmatpush3.msra.mxu0 %v33374_v38  ;;  %28049 = vmatprep.mubr.msk.f32.mxu1 %vm32444_vm0, %v36864_v33  ;;  %v33514_v11 = vpack.c.bf16 %v4510_v29, %v4507_v30 }
 0x220   : > { %28057 = vmatprep.subr.mxu1 %v36864_v33  ;;  %28064 = vmatprep.mubr.msk.f32.mxu0 %vm32444_vm0, %v36864_v33 }
 0x221   : > { %28072 = vmatprep.subr.mxu0 %v36864_v33  ;;  %28050 = vmatmul.mubr.f32.vlgmr.msra.gmra.mrb[8].mxu1 %v33335_v44 }
 0x222   : > { %28058 = vmatpush3.msra.mxu1 %v33344_v45  ;;  %28065 = vmatmul.mubr.f32.vlgmr.msra.gmra.mrb[12].mxu0 %v33335_v44 }
 0x223   : > { %28073 = vmatpush3.msra.mxu0 %v33339_v60  ;;  %28059 = vmatprep.mubr.msk.f32.mxu1 %vm32444_vm0, %v36864_v33 }
 0x224   : > { %28067 = vmatprep.subr.mxu1 %v36864_v33  ;;  %28074 = vmatprep.mubr.msk.f32.mxu0 %vm32444_vm0, %v36864_v33 }
 0x225   : > { %28082 = vmatprep.subr.mxu0 %v36864_v33  ;;  %28060 = vmatmul.mubr.f32.vlgmr.msra.gmra.mrb[10].mxu1 %v3193_v41  ;;  %v33538_v41 = vpack.c.bf16 %v4522_v4, %v4519_v34  ;;  %v4652_v4 = vand.u32 4294901760, %v33593_v15 }
 0x226   : > { %28068 = vmatpush3.msra.mxu1 %v33344_v45  ;;  %28075 = vmatmul.mubr.f32.vlgmr.msra.gmra.mrb[14].mxu0 %v3646_v6 }
 0x227   : > { %28083 = vmatpush3.msra.mxu0 %v33347_v3  ;;  %28069 = vmatprep.mubr.msk.f32.mxu1 %vm32444_vm0, %v36864_v33  ;;  %v33533_v3 = vsub.f32 %v26109_v46, %v4498_v58  ;;  %v4618_v58 = vsub.f32 %v33556_v42, %v4617_v25 }
 0x228   : > { %28077 = vmatprep.subr.mxu1 %v36864_v33  ;;  %28084 = vmatprep.mubr.msk.f32.mxu0 %vm32444_vm0, %v36864_v33 }
 0x229   : > { %28092 = vmatprep.subr.mxu0 %v36864_v33  ;;  %28070 = vmatmul.mubr.f32.vlgmr.msra.gmra.mrb[12].mxu1 %v33335_v44  ;;  %v4516_v44 = vand.u32 4294901760, %v26115_v23 }
 0x22a   : > { %28078 = vmatpush3.msra.mxu1 %v2754_v2  ;;  %28085 = vmatmul.mubr.f32.vlgmr.msra.gmra.mrb[16].mxu0 %v33381_v40  ;;  %v33544_v2 = vld [vmem:[%s36788_s9 + $0x178] sm:$0xff]  ;;  %v4603_v40 = vand.u32 4294901760, %v33533_v3 }
 0x22b   : > { %28093 = vmatpush3.msra.mxu0 %v33356_v50  ;;  %28079 = vmatprep.mubr.msk.f32.mxu1 %vm32444_vm0, %v36864_v33  ;;  %v33524_v10 = vpack.c.bf16 %v4516_v44, %v4513_v43  ;;  %v4589_v50 = vand.u32 4294901760, %v33521_v62  ;;  %v4534_v55 = vand.u32 4294901760, %v33544_v2  ;;  %v33581_v27 = vsub.f32 %v26115_v23, %v4516_v44 }
 0x22c   : > { %28087 = vmatprep.subr.mxu1 %v36864_v33  ;;  %28094 = vmatprep.mubr.msk.f32.mxu0 %vm32444_vm0, %v36864_v33  ;;  %v4619_v23 = vand.u32 4294901760, %v4618_v58 }
 0x22d   : > { %28102 = vmatprep.subr.mxu0 %v36864_v33  ;;  %28080 = vmatmul.mubr.f32.vlgmr.msra.gmra.mrb[14].mxu1 %v33370_v37 }
 0x22e   : > { %28088 = vmatpush3.msra.mxu1 %v33339_v60  ;;  %28095 = vmatmul.mubr.f32.vlgmr.msra.gmra.mrb[18].mxu0 %v33370_v37 }
 0x22f   : > { %28103 = vmatpush3.msra.mxu0 %v33344_v45  ;;  %28089 = vmatprep.mubr.msk.f32.mxu1 %vm32444_vm0, %v36864_v33 }
 0x230   : > { %28097 = vmatprep.subr.mxu1 %v36864_v33  ;;  %28104 = vmatprep.mubr.msk.f32.mxu0 %vm32444_vm0, %v36864_v33 }
 0x231   : > { %28112 = vmatprep.subr.mxu0 %v36864_v33  ;;  %28090 = vmatmul.mubr.f32.vlgmr.msra.gmra.mrb[16].mxu1 %v3644_v54  ;;  %v4531_v54 = vand.u32 4294901760, %v26120_v59 }
 0x232   : > { %28098 = vmatpush3.msra.mxu1 %v33339_v60  ;;  %28105 = vmatmul.mubr.f32.vlgmr.msra.gmra.mrb[20].mxu0 %v4095_v24  ;;  %v26118_v60 = vld [vmem:[%s36788_s9 + $0x160] sm:$0xff]  ;;  %v4610_v24 = vand.u32 4294901760, %v33546_v32 }
 0x233   : > { %28113 = vmatpush3.msra.mxu0 %v33362_v18  ;;  %28099 = vmatprep.mubr.msk.f32.mxu1 %vm32444_vm0, %v36864_v33  ;;  %v4525_v1 = vand.u32 4294901760, %v26118_v60  ;;  %v4528_v18 = vand.u32 4294901760, %v33529_v20  ;;  %v33574_v21 = vpack.c.bf16 %v4534_v55, %v4531_v54 }
 0x234   : > { %28107 = vmatprep.subr.mxu1 %v36864_v33  ;;  %28114 = vmatprep.mubr.msk.f32.mxu0 %vm32444_vm0, %v36864_v33 }
 0x235   : > { %28122 = vmatprep.subr.mxu0 %v36864_v33  ;;  %28100 = vmatmul.mubr.f32.vlgmr.msra.gmra.mrb[18].mxu1 %v33370_v37  ;;  %v4583_v37 = vsub.f32 %v33519_v48, %v4582_v12  ;;  %v33559_v49 = vpack.c.bf16 %v4528_v18, %v4525_v1  ;;  %v33609_v14 = vsub.f32 %v26118_v60, %v4525_v1 }
 0x236   : > { %28108 = vmatpush3.msra.mxu1 %v33402_v56  ;;  %28115 = vmatmul.mubr.f32.vlgmr.msra.gmra.mrb[22].mxu0 %v33422_v7  ;;  %v33563_v56 = vsub.f32 %v26112_v51, %v4507_v30  ;;  %v4604_v7 = vsub.f32 %v33533_v3, %v4603_v40  ;;  %v36886_v51 = vld [vmem:[#allocation58_spill] sm:$0xff]  ;;  %v4638_v30 = vand.u32 4294901760, %v33579_v26  ;;  %v33623_v1 = vsub.f32 %v26120_v59, %v4531_v54 }
 0x237   : > { %28123 = vmatpush3.msra.mxu0 %v33374_v38  ;;  %28109 = vmatprep.mubr.msk.f32.mxu1 %vm32444_vm0, %v36864_v33  ;;  %v4590_v38 = vsub.f32 %v33521_v62, %v4589_v50  ;;  %v4584_v57 = vand.u32 4294901760, %v4583_v37  ;;  %v4659_v37 = vand.u32 4294901760, %v33595_v8 }
 0x238   : > { %28117 = vmatprep.subr.mxu1 %v36864_v33  ;;  %28124 = vmatprep.mubr.msk.f32.mxu0 %vm32444_vm0, %v36864_v33  ;;  %v4605_v46 = vand.u32 4294901760, %v4604_v7  ;;  %v4624_v63 = vand.u32 4294901760, %v33563_v56  ;;  %v4639_v22 = vsub.f32 %v33579_v26, %v4638_v30 }
 0x239   : > { %30934 = vmatprep.subr.bf16.mxu0 %v36810_v19  ;;  %28110 = vmatmul.mubr.f32.vlgmr.msra.gmra.mrb[20].mxu1 %v33409_v5 }
 0x23a   : > { %28118 = vmatpush3.msra.mxu1 %v33344_v45  ;;  %28125 = vmatmul.mubr.f32.vlgmr.msra.gmra.mrb[24].mxu0 %v33409_v5  ;;  %v4625_v43 = vsub.f32 %v33563_v56, %v4624_v63 }
 0x23b   : > { %30936 = vmatpush3.bf16.msra.mxu0 %v33478_v47  ;;  %28119 = vmatprep.mubr.msk.f32.mxu1 %vm32444_vm0, %v36864_v33 }
 0x23c   : > { %28127 = vmatprep.subr.mxu1 %v36864_v33  ;;  %30937 = vmatprep.subr.bf16.mxu0 %v36810_v19 }
 0x23d   : > { %28120 = vmatmul.mubr.f32.vlgmr.msra.gmra.mrb[22].mxu1 %v4093_v9  ;;  %28164 = vmatprep.mubr.msk.f32.mxu0 %vm32444_vm0, %v36864_v33  ;;  %v33571_v9 = vsub.f32 %v26113_v31, %v4510_v29  ;;  %v4645_v29 = vand.u32 4294901760, %v33581_v27 }
 0x23e   : > { %28128 = vmatpush3.msra.mxu1 %v33344_v45  ;;  %28129 = vmatprep.mubr.msk.f32.mxu1 %vm32444_vm0, %v36864_v33  ;;  %v33531_v45 = vsub.f32 %v26108_v36, %v4495_v61  ;;  %v4611_v61 = vsub.f32 %v33546_v32, %v4610_v24 }
 0x23f   : > { %30939 = vmatpush3.bf16.msra.mxu0 %v33492_v28  ;;  %28342 = vmatprep.subr.mxu1 %v36864_v33  ;;  %v4631_v16 = vand.u32 4294901760, %v33571_v9  ;;  %v4646_v34 = vsub.f32 %v33581_v27, %v4645_v29 }
 0x240   : > { %30940 = vmatprep.subr.bf16.mxu0 %v36810_v19  ;;  %v4596_v39 = vand.u32 4294901760, %v33531_v45  ;;  %v4612_v52 = vand.u32 4294901760, %v4611_v61 }
 0x241   : > { %28130 = vmatmul.mubr.f32.vlgmr.msra.gmra.mrb[24].mxu1 %v33409_v5  ;;  %v4591_v5 = vand.u32 4294901760, %v4590_v38  ;;  %v4632_v44 = vsub.f32 %v33571_v9, %v4631_v16  ;;  %v33620_v38 = vsub.f32 %v33529_v20, %v4528_v18  ;;  %v4647_v7 = vand.u32 4294901760, %v4646_v34 }
 0x242   : > { %28344 = vmatprep.mubr.msk.f32.mxu1 %vm32444_vm0, %v36864_v33  ;;  %v4597_v6 = vsub.f32 %v33531_v45, %v4596_v39  ;;  %v33632_v20 = vsub.f32 %v33544_v2, %v4534_v55  ;;  %v4680_v55 = vand.u32 4294901760, %v33623_v1 }
 0x243   : > { %30942 = vmatpush3.bf16.msra.mxu0 %v33504_v0  ;;  %v30959_v35 = vpack.c.bf16 %v4591_v5, %v4584_v57  ;;  %v30965_v57 = vpack.c.bf16 %v4619_v23, %v4612_v52  ;;  %v4626_v5 = vand.u32 4294901760, %v4625_v43  ;;  %v4633_v60 = vand.u32 4294901760, %v4632_v44 }
 0x244   : > { %30943 = vmatprep.subr.bf16.mxu0 %v36810_v19  ;;  %v4598_v36 = vand.u32 4294901760, %v4597_v6  ;;  %v4640_v6 = vand.u32 4294901760, %v4639_v22  ;;  %v4673_v59 = vand.u32 4294901760, %v33620_v38  ;;  %v4681_v44 = vsub.f32 %v33623_v1, %v4680_v55 }
 0x245   : > { %v30968_v18 = vpack.c.bf16 %v4633_v60, %v4626_v5 }
 0x246   : > { %v30962_v31 = vpack.c.bf16 %v4605_v46, %v4598_v36  ;;  %v4660_v36 = vsub.f32 %v33595_v8, %v4659_v37  ;;  %v4666_v46 = vand.u32 4294901760, %v33609_v14  ;;  %v30971_v54 = vpack.c.bf16 %v4647_v7, %v4640_v6 }
 0x247   : > { %30945 = vmatpush3.bf16.msra.mxu0 %v33514_v11  ;;  %v4674_v2 = vsub.f32 %v33620_v38, %v4673_v59  ;;  %v30983_v6 = vpack.c.bf16 %v33521_v62, %v33519_v48  ;;  %v30986_v7 = vpack.c.bf16 %v33533_v3, %v33531_v45  ;;  %v31037_v48 = vpack.c.bf16 %v4617_v25, %v4610_v24 }
 0x248   : > { %30946 = vmatprep.subr.bf16.mxu0 %v36810_v19  ;;  %v4661_v58 = vand.u32 4294901760, %v4660_v36  ;;  %v30992_v36 = vpack.c.bf16 %v33571_v9, %v33563_v56  ;;  %v31043_v62 = vpack.c.bf16 %v4645_v29, %v4638_v30  ;;  %v31046_v45 = vpack.c.bf16 %v4659_v37, %v4652_v4 }
 0x249   : > { %v4675_v43 = vand.u32 4294901760, %v4674_v2  ;;  %v31049_v3 = vpack.c.bf16 %v4673_v59, %v4666_v46 }
 0x24b   : > { %30948 = vmatpush3.bf16.msra.mxu0 %v33524_v10 }
 0x24c   : > { %30949 = vmatprep.subr.bf16.mxu0 %v36810_v19 }
 0x24f   : > { %30951 = vmatpush3.bf16.msra.mxu0 %v33538_v41 }
 0x250   : > { %30952 = vmatprep.subr.bf16.mxu0 %v36810_v19 }
 0x253   : > { %30954 = vmatpush3.bf16.msra.mxu0 %v33559_v49 }
 0x254   : > { %30955 = vmatprep.subr.bf16.mxu0 %v36810_v19 }
 0x257   : > { %30957 = vmatpush3.bf16.msra.mxu0 %v33574_v21 }
 0x258   : > { %30958 = vmatprep.subr.bf16.mxu0 %v36810_v19 }
 0x25a   : > { %28165 = vmatmul.mubr.f32.vlgmr.msra.gmra.mrb[26].mxu0 %v36886_v51  ;;  %v4667_v51 = vsub.f32 %v33609_v14, %v4666_v46 }
 0x25b   : > { %30960 = vmatpush3.bf16.msra.mxu0 %v30959_v35  ;;  %28199 = vmatprep.mubr.msk.f32.mxu0 %vm32444_vm0, %v36864_v33  ;;  %v4653_v35 = vsub.f32 %v33593_v15, %v4652_v4 }
 0x25c   : > { %30961 = vmatprep.subr.bf16.mxu0 %v36810_v19  ;;  %v4668_v23 = vand.u32 4294901760, %v4667_v51  ;;  %v31034_v51 = vpack.c.bf16 %v4603_v40, %v4596_v39 }
 0x25d   : > { %v4654_v61 = vand.u32 4294901760, %v4653_v35  ;;  %v30989_v35 = vpack.c.bf16 %v33556_v42, %v33546_v32 }
 0x25e   : > { %v30977_v34 = vpack.c.bf16 %v4675_v43, %v4668_v23 }
 0x25f   : > { %30963 = vmatpush3.bf16.msra.mxu0 %v30962_v31  ;;  %v4687_v31 = vand.u32 4294901760, %v33632_v20  ;;  %v30974_v52 = vpack.c.bf16 %v4661_v58, %v4654_v61  ;;  %v31001_v61 = vpack.c.bf16 %v33620_v38, %v33609_v14  ;;  %v31004_v58 = vpack.c.bf16 %v33632_v20, %v33623_v1 }
 0x260   : > { %30964 = vmatprep.subr.bf16.mxu0 %v36810_v19 }
 0x261   : > { %v4688_v22 = vsub.f32 %v33632_v20, %v4687_v31 }
 0x263   : > { %30966 = vmatpush3.bf16.msra.mxu0 %v30965_v57  ;;  %v4682_v57 = vand.u32 4294901760, %v4681_v44  ;;  %v4689_v5 = vand.u32 4294901760, %v4688_v22 }
 0x264   : > { %30967 = vmatprep.subr.bf16.mxu0 %v36810_v19 }
 0x265   : > { %v30980_v60 = vpack.c.bf16 %v4689_v5, %v4682_v57 }
 0x267   : > { %30969 = vmatpush3.bf16.msra.mxu0 %v30968_v18  ;;  %v30995_v18 = vpack.c.bf16 %v33581_v27, %v33579_v26 }
 0x268   : > { %30970 = vmatprep.subr.bf16.mxu0 %v36810_v19 }
 0x26b   : > { %30972 = vmatpush3.bf16.msra.mxu0 %v30971_v54  ;;  %v30998_v54 = vpack.c.bf16 %v33595_v8, %v33593_v15 }
 0x26c   : > { %30973 = vmatprep.subr.bf16.mxu0 %v36810_v19 }
 0x26f   : > { %30975 = vmatpush3.bf16.msra.mxu0 %v30974_v52 }
 0x270   : > { %30976 = vmatprep.subr.bf16.mxu0 %v36810_v19 }
 0x273   : > { %30978 = vmatpush3.bf16.msra.mxu0 %v30977_v34 }
 0x274   : > { %30979 = vmatprep.subr.bf16.mxu0 %v36810_v19 }
 0x277   : > { %30981 = vmatpush3.bf16.msra.mxu0 %v30980_v60 }
 0x278   : > { %30982 = vmatprep.subr.bf16.mxu0 %v36810_v19 }
 0x27a   : > { %28200 = vmatmul.mubr.f32.vlgmr.msra.gmra.mrb[26].mxu0 %v32870_v53 }
 0x27b   : > { %30984 = vmatpush3.bf16.msra.mxu0 %v30983_v6  ;;  %28234 = vmatprep.mubr.msk.f32.mxu0 %vm32444_vm0, %v36864_v33 }
 0x27c   : > { %30985 = vmatprep.subr.bf16.mxu0 %v36810_v19 }
 0x27f   : > { %30987 = vmatpush3.bf16.msra.mxu0 %v30986_v7 }
 0x280   : > { %30988 = vmatprep.subr.bf16.mxu0 %v36810_v19 }
 0x283   : > { %30990 = vmatpush3.bf16.msra.mxu0 %v30989_v35 }
 0x284   : > { %30991 = vmatprep.subr.bf16.mxu0 %v36810_v19 }
 0x287   : > { %30993 = vmatpush3.bf16.msra.mxu0 %v30992_v36 }
 0x288   : > { %30994 = vmatprep.subr.bf16.mxu0 %v36810_v19 }
 0x28b   : > { %30996 = vmatpush3.bf16.msra.mxu0 %v30995_v18 }
 0x28c   : > { %30997 = vmatprep.subr.bf16.mxu0 %v36810_v19 }
 0x28f   : > { %30999 = vmatpush3.bf16.msra.mxu0 %v30998_v54 }
 0x290   : > { %31000 = vmatprep.subr.bf16.mxu0 %v36810_v19 }
 0x293   : > { %31002 = vmatpush3.bf16.msra.mxu0 %v31001_v61 }
 0x294   : > { %31003 = vmatprep.subr.bf16.mxu0 %v36810_v19 }
 0x297   : > { %31005 = vmatpush3.bf16.msra.mxu0 %v31004_v58 }
 0x298   : > { %31006 = vmatprep.subr.bf16.mxu0 %v36810_v19 }
 0x29a   : > { %28235 = vmatmul.mubr.f32.vlgmr.msra.gmra.mrb[26].mxu0 %v36865_v17  ;;  %v31031_v17 = vpack.c.bf16 %v4589_v50, %v4582_v12  ;;  %v31052_v12 = vpack.c.bf16 %v4687_v31, %v4680_v55 }
 0x29b   : > { %31008 = vmatpush3.bf16.msra.mxu0 %v33478_v47  ;;  %28269 = vmatprep.mubr.msk.f32.mxu0 %vm32444_vm0, %v36864_v33 }
 0x29c   : > { %31009 = vmatprep.subr.bf16.mxu0 %v36810_v19 }
 0x29f   : > { %31011 = vmatpush3.bf16.msra.mxu0 %v33492_v28 }
 0x2a0   : > { %31012 = vmatprep.subr.bf16.mxu0 %v36810_v19 }
 0x2a3   : > { %31014 = vmatpush3.bf16.msra.mxu0 %v33504_v0 }
 0x2a4   : > { %31015 = vmatprep.subr.bf16.mxu0 %v36810_v19 }
 0x2a7   : > { %31017 = vmatpush3.bf16.msra.mxu0 %v33514_v11 }
 0x2a8   : > { %31018 = vmatprep.subr.bf16.mxu0 %v36810_v19 }
 0x2ab   : > { %31020 = vmatpush3.bf16.msra.mxu0 %v33524_v10 }
 0x2ac   : > { %31021 = vmatprep.subr.bf16.mxu0 %v36810_v19 }
 0x2af   : > { %31023 = vmatpush3.bf16.msra.mxu0 %v33538_v41 }
 0x2b0   : > { %31024 = vmatprep.subr.bf16.mxu0 %v36810_v19 }
 0x2b3   : > { %31026 = vmatpush3.bf16.msra.mxu0 %v33559_v49 }
 0x2b4   : > { %31027 = vmatprep.subr.bf16.mxu0 %v36810_v19 }
 0x2b7   : > { %31029 = vmatpush3.bf16.msra.mxu0 %v33574_v21 }
 0x2b8   : > { %31030 = vmatprep.subr.bf16.mxu0 %v36810_v19 }
 0x2ba   : > { %28270 = vmatmul.mubr.f32.vlgmr.msra.gmra.mrb[26].mxu0 %v36882_v13  ;;  %v31040_v13 = vpack.c.bf16 %v4631_v16, %v4624_v63 }
 0x2bb   : > { %31032 = vmatpush3.bf16.msra.mxu0 %v31031_v17  ;;  %28304 = vmatprep.mubr.msk.f32.mxu0 %vm32444_vm0, %v36864_v33 }
 0x2bc   : > { %31033 = vmatprep.subr.bf16.mxu0 %v36810_v19 }
 0x2bf   : > { %31035 = vmatpush3.bf16.msra.mxu0 %v31034_v51 }
 0x2c0   : > { %31036 = vmatprep.subr.bf16.mxu0 %v36810_v19 }
 0x2c3   : > { %31038 = vmatpush3.bf16.msra.mxu0 %v31037_v48 }
 0x2c4   : > { %31039 = vmatprep.subr.bf16.mxu0 %v36810_v19 }
 0x2c7   : > { %31041 = vmatpush3.bf16.msra.mxu0 %v31040_v13 }
 0x2c8   : > { %31042 = vmatprep.subr.bf16.mxu0 %v36810_v19 }
 0x2cb   : > { %31044 = vmatpush3.bf16.msra.mxu0 %v31043_v62 }
 0x2cc   : > { %31045 = vmatprep.subr.bf16.mxu0 %v36810_v19 }
 0x2cf   : > { %31047 = vmatpush3.bf16.msra.mxu0 %v31046_v45 }
 0x2d0   : > { %31048 = vmatprep.subr.bf16.mxu0 %v36810_v19 }
 0x2d3   : > { %31050 = vmatpush3.bf16.msra.mxu0 %v31049_v3 }
 0x2d4   : > { %31051 = vmatprep.subr.bf16.mxu0 %v36810_v19 }
 0x2d7   : > { %31053 = vmatpush3.bf16.msra.mxu0 %v31052_v12 }
 0x2d8   : > { %31054 = vmatprep.subr.bf16.mxu0 %v36810_v19 }
 0x2da   : > { %28305 = vmatmul.mubr.f32.vlgmr.msra.gmra.mrb[26].mxu0 %v32870_v53 }
 0x2db   : > { %31056 = vmatpush3.bf16.msra.mxu0 %v33478_v47  ;;  %28339 = vmatprep.mubr.msk.f32.mxu0 %vm32444_vm0, %v36864_v33 }
 0x2dc   : > { %31057 = vmatprep.subr.bf16.mxu0 %v36810_v19 }
 0x2df   : > { %31059 = vmatpush3.bf16.msra.mxu0 %v33492_v28 }
 0x2e0   : > { %v2745_v50 = vpop.f32.mrb[2].mxu0  ;;  %31060 = vmatprep.subr.bf16.mxu0 %v36810_v19 }
 0x2e1   : > { %v28016_v32 = vpop.f32.mrb[3].mxu0 }
 0x2e3   : > { %31062 = vmatpush3.bf16.msra.mxu0 %v33504_v0 }
 0x2e4   : > { %v2895_v39 = vpop.f32.mrb[4].mxu0  ;;  %31063 = vmatprep.subr.bf16.mxu0 %v36810_v19 }
 0x2e5   : > { %v28026_v40 = vpop.f32.mrb[5].mxu0 }
 0x2e7   : > { %31065 = vmatpush3.bf16.msra.mxu0 %v33514_v11 }
 0x2e8   : > { %v2821_v47 = vpop.f32.mrb[2].mxu1  ;;  %31066 = vmatprep.subr.bf16.mxu0 %v36810_v19 }
 0x2e9   : > { %v2822_v42 = vadd.f32 %v2821_v47, %v2745_v50  ;;  %v3043_v56 = vpop.f32.mrb[6].mxu0  ;;  %v28021_v9 = vpop.f32.mrb[3].mxu1 }
 0x2ea   : > { %v28036_v24 = vpop.f32.mrb[7].mxu0 }
 0x2eb   : > { %v2896_v28 = vadd.f32 %v2895_v39, %v2822_v42  ;;  %31068 = vmatpush3.bf16.msra.mxu0 %v33524_v10  ;;  %v6036_v24 = vld [vmem:[%s32472_s17] sm:$0xf] }
 0x2ec   : > { %v2969_v25 = vpop.f32.mrb[4].mxu1  ;;  %31069 = vmatprep.subr.bf16.mxu0 %v36810_v19 }
 0x2ed   : > { %v3197_v0 = vpop.f32.mrb[8].mxu0  ;;  %v28031_v26 = vpop.f32.mrb[5].mxu1  ;;  %v2970_v27 = vadd.f32 %v2969_v25, %v2896_v28  ;;  %v32446_v28 = vmov 0   ;;  %v6049_v25 = vld [vmem:[%s32482_s25] sm:$0xf] }
 0x2ee   : > { %v28046_v63 = vpop.f32.mrb[9].mxu0  ;;  %32292 = vset.pattern.permute.xlu0 %v32446_v28  ;;  %32293 = vset.pattern.permute.xlu1 %v32446_v28  ;;  %v26122_v26 = vld [vmem:[%s36787_s13 + $0x8] sm:$0xf] }
 0x2ef   : > { %31071 = vmatpush3.bf16.msra.mxu0 %v33538_v41  ;;  %v3044_v11 = vadd.f32 %v3043_v56, %v2970_v27  ;;  %6039 = vperm.xlu0 %32292, %v6036_v24   ;;  %v5132_v27 = vsel %vm2665_vm1, %v26122_v26, 0 }
 0x2f0   : > { %v3115_v16 = vpop.f32.mrb[6].mxu1  ;;  %31072 = vmatprep.subr.bf16.mxu0 %v36810_v19  ;;  %v5203_v63 = vand.u32 4294901760, %v5132_v27 }
 0x2f1   : > { %v3116_v15 = vadd.f32 %v3115_v16, %v3044_v11  ;;  %v3347_v8 = vpop.f32.mrb[10].mxu0  ;;  %v28041_v30 = vpop.f32.mrb[7].mxu1 }
 0x2f2   : > { %v28056_v29 = vpop.f32.mrb[11].mxu0  ;;  %v5204_v11 = vsub.f32 %v5132_v27, %v5203_v63 }
 0x2f3   : > { %31074 = vmatpush3.bf16.msra.mxu0 %v33559_v49  ;;  %v3198_v10 = vadd.f32 %v3197_v0, %v3116_v15  ;;  %6052 = vperm.xlu0 %32292, %v6049_v25   ;;  %v10782_v0 = vld [vmem:[%s32507_s19] sm:$0xf] }
 0x2f4   : > { %v3273_v14 = vpop.f32.mrb[8].mxu1  ;;  %31075 = vmatprep.subr.bf16.mxu0 %v36810_v19  ;;  %v5205_v16 = vand.u32 4294901760, %v5204_v11 }
 0x2f5   : > { %v3274_v4 = vadd.f32 %v3273_v14, %v3198_v10  ;;  %v3495_v37 = vpop.f32.mrb[12].mxu0  ;;  %v28051_v38 = vpop.f32.mrb[9].mxu1 }
 0x2f6   : > { %v28066_v1 = vpop.f32.mrb[13].mxu0  ;;  %v5206_v15 = vsub.f32 %v5204_v11, %v5205_v16  ;;  %v26123_v38 = vld [vmem:[%s32477_s21 + $0x8] sm:$0xf] }
 0x2f7   : > { %31077 = vmatpush3.bf16.msra.mxu0 %v33574_v21  ;;  %v3348_v41 = vadd.f32 %v3347_v8, %v3274_v4  ;;  %10785 = vperm.xlu0 %32292, %v10782_v0  }
 0x2f8   : > { %v3421_v20 = vpop.f32.mrb[10].mxu1  ;;  %31222 = vmatprep.subr.bf16.mxu0 %v36810_v19  ;;  %v5207_v10 = vand.u32 4294901760, %v5206_v15 }
 0x2f9   : > { %v3422_v46 = vadd.f32 %v3421_v20, %v3348_v41  ;;  %v3648_v59 = vpop.f32.mrb[14].mxu0  ;;  %v28061_v2 = vpop.f32.mrb[11].mxu1  ;;  %v5587_v20 = vsel %vm2665_vm1, %v26123_v38, 0 }
 0x2fa   : > { %28340 = vmatmul.mubr.f32.vlgmr.msra.gmra.mrb[26].mxu0 %v32870_v53  ;;  %v28076_v49 = vpop.f32.mrb[15].mxu0 }
 0x2fb   : > { %v3496_v55 = vadd.f32 %v3495_v37, %v3422_v46  ;;  %28644 = vmatprep.mubr.msk.f32.mxu0 %vm32444_vm0, %v36864_v33  ;;  %v5655_v46 = vand.u32 4294901760, %v5587_v20 }
 0x2fc   : > { %v3567_v31 = vpop.f32.mrb[12].mxu1 }
 0x2fd   : > { %v33767_v52 = vadd.f32 %v3567_v31, %v3496_v55  ;;  %v3798_v23 = vpop.f32.mrb[16].mxu0  ;;  %v28071_v43 = vpop.f32.mrb[13].mxu1 }
 0x2fe   : > { %v28086_v21 = vpop.f32.mrb[17].mxu0 }
 0x300   : > { %v3724_v44 = vpop.f32.mrb[14].mxu1 }
 0x301   : > { %v3725_v22 = vadd.f32 %v3724_v44, %v3648_v59  ;;  %v3946_v34 = vpop.f32.mrb[18].mxu0  ;;  %v28081_v57 = vpop.f32.mrb[15].mxu1  ;;  %v5656_v59 = vsub.f32 %v5587_v20, %v5655_v46 }
 0x302   : > { %v28096_v5 = vpop.f32.mrb[19].mxu0 }
 0x303   : > { %v3799_v60 = vadd.f32 %v3798_v23, %v3725_v22  ;;  %v5657_v2 = vand.u32 4294901760, %v5656_v59 }
 0x304   : > { %v3872_v6 = vpop.f32.mrb[16].mxu1 }
 0x305   : > { %v3873_v7 = vadd.f32 %v3872_v6, %v3799_v60  ;;  %v4097_v53 = vpop.f32.mrb[20].mxu0  ;;  %v28091_v35 = vpop.f32.mrb[17].mxu1  ;;  %v5658_v49 = vsub.f32 %v5656_v59, %v5657_v2 }
 0x306   : > { %v28106_v36 = vpop.f32.mrb[21].mxu0 }
 0x307   : > { %v3947_v18 = vadd.f32 %v3946_v34, %v3873_v7  ;;  %v5659_v55 = vand.u32 4294901760, %v5658_v49  ;;  %v33827_v49 = vld [vmem:[%s36790_s8 + $0x8] sm:$0xff] }
 0x308   : > { %v4018_v54 = vpop.f32.mrb[18].mxu1 }
 0x309   : > { %v4019_v61 = vadd.f32 %v4018_v54, %v3947_v18  ;;  %v4247_v58 = vpop.f32.mrb[22].mxu0  ;;  %v28101_v17 = vpop.f32.mrb[19].mxu1 }
 0x30a   : > { %v28116_v51 = vpop.f32.mrb[23].mxu0 }
 0x30b   : > { %v4098_v48 = vadd.f32 %v4097_v53, %v4019_v61 }
 0x30c   : > { %v4173_v13 = vpop.f32.mrb[20].mxu1 }
 0x30d   : > { %v4395_v62 = vpop.f32.mrb[24].mxu0  ;;  %v28111_v45 = vpop.f32.mrb[21].mxu1  ;;  %v4174_v3 = vadd.f32 %v4173_v13, %v4098_v48 }
 0x30e   : > { %v28126_v12 = vpop.f32.mrb[25].mxu0 }
 0x30f   : > { %v4248_v50 = vadd.f32 %v4247_v58, %v4174_v3 }
 0x310   : > { %v4321_v32 = vpop.f32.mrb[22].mxu1 }
 0x311   : > { %v4322_v39 = vadd.f32 %v4321_v32, %v4248_v50  ;;  %v28121_v40 = vpop.f32.mrb[23].mxu1 }
 0x313   : > { %v4396_v47 = vadd.f32 %v4395_v62, %v4322_v39 }
 0x314   : > { %v4467_v42 = vpop.f32.mrb[24].mxu1 }
 0x315   : > { %v33769_v56 = vadd.f32 %v4467_v42, %v4396_v47  ;;  %v28131_v9 = vpop.f32.mrb[25].mxu1 }
 0x36e   : > { %v6040_v61 = vpop.permute.xlu0 %6039 }
 0x3cd   : > { %v5125_v8 = vpop.f32.mrb[26].mxu0 }
 0x3ce   : > { %v5135_v30 = vsel %vm2669_vm2, %v5125_v8, 0  ;;  %v28341_v29 = vpop.f32.mrb[27].mxu0 }
 0x3cf   : > { %v5138_v14 = vand.u32 4294901760, %v5135_v30 }
 0x3d1   : > { %v5215_v4 = vsub.f32 %v5135_v30, %v5138_v14  ;;  %28343 = vmatpush3.msra.mxu1 %v5138_v14 }
 0x3d2   : > { %28345 = vmatmul.mubr.f32.vlgmr.msra.gmra.mrb[26].mxu1 %v5207_v10  ;;  %28347 = vmatprep.subr.mxu1 %v36864_v33 }
 0x3d3   : > { %v5216_v37 = vand.u32 4294901760, %v5215_v4  ;;  %28349 = vmatprep.mubr.msk.f32.mxu1 %vm32444_vm0, %v36864_v33 }
 0x3d5   : > { %v5217_v1 = vsub.f32 %v5215_v4, %v5216_v37 }
 0x3d7   : > { %v5218_v41 = vand.u32 4294901760, %v5217_v1 }
 0x3d9   : > { %28348 = vmatpush3.msra.mxu1 %v5218_v41 }
 0x3da   : > { %28350 = vmatmul.mubr.f32.vlgmr.msra.gmra.mrb[28].mxu1 %v5203_v63  ;;  %28352 = vmatprep.subr.mxu1 %v36864_v33 }
 0x3db   : > { %28353 = vmatpush3.msra.mxu1 %v5215_v4  ;;  %28354 = vmatprep.mubr.msk.f32.mxu1 %vm32444_vm0, %v36864_v33 }
 0x3dc   : > { %28357 = vmatprep.subr.mxu1 %v36864_v33 }
 0x3de   : > { %28355 = vmatmul.mubr.f32.vlgmr.msra.gmra.mrb[30].mxu1 %v5204_v11 }
 0x3df   : > { %28358 = vmatpush3.msra.mxu1 %v5138_v14  ;;  %28359 = vmatprep.mubr.msk.f32.mxu1 %vm32444_vm0, %v36864_v33 }
 0x3e0   : > { %28362 = vmatprep.subr.mxu1 %v36864_v33 }
 0x3e2   : > { %28360 = vmatmul.mubr.f32.vlgmr.msra.gmra.mrb[32].mxu1 %v5205_v16 }
 0x3e3   : > { %28363 = vmatpush3.msra.mxu1 %v5216_v37  ;;  %28364 = vmatprep.mubr.msk.f32.mxu1 %vm32444_vm0, %v36864_v33 }
 0x3e4   : > { %28367 = vmatprep.subr.mxu1 %v36864_v33 }
 0x3e6   : > { %28365 = vmatmul.mubr.f32.vlgmr.msra.gmra.mrb[34].mxu1 %v5203_v63 }
 0x3e7   : > { %28368 = vmatpush3.msra.mxu1 %v5138_v14  ;;  %28369 = vmatprep.mubr.msk.f32.mxu1 %vm32444_vm0, %v36864_v33 }
 0x3e8   : > { %28372 = vmatprep.subr.mxu1 %v36864_v33 }
 0x3ea   : > { %28370 = vmatmul.mubr.f32.vlgmr.msra.gmra.mrb[36].mxu1 %v5203_v63  ;;  %v6053_v63 = vpop.permute.xlu0 %6052 }
 0x3eb   : > { %28373 = vmatpush3.msra.mxu1 %v5138_v14  ;;  %28374 = vmatprep.mubr.msk.f32.mxu1 %vm32444_vm0, %v36864_v33 }
 0x3ec   : > { %28377 = vmatprep.subr.mxu1 %v36864_v33 }
 0x3ee   : > { %28375 = vmatmul.mubr.f32.vlgmr.msra.gmra.mrb[38].mxu1 %v5659_v55  ;;  %v33830_v55 = vld [vmem:[%s36790_s8 + $0x80] sm:$0xff] }
 0x3ef   : > { %28378 = vmatpush3.msra.mxu1 %v5218_v41  ;;  %28379 = vmatprep.mubr.msk.f32.mxu1 %vm32444_vm0, %v36864_v33 }
 0x3f0   : > { %28382 = vmatprep.subr.mxu1 %v36864_v33 }
 0x3f2   : > { %28380 = vmatmul.mubr.f32.vlgmr.msra.gmra.mrb[40].mxu1 %v5655_v46 }
 0x3f3   : > { %28383 = vmatpush3.msra.mxu1 %v5215_v4  ;;  %28384 = vmatprep.mubr.msk.f32.mxu1 %vm32444_vm0, %v36864_v33 }
 0x3f4   : > { %28387 = vmatprep.subr.mxu1 %v36864_v33 }
 0x3f6   : > { %28385 = vmatmul.mubr.f32.vlgmr.msra.gmra.mrb[42].mxu1 %v5656_v59 }
 0x3f7   : > { %28388 = vmatpush3.msra.mxu1 %v5138_v14  ;;  %28389 = vmatprep.mubr.msk.f32.mxu1 %vm32444_vm0, %v36864_v33 }
 0x3f8   : > { %28392 = vmatprep.subr.mxu1 %v36864_v33 }
 0x3fa   : > { %28390 = vmatmul.mubr.f32.vlgmr.msra.gmra.mrb[44].mxu1 %v5657_v2  ;;  %v33824_v2 = vld [vmem:[%s36790_s8] sm:$0xff] }
 0x3fb   : > { %28393 = vmatpush3.msra.mxu1 %v5216_v37  ;;  %28394 = vmatprep.mubr.msk.f32.mxu1 %vm32444_vm0, %v36864_v33 }
 0x3fc   : > { %28397 = vmatprep.subr.mxu1 %v36864_v33 }
 0x3fe   : > { %28395 = vmatmul.mubr.f32.vlgmr.msra.gmra.mrb[46].mxu1 %v5655_v46 }
 0x3ff   : > { %28398 = vmatpush3.msra.mxu1 %v5138_v14  ;;  %28399 = vmatprep.mubr.msk.f32.mxu1 %vm32444_vm0, %v36864_v33 }
 0x400   : > { %31078 = vmatprep.subr.bf16.mxu1 %v36810_v19 }
 0x402   : > { %28400 = vmatmul.mubr.f32.vlgmr.msra.gmra.mrb[48].mxu1 %v5655_v46 }
 0x403   : > { %28434 = vmatprep.mubr.msk.f32.mxu1 %vm32444_vm0, %v36864_v33 }
 0x4a5   : > { %v5209_v31 = vpop.f32.mrb[26].mxu1 }
 0x4a6   : > { %v28346_v23 = vpop.f32.mrb[27].mxu1 }
 0x4a7   : > { %v6113_v23 = vand.u32 4294901760, %v33827_v49 }
 0x4ad   : > { %v5285_v43 = vpop.f32.mrb[28].mxu1 }
 0x4ae   : > { %v5286_v21 = vadd.f32 %v5285_v43, %v5209_v31  ;;  %v28351_v44 = vpop.f32.mrb[29].mxu1  ;;  %v6110_v31 = vand.u32 4294901760, %v33824_v2  ;;  %v33835_v43 = vld [vmem:[%s36790_s8 + $0x88] sm:$0xff] }
 0x4af   : > { %v6773_v44 = vand.u32 4294901760, %v33835_v43 }
 0x4b1   : > { %v5359_v22 = vpop.f32.mrb[30].mxu1 }
 0x4b2   : > { %v5360_v34 = vadd.f32 %v5359_v22, %v5286_v21  ;;  %v28356_v57 = vpop.f32.mrb[31].mxu1  ;;  %v6770_v21 = vand.u32 4294901760, %v33830_v55  ;;  %v33843_v22 = vpack.c.bf16 %v6113_v23, %v6110_v31 }
 0x4b3   : > { %v33852_v57 = vld [vmem:[%s36790_s8 + $0x10] sm:$0xff] }
 0x4b4   : > { %36887 = vst [vmem:[#allocation54_spill] sm:$0xff] %v33843_v22  ;;  %31080 = vmatpush3.bf16.msra.mxu1 %v33843_v22 }
 0x4b5   : > { %v5433_v5 = vpop.f32.mrb[32].mxu1  ;;  %31081 = vmatprep.subr.bf16.mxu1 %v36810_v19 }
 0x4b6   : > { %v5434_v60 = vadd.f32 %v5433_v5, %v5360_v34  ;;  %v28361_v6 = vpop.f32.mrb[33].mxu1  ;;  %v33849_v34 = vpack.c.bf16 %v6773_v44, %v6770_v21  ;;  %v33855_v5 = vld [vmem:[%s36790_s8 + $0x18] sm:$0xff] }
 0x4b7   : > { %v36672_v6 = vand.u32 4294901760, %v33852_v57 }
 0x4b8   : > { %36888 = vst [vmem:[#allocation40_spill] sm:$0xff] %v33849_v34  ;;  %31224 = vmatpush3.bf16.msra.mxu0 %v33849_v34 }
 0x4b9   : > { %v5507_v7 = vpop.f32.mrb[34].mxu1  ;;  %31225 = vmatprep.subr.bf16.mxu0 %v36810_v19 }
 0x4ba   : > { %v5508_v53 = vadd.f32 %v5507_v7, %v5434_v60  ;;  %v28366_v35 = vpop.f32.mrb[35].mxu1  ;;  %v33858_v60 = vld [vmem:[%s36790_s8 + $0x90] sm:$0xff]  ;;  %v36671_v7 = vand.u32 4294901760, %v33855_v5 }
 0x4bb   : > { %v36670_v35 = vand.u32 4294901760, %v33858_v60 }
 0x4bd   : > { %v5579_v36 = vpop.f32.mrb[36].mxu1 }
 0x4be   : > { %v5580_v18 = vadd.f32 %v5579_v36, %v5508_v53  ;;  %v28371_v54 = vpop.f32.mrb[37].mxu1  ;;  %v33864_v53 = vld [vmem:[%s36790_s8 + $0x98] sm:$0xff] }
 0x4bf   : > { %v36669_v36 = vand.u32 4294901760, %v33864_v53 }
 0x4c0   : > { %v5583_v58 = vadd.f32 %v5580_v18, %v33767_v52  ;;  %v33875_v18 = vpack.c.bf16 %v36671_v7, %v36672_v6  ;;  %v33972_v7 = vsub.f32 %v33827_v49, %v6113_v23  ;;  %v33977_v6 = vsub.f32 %v33830_v55, %v6770_v21 }
 0x4c1   : > { %v5661_v17 = vpop.f32.mrb[38].mxu1  ;;  %v33881_v54 = vpack.c.bf16 %v36669_v36, %v36670_v35  ;;  %v33967_v35 = vsub.f32 %v33824_v2, %v6110_v31  ;;  %v36899_v2 = vand.u32 4294901760, %v33852_v57  ;;  %v36900_v49 = vand.u32 4294901760, %v33855_v5 }
 0x4c2   : > { %v6042_v51 = vadd.f32 %v6040_v61, %v5583_v58  ;;  %v28376_v48 = vpop.f32.mrb[39].mxu1  ;;  %36889 = vst [vmem:[#allocation41_spill] sm:$0xff] %v33875_v18  ;;  %v33884_v61 = vld [vmem:[%s36790_s8 + $0x20] sm:$0xff]  ;;  %v33887_v58 = vld [vmem:[%s36790_s8 + $0x28] sm:$0xff]  ;;  %31083 = vmatpush3.bf16.msra.mxu1 %v33875_v18  ;;  %v36901_v55 = vand.u32 4294901760, %v33858_v60 }
 0x4c3   : > { %36890 = vst [vmem:[#allocation42_spill] sm:$0xff] %v33881_v54  ;;  %v36667_v48 = vand.u32 4294901760, %v33887_v58  ;;  %31227 = vmatpush3.bf16.msra.mxu0 %v33881_v54  ;;  %31084 = vmatprep.subr.bf16.mxu1 %v36810_v19  ;;  %v33988_v31 = vsub.f32 %v33852_v57, %v36899_v2  ;;  %v33993_v23 = vsub.f32 %v33855_v5, %v36900_v49  ;;  %v36903_v57 = vand.u32 4294901760, %v33884_v61 }
 0x4c4   : > { %v26124_v62 = vmul.f32 -1.442695, %v6042_v51  ;;  %v36668_v51 = vand.u32 4294901760, %v33884_v61  ;;  %31228 = vmatprep.subr.bf16.mxu0 %v36810_v19  ;;  %v33998_v21 = vsub.f32 %v33858_v60, %v36901_v55  ;;  %v36904_v5 = vand.u32 4294901760, %v33887_v58 }
 0x4c5   : > { %v5737_v13 = vpop.f32.mrb[40].mxu1  ;;  %v34009_v2 = vsub.f32 %v33884_v61, %v36903_v57 }
 0x4c6   : > { %v5738_v45 = vadd.f32 %v5737_v13, %v5661_v17  ;;  %v28381_v3 = vpop.f32.mrb[41].mxu1  ;;  %32294 = vpow2.f32 %v26124_v62  ;;  %v33890_v17 = vld [vmem:[%s36790_s8 + $0xa0] sm:$0xff]  ;;  %v33896_v13 = vld [vmem:[%s36790_s8 + $0xa8] sm:$0xff]  ;;  %v34014_v60 = vsub.f32 %v33887_v58, %v36904_v5 }
 0x4c7   : > { %v36666_v62 = vand.u32 4294901760, %v33890_v17  ;;  %v33907_v3 = vpack.c.bf16 %v36667_v48, %v36668_v51  ;;  %v36905_v49 = vand.u32 4294901760, %v33890_v17  ;;  %v36906_v55 = vand.u32 4294901760, %v33896_v13 }
 0x4c9   : > { %v5811_v12 = vpop.f32.mrb[42].mxu1  ;;  %36891 = vst [vmem:[#allocation43_spill] sm:$0xff] %v33907_v3  ;;  %31086 = vmatpush3.bf16.msra.mxu1 %v33907_v3 }
 0x4ca   : > { %v5812_v50 = vadd.f32 %v5811_v12, %v5738_v45  ;;  %v28386_v32 = vpop.f32.mrb[43].mxu1  ;;  %v36665_v45 = vand.u32 4294901760, %v33896_v13  ;;  %31087 = vmatprep.subr.bf16.mxu1 %v36810_v19 }
 0x4cb   : > { %v33919_v32 = vld [vmem:[%s36790_s8 + $0x38] sm:$0xff] }
 0x4cc   : > { %v33913_v12 = vpack.c.bf16 %v36665_v45, %v36666_v62  ;;  %v6106_v45 = vld [vmem:[%s36790_s8 + $0x68] sm:$0xff]  ;;  %v26137_v62 = vld [vmem:[%s36790_s8 + $0xe0] sm:$0xff] }
 0x4cd   : > { %v5885_v39 = vpop.f32.mrb[44].mxu1  ;;  %v6149_v51 = vand.u32 4294901760, %v6106_v45  ;;  %v6806_v36 = vand.u32 4294901760, %v26137_v62 }
 0x4ce   : > { %v5886_v40 = vadd.f32 %v5885_v39, %v5812_v50  ;;  %v28391_v47 = vpop.f32.mrb[45].mxu1  ;;  %36892 = vst [vmem:[#allocation44_spill] sm:$0xff] %v33913_v12  ;;  %v33916_v50 = vld [vmem:[%s36790_s8 + $0x30] sm:$0xff]  ;;  %31230 = vmatpush3.bf16.msra.mxu0 %v33913_v12 }
 0x4cf   : > { %v33922_v39 = vld [vmem:[%s36790_s8 + $0xb0] sm:$0xff]  ;;  %v6131_v47 = vand.u32 4294901760, %v33919_v32  ;;  %31231 = vmatprep.subr.bf16.mxu0 %v36810_v19 }
 0x4d0   : > { %v32295_v28 = vpop.eup %32294 }
 0x4d1   : > { %v5959_v42 = vpop.f32.mrb[46].mxu1  ;;  %v6046_v26 = vadd.f32 1.0, %v32295_v28  ;;  %v34031_v57 = vsub.f32 %v33919_v32, %v6131_v47 }
 0x4d2   : > { %v5960_v9 = vadd.f32 %v5959_v42, %v5886_v40  ;;  %v28396_v24 = vpop.f32.mrb[47].mxu1  ;;  %v6128_v40 = vand.u32 4294901760, %v33916_v50  ;;  %v26132_v42 = vld [vmem:[%s36790_s8 + $0xb8] sm:$0xff] }
 0x4d3   : > { %32296 = vrcp.f32 %v6046_v26  ;;  %v6791_v24 = vand.u32 4294901760, %v26132_v42  ;;  %v26133_v26 = vld [vmem:[%s36790_s8 + $0xc0] sm:$0xff] }
 0x4d4   : > { %v33932_v28 = vpack.c.bf16 %v6131_v47, %v6128_v40  ;;  %v34028_v61 = vsub.f32 %v33916_v50, %v6128_v40  ;;  %v6107_v50 = vld [vmem:[%s36790_s8 + $0x70] sm:$0xff]  ;;  %v6108_v40 = vld [vmem:[%s36790_s8 + $0x78] sm:$0xff] }
 0x4d5   : > { %v6031_v25 = vpop.f32.mrb[48].mxu1  ;;  %v34036_v5 = vsub.f32 %v26132_v42, %v6791_v24  ;;  %v26140_v42 = vld [vmem:[%s36790_s8 + $0xf8] sm:$0xff] }
 0x4d6   : > { %v6032_v52 = vadd.f32 %v6031_v25, %v5960_v9  ;;  %v28401_v0 = vpop.f32.mrb[49].mxu1  ;;  %v6788_v9 = vand.u32 4294901760, %v33922_v39  ;;  %36893 = vst [vmem:[#allocation45_spill] sm:$0xff] %v33932_v28  ;;  %31089 = vmatpush3.bf16.msra.mxu1 %v33932_v28 }
 0x4d7   : > { %v6102_v0 = vld [vmem:[%s36790_s8 + $0x48] sm:$0xff]  ;;  %31090 = vmatprep.subr.bf16.mxu1 %v36810_v19 }
 0x4d8   : > { %v6035_v27 = vadd.f32 %v6032_v52, %v33769_v56  ;;  %v33934_v25 = vpack.c.bf16 %v6791_v24, %v6788_v9  ;;  %v6101_v52 = vld [vmem:[%s36790_s8 + $0x40] sm:$0xff]  ;;  %v34034_v58 = vsub.f32 %v33922_v39, %v6788_v9 }
 0x4da   : > { %v6055_v11 = vadd.f32 %v6053_v63, %v6035_v27  ;;  %36894 = vst [vmem:[#allocation46_spill] sm:$0xff] %v33934_v25  ;;  %v6134_v27 = vand.u32 4294901760, %v6101_v52  ;;  %v6137_v63 = vand.u32 4294901760, %v6102_v0  ;;  %31233 = vmatpush3.bf16.msra.mxu0 %v33934_v25 }
 0x4db   : > { %31234 = vmatprep.subr.bf16.mxu0 %v36810_v19 }
 0x4dc   : > { %32298 = vtanh.f32 %v6055_v11  ;;  %v26134_v11 = vld [vmem:[%s36790_s8 + $0xc8] sm:$0xff] }
 0x4dd   : > { %v32297_v16 = vpop.eup %32296 }
 0x4e6   : > { %v32299_v15 = vpop.eup %32298 }
 0x4e7   : > { %v6057_v8 = vmul.f32 %v32299_v15, %v32297_v16  ;;  %v6794_v16 = vand.u32 4294901760, %v26133_v26  ;;  %v6797_v15 = vand.u32 4294901760, %v26134_v11 }
 0x4e9   : > { %v6059_v30 = vsel %vm6058_vm3, %v6057_v8, 0.0 }
 0x4ea   : > { %6060 = vadd.xlane.f32.xlu1 %v6059_v30  ;;  %v33946_v30 = vpack.c.bf16 %v6797_v15, %v6794_v16 }
 0x4ec   : > { %36896 = vst [vmem:[#allocation48_spill] sm:$0xff] %v33946_v30  ;;  %31236 = vmatpush3.bf16.msra.mxu0 %v33946_v30  ;;  %v26139_v30 = vld [vmem:[%s36790_s8 + $0xf0] sm:$0xff] }
 0x4ed   : > { %31237 = vmatprep.subr.bf16.mxu0 %v36810_v19 }
 0x577   : > { %v6061_v29 = vpop.xlane.xlu1 %6060 }
 0x578   : > { %v6062_v10 = vrot.slane %v6061_v29, 4 }
 0x57a   : > { %v6063_v14 = vadd.f32 %v6062_v10, %v6061_v29  ;;  %v6103_v29 = vld [vmem:[%s36790_s8 + $0x50] sm:$0xff]  ;;  %v6104_v10 = vld [vmem:[%s36790_s8 + $0x58] sm:$0xff] }
 0x57c   : > { %v6064_v4 = vrot.slane %v6063_v14, 2 }
 0x57e   : > { %v6065_v37 = vadd.f32 %v6064_v4, %v6063_v14  ;;  %v6140_v14 = vand.u32 4294901760, %v6103_v29  ;;  %v6143_v4 = vand.u32 4294901760, %v6104_v10 }
 0x580   : > { %v6066_v56 = vrot.slane %v6065_v37, 1  ;;  %v34052_v32 = vsub.f32 %v6104_v10, %v6143_v4  ;;  %v36685_v10 = vand.u32 4294901760, %v33967_v35 }
 0x582   : > { %v6067_v38 = vadd.f32 %v6066_v56, %v6065_v37  ;;  %v26135_v37 = vld [vmem:[%s36790_s8 + $0xd0] sm:$0xff]  ;;  %v26136_v56 = vld [vmem:[%s36790_s8 + $0xd8] sm:$0xff] }
 0x584   : > { %32185 = vpush %v6067_v38  ;;  %v6800_v38 = vand.u32 4294901760, %v26135_v37 }
 0x586   : > { %v34054_v39 = vsub.f32 %v26135_v37, %v6800_v38  ;;  %v36684_v37 = vand.u32 4294901760, %v33972_v7 }
 0x5b5   : > { %s32186_s12 = spop %32185 }
 0x5b6   : > { %v6069_v1 = vstv %s32186_s12  ;;  %s36979_s12 = sld [smem:[#allocation14_spill]] }
 0x5b7   : > { %v6071_v41 = vmul.f32 0.001953125, %v6069_v1  ;;  %v6803_v1 = vand.u32 4294901760, %v26136_v56 }
 0x5b9   : > { %v33818_v20 = vsub.f32 %v6057_v8, %v6071_v41  ;;  %v33944_v8 = vpack.c.bf16 %v6137_v63, %v6134_v27  ;;  %v33956_v41 = vpack.c.bf16 %v6143_v4, %v6140_v14  ;;  %v34056_v47 = vsub.f32 %v26136_v56, %v6803_v1 }
 0x5ba   : > { %v6204_v4 = vsub.f32 %v33967_v35, %v36685_v10  ;;  %v36683_v56 = vand.u32 4294901760, %v33977_v6 }
 0x5bb   : > { %v6073_v46 = vmul.f32 %v33818_v20, %v33818_v20  ;;  %36895 = vst [vmem:[#allocation47_spill] sm:$0xff] %v33944_v8  ;;  %31092 = vmatpush3.bf16.msra.mxu1 %v33944_v8  ;;  %36897 = vst [vmem:[#allocation49_spill] sm:$0xff] %v33956_v41  ;;  %v34050_v8 = vsub.f32 %v6103_v29, %v6140_v14  ;;  %v6815_v29 = vand.u32 4294901760, %v26140_v42 }
 0x5bc   : > { %31093 = vmatprep.subr.bf16.mxu1 %v36810_v19 }
 0x5bd   : > { %v6074_v59 = vsel %vm6058_vm3, %v6073_v46, 0.0  ;;  %v33958_v46 = vpack.c.bf16 %v6803_v1, %v6800_v38  ;;  %v36686_v1 = vand.u32 4294901760, %v33993_v23 }
 0x5be   : > { %6075 = vadd.xlane.f32.xlu1 %v6074_v59  ;;  %v6105_v59 = vld [vmem:[%s36790_s8 + $0x60] sm:$0xff] }
 0x5bf   : > { %36898 = vst [vmem:[#allocation50_spill] sm:$0xff] %v33958_v46  ;;  %31095 = vmatpush3.bf16.msra.mxu1 %v33956_v41  ;;  %v6146_v48 = vand.u32 4294901760, %v6105_v59  ;;  %v33982_v41 = vsub.f32 %v33835_v43, %v6773_v44  ;;  %31239 = vmatpush3.bf16.msra.mxu0 %v33958_v46  ;;  %v36902_v43 = vand.u32 4294901760, %v33864_v53  ;;  %v34041_v46 = vsub.f32 %v6102_v0, %v6137_v63 }
 0x5c0   : > { %31096 = vmatprep.subr.bf16.mxu1 %v36810_v19  ;;  %31240 = vmatprep.subr.bf16.mxu0 %v36810_v19  ;;  %v6155_v63 = vand.u32 4294901760, %v6108_v40 }
 0x5c1   : > { %v34003_v44 = vsub.f32 %v33864_v53, %v36902_v43  ;;  %v34019_v53 = vsub.f32 %v33890_v17, %v36905_v49  ;;  %v34024_v43 = vsub.f32 %v33896_v13, %v36906_v55  ;;  %v26138_v17 = vld [vmem:[%s36790_s8 + $0xe8] sm:$0xff]  ;;  %v34039_v49 = vsub.f32 %v6101_v52, %v6134_v27 }
 0x5c2   : > { %v34043_v13 = vsub.f32 %v26133_v26, %v6794_v16  ;;  %v34045_v55 = vsub.f32 %v26134_v11, %v6797_v15  ;;  %v34059_v9 = vpack.c.bf16 %v6149_v51, %v6146_v48  ;;  %v34061_v24 = vsub.f32 %v6105_v59, %v6146_v48 }
 0x5c3   : > { %v34063_v52 = vsub.f32 %v6106_v45, %v6149_v51  ;;  %v6809_v0 = vand.u32 4294901760, %v26138_v17  ;;  %v34065_v26 = vsub.f32 %v26137_v62, %v6806_v36  ;;  %v6152_v27 = vand.u32 4294901760, %v6107_v50 }
 0x5c4   : > { %36907 = vst [vmem:[#allocation51_spill] sm:$0xff] %v34059_v9  ;;  %v6812_v11 = vand.u32 4294901760, %v26139_v30  ;;  %31098 = vmatpush3.bf16.msra.mxu1 %v34059_v9  ;;  %v34078_v62 = vsub.f32 %v6108_v40, %v6155_v63  ;;  %v36681_v38 = vand.u32 4294901760, %v33982_v41  ;;  %v6205_v59 = vand.u32 4294901760, %v6204_v4 }
 0x5c5   : > { %v34068_v16 = vpack.c.bf16 %v6809_v0, %v6806_v36  ;;  %v34070_v15 = vsub.f32 %v26138_v17, %v6809_v0  ;;  %31099 = vmatprep.subr.bf16.mxu1 %v36810_v19  ;;  %v34074_v48 = vpack.c.bf16 %v6155_v63, %v6152_v27  ;;  %v34076_v51 = vsub.f32 %v6107_v50, %v6152_v27 }
 0x5c6   : > { %v34080_v45 = vsub.f32 %v26139_v30, %v6812_v11  ;;  %v34083_v14 = vpack.c.bf16 %v6815_v29, %v6812_v11  ;;  %v34085_v36 = vsub.f32 %v26140_v42, %v6815_v29  ;;  %v36682_v30 = vand.u32 4294901760, %v33988_v31 }
 0x5c7   : > { %36908 = vst [vmem:[#allocation52_spill] sm:$0xff] %v34068_v16  ;;  %36909 = vst [vmem:[#allocation53_spill] sm:$0xff] %v34074_v48  ;;  %31242 = vmatpush3.bf16.msra.mxu0 %v34068_v16  ;;  %v6211_v17 = vsub.f32 %v33972_v7, %v36684_v37  ;;  %v36689_v50 = vand.u32 4294901760, %v33998_v21  ;;  %v36694_v40 = vand.u32 4294901760, %v34003_v44  ;;  %v6864_v42 = vsub.f32 %v33977_v6, %v36683_v56 }
 0x5c8   : > { %36910 = vst [vmem:[#allocation56_spill] sm:$0xff] %v34083_v14  ;;  %31243 = vmatprep.subr.bf16.mxu0 %v36810_v19  ;;  %31101 = vmatpush3.bf16.msra.mxu1 %v34074_v48  ;;  %v6871_v0 = vsub.f32 %v33982_v41, %v36681_v38  ;;  %v6218_v27 = vsub.f32 %v33988_v31, %v36682_v30  ;;  %v36701_v38 = vand.u32 4294901760, %v34009_v2  ;;  %v36697_v9 = vand.u32 4294901760, %v34019_v53 }
 0x5c9   : > { %31102 = vmatprep.subr.bf16.mxu1 %v36810_v19  ;;  %v6225_v63 = vsub.f32 %v33993_v23, %v36686_v1  ;;  %v6212_v11 = vand.u32 4294901760, %v6211_v17  ;;  %v6878_v29 = vsub.f32 %v33998_v21, %v36689_v50  ;;  %v6885_v4 = vsub.f32 %v34003_v44, %v36694_v40 }
 0x5ca   : > { %v6865_v30 = vand.u32 4294901760, %v6864_v42  ;;  %v6872_v56 = vand.u32 4294901760, %v6871_v0  ;;  %v6219_v37 = vand.u32 4294901760, %v6218_v27  ;;  %v6232_v50 = vsub.f32 %v34009_v2, %v36701_v38 }
 0x5cb   : > { %31245 = vmatpush3.bf16.msra.mxu0 %v34083_v14  ;;  %v6226_v10 = vand.u32 4294901760, %v6225_v63  ;;  %v34124_v1 = vpack.c.bf16 %v6212_v11, %v6205_v59  ;;  %v6879_v14 = vand.u32 4294901760, %v6878_v29  ;;  %v6886_v17 = vand.u32 4294901760, %v6885_v4 }
 0x5cc   : > { %31246 = vmatprep.subr.bf16.mxu0 %v36810_v19  ;;  %v34129_v48 = vpack.c.bf16 %v6872_v56, %v6865_v30  ;;  %v36698_v40 = vand.u32 4294901760, %v34014_v60  ;;  %v6233_v0 = vand.u32 4294901760, %v6232_v50  ;;  %v36699_v59 = vand.u32 4294901760, %v34024_v43 }
 0x5cd   : > { %v34131_v16 = vpack.c.bf16 %v6226_v10, %v6219_v37  ;;  %v34135_v42 = vpack.c.bf16 %v6886_v17, %v6879_v14  ;;  %v36700_v27 = vand.u32 4294901760, %v34028_v61  ;;  %v6892_v10 = vsub.f32 %v34019_v53, %v36697_v9 }
 0x5ce   : > { %v6239_v63 = vsub.f32 %v34014_v60, %v36698_v40  ;;  %v36704_v37 = vand.u32 4294901760, %v34031_v57  ;;  %v36709_v56 = vand.u32 4294901760, %v34034_v58  ;;  %v6899_v14 = vsub.f32 %v34024_v43, %v36699_v59 }
 0x5cf   : > { %v6246_v30 = vsub.f32 %v34028_v61, %v36700_v27  ;;  %v36710_v50 = vand.u32 4294901760, %v34036_v5  ;;  %v36711_v11 = vand.u32 4294901760, %v34039_v49  ;;  %v6893_v4 = vand.u32 4294901760, %v6892_v10 }
 0x5d0   : > { %v6240_v29 = vand.u32 4294901760, %v6239_v63  ;;  %v6253_v17 = vsub.f32 %v34031_v57, %v36704_v37  ;;  %v6906_v9 = vsub.f32 %v34034_v58, %v36709_v56  ;;  %v6900_v40 = vand.u32 4294901760, %v6899_v14 }
 0x5d1   : > { %v6247_v59 = vand.u32 4294901760, %v6246_v30  ;;  %v6913_v27 = vsub.f32 %v34036_v5, %v36710_v50  ;;  %v6260_v38 = vsub.f32 %v34039_v49, %v36711_v11  ;;  %v36714_v37 = vand.u32 4294901760, %v34041_v46 }
 0x5d2   : > { %v34167_v63 = vpack.c.bf16 %v6240_v29, %v6233_v0  ;;  %v6254_v10 = vand.u32 4294901760, %v6253_v17  ;;  %v6907_v25 = vand.u32 4294901760, %v6906_v9  ;;  %v34170_v28 = vpack.c.bf16 %v6900_v40, %v6893_v4 }
 0x5d3   : > { %v6914_v12 = vand.u32 4294901760, %v6913_v27  ;;  %v6261_v56 = vand.u32 4294901760, %v6260_v38  ;;  %v36712_v14 = vand.u32 4294901760, %v34043_v13  ;;  %v6267_v50 = vsub.f32 %v34041_v46, %v36714_v37 }
 0x5d4   : > { %v34173_v30 = vpack.c.bf16 %v6254_v10, %v6247_v59  ;;  %v36713_v11 = vand.u32 4294901760, %v34045_v55  ;;  %v36715_v0 = vand.u32 4294901760, %v34050_v8  ;;  %v36718_v38 = vand.u32 4294901760, %v34052_v32 }
 0x5d5   : > { %v34180_v29 = vpack.c.bf16 %v6914_v12, %v6907_v25  ;;  %v6920_v9 = vsub.f32 %v34043_v13, %v36712_v14  ;;  %v36723_v40 = vand.u32 4294901760, %v34054_v39  ;;  %v6268_v59 = vand.u32 4294901760, %v6267_v50 }
 0x5d6   : > { %v6927_v27 = vsub.f32 %v34045_v55, %v36713_v11  ;;  %v6274_v4 = vsub.f32 %v34050_v8, %v36715_v0  ;;  %v36724_v12 = vand.u32 4294901760, %v34056_v47  ;;  %v6281_v17 = vsub.f32 %v34052_v32, %v36718_v38 }
 0x5d7   : > { %v6921_v25 = vand.u32 4294901760, %v6920_v9  ;;  %v6934_v10 = vsub.f32 %v34054_v39, %v36723_v40  ;;  %v36727_v50 = vand.u32 4294901760, %v34061_v24  ;;  %v34201_v14 = vpack.c.bf16 %v6268_v59, %v6261_v56 }
 0x5d8   : > { %v6928_v11 = vand.u32 4294901760, %v6927_v27  ;;  %v6275_v37 = vand.u32 4294901760, %v6274_v4  ;;  %v6941_v0 = vsub.f32 %v34056_v47, %v36724_v12  ;;  %v6282_v3 = vand.u32 4294901760, %v6281_v17 }
 0x5d9   : > { %v6935_v9 = vand.u32 4294901760, %v6934_v10  ;;  %v6288_v38 = vsub.f32 %v34061_v24, %v36727_v50  ;;  %v36725_v54 = vand.u32 4294901760, %v34063_v52  ;;  %v36726_v56 = vand.u32 4294901760, %v34065_v26 }
 0x5da   : > { %v34210_v18 = vpack.c.bf16 %v6928_v11, %v6921_v25  ;;  %v6942_v40 = vand.u32 4294901760, %v6941_v0  ;;  %v36728_v59 = vand.u32 4294901760, %v34070_v15  ;;  %v34214_v27 = vpack.c.bf16 %v6282_v3, %v6275_v37 }
 0x5db   : > { %v6289_v4 = vand.u32 4294901760, %v6288_v38  ;;  %v6295_v17 = vsub.f32 %v34063_v52, %v36725_v54  ;;  %v36729_v10 = vand.u32 4294901760, %v34076_v51  ;;  %v6948_v11 = vsub.f32 %v34065_v26, %v36726_v56 }
 0x5dc   : > { %36911 = vst [vmem:[#allocation57_spill] sm:$0xff] %v34214_v27  ;;  %v34220_v12 = vpack.c.bf16 %v6942_v40, %v6935_v9  ;;  %v6955_v0 = vsub.f32 %v34070_v15, %v36728_v59  ;;  %v36736_v3 = vand.u32 4294901760, %v34078_v62  ;;  %v36734_v25 = vand.u32 4294901760, %v34080_v45 }
 0x5dd   : > { %v6296_v37 = vand.u32 4294901760, %v6295_v17  ;;  %v6302_v38 = vsub.f32 %v34076_v51, %v36729_v10  ;;  %v36735_v40 = vand.u32 4294901760, %v34085_v36  ;;  %v6949_v9 = vand.u32 4294901760, %v6948_v11 }
 0x5de   : > { %36912 = vst [vmem:[#allocation55_spill] sm:$0xff] %v34220_v12  ;;  %v6956_v54 = vand.u32 4294901760, %v6955_v0  ;;  %v6309_v56 = vsub.f32 %v34078_v62, %v36736_v3  ;;  %v6962_v17 = vsub.f32 %v34080_v45, %v36734_v25 }
 0x5df   : > { %v34237_v50 = vpack.c.bf16 %v6296_v37, %v6289_v4  ;;  %v6303_v59 = vand.u32 4294901760, %v6302_v38  ;;  %v6969_v10 = vsub.f32 %v34085_v36, %v36735_v40  ;;  %v31127_v4 = vpack.c.bf16 %v33972_v7, %v33967_v35 }
 0x5e0   : > { %v34245_v34 = vpack.c.bf16 %v6956_v54, %v6949_v9  ;;  %v6310_v22 = vand.u32 4294901760, %v6309_v56  ;;  %v6963_v11 = vand.u32 4294901760, %v6962_v17  ;;  %v31271_v37 = vpack.c.bf16 %v33982_v41, %v33977_v6 }
 0x5e1   : > { %v6970_v0 = vand.u32 4294901760, %v6969_v10  ;;  %v31130_v40 = vpack.c.bf16 %v33993_v23, %v33988_v31 }
 0x5e2   : > { %v34247_v12 = vpack.c.bf16 %v6310_v22, %v6303_v59  ;;  %v6089_v59 = vld [vmem:[%s32487_s29] sm:$0xf] }
 0x5e3   : > { %v34249_v27 = vpack.c.bf16 %v6970_v0, %v6963_v11  ;;  %v6091_v22 = vld [vmem:[%s36913_s3] sm:$0xf]  ;;  %s36986_s3 = sld [smem:[#allocation21_spill]] }
 0x64b   : > { %v6076_v38 = vpop.xlane.xlu1 %6075 }
 0x64c   : > { %v6077_v25 = vrot.slane %v6076_v38, 4 }
 0x64e   : > { %v6078_v56 = vadd.f32 %v6077_v25, %v6076_v38 }
 0x650   : > { %v6079_v10 = vrot.slane %v6078_v56, 2 }
 0x652   : > { %v6080_v9 = vadd.f32 %v6079_v10, %v6078_v56 }
 0x654   : > { %v6081_v17 = vrot.slane %v6080_v9, 1 }
 0x656   : > { %v6082_v3 = vadd.f32 %v6081_v17, %v6080_v9 }
 0x658   : > { %32187 = vpush %v6082_v3 }
 0x689   : > { %s32188_s22 = spop %32187 }
 0x68a   : > { %v6084_v38 = vstv %s32188_s22 }
 0x68b   : > { %v6085_v25 = vmul.f32 0.001953125, %v6084_v38  ;;  %v36935_v38 = vld [vmem:[#allocation45_spill] sm:$0xff] }
 0x68d   : > { %v6086_v0 = vadd.f32 1e-05, %v6085_v25 }
 0x68f   : > { %32300 = vrsqrt.f32 %v6086_v0 }
 0x699   : > { %v32301_v56 = vpop.eup %32300 }
 0x69a   : > { %v6088_v10 = vmul.f32 %v32301_v56, %v33818_v20  ;;  %v36914_v20 = vld [vmem:[#allocation57_spill] sm:$0xff]  ;;  %v36936_v56 = vld [vmem:[#allocation46_spill] sm:$0xff] }
 0x69c   : > { %v6090_v11 = vmul.f32 %v6089_v59, %v6088_v10  ;;  %v36933_v59 = vld [vmem:[#allocation43_spill] sm:$0xff] }
 0x69d   : > { %v36937_v10 = vld [vmem:[#allocation47_spill] sm:$0xff] }
 0x69e   : > { %v34286_v54 = vadd.f32 %v6091_v22, %v6090_v11  ;;  %v36932_v22 = vld [vmem:[#allocation42_spill] sm:$0xff]  ;;  %v36934_v11 = vld [vmem:[#allocation44_spill] sm:$0xff] }
 0x6a0   : > { %v34289_v9 = vand.u32 4294901760, %v34286_v54 }
 0x6a2   : > { %v34293_v3 = vsub.f32 %v34286_v54, %v34289_v9 }
 0x6a4   : > { %v34296_v17 = vand.u32 4294901760, %v34293_v3 }
 0x6a6   : > { %v6193_v0 = vsub.f32 %v34293_v3, %v34296_v17 }
 0x6a8   : > { %v34300_v25 = vand.u32 4294901760, %v6193_v0  ;;  %v36938_v0 = vld [vmem:[#allocation48_spill] sm:$0xff] }
 0x6aa   : > { %28435 = vmatmul.mubr.f32.vlgmr.msra.gmra.mrb[50].mxu1 %v34300_v25  ;;  %28645 = vmatmul.mubr.f32.vlgmr.msra.gmra.mrb[28].mxu0 %v34300_v25 }
 0x6ab   : > { %31104 = vmatpush3.bf16.msra.mxu1 %v34124_v1  ;;  %31248 = vmatpush3.bf16.msra.mxu0 %v34129_v48  ;;  %v36919_v48 = vpack.c.bf16 %v34031_v57, %v34028_v61  ;;  %v36920_v1 = vpack.c.bf16 %v34036_v5, %v34034_v58 }
 0x6ac   : > { %31105 = vmatprep.subr.bf16.mxu1 %v36810_v19  ;;  %31249 = vmatprep.subr.bf16.mxu0 %v36810_v19 }
 0x6ad   : > { %28469 = vmatprep.mubr.msk.f32.mxu1 %vm32444_vm0, %v36864_v33  ;;  %28679 = vmatprep.mubr.msk.f32.mxu0 %vm32444_vm0, %v36864_v33 }
 0x6af   : > { %31107 = vmatpush3.bf16.msra.mxu1 %v34131_v16  ;;  %31251 = vmatpush3.bf16.msra.mxu0 %v34135_v42  ;;  %v36918_v16 = vpack.c.bf16 %v34024_v43, %v34019_v53  ;;  %v36921_v42 = vpack.c.bf16 %v34041_v46, %v34039_v49 }
 0x6b0   : > { %31108 = vmatprep.subr.bf16.mxu1 %v36810_v19  ;;  %31252 = vmatprep.subr.bf16.mxu0 %v36810_v19 }
 0x6b3   : > { %31110 = vmatpush3.bf16.msra.mxu1 %v34167_v63  ;;  %31254 = vmatpush3.bf16.msra.mxu0 %v34170_v28  ;;  %v36915_v28 = vld [vmem:[#allocation55_spill] sm:$0xff]  ;;  %v36922_v63 = vpack.c.bf16 %v34045_v55, %v34043_v13 }
 0x6b4   : > { %31111 = vmatprep.subr.bf16.mxu1 %v36810_v19  ;;  %31255 = vmatprep.subr.bf16.mxu0 %v36810_v19 }
 0x6b7   : > { %31113 = vmatpush3.bf16.msra.mxu1 %v34173_v30  ;;  %31257 = vmatpush3.bf16.msra.mxu0 %v34180_v29  ;;  %v36924_v30 = vpack.c.bf16 %v34056_v47, %v34054_v39  ;;  %v36925_v29 = vpack.c.bf16 %v34063_v52, %v34061_v24 }
 0x6b8   : > { %31114 = vmatprep.subr.bf16.mxu1 %v36810_v19  ;;  %31258 = vmatprep.subr.bf16.mxu0 %v36810_v19 }
 0x6bb   : > { %31116 = vmatpush3.bf16.msra.mxu1 %v34201_v14  ;;  %31260 = vmatpush3.bf16.msra.mxu0 %v34210_v18  ;;  %v36917_v18 = vpack.c.bf16 %v34014_v60, %v34009_v2  ;;  %v36923_v14 = vpack.c.bf16 %v34052_v32, %v34050_v8 }
 0x6bc   : > { %31117 = vmatprep.subr.bf16.mxu1 %v36810_v19  ;;  %31261 = vmatprep.subr.bf16.mxu0 %v36810_v19 }
 0x6bf   : > { %31119 = vmatpush3.bf16.msra.mxu1 %v36914_v20  ;;  %31263 = vmatpush3.bf16.msra.mxu0 %v36915_v28  ;;  %v36939_v20 = vld [vmem:[#allocation49_spill] sm:$0xff]  ;;  %v36940_v28 = vld [vmem:[#allocation50_spill] sm:$0xff] }
 0x6c0   : > { %31120 = vmatprep.subr.bf16.mxu1 %v36810_v19  ;;  %31264 = vmatprep.subr.bf16.mxu0 %v36810_v19 }
 0x6c3   : > { %31122 = vmatpush3.bf16.msra.mxu1 %v34237_v50  ;;  %31266 = vmatpush3.bf16.msra.mxu0 %v34245_v34  ;;  %v36916_v34 = vpack.c.bf16 %v34003_v44, %v33998_v21  ;;  %v36927_v50 = vpack.c.bf16 %v34078_v62, %v34076_v51 }
 0x6c4   : > { %31123 = vmatprep.subr.bf16.mxu1 %v36810_v19  ;;  %31267 = vmatprep.subr.bf16.mxu0 %v36810_v19 }
 0x6c7   : > { %31125 = vmatpush3.bf16.msra.mxu1 %v34247_v12  ;;  %31269 = vmatpush3.bf16.msra.mxu0 %v34249_v27  ;;  %v36926_v12 = vpack.c.bf16 %v34070_v15, %v34065_v26  ;;  %v36928_v27 = vpack.c.bf16 %v34085_v36, %v34080_v45 }
 0x6c8   : > { %31126 = vmatprep.subr.bf16.mxu1 %v36810_v19  ;;  %31270 = vmatprep.subr.bf16.mxu0 %v36810_v19 }
 0x6ca   : > { %28470 = vmatmul.mubr.f32.vlgmr.msra.gmra.mrb[50].mxu1 %v34289_v9  ;;  %28680 = vmatmul.mubr.f32.vlgmr.msra.gmra.mrb[28].mxu0 %v34289_v9 }
 0x6cb   : > { %31128 = vmatpush3.bf16.msra.mxu1 %v31127_v4  ;;  %31272 = vmatpush3.bf16.msra.mxu0 %v31271_v37  ;;  %v36930_v4 = vld [vmem:[#allocation40_spill] sm:$0xff]  ;;  %v36931_v37 = vld [vmem:[#allocation41_spill] sm:$0xff] }
 0x6cc   : > { %31129 = vmatprep.subr.bf16.mxu1 %v36810_v19  ;;  %31273 = vmatprep.subr.bf16.mxu0 %v36810_v19 }
 0x6cd   : > { %28504 = vmatprep.mubr.msk.f32.mxu1 %vm32444_vm0, %v36864_v33  ;;  %28714 = vmatprep.mubr.msk.f32.mxu0 %vm32444_vm0, %v36864_v33 }
 0x6cf   : > { %31131 = vmatpush3.bf16.msra.mxu1 %v31130_v40  ;;  %31275 = vmatpush3.bf16.msra.mxu0 %v36916_v34  ;;  %v36929_v40 = vld [vmem:[#allocation54_spill] sm:$0xff]  ;;  %v36941_v34 = vld [vmem:[#allocation51_spill] sm:$0xff] }
 0x6d0   : > { %31132 = vmatprep.subr.bf16.mxu1 %v36810_v19  ;;  %31276 = vmatprep.subr.bf16.mxu0 %v36810_v19 }
 0x6d3   : > { %31134 = vmatpush3.bf16.msra.mxu1 %v36917_v18  ;;  %31278 = vmatpush3.bf16.msra.mxu0 %v36918_v16  ;;  %v36942_v18 = vld [vmem:[#allocation52_spill] sm:$0xff]  ;;  %v36943_v16 = vld [vmem:[#allocation53_spill] sm:$0xff] }
 0x6d4   : > { %31135 = vmatprep.subr.bf16.mxu1 %v36810_v19  ;;  %31279 = vmatprep.subr.bf16.mxu0 %v36810_v19 }
 0x6d7   : > { %31137 = vmatpush3.bf16.msra.mxu1 %v36919_v48  ;;  %31281 = vmatpush3.bf16.msra.mxu0 %v36920_v1  ;;  %v36944_v48 = vld [vmem:[#allocation56_spill] sm:$0xff]  ;;  %v36945_v1 = vand.u32 4294901760, %v33967_v35  ;;  %v36949_v35 = vand.u32 4294901760, %v33988_v31  ;;  %v36953_v31 = vand.u32 4294901760, %v34009_v2  ;;  %v36959_v2 = vand.u32 4294901760, %v34034_v58 }
 0x6d8   : > { %31138 = vmatprep.subr.bf16.mxu1 %v36810_v19  ;;  %31282 = vmatprep.subr.bf16.mxu0 %v36810_v19  ;;  %v36965_v58 = vand.u32 4294901760, %v34050_v8  ;;  %v36971_v8 = vand.u32 4294901760, %v34065_v26  ;;  %v26141_v26 = vld [vmem:[%s36786_s14 + $0x4] sm:$0xf] }
 0x6db   : > { %31140 = vmatpush3.bf16.msra.mxu1 %v36921_v42  ;;  %31284 = vmatpush3.bf16.msra.mxu0 %v36922_v63  ;;  %v36946_v42 = vand.u32 4294901760, %v33972_v7  ;;  %v36950_v7 = vand.u32 4294901760, %v33993_v23  ;;  %v36954_v23 = vand.u32 4294901760, %v34014_v60  ;;  %v36960_v60 = vand.u32 4294901760, %v34036_v5 }
 0x6dc   : > { %31141 = vmatprep.subr.bf16.mxu1 %v36810_v19  ;;  %31285 = vmatprep.subr.bf16.mxu0 %v36810_v19  ;;  %v36966_v5 = vand.u32 4294901760, %v34052_v32  ;;  %v36972_v32 = vand.u32 4294901760, %v34070_v15  ;;  %v7414_v15 = vsel %vm7412_vm4, %v26141_v26, 0 }
 0x6dd   : > { %v31175_v63 = vpack.c.bf16 %v36946_v42, %v36945_v1  ;;  %v36957_v42 = vand.u32 4294901760, %v34028_v61  ;;  %v36963_v61 = vand.u32 4294901760, %v34043_v13  ;;  %v36969_v13 = vand.u32 4294901760, %v34061_v24 }
 0x6de   : > { %v36975_v24 = vand.u32 4294901760, %v34080_v45 }
 0x6df   : > { %31143 = vmatpush3.bf16.msra.mxu1 %v36923_v14  ;;  %31287 = vmatpush3.bf16.msra.mxu0 %v36924_v30  ;;  %v36947_v14 = vand.u32 4294901760, %v33977_v6  ;;  %v36948_v30 = vand.u32 4294901760, %v33982_v41  ;;  %v36951_v6 = vand.u32 4294901760, %v33998_v21  ;;  %v36952_v41 = vand.u32 4294901760, %v34003_v44 }
 0x6e0   : > { %31144 = vmatprep.subr.bf16.mxu1 %v36810_v19  ;;  %31288 = vmatprep.subr.bf16.mxu0 %v36810_v19  ;;  %v31181_v21 = vpack.c.bf16 %v36954_v23, %v36953_v31  ;;  %v36955_v44 = vand.u32 4294901760, %v34019_v53  ;;  %v36961_v53 = vand.u32 4294901760, %v34039_v49  ;;  %v36967_v49 = vand.u32 4294901760, %v34054_v39 }
 0x6e1   : > { %v36973_v39 = vand.u32 4294901760, %v34076_v51  ;;  %v7485_v51 = vand.u32 4294901760, %v7414_v15 }
 0x6e3   : > { %31146 = vmatpush3.bf16.msra.mxu1 %v36925_v29  ;;  %31290 = vmatpush3.bf16.msra.mxu0 %v36926_v12  ;;  %v31319_v29 = vpack.c.bf16 %v36948_v30, %v36947_v14  ;;  %v31178_v12 = vpack.c.bf16 %v36950_v7, %v36949_v35  ;;  %v31328_v30 = vpack.c.bf16 %v36960_v60, %v36959_v2 }
 0x6e4   : > { %31147 = vmatprep.subr.bf16.mxu1 %v36810_v19  ;;  %31291 = vmatprep.subr.bf16.mxu0 %v36810_v19  ;;  %v31190_v7 = vpack.c.bf16 %v36966_v5, %v36965_v58 }
 0x6e7   : > { %31149 = vmatpush3.bf16.msra.mxu1 %v36927_v50  ;;  %31293 = vmatpush3.bf16.msra.mxu0 %v36928_v27  ;;  %v31322_v50 = vpack.c.bf16 %v36952_v41, %v36951_v6  ;;  %v36956_v27 = vand.u32 4294901760, %v34024_v43  ;;  %v36962_v43 = vand.u32 4294901760, %v34041_v46  ;;  %v36968_v46 = vand.u32 4294901760, %v34056_v47 }
 0x6e8   : > { %31150 = vmatprep.subr.bf16.mxu1 %v36810_v19  ;;  %31294 = vmatprep.subr.bf16.mxu0 %v36810_v19  ;;  %v31337_v41 = vpack.c.bf16 %v36972_v32, %v36971_v8  ;;  %v36974_v47 = vand.u32 4294901760, %v34078_v62  ;;  %v7486_v62 = vsub.f32 %v7414_v15, %v7485_v51  ;;  %v26145_v8 = vld [vmem:[%s36790_s8 + $0x110] sm:$0xff]  ;;  %v26146_v32 = vld [vmem:[%s36790_s8 + $0x118] sm:$0xff] }
 0x6e9   : > { %v31325_v1 = vpack.c.bf16 %v36956_v27, %v36955_v44  ;;  %v26149_v15 = vld [vmem:[%s36790_s8 + $0x130] sm:$0xff] }
 0x6ea   : > { %28505 = vmatmul.mubr.f32.vlgmr.msra.gmra.mrb[50].mxu1 %v34293_v3  ;;  %28715 = vmatmul.mubr.f32.vlgmr.msra.gmra.mrb[28].mxu0 %v34293_v3  ;;  %v7487_v45 = vand.u32 4294901760, %v7486_v62 }
 0x6eb   : > { %31152 = vmatpush3.bf16.msra.mxu1 %v36929_v40  ;;  %31296 = vmatpush3.bf16.msra.mxu0 %v36930_v4 }
 0x6ec   : > { %31153 = vmatprep.subr.bf16.mxu1 %v36810_v19  ;;  %31297 = vmatprep.subr.bf16.mxu0 %v36810_v19 }
 0x6ed   : > { %28539 = vmatprep.mubr.msk.f32.mxu1 %vm32444_vm0, %v36864_v33  ;;  %28749 = vmatprep.mubr.msk.f32.mxu0 %vm32444_vm0, %v36864_v33 }
 0x6ef   : > { %31155 = vmatpush3.bf16.msra.mxu1 %v36931_v37  ;;  %31299 = vmatpush3.bf16.msra.mxu0 %v36932_v22 }
 0x6f0   : > { %31156 = vmatprep.subr.bf16.mxu1 %v36810_v19  ;;  %31300 = vmatprep.subr.bf16.mxu0 %v36810_v19 }
 0x6f3   : > { %31158 = vmatpush3.bf16.msra.mxu1 %v36933_v59  ;;  %31302 = vmatpush3.bf16.msra.mxu0 %v36934_v11 }
 0x6f4   : > { %31159 = vmatprep.subr.bf16.mxu1 %v36810_v19  ;;  %31303 = vmatprep.subr.bf16.mxu0 %v36810_v19 }
 0x6f7   : > { %31161 = vmatpush3.bf16.msra.mxu1 %v36935_v38  ;;  %31305 = vmatpush3.bf16.msra.mxu0 %v36936_v56 }
 0x6f8   : > { %31162 = vmatprep.subr.bf16.mxu1 %v36810_v19  ;;  %31306 = vmatprep.subr.bf16.mxu0 %v36810_v19 }
 0x6fb   : > { %31164 = vmatpush3.bf16.msra.mxu1 %v36937_v10  ;;  %31308 = vmatpush3.bf16.msra.mxu0 %v36938_v0 }
 0x6fc   : > { %31165 = vmatprep.subr.bf16.mxu1 %v36810_v19  ;;  %31309 = vmatprep.subr.bf16.mxu0 %v36810_v19 }
 0x6ff   : > { %31167 = vmatpush3.bf16.msra.mxu1 %v36939_v20  ;;  %31311 = vmatpush3.bf16.msra.mxu0 %v36940_v28 }
 0x700   : > { %31168 = vmatprep.subr.bf16.mxu1 %v36810_v19  ;;  %31312 = vmatprep.subr.bf16.mxu0 %v36810_v19 }
 0x703   : > { %31170 = vmatpush3.bf16.msra.mxu1 %v36941_v34  ;;  %31314 = vmatpush3.bf16.msra.mxu0 %v36942_v18 }
 0x704   : > { %31171 = vmatprep.subr.bf16.mxu1 %v36810_v19  ;;  %31315 = vmatprep.subr.bf16.mxu0 %v36810_v19 }
 0x707   : > { %31173 = vmatpush3.bf16.msra.mxu1 %v36943_v16  ;;  %31317 = vmatpush3.bf16.msra.mxu0 %v36944_v48 }
 0x708   : > { %31174 = vmatprep.subr.bf16.mxu1 %v36810_v19  ;;  %31318 = vmatprep.subr.bf16.mxu0 %v36810_v19 }
 0x70a   : > { %28540 = vmatmul.mubr.f32.vlgmr.msra.gmra.mrb[50].mxu1 %v34296_v17  ;;  %28750 = vmatmul.mubr.f32.vlgmr.msra.gmra.mrb[28].mxu0 %v34296_v17 }
 0x70b   : > { %31176 = vmatpush3.bf16.msra.mxu1 %v31175_v63  ;;  %31320 = vmatpush3.bf16.msra.mxu0 %v31319_v29  ;;  %v36958_v63 = vand.u32 4294901760, %v34031_v57  ;;  %v31187_v29 = vpack.c.bf16 %v36962_v43, %v36961_v53  ;;  %v36964_v57 = vand.u32 4294901760, %v34045_v55  ;;  %v36970_v55 = vand.u32 4294901760, %v34063_v52 }
 0x70c   : > { %31177 = vmatprep.subr.bf16.mxu1 %v36810_v19  ;;  %31321 = vmatprep.subr.bf16.mxu0 %v36810_v19  ;;  %v36976_v52 = vand.u32 4294901760, %v34085_v36  ;;  %v7488_v36 = vsub.f32 %v7486_v62, %v7487_v45 }
 0x70d   : > { %28574 = vmatprep.mubr.msk.f32.mxu1 %vm32444_vm0, %v36864_v33  ;;  %28784 = vmatprep.mubr.msk.f32.mxu0 %vm32444_vm0, %v36864_v33  ;;  %v31184_v14 = vpack.c.bf16 %v36958_v63, %v36957_v42  ;;  %v31331_v35 = vpack.c.bf16 %v36964_v57, %v36963_v61  ;;  %v31193_v6 = vpack.c.bf16 %v36970_v55, %v36969_v13  ;;  %v6751_v57 = vld [vmem:[%s32512_s24] sm:$0xf]  ;;  %v26144_v13 = vld [vmem:[%s36790_s8 + $0x108] sm:$0xff] }
 0x70e   : > { %v31340_v31 = vpack.c.bf16 %v36976_v52, %v36975_v24  ;;  %v26148_v24 = vld [vmem:[%s36790_s8 + $0x128] sm:$0xff] }
 0x70f   : > { %31179 = vmatpush3.bf16.msra.mxu1 %v31178_v12  ;;  %31323 = vmatpush3.bf16.msra.mxu0 %v31322_v50  ;;  %v31334_v12 = vpack.c.bf16 %v36968_v46, %v36967_v49  ;;  %v31196_v50 = vpack.c.bf16 %v36974_v47, %v36973_v39  ;;  %v9241_v39 = vand.u32 4294901760, %v26145_v8  ;;  %v9244_v47 = vand.u32 4294901760, %v26146_v32 }
 0x710   : > { %31180 = vmatprep.subr.bf16.mxu1 %v36810_v19  ;;  %31324 = vmatprep.subr.bf16.mxu0 %v36810_v19  ;;  %v9250_v26 = vand.u32 4294901760, %v26148_v24 }
 0x711   : > { %v34711_v52 = vpack.c.bf16 %v9244_v47, %v9241_v39 }
 0x713   : > { %31182 = vmatpush3.bf16.msra.mxu1 %v31181_v21  ;;  %31326 = vmatpush3.bf16.msra.mxu0 %v31325_v1 }
 0x714   : > { %31183 = vmatprep.subr.bf16.mxu1 %v36810_v19  ;;  %31327 = vmatprep.subr.bf16.mxu0 %v36810_v19 }
 0x717   : > { %31185 = vmatpush3.bf16.msra.mxu1 %v31184_v14  ;;  %31329 = vmatpush3.bf16.msra.mxu0 %v31328_v30  ;;  %v26142_v14 = vld [vmem:[%s32512_s24 + $0x4] sm:$0xf] }
 0x718   : > { %31186 = vmatprep.subr.bf16.mxu1 %v36810_v19  ;;  %31330 = vmatprep.subr.bf16.mxu0 %v36810_v19  ;;  %v8320_v60 = vsel %vm7412_vm4, %v26142_v14, 0 }
 0x719   : > { %v8388_v30 = vand.u32 4294901760, %v8320_v60 }
 0x71b   : > { %31188 = vmatpush3.bf16.msra.mxu1 %v31187_v29  ;;  %31332 = vmatpush3.bf16.msra.mxu0 %v31331_v35  ;;  %v8389_v53 = vsub.f32 %v8320_v60, %v8388_v30  ;;  %v8769_v35 = vsel %vm7412_vm4, %v6751_v57, 0 }
 0x71c   : > { %31189 = vmatprep.subr.bf16.mxu1 %v36810_v19  ;;  %31333 = vmatprep.subr.bf16.mxu0 %v36810_v19  ;;  %v8837_v58 = vand.u32 4294901760, %v8769_v35 }
 0x71d   : > { %v8390_v43 = vand.u32 4294901760, %v8389_v53 }
 0x71e   : > { %v8838_v5 = vsub.f32 %v8769_v35, %v8837_v58 }
 0x71f   : > { %31191 = vmatpush3.bf16.msra.mxu1 %v31190_v7  ;;  %31335 = vmatpush3.bf16.msra.mxu0 %v31334_v12  ;;  %v8391_v29 = vsub.f32 %v8389_v53, %v8390_v43  ;;  %v26143_v12 = vld [vmem:[%s36790_s8 + $0x100] sm:$0xff] }
 0x720   : > { %31192 = vmatprep.subr.bf16.mxu1 %v36810_v19  ;;  %31336 = vmatprep.subr.bf16.mxu0 %v36810_v19  ;;  %v8839_v7 = vand.u32 4294901760, %v8838_v5  ;;  %v9235_v55 = vand.u32 4294901760, %v26143_v12 }
 0x721   : > { %v8392_v61 = vand.u32 4294901760, %v8391_v29 }
 0x722   : > { %v8840_v49 = vsub.f32 %v8838_v5, %v8839_v7 }
 0x723   : > { %31194 = vmatpush3.bf16.msra.mxu1 %v31193_v6  ;;  %31338 = vmatpush3.bf16.msra.mxu0 %v31337_v41  ;;  %v9238_v6 = vand.u32 4294901760, %v26144_v13 }
 0x724   : > { %31195 = vmatprep.subr.bf16.mxu1 %v36810_v19  ;;  %31339 = vmatprep.subr.bf16.mxu0 %v36810_v19  ;;  %v8841_v46 = vand.u32 4294901760, %v8840_v49 }
 0x725   : > { %v34705_v41 = vpack.c.bf16 %v9238_v6, %v9235_v55 }
 0x727   : > { %31197 = vmatpush3.bf16.msra.mxu1 %v31196_v50  ;;  %31341 = vmatpush3.bf16.msra.mxu0 %v31340_v31  ;;  %v26147_v50 = vld [vmem:[%s36790_s8 + $0x120] sm:$0xff] }
 0x728   : > { %31198 = vmatprep.subr.bf16.mxu1 %v36810_v19  ;;  %31342 = vmatprep.subr.bf16.mxu0 %v36810_v19  ;;  %v9247_v31 = vand.u32 4294901760, %v26147_v50 }
 0x72a   : > { %28575 = vmatmul.mubr.f32.vlgmr.msra.gmra.mrb[50].mxu1 %v34289_v9  ;;  %28785 = vmatmul.mubr.f32.vlgmr.msra.gmra.mrb[28].mxu0 %v34289_v9  ;;  %v34757_v14 = vsub.f32 %v26147_v50, %v9247_v31 }
 0x72b   : > { %31200 = vmatpush3.bf16.msra.mxu1 %v36929_v40  ;;  %31344 = vmatpush3.bf16.msra.mxu0 %v36930_v4 }
 0x72c   : > { %31201 = vmatprep.subr.bf16.mxu1 %v36810_v19  ;;  %31345 = vmatprep.subr.bf16.mxu0 %v36810_v19 }
 0x72d   : > { %28609 = vmatprep.mubr.msk.f32.mxu1 %vm32444_vm0, %v36864_v33  ;;  %28819 = vmatprep.mubr.msk.f32.mxu0 %vm32444_vm0, %v36864_v33 }
 0x72f   : > { %31203 = vmatpush3.bf16.msra.mxu1 %v36931_v37  ;;  %31347 = vmatpush3.bf16.msra.mxu0 %v36932_v22 }
 0x730   : > { %31204 = vmatprep.subr.bf16.mxu1 %v36810_v19  ;;  %31348 = vmatprep.subr.bf16.mxu0 %v36810_v19 }
 0x733   : > { %31206 = vmatpush3.bf16.msra.mxu1 %v36933_v59  ;;  %31350 = vmatpush3.bf16.msra.mxu0 %v36934_v11  ;;  %v7489_v11 = vand.u32 4294901760, %v7488_v36 }
 0x734   : > { %31207 = vmatprep.subr.bf16.mxu1 %v36810_v19  ;;  %31351 = vmatprep.subr.bf16.mxu0 %v36810_v19 }
 0x737   : > { %31209 = vmatpush3.bf16.msra.mxu1 %v36935_v38  ;;  %31353 = vmatpush3.bf16.msra.mxu0 %v36936_v56 }
 0x738   : > { %31210 = vmatprep.subr.bf16.mxu1 %v36810_v19  ;;  %31354 = vmatprep.subr.bf16.mxu0 %v36810_v19 }
 0x73b   : > { %31212 = vmatpush3.bf16.msra.mxu1 %v36937_v10  ;;  %31356 = vmatpush3.bf16.msra.mxu0 %v36938_v0  ;;  %v6750_v0 = vld [vmem:[%s36786_s14] sm:$0xf] }
 0x73c   : > { %31213 = vmatprep.subr.bf16.mxu1 %v36810_v19  ;;  %31357 = vmatprep.subr.bf16.mxu0 %v36810_v19 }
 0x73f   : > { %31215 = vmatpush3.bf16.msra.mxu1 %v36939_v20  ;;  %31359 = vmatpush3.bf16.msra.mxu0 %v36940_v28 }
 0x740   : > { %31216 = vmatprep.subr.bf16.mxu1 %v36810_v19  ;;  %31360 = vmatprep.subr.bf16.mxu0 %v36810_v19 }
 0x743   : > { %31218 = vmatpush3.bf16.msra.mxu1 %v36941_v34  ;;  %31362 = vmatpush3.bf16.msra.mxu0 %v36942_v18  ;;  %v7866_v34 = vsel %vm7412_vm4, %v6750_v0, 0 }
 0x744   : > { %31219 = vmatprep.subr.bf16.mxu1 %v36810_v19  ;;  %31363 = vmatprep.subr.bf16.mxu0 %v36810_v19 }
 0x747   : > { %31221 = vmatpush3.bf16.msra.mxu1 %v36943_v16  ;;  %31365 = vmatpush3.bf16.msra.mxu0 %v36944_v48  ;;  %v7937_v16 = vand.u32 4294901760, %v7866_v34 }
 0x748   : > { %28822 = vmatprep.subr.mxu1 %v36864_v33  ;;  %29152 = vmatprep.subr.mxu0 %v36864_v33 }
 0x749   : > { %v7938_v23 = vsub.f32 %v7866_v34, %v7937_v16  ;;  %v26155_v34 = vld [vmem:[%s36790_s8 + $0x160] sm:$0xff] }
 0x74a   : > { %28610 = vmatmul.mubr.f32.vlgmr.msra.gmra.mrb[50].mxu1 %v34289_v9  ;;  %28820 = vmatmul.mubr.f32.vlgmr.msra.gmra.mrb[28].mxu0 %v34289_v9 }
 0x74b   : > { %28824 = vmatprep.mubr.msk.f32.mxu1 %vm32444_vm0, %v36864_v33  ;;  %29154 = vmatprep.mubr.msk.f32.mxu0 %vm32444_vm0, %v36864_v33  ;;  %v7939_v44 = vand.u32 4294901760, %v7938_v23 }
 0x74d   : > { %v7940_v1 = vsub.f32 %v7938_v23, %v7939_v44 }
 0x74f   : > { %v7941_v63 = vand.u32 4294901760, %v7940_v1 }
 0x81d   : > { %v6746_v40 = vpop.f32.mrb[50].mxu1  ;;  %v7406_v4 = vpop.f32.mrb[28].mxu0 }
 0x81e   : > { %v7417_v37 = vsel %vm6058_vm3, %v7406_v4, 0  ;;  %v28611_v22 = vpop.f32.mrb[51].mxu1  ;;  %v28821_v59 = vpop.f32.mrb[29].mxu0  ;;  %v7869_v18 = vsel %vm6058_vm3, %v6746_v40, 0  ;;  %v26151_v40 = vld [vmem:[%s36790_s8 + $0x140] sm:$0xff]  ;;  %v26152_v4 = vld [vmem:[%s36790_s8 + $0x148] sm:$0xff] }
 0x81f   : > { %v34581_v38 = vand.u32 4294901760, %v7417_v37  ;;  %v34606_v48 = vand.u32 4294901760, %v7869_v18  ;;  %v9259_v22 = vand.u32 4294901760, %v26151_v40  ;;  %v9262_v59 = vand.u32 4294901760, %v26152_v4 }
 0x821   : > { %v34584_v56 = vsub.f32 %v7417_v37, %v34581_v38  ;;  %28823 = vmatpush3.msra.mxu1 %v34581_v38  ;;  %v34613_v21 = vsub.f32 %v7869_v18, %v34606_v48  ;;  %v34735_v0 = vpack.c.bf16 %v9262_v59, %v9259_v22  ;;  %v34740_v18 = vld [vmem:[%s36790_s8 + $0x168] sm:$0xff] }
 0x822   : > { %28825 = vmatmul.mubr.f32.vlgmr.msra.gmra.mrb[52].mxu1 %v7489_v11  ;;  %28827 = vmatprep.subr.mxu1 %v36864_v33  ;;  %v26153_v11 = vld [vmem:[%s36790_s8 + $0x150] sm:$0xff]  ;;  %v9274_v1 = vand.u32 4294901760, %v34740_v18 }
 0x823   : > { %v34589_v10 = vand.u32 4294901760, %v34584_v56  ;;  %28829 = vmatprep.mubr.msk.f32.mxu1 %vm32444_vm0, %v36864_v33  ;;  %v34620_v27 = vand.u32 4294901760, %v34613_v21 }
 0x825   : > { %v7499_v20 = vsub.f32 %v34584_v56, %v34589_v10  ;;  %v7951_v42 = vsub.f32 %v34613_v21, %v34620_v27 }
 0x827   : > { %v34596_v28 = vand.u32 4294901760, %v7499_v20  ;;  %v7952_v2 = vand.u32 4294901760, %v7951_v42  ;;  %v9265_v20 = vand.u32 4294901760, %v26153_v11  ;;  %v26157_v42 = vld [vmem:[%s36790_s8 + $0x170] sm:$0xff] }
 0x829   : > { %28828 = vmatpush3.msra.mxu1 %v34596_v28 }
 0x82a   : > { %28830 = vmatmul.mubr.f32.vlgmr.msra.gmra.mrb[54].mxu1 %v7485_v51  ;;  %28832 = vmatprep.subr.mxu1 %v36864_v33 }
 0x82b   : > { %28833 = vmatpush3.msra.mxu1 %v34584_v56  ;;  %28834 = vmatprep.mubr.msk.f32.mxu1 %vm32444_vm0, %v36864_v33 }
 0x82c   : > { %28837 = vmatprep.subr.mxu1 %v36864_v33 }
 0x82e   : > { %28835 = vmatmul.mubr.f32.vlgmr.msra.gmra.mrb[56].mxu1 %v7486_v62  ;;  %v34719_v62 = vpack.c.bf16 %v9250_v26, %v9247_v31 }
 0x82f   : > { %28838 = vmatpush3.msra.mxu1 %v34581_v38  ;;  %28839 = vmatprep.mubr.msk.f32.mxu1 %vm32444_vm0, %v36864_v33 }
 0x830   : > { %28842 = vmatprep.subr.mxu1 %v36864_v33 }
 0x832   : > { %28840 = vmatmul.mubr.f32.vlgmr.msra.gmra.mrb[58].mxu1 %v7487_v45  ;;  %v9253_v45 = vand.u32 4294901760, %v26149_v15 }
 0x833   : > { %28843 = vmatpush3.msra.mxu1 %v34589_v10  ;;  %28844 = vmatprep.mubr.msk.f32.mxu1 %vm32444_vm0, %v36864_v33 }
 0x834   : > { %28847 = vmatprep.subr.mxu1 %v36864_v33  ;;  %v34774_v35 = vsub.f32 %v26149_v15, %v9253_v45  ;;  %v34804_v15 = vsub.f32 %v26153_v11, %v9265_v20 }
 0x836   : > { %28845 = vmatmul.mubr.f32.vlgmr.msra.gmra.mrb[60].mxu1 %v7485_v51  ;;  %v9370_v31 = vand.u32 4294901760, %v34774_v35 }
 0x837   : > { %28848 = vmatpush3.msra.mxu1 %v34581_v38  ;;  %28849 = vmatprep.mubr.msk.f32.mxu1 %vm32444_vm0, %v36864_v33 }
 0x838   : > { %28852 = vmatprep.subr.mxu1 %v36864_v33 }
 0x83a   : > { %28850 = vmatmul.mubr.f32.vlgmr.msra.gmra.mrb[62].mxu1 %v7485_v51  ;;  %v26150_v51 = vld [vmem:[%s36790_s8 + $0x138] sm:$0xff] }
 0x83b   : > { %28853 = vmatpush3.msra.mxu1 %v34606_v48  ;;  %28854 = vmatprep.mubr.msk.f32.mxu1 %vm32444_vm0, %v36864_v33  ;;  %v9256_v36 = vand.u32 4294901760, %v26150_v51 }
 0x83c   : > { %28857 = vmatprep.subr.mxu1 %v36864_v33 }
 0x83d   : > { %v34725_v37 = vpack.c.bf16 %v9256_v36, %v9253_v45 }
 0x83e   : > { %28855 = vmatmul.mubr.f32.vlgmr.msra.gmra.mrb[64].mxu1 %v7941_v63  ;;  %v34755_v63 = vld [vmem:[%s36790_s8 + $0x178] sm:$0xff] }
 0x83f   : > { %28858 = vmatpush3.msra.mxu1 %v7952_v2  ;;  %28859 = vmatprep.mubr.msk.f32.mxu1 %vm32444_vm0, %v36864_v33  ;;  %v9280_v57 = vand.u32 4294901760, %v34755_v63 }
 0x840   : > { %28862 = vmatprep.subr.mxu1 %v36864_v33 }
 0x842   : > { %28860 = vmatmul.mubr.f32.vlgmr.msra.gmra.mrb[66].mxu1 %v7937_v16 }
 0x843   : > { %28863 = vmatpush3.msra.mxu1 %v34613_v21  ;;  %28864 = vmatprep.mubr.msk.f32.mxu1 %vm32444_vm0, %v36864_v33 }
 0x844   : > { %28867 = vmatprep.subr.mxu1 %v36864_v33 }
 0x846   : > { %28865 = vmatmul.mubr.f32.vlgmr.msra.gmra.mrb[68].mxu1 %v7938_v23 }
 0x847   : > { %28868 = vmatpush3.msra.mxu1 %v34606_v48  ;;  %28869 = vmatprep.mubr.msk.f32.mxu1 %vm32444_vm0, %v36864_v33 }
 0x848   : > { %28872 = vmatprep.subr.mxu1 %v36864_v33 }
 0x84a   : > { %28870 = vmatmul.mubr.f32.vlgmr.msra.gmra.mrb[70].mxu1 %v7939_v44 }
 0x84b   : > { %28873 = vmatpush3.msra.mxu1 %v34620_v27  ;;  %28874 = vmatprep.mubr.msk.f32.mxu1 %vm32444_vm0, %v36864_v33 }
 0x84c   : > { %28877 = vmatprep.subr.mxu1 %v36864_v33 }
 0x84e   : > { %28875 = vmatmul.mubr.f32.vlgmr.msra.gmra.mrb[72].mxu1 %v7937_v16 }
 0x84f   : > { %28878 = vmatpush3.msra.mxu1 %v34606_v48  ;;  %28879 = vmatprep.mubr.msk.f32.mxu1 %vm32444_vm0, %v36864_v33 }
 0x850   : > { %28882 = vmatprep.subr.mxu1 %v36864_v33 }
 0x852   : > { %28880 = vmatmul.mubr.f32.vlgmr.msra.gmra.mrb[74].mxu1 %v7937_v16  ;;  %v34742_v16 = vsub.f32 %v26145_v8, %v9241_v39  ;;  %v34792_v8 = vsub.f32 %v26152_v4, %v9262_v59  ;;  %v9371_v59 = vsub.f32 %v34774_v35, %v9370_v31 }
 0x853   : > { %28883 = vmatpush3.msra.mxu1 %v34581_v38  ;;  %28884 = vmatprep.mubr.msk.f32.mxu1 %vm32444_vm0, %v36864_v33 }
 0x854   : > { %28887 = vmatprep.subr.mxu1 %v36864_v33 }
 0x856   : > { %28885 = vmatmul.mubr.f32.vlgmr.msra.gmra.mrb[76].mxu1 %v8392_v61  ;;  %v9277_v61 = vand.u32 4294901760, %v26157_v42 }
 0x857   : > { %28888 = vmatpush3.msra.mxu1 %v34596_v28  ;;  %28889 = vmatprep.mubr.msk.f32.mxu1 %vm32444_vm0, %v36864_v33 }
 0x858   : > { %28892 = vmatprep.subr.mxu1 %v36864_v33 }
 0x85a   : > { %28890 = vmatmul.mubr.f32.vlgmr.msra.gmra.mrb[78].mxu1 %v8388_v30 }
 0x85b   : > { %28893 = vmatpush3.msra.mxu1 %v34584_v56  ;;  %28894 = vmatprep.mubr.msk.f32.mxu1 %vm32444_vm0, %v36864_v33  ;;  %v34730_v56 = vsub.f32 %v26143_v12, %v9235_v55  ;;  %v34785_v12 = vpack.c.bf16 %v9280_v57, %v9277_v61 }
 0x85c   : > { %28897 = vmatprep.subr.mxu1 %v36864_v33 }
 0x85d   : > { %v9328_v23 = vand.u32 4294901760, %v34730_v56 }
 0x85e   : > { %28895 = vmatmul.mubr.f32.vlgmr.msra.gmra.mrb[80].mxu1 %v8389_v53 }
 0x85f   : > { %28898 = vmatpush3.msra.mxu1 %v34581_v38  ;;  %28899 = vmatprep.mubr.msk.f32.mxu1 %vm32444_vm0, %v36864_v33 }
 0x860   : > { %28902 = vmatprep.subr.mxu1 %v36864_v33 }
 0x862   : > { %28900 = vmatmul.mubr.f32.vlgmr.msra.gmra.mrb[82].mxu1 %v8390_v43  ;;  %v34767_v43 = vsub.f32 %v26148_v24, %v9250_v26 }
 0x863   : > { %28903 = vmatpush3.msra.mxu1 %v34589_v10  ;;  %28904 = vmatprep.mubr.msk.f32.mxu1 %vm32444_vm0, %v36864_v33  ;;  %v34732_v10 = vsub.f32 %v26144_v13, %v9238_v6  ;;  %v9356_v13 = vand.u32 4294901760, %v34757_v14  ;;  %v34790_v6 = vsub.f32 %v26151_v40, %v9259_v22  ;;  %v9391_v40 = vand.u32 4294901760, %v34792_v8 }
 0x864   : > { %28907 = vmatprep.subr.mxu1 %v36864_v33  ;;  %v9363_v55 = vand.u32 4294901760, %v34767_v43 }
 0x865   : > { %v9357_v50 = vsub.f32 %v34757_v14, %v9356_v13 }
 0x866   : > { %28905 = vmatmul.mubr.f32.vlgmr.msra.gmra.mrb[84].mxu1 %v8388_v30  ;;  %v9364_v24 = vsub.f32 %v34767_v43, %v9363_v55 }
 0x867   : > { %28908 = vmatpush3.msra.mxu1 %v34581_v38  ;;  %28909 = vmatprep.mubr.msk.f32.mxu1 %vm32444_vm0, %v36864_v33  ;;  %v26154_v38 = vld [vmem:[%s36790_s8 + $0x158] sm:$0xff]  ;;  %v9358_v4 = vand.u32 4294901760, %v9357_v50 }
 0x868   : > { %28912 = vmatprep.subr.mxu1 %v36864_v33  ;;  %v9268_v28 = vand.u32 4294901760, %v26154_v38  ;;  %v9365_v22 = vand.u32 4294901760, %v9364_v24 }
 0x86a   : > { %28910 = vmatmul.mubr.f32.vlgmr.msra.gmra.mrb[86].mxu1 %v8388_v30  ;;  %v34749_v44 = vpack.c.bf16 %v9268_v28, %v9265_v20  ;;  %v9342_v30 = vand.u32 4294901760, %v34742_v16  ;;  %v9392_v20 = vsub.f32 %v34792_v8, %v9391_v40 }
 0x86b   : > { %28913 = vmatpush3.msra.mxu1 %v34606_v48  ;;  %28914 = vmatprep.mubr.msk.f32.mxu1 %vm32444_vm0, %v36864_v33 }
 0x86c   : > { %28917 = vmatprep.subr.mxu1 %v36864_v33 }
 0x86e   : > { %28915 = vmatmul.mubr.f32.vlgmr.msra.gmra.mrb[88].mxu1 %v8841_v46  ;;  %v34782_v46 = vsub.f32 %v26150_v51, %v9256_v36  ;;  %v34806_v51 = vsub.f32 %v26154_v38, %v9268_v28  ;;  %v9384_v36 = vand.u32 4294901760, %v34790_v6  ;;  %v9398_v28 = vand.u32 4294901760, %v34804_v15 }
 0x86f   : > { %28918 = vmatpush3.msra.mxu1 %v7952_v2  ;;  %28919 = vmatprep.mubr.msk.f32.mxu1 %vm32444_vm0, %v36864_v33  ;;  %v9329_v2 = vsub.f32 %v34730_v56, %v9328_v23 }
 0x870   : > { %28922 = vmatprep.subr.mxu1 %v36864_v33  ;;  %v9377_v26 = vand.u32 4294901760, %v34782_v46  ;;  %v9385_v38 = vsub.f32 %v34790_v6, %v9384_v36 }
 0x872   : > { %28920 = vmatmul.mubr.f32.vlgmr.msra.gmra.mrb[90].mxu1 %v8837_v58  ;;  %v9378_v11 = vsub.f32 %v34782_v46, %v9377_v26 }
 0x873   : > { %28923 = vmatpush3.msra.mxu1 %v34613_v21  ;;  %28924 = vmatprep.mubr.msk.f32.mxu1 %vm32444_vm0, %v36864_v33  ;;  %v9335_v21 = vand.u32 4294901760, %v34732_v10 }
 0x874   : > { %28927 = vmatprep.subr.mxu1 %v36864_v33 }
 0x875   : > { %v9336_v60 = vsub.f32 %v34732_v10, %v9335_v21 }
 0x876   : > { %28925 = vmatmul.mubr.f32.vlgmr.msra.gmra.mrb[92].mxu1 %v8838_v5 }
 0x877   : > { %28928 = vmatpush3.msra.mxu1 %v34606_v48  ;;  %28929 = vmatprep.mubr.msk.f32.mxu1 %vm32444_vm0, %v36864_v33  ;;  %v9337_v5 = vand.u32 4294901760, %v9336_v60  ;;  %v34831_v60 = vsub.f32 %v34740_v18, %v9274_v1  ;;  %v34843_v18 = vsub.f32 %v34755_v63, %v9280_v57 }
 0x878   : > { %28932 = vmatprep.subr.mxu1 %v36864_v33 }
 0x87a   : > { %28930 = vmatmul.mubr.f32.vlgmr.msra.gmra.mrb[94].mxu1 %v8839_v7  ;;  %v9343_v7 = vsub.f32 %v34742_v16, %v9342_v30 }
 0x87b   : > { %28933 = vmatpush3.msra.mxu1 %v34620_v27  ;;  %28934 = vmatprep.mubr.msk.f32.mxu1 %vm32444_vm0, %v36864_v33  ;;  %v9271_v27 = vand.u32 4294901760, %v26155_v34 }
 0x87c   : > { %28937 = vmatprep.subr.mxu1 %v36864_v33  ;;  %v9344_v39 = vand.u32 4294901760, %v9343_v7  ;;  %v9386_v7 = vand.u32 4294901760, %v9385_v38 }
 0x87d   : > { %v34770_v29 = vpack.c.bf16 %v9274_v1, %v9271_v27 }
 0x87e   : > { %28935 = vmatmul.mubr.f32.vlgmr.msra.gmra.mrb[96].mxu1 %v8837_v58 }
 0x87f   : > { %28938 = vmatpush3.msra.mxu1 %v34606_v48  ;;  %28939 = vmatprep.mubr.msk.f32.mxu1 %vm32444_vm0, %v36864_v33  ;;  %v34744_v48 = vsub.f32 %v26146_v32, %v9244_v47 }
 0x880   : > { %31366 = vmatprep.subr.bf16.mxu1 %v36810_v19 }
 0x881   : > { %v9349_v53 = vand.u32 4294901760, %v34744_v48 }
 0x882   : > { %28940 = vmatmul.mubr.f32.vlgmr.msra.gmra.mrb[98].mxu1 %v8837_v58  ;;  %v9330_v58 = vand.u32 4294901760, %v9329_v2  ;;  %v9405_v2 = vand.u32 4294901760, %v34806_v51 }
 0x883   : > { %31368 = vmatpush3.bf16.msra.mxu1 %v34705_v41  ;;  %28974 = vmatprep.mubr.msk.f32.mxu1 %vm32444_vm0, %v36864_v33  ;;  %v9350_v49 = vsub.f32 %v34744_v48, %v9349_v53 }
 0x884   : > { %31369 = vmatprep.subr.bf16.mxu1 %v36810_v19  ;;  %v31391_v32 = vpack.c.bf16 %v9337_v5, %v9330_v58  ;;  %v31397_v58 = vpack.c.bf16 %v9365_v22, %v9358_v4  ;;  %v9372_v5 = vand.u32 4294901760, %v9371_v59  ;;  %v9433_v4 = vand.u32 4294901760, %v34843_v18 }
 0x885   : > { %v9351_v47 = vand.u32 4294901760, %v9350_v49  ;;  %v9393_v49 = vand.u32 4294901760, %v9392_v20 }
 0x886   : > { %v9434_v20 = vsub.f32 %v34843_v18, %v9433_v4 }
 0x887   : > { %31371 = vmatpush3.bf16.msra.mxu1 %v34711_v52  ;;  %v31394_v45 = vpack.c.bf16 %v9351_v47, %v9344_v39  ;;  %v9406_v39 = vsub.f32 %v34806_v51, %v9405_v2 }
 0x888   : > { %31372 = vmatprep.subr.bf16.mxu1 %v36810_v19 }
 0x889   : > { %v9407_v24 = vand.u32 4294901760, %v9406_v39  ;;  %v31421_v39 = vpack.c.bf16 %v34767_v43, %v34757_v14  ;;  %v31475_v14 = vpack.c.bf16 %v9391_v40, %v9384_v36 }
 0x88b   : > { %31374 = vmatpush3.bf16.msra.mxu1 %v34719_v62 }
 0x88c   : > { %31375 = vmatprep.subr.bf16.mxu1 %v36810_v19 }
 0x88f   : > { %31377 = vmatpush3.bf16.msra.mxu1 %v34725_v37 }
 0x890   : > { %31378 = vmatprep.subr.bf16.mxu1 %v36810_v19 }
 0x893   : > { %31380 = vmatpush3.bf16.msra.mxu1 %v34735_v0 }
 0x894   : > { %31381 = vmatprep.subr.bf16.mxu1 %v36810_v19 }
 0x897   : > { %31383 = vmatpush3.bf16.msra.mxu1 %v34749_v44 }
 0x898   : > { %31384 = vmatprep.subr.bf16.mxu1 %v36810_v19 }
 0x89b   : > { %31386 = vmatpush3.bf16.msra.mxu1 %v34770_v29 }
 0x89c   : > { %31387 = vmatprep.subr.bf16.mxu1 %v36810_v19 }
 0x89f   : > { %31389 = vmatpush3.bf16.msra.mxu1 %v34785_v12 }
 0x8a0   : > { %31390 = vmatprep.subr.bf16.mxu1 %v36810_v19 }
 0x8a2   : > { %28975 = vmatmul.mubr.f32.vlgmr.msra.gmra.mrb[100].mxu1 %v34300_v25  ;;  %v34820_v25 = vsub.f32 %v26155_v34, %v9271_v27  ;;  %v9379_v34 = vand.u32 4294901760, %v9378_v11  ;;  %v34834_v27 = vsub.f32 %v26157_v42, %v9277_v61  ;;  %v9419_v42 = vand.u32 4294901760, %v34831_v60 }
 0x8a3   : > { %31392 = vmatpush3.bf16.msra.mxu1 %v31391_v32  ;;  %29009 = vmatprep.mubr.msk.f32.mxu1 %vm32444_vm0, %v36864_v33  ;;  %v9399_v32 = vsub.f32 %v34804_v15, %v9398_v28  ;;  %v31403_v61 = vpack.c.bf16 %v9393_v49, %v9386_v7  ;;  %v31415_v49 = vpack.c.bf16 %v34732_v10, %v34730_v56 }
 0x8a4   : > { %31393 = vmatprep.subr.bf16.mxu1 %v36810_v19  ;;  %v31400_v1 = vpack.c.bf16 %v9379_v34, %v9372_v5  ;;  %v9412_v47 = vand.u32 4294901760, %v34820_v25  ;;  %v9420_v63 = vsub.f32 %v34831_v60, %v9419_v42  ;;  %v9426_v57 = vand.u32 4294901760, %v34834_v27 }
 0x8a5   : > { %v9400_v50 = vand.u32 4294901760, %v9399_v32  ;;  %v9435_v34 = vand.u32 4294901760, %v9434_v20  ;;  %v31418_v32 = vpack.c.bf16 %v34744_v48, %v34742_v16 }
 0x8a6   : > { %v9421_v11 = vand.u32 4294901760, %v9420_v63  ;;  %v9427_v38 = vsub.f32 %v34834_v27, %v9426_v57 }
 0x8a7   : > { %31395 = vmatpush3.bf16.msra.mxu1 %v31394_v45  ;;  %v9413_v45 = vsub.f32 %v34820_v25, %v9412_v47  ;;  %v31406_v22 = vpack.c.bf16 %v9407_v24, %v9400_v50  ;;  %v31430_v50 = vpack.c.bf16 %v34806_v51, %v34804_v15  ;;  %v31433_v24 = vpack.c.bf16 %v34831_v60, %v34820_v25 }
 0x8a8   : > { %31396 = vmatprep.subr.bf16.mxu1 %v36810_v19  ;;  %v9428_v5 = vand.u32 4294901760, %v9427_v38  ;;  %v31463_v38 = vpack.c.bf16 %v9335_v21, %v9328_v23  ;;  %v31484_v15 = vpack.c.bf16 %v9433_v4, %v9426_v57 }
 0x8a9   : > { %v9414_v59 = vand.u32 4294901760, %v9413_v45  ;;  %v31436_v45 = vpack.c.bf16 %v34843_v18, %v34834_v27 }
 0x8aa   : > { %v31412_v7 = vpack.c.bf16 %v9435_v34, %v9428_v5  ;;  %v31466_v34 = vpack.c.bf16 %v9349_v53, %v9342_v30  ;;  %v31472_v30 = vpack.c.bf16 %v9377_v26, %v9370_v31 }
 0x8ab   : > { %31398 = vmatpush3.bf16.msra.mxu1 %v31397_v58  ;;  %v31409_v58 = vpack.c.bf16 %v9421_v11, %v9414_v59 }
 0x8ac   : > { %31399 = vmatprep.subr.bf16.mxu1 %v36810_v19 }
 0x8af   : > { %31401 = vmatpush3.bf16.msra.mxu1 %v31400_v1  ;;  %v31424_v1 = vpack.c.bf16 %v34782_v46, %v34774_v35  ;;  %v31478_v35 = vpack.c.bf16 %v9405_v2, %v9398_v28 }
 0x8b0   : > { %31402 = vmatprep.subr.bf16.mxu1 %v36810_v19 }
 0x8b3   : > { %31404 = vmatpush3.bf16.msra.mxu1 %v31403_v61  ;;  %v31427_v61 = vpack.c.bf16 %v34792_v8, %v34790_v6  ;;  %v31481_v6 = vpack.c.bf16 %v9419_v42, %v9412_v47 }
 0x8b4   : > { %31405 = vmatprep.subr.bf16.mxu1 %v36810_v19 }
 0x8b7   : > { %31407 = vmatpush3.bf16.msra.mxu1 %v31406_v22 }
 0x8b8   : > { %31408 = vmatprep.subr.bf16.mxu1 %v36810_v19 }
 0x8bb   : > { %31410 = vmatpush3.bf16.msra.mxu1 %v31409_v58 }
 0x8bc   : > { %31411 = vmatprep.subr.bf16.mxu1 %v36810_v19 }
 0x8bf   : > { %31413 = vmatpush3.bf16.msra.mxu1 %v31412_v7 }
 0x8c0   : > { %31414 = vmatprep.subr.bf16.mxu1 %v36810_v19 }
 0x8c2   : > { %29010 = vmatmul.mubr.f32.vlgmr.msra.gmra.mrb[100].mxu1 %v34289_v9 }
 0x8c3   : > { %31416 = vmatpush3.bf16.msra.mxu1 %v31415_v49  ;;  %29044 = vmatprep.mubr.msk.f32.mxu1 %vm32444_vm0, %v36864_v33 }
 0x8c4   : > { %31417 = vmatprep.subr.bf16.mxu1 %v36810_v19 }
 0x8c7   : > { %31419 = vmatpush3.bf16.msra.mxu1 %v31418_v32 }
 0x8c8   : > { %31420 = vmatprep.subr.bf16.mxu1 %v36810_v19 }
 0x8cb   : > { %31422 = vmatpush3.bf16.msra.mxu1 %v31421_v39 }
 0x8cc   : > { %31423 = vmatprep.subr.bf16.mxu1 %v36810_v19 }
 0x8cf   : > { %31425 = vmatpush3.bf16.msra.mxu1 %v31424_v1 }
 0x8d0   : > { %31426 = vmatprep.subr.bf16.mxu1 %v36810_v19 }
 0x8d3   : > { %31428 = vmatpush3.bf16.msra.mxu1 %v31427_v61 }
 0x8d4   : > { %31429 = vmatprep.subr.bf16.mxu1 %v36810_v19 }
 0x8d7   : > { %31431 = vmatpush3.bf16.msra.mxu1 %v31430_v50 }
 0x8d8   : > { %31432 = vmatprep.subr.bf16.mxu1 %v36810_v19 }
 0x8db   : > { %31434 = vmatpush3.bf16.msra.mxu1 %v31433_v24 }
 0x8dc   : > { %31435 = vmatprep.subr.bf16.mxu1 %v36810_v19 }
 0x8df   : > { %31437 = vmatpush3.bf16.msra.mxu1 %v31436_v45 }
 0x8e0   : > { %31438 = vmatprep.subr.bf16.mxu1 %v36810_v19 }
 0x8e2   : > { %29045 = vmatmul.mubr.f32.vlgmr.msra.gmra.mrb[100].mxu1 %v34293_v3 }
 0x8e3   : > { %31440 = vmatpush3.bf16.msra.mxu1 %v34705_v41  ;;  %29079 = vmatprep.mubr.msk.f32.mxu1 %vm32444_vm0, %v36864_v33 }
 0x8e4   : > { %31441 = vmatprep.subr.bf16.mxu1 %v36810_v19 }
 0x8e7   : > { %31443 = vmatpush3.bf16.msra.mxu1 %v34711_v52 }
 0x8e8   : > { %31444 = vmatprep.subr.bf16.mxu1 %v36810_v19 }
 0x8eb   : > { %31446 = vmatpush3.bf16.msra.mxu1 %v34719_v62 }
 0x8ec   : > { %31447 = vmatprep.subr.bf16.mxu1 %v36810_v19 }
 0x8ef   : > { %31449 = vmatpush3.bf16.msra.mxu1 %v34725_v37 }
 0x8f0   : > { %31450 = vmatprep.subr.bf16.mxu1 %v36810_v19 }
 0x8f3   : > { %31452 = vmatpush3.bf16.msra.mxu1 %v34735_v0 }
 0x8f4   : > { %31453 = vmatprep.subr.bf16.mxu1 %v36810_v19 }
 0x8f5   : > { %v7491_v3 = vpop.f32.mrb[52].mxu1 }
 0x8f6   : > { %v28826_v63 = vpop.f32.mrb[53].mxu1 }
 0x8f7   : > { %31455 = vmatpush3.bf16.msra.mxu1 %v34749_v44 }
 0x8f8   : > { %31456 = vmatprep.subr.bf16.mxu1 %v36810_v19 }
 0x8fb   : > { %31458 = vmatpush3.bf16.msra.mxu1 %v34770_v29 }
 0x8fc   : > { %31459 = vmatprep.subr.bf16.mxu1 %v36810_v19 }
 0x8fd   : > { %v7567_v22 = vpop.f32.mrb[54].mxu1 }
 0x8fe   : > { %v7568_v59 = vadd.f32 %v7567_v22, %v7491_v3  ;;  %v28831_v11 = vpop.f32.mrb[55].mxu1 }
 0x8ff   : > { %31461 = vmatpush3.bf16.msra.mxu1 %v34785_v12 }
 0x900   : > { %31462 = vmatprep.subr.bf16.mxu1 %v36810_v19 }
 0x901   : > { %v7641_v20 = vpop.f32.mrb[56].mxu1 }
 0x902   : > { %v7642_v58 = vadd.f32 %v7641_v20, %v7568_v59  ;;  %29080 = vmatmul.mubr.f32.vlgmr.msra.gmra.mrb[100].mxu1 %v34296_v17  ;;  %v28836_v5 = vpop.f32.mrb[57].mxu1  ;;  %v31469_v17 = vpack.c.bf16 %v9363_v55, %v9356_v13 }
 0x903   : > { %31464 = vmatpush3.bf16.msra.mxu1 %v31463_v38  ;;  %29114 = vmatprep.mubr.msk.f32.mxu1 %vm32444_vm0, %v36864_v33 }
 0x904   : > { %31465 = vmatprep.subr.bf16.mxu1 %v36810_v19 }
 0x905   : > { %v7715_v56 = vpop.f32.mrb[58].mxu1 }
 0x906   : > { %v7716_v10 = vadd.f32 %v7715_v56, %v7642_v58  ;;  %v28841_v23 = vpop.f32.mrb[59].mxu1 }
 0x907   : > { %31467 = vmatpush3.bf16.msra.mxu1 %v31466_v34 }
 0x908   : > { %31468 = vmatprep.subr.bf16.mxu1 %v36810_v19 }
 0x909   : > { %v7789_v16 = vpop.f32.mrb[60].mxu1 }
 0x90a   : > { %v7790_v21 = vadd.f32 %v7789_v16, %v7716_v10  ;;  %v28846_v48 = vpop.f32.mrb[61].mxu1 }
 0x90b   : > { %31470 = vmatpush3.bf16.msra.mxu1 %v31469_v17 }
 0x90c   : > { %31471 = vmatprep.subr.bf16.mxu1 %v36810_v19 }
 0x90d   : > { %v7861_v53 = vpop.f32.mrb[62].mxu1 }
 0x90e   : > { %v7862_v7 = vadd.f32 %v7861_v53, %v7790_v21  ;;  %v28851_v49 = vpop.f32.mrb[63].mxu1  ;;  %v26159_v53 = vld [vmem:[%s36786_s14 + $0x8] sm:$0xf] }
 0x90f   : > { %31473 = vmatpush3.bf16.msra.mxu1 %v31472_v30  ;;  %v10795_v30 = vld [vmem:[%s32517_s30] sm:$0xf] }
 0x910   : > { %31474 = vmatprep.subr.bf16.mxu1 %v36810_v19  ;;  %10798 = vperm.xlu1 %32293, %v10795_v30  }
 0x911   : > { %v7943_v43 = vpop.f32.mrb[64].mxu1 }
 0x912   : > { %v7944_v13 = vadd.f32 %v7943_v43, %v7862_v7  ;;  %v28856_v55 = vpop.f32.mrb[65].mxu1  ;;  %v9878_v7 = vsel %vm7412_vm4, %v26159_v53, 0 }
 0x913   : > { %31476 = vmatpush3.bf16.msra.mxu1 %v31475_v14  ;;  %v9949_v49 = vand.u32 4294901760, %v9878_v7 }
 0x914   : > { %31477 = vmatprep.subr.bf16.mxu1 %v36810_v19 }
 0x915   : > { %v8019_v46 = vpop.f32.mrb[66].mxu1  ;;  %v9950_v14 = vsub.f32 %v9878_v7, %v9949_v49 }
 0x916   : > { %v8020_v31 = vadd.f32 %v8019_v46, %v7944_v13  ;;  %v28861_v26 = vpop.f32.mrb[67].mxu1 }
 0x917   : > { %31479 = vmatpush3.bf16.msra.mxu1 %v31478_v35  ;;  %v9951_v43 = vand.u32 4294901760, %v9950_v14 }
 0x918   : > { %31480 = vmatprep.subr.bf16.mxu1 %v36810_v19 }
 0x919   : > { %v8093_v8 = vpop.f32.mrb[68].mxu1  ;;  %v9952_v13 = vsub.f32 %v9950_v14, %v9951_v43 }
 0x91a   : > { %v8094_v36 = vadd.f32 %v8093_v8, %v8020_v31  ;;  %v28866_v40 = vpop.f32.mrb[69].mxu1 }
 0x91b   : > { %31482 = vmatpush3.bf16.msra.mxu1 %v31481_v6  ;;  %v9953_v31 = vand.u32 4294901760, %v9952_v13 }
 0x91c   : > { %31483 = vmatprep.subr.bf16.mxu1 %v36810_v19 }
 0x91d   : > { %v8167_v51 = vpop.f32.mrb[70].mxu1 }
 0x91e   : > { %v8168_v28 = vadd.f32 %v8167_v51, %v8094_v36  ;;  %v28871_v2 = vpop.f32.mrb[71].mxu1  ;;  %v26160_v36 = vld [vmem:[%s32512_s24 + $0x8] sm:$0xf] }
 0x91f   : > { %31485 = vmatpush3.bf16.msra.mxu1 %v31484_v15  ;;  %v10333_v51 = vsel %vm7412_vm4, %v26160_v36, 0 }
 0x920   : > { %31486 = vmatprep.subr.bf16.mxu1 %v36810_v19 }
 0x921   : > { %v8241_v25 = vpop.f32.mrb[72].mxu1 }
 0x922   : > { %v8242_v60 = vadd.f32 %v8241_v25, %v8168_v28  ;;  %29115 = vmatmul.mubr.f32.vlgmr.msra.gmra.mrb[100].mxu1 %v34289_v9  ;;  %v28876_v47 = vpop.f32.mrb[73].mxu1  ;;  %v10401_v28 = vand.u32 4294901760, %v10333_v51 }
 0x923   : > { %31488 = vmatpush3.bf16.msra.mxu1 %v34705_v41  ;;  %29149 = vmatprep.mubr.msk.f32.mxu1 %vm32444_vm0, %v36864_v33 }
 0x924   : > { %31489 = vmatprep.subr.bf16.mxu1 %v36810_v19  ;;  %v10402_v2 = vsub.f32 %v10333_v51, %v10401_v28 }
 0x925   : > { %v8313_v27 = vpop.f32.mrb[74].mxu1 }
 0x926   : > { %v34961_v18 = vadd.f32 %v8313_v27, %v8242_v60  ;;  %v28881_v42 = vpop.f32.mrb[75].mxu1  ;;  %v10403_v25 = vand.u32 4294901760, %v10402_v2 }
 0x927   : > { %31491 = vmatpush3.bf16.msra.mxu1 %v34711_v52 }
 0x928   : > { %31492 = vmatprep.subr.bf16.mxu1 %v36810_v19  ;;  %v10404_v60 = vsub.f32 %v10402_v2, %v10403_v25 }
 0x929   : > { %v8394_v57 = vpop.f32.mrb[76].mxu1 }
 0x92a   : > { %v28886_v4 = vpop.f32.mrb[77].mxu1  ;;  %v10405_v47 = vand.u32 4294901760, %v10404_v60 }
 0x92b   : > { %31494 = vmatpush3.bf16.msra.mxu1 %v34719_v62 }
 0x92c   : > { %31495 = vmatprep.subr.bf16.mxu1 %v36810_v19 }
 0x92d   : > { %v8470_v41 = vpop.f32.mrb[78].mxu1 }
 0x92e   : > { %v8471_v32 = vadd.f32 %v8470_v41, %v8394_v57  ;;  %v28891_v39 = vpop.f32.mrb[79].mxu1 }
 0x92f   : > { %31497 = vmatpush3.bf16.msra.mxu1 %v34725_v37 }
 0x930   : > { %31498 = vmatprep.subr.bf16.mxu1 %v36810_v19 }
 0x931   : > { %v8544_v1 = vpop.f32.mrb[80].mxu1 }
 0x932   : > { %v8545_v61 = vadd.f32 %v8544_v1, %v8471_v32  ;;  %v28896_v50 = vpop.f32.mrb[81].mxu1 }
 0x933   : > { %31500 = vmatpush3.bf16.msra.mxu1 %v34735_v0 }
 0x934   : > { %31501 = vmatprep.subr.bf16.mxu1 %v36810_v19 }
 0x935   : > { %v8618_v52 = vpop.f32.mrb[82].mxu1 }
 0x936   : > { %v8619_v24 = vadd.f32 %v8618_v52, %v8545_v61  ;;  %v28901_v45 = vpop.f32.mrb[83].mxu1 }
 0x937   : > { %31503 = vmatpush3.bf16.msra.mxu1 %v34749_v44 }
 0x938   : > { %31504 = vmatprep.subr.bf16.mxu1 %v36810_v19 }
 0x939   : > { %v8692_v62 = vpop.f32.mrb[84].mxu1 }
 0x93a   : > { %v8693_v3 = vadd.f32 %v8692_v62, %v8619_v24  ;;  %v28906_v63 = vpop.f32.mrb[85].mxu1 }
 0x93b   : > { %31506 = vmatpush3.bf16.msra.mxu1 %v34770_v29 }
 0x93c   : > { %31507 = vmatprep.subr.bf16.mxu1 %v36810_v19 }
 0x93d   : > { %v8764_v37 = vpop.f32.mrb[86].mxu1 }
 0x93e   : > { %v8765_v22 = vadd.f32 %v8764_v37, %v8693_v3  ;;  %v28911_v59 = vpop.f32.mrb[87].mxu1 }
 0x93f   : > { %31509 = vmatpush3.bf16.msra.mxu1 %v34785_v12  ;;  %v10786_v59 = vpop.permute.xlu0 %10785 }
 0x940   : > { %29440 = vmatprep.subr.mxu1 %v36864_v33 }
 0x941   : > { %v8843_v0 = vpop.f32.mrb[88].mxu1 }
 0x942   : > { %v8844_v11 = vadd.f32 %v8843_v0, %v8765_v22  ;;  %29150 = vmatmul.mubr.f32.vlgmr.msra.gmra.mrb[100].mxu1 %v34289_v9  ;;  %v28916_v44 = vpop.f32.mrb[89].mxu1 }
 0x943   : > { %29442 = vmatprep.mubr.msk.f32.mxu1 %vm32444_vm0, %v36864_v33 }
 0x945   : > { %v8919_v38 = vpop.f32.mrb[90].mxu1 }
 0x946   : > { %v8920_v29 = vadd.f32 %v8919_v38, %v8844_v11  ;;  %v28921_v20 = vpop.f32.mrb[91].mxu1 }
 0x949   : > { %v8993_v58 = vpop.f32.mrb[92].mxu1 }
 0x94a   : > { %v8994_v5 = vadd.f32 %v8993_v58, %v8920_v29  ;;  %v28926_v34 = vpop.f32.mrb[93].mxu1 }
 0x94d   : > { %v9067_v56 = vpop.f32.mrb[94].mxu1 }
 0x94e   : > { %v9068_v12 = vadd.f32 %v9067_v56, %v8994_v5  ;;  %v28931_v10 = vpop.f32.mrb[95].mxu1 }
 0x951   : > { %v9141_v23 = vpop.f32.mrb[96].mxu1 }
 0x952   : > { %v9142_v17 = vadd.f32 %v9141_v23, %v9068_v12  ;;  %v28936_v16 = vpop.f32.mrb[97].mxu1 }
 0x955   : > { %v9213_v21 = vpop.f32.mrb[98].mxu1 }
 0x956   : > { %v34980_v9 = vadd.f32 %v9213_v21, %v9142_v17  ;;  %v28941_v48 = vpop.f32.mrb[99].mxu1 }
 0xa15   : > { %v9871_v55 = vpop.f32.mrb[100].mxu1 }
 0xa16   : > { %v9881_v35 = vsel %vm6058_vm3, %v9871_v55, 0  ;;  %v29151_v46 = vpop.f32.mrb[101].mxu1 }
 0xa17   : > { %v9884_v26 = vand.u32 4294901760, %v9881_v35 }
 0xa19   : > { %v9961_v6 = vsub.f32 %v9881_v35, %v9884_v26  ;;  %29153 = vmatpush3.msra.mxu0 %v9884_v26 }
 0xa1a   : > { %29155 = vmatmul.mubr.f32.vlgmr.msra.gmra.mrb[30].mxu0 %v9953_v31  ;;  %29157 = vmatprep.subr.mxu0 %v36864_v33  ;;  %v15195_v31 = vld [vmem:[%s36977_s2] sm:$0xf]  ;;  %s36980_s2 = sld [smem:[#allocation12_spill]] }
 0xa1b   : > { %v9962_v8 = vand.u32 4294901760, %v9961_v6  ;;  %29159 = vmatprep.mubr.msk.f32.mxu0 %vm32444_vm0, %v36864_v33 }
 0xa1d   : > { %v9963_v40 = vsub.f32 %v9961_v6, %v9962_v8 }
 0xa1f   : > { %v9964_v15 = vand.u32 4294901760, %v9963_v40 }
 0xa21   : > { %29158 = vmatpush3.msra.mxu0 %v9964_v15 }
 0xa22   : > { %29160 = vmatmul.mubr.f32.vlgmr.msra.gmra.mrb[32].mxu0 %v9949_v49  ;;  %29162 = vmatprep.subr.mxu0 %v36864_v33 }
 0xa23   : > { %29163 = vmatpush3.msra.mxu0 %v9961_v6  ;;  %29164 = vmatprep.mubr.msk.f32.mxu0 %vm32444_vm0, %v36864_v33 }
 0xa24   : > { %29167 = vmatprep.subr.mxu0 %v36864_v33 }
 0xa26   : > { %29165 = vmatmul.mubr.f32.vlgmr.msra.gmra.mrb[34].mxu0 %v9950_v14 }
 0xa27   : > { %29168 = vmatpush3.msra.mxu0 %v9884_v26  ;;  %29169 = vmatprep.mubr.msk.f32.mxu0 %vm32444_vm0, %v36864_v33 }
 0xa28   : > { %29172 = vmatprep.subr.mxu0 %v36864_v33 }
 0xa2a   : > { %29170 = vmatmul.mubr.f32.vlgmr.msra.gmra.mrb[36].mxu0 %v9951_v43 }
 0xa2b   : > { %29173 = vmatpush3.msra.mxu0 %v9962_v8  ;;  %29174 = vmatprep.mubr.msk.f32.mxu0 %vm32444_vm0, %v36864_v33 }
 0xa2c   : > { %29177 = vmatprep.subr.mxu0 %v36864_v33 }
 0xa2e   : > { %29175 = vmatmul.mubr.f32.vlgmr.msra.gmra.mrb[38].mxu0 %v9949_v49 }
 0xa2f   : > { %29178 = vmatpush3.msra.mxu0 %v9884_v26  ;;  %29179 = vmatprep.mubr.msk.f32.mxu0 %vm32444_vm0, %v36864_v33 }
 0xa30   : > { %29182 = vmatprep.subr.mxu0 %v36864_v33 }
 0xa32   : > { %29180 = vmatmul.mubr.f32.vlgmr.msra.gmra.mrb[40].mxu0 %v9949_v49  ;;  %v10799_v49 = vpop.permute.xlu1 %10798 }
 0xa33   : > { %29183 = vmatpush3.msra.mxu0 %v9884_v26  ;;  %29184 = vmatprep.mubr.msk.f32.mxu0 %vm32444_vm0, %v36864_v33 }
 0xa34   : > { %29187 = vmatprep.subr.mxu0 %v36864_v33 }
 0xa36   : > { %29185 = vmatmul.mubr.f32.vlgmr.msra.gmra.mrb[42].mxu0 %v10405_v47  ;;  %v15208_v47 = vld [vmem:[%s36978_s15] sm:$0xf]  ;;  %s36981_s15 = sld [smem:[#allocation13_spill]] }
 0xa37   : > { %29188 = vmatpush3.msra.mxu0 %v9964_v15  ;;  %29189 = vmatprep.mubr.msk.f32.mxu0 %vm32444_vm0, %v36864_v33 }
 0xa38   : > { %29192 = vmatprep.subr.mxu0 %v36864_v33 }
 0xa3a   : > { %29190 = vmatmul.mubr.f32.vlgmr.msra.gmra.mrb[44].mxu0 %v10401_v28 }
 0xa3b   : > { %29193 = vmatpush3.msra.mxu0 %v9961_v6  ;;  %29194 = vmatprep.mubr.msk.f32.mxu0 %vm32444_vm0, %v36864_v33 }
 0xa3c   : > { %29197 = vmatprep.subr.mxu0 %v36864_v33 }
 0xa3e   : > { %29195 = vmatmul.mubr.f32.vlgmr.msra.gmra.mrb[46].mxu0 %v10402_v2 }
 0xa3f   : > { %29198 = vmatpush3.msra.mxu0 %v9884_v26  ;;  %29199 = vmatprep.mubr.msk.f32.mxu0 %vm32444_vm0, %v36864_v33 }
 0xa40   : > { %29202 = vmatprep.subr.mxu0 %v36864_v33 }
 0xa42   : > { %29200 = vmatmul.mubr.f32.vlgmr.msra.gmra.mrb[48].mxu0 %v10403_v25 }
 0xa43   : > { %29203 = vmatpush3.msra.mxu0 %v9962_v8  ;;  %29204 = vmatprep.mubr.msk.f32.mxu0 %vm32444_vm0, %v36864_v33 }
 0xa44   : > { %29207 = vmatprep.subr.mxu0 %v36864_v33 }
 0xa46   : > { %29205 = vmatmul.mubr.f32.vlgmr.msra.gmra.mrb[50].mxu0 %v10401_v28 }
 0xa47   : > { %29208 = vmatpush3.msra.mxu0 %v9884_v26  ;;  %29209 = vmatprep.mubr.msk.f32.mxu0 %vm32444_vm0, %v36864_v33 }
 0xa48   : > { %31510 = vmatprep.subr.bf16.mxu0 %v36810_v19 }
 0xa4a   : > { %29210 = vmatmul.mubr.f32.vlgmr.msra.gmra.mrb[52].mxu0 %v10401_v28 }
 0xa4b   : > { %29228 = vmatprep.mubr.msk.f32.mxu0 %vm32444_vm0, %v36864_v33 }
 0xaed   : > { %v9955_v27 = vpop.f32.mrb[30].mxu0 }
 0xaee   : > { %v29156_v42 = vpop.f32.mrb[31].mxu0 }
 0xaef   : > { %v10840_v42 = vld [vmem:[%s36979_s12 + $0x8] sm:$0xff] }
 0xaf5   : > { %v10031_v57 = vpop.f32.mrb[32].mxu0 }
 0xaf6   : > { %v10032_v4 = vadd.f32 %v10031_v57, %v9955_v27  ;;  %v29161_v41 = vpop.f32.mrb[33].mxu0  ;;  %v10839_v27 = vld [vmem:[%s36979_s12] sm:$0xff] }
 0xaf7   : > { %v10852_v57 = vand.u32 4294901760, %v10839_v27 }
 0xaf9   : > { %v10105_v32 = vpop.f32.mrb[34].mxu0 }
 0xafa   : > { %v10106_v39 = vadd.f32 %v10105_v32, %v10032_v4  ;;  %v29166_v1 = vpop.f32.mrb[35].mxu0  ;;  %v10855_v4 = vand.u32 4294901760, %v10840_v42  ;;  %v10841_v32 = vld [vmem:[%s36979_s12 + $0x10] sm:$0xff] }
 0xafb   : > { %v10858_v1 = vand.u32 4294901760, %v10841_v32 }
 0xafc   : > { %v35036_v41 = vpack.c.bf16 %v10855_v4, %v10852_v57 }
 0xafd   : > { %v10179_v61 = vpop.f32.mrb[36].mxu0 }
 0xafe   : > { %v10180_v50 = vadd.f32 %v10179_v61, %v10106_v39  ;;  %v29171_v52 = vpop.f32.mrb[37].mxu0  ;;  %v10842_v39 = vld [vmem:[%s36979_s12 + $0x18] sm:$0xff]  ;;  %31512 = vmatpush3.bf16.msra.mxu0 %v35036_v41 }
 0xaff   : > { %v10861_v61 = vand.u32 4294901760, %v10842_v39  ;;  %31513 = vmatprep.subr.bf16.mxu0 %v36810_v19  ;;  %v10843_v52 = vld [vmem:[%s36979_s12 + $0x20] sm:$0xff] }
 0xb01   : > { %v10253_v24 = vpop.f32.mrb[38].mxu0 }
 0xb02   : > { %v10254_v45 = vadd.f32 %v10253_v24, %v10180_v50  ;;  %v29176_v62 = vpop.f32.mrb[39].mxu0  ;;  %v35042_v50 = vpack.c.bf16 %v10861_v61, %v10858_v1  ;;  %v10844_v24 = vld [vmem:[%s36979_s12 + $0x28] sm:$0xff] }
 0xb03   : > { %v10867_v62 = vand.u32 4294901760, %v10844_v24 }
 0xb04   : > { %31515 = vmatpush3.bf16.msra.mxu0 %v35042_v50 }
 0xb05   : > { %v10325_v3 = vpop.f32.mrb[40].mxu0  ;;  %31516 = vmatprep.subr.bf16.mxu0 %v36810_v19 }
 0xb06   : > { %v10326_v63 = vadd.f32 %v10325_v3, %v10254_v45  ;;  %v29181_v37 = vpop.f32.mrb[41].mxu0  ;;  %v10864_v45 = vand.u32 4294901760, %v10843_v52  ;;  %v35048_v3 = vsub.f32 %v10839_v27, %v10852_v57 }
 0xb08   : > { %v10329_v22 = vadd.f32 %v10326_v63, %v34961_v18  ;;  %v35050_v63 = vsub.f32 %v10840_v42, %v10855_v4  ;;  %v35052_v37 = vpack.c.bf16 %v10867_v62, %v10864_v45 }
 0xb09   : > { %v10407_v0 = vpop.f32.mrb[42].mxu0 }
 0xb0a   : > { %v10788_v11 = vadd.f32 %v10786_v59, %v10329_v22  ;;  %v29186_v44 = vpop.f32.mrb[43].mxu0  ;;  %v35054_v22 = vsub.f32 %v10841_v32, %v10858_v1  ;;  %v35056_v59 = vsub.f32 %v10842_v39, %v10861_v61  ;;  %31518 = vmatpush3.bf16.msra.mxu0 %v35052_v37 }
 0xb0b   : > { %v10845_v44 = vld [vmem:[%s36979_s12 + $0x30] sm:$0xff]  ;;  %31519 = vmatprep.subr.bf16.mxu0 %v36810_v19 }
 0xb0c   : > { %v26161_v29 = vmul.f32 -1.442695, %v10788_v11  ;;  %v35060_v11 = vsub.f32 %v10844_v24, %v10867_v62 }
 0xb0d   : > { %v10483_v38 = vpop.f32.mrb[44].mxu0 }
 0xb0e   : > { %v10484_v20 = vadd.f32 %v10483_v38, %v10407_v0  ;;  %v29191_v58 = vpop.f32.mrb[45].mxu0  ;;  %32302 = vpow2.f32 %v26161_v29  ;;  %v35058_v0 = vsub.f32 %v10843_v52, %v10864_v45  ;;  %v10846_v38 = vld [vmem:[%s36979_s12 + $0x38] sm:$0xff]  ;;  %v10870_v29 = vand.u32 4294901760, %v10845_v44 }
 0xb0f   : > { %v10937_v58 = vand.u32 4294901760, %v35048_v3 }
 0xb11   : > { %v10557_v5 = vpop.f32.mrb[46].mxu0 }
 0xb12   : > { %v10558_v34 = vadd.f32 %v10557_v5, %v10484_v20  ;;  %v29196_v56 = vpop.f32.mrb[47].mxu0  ;;  %v10873_v20 = vand.u32 4294901760, %v10846_v38  ;;  %v10944_v5 = vand.u32 4294901760, %v35050_v63 }
 0xb13   : > { %v35070_v56 = vsub.f32 %v10845_v44, %v10870_v29 }
 0xb14   : > { %v31559_v61 = vpack.c.bf16 %v10944_v5, %v10937_v58 }
 0xb15   : > { %v10631_v12 = vpop.f32.mrb[48].mxu0 }
 0xb16   : > { %v10632_v10 = vadd.f32 %v10631_v12, %v10558_v34  ;;  %v29201_v23 = vpop.f32.mrb[49].mxu0  ;;  %v35068_v34 = vpack.c.bf16 %v10873_v20, %v10870_v29  ;;  %v35072_v12 = vsub.f32 %v10846_v38, %v10873_v20 }
 0xb17   : > { %v10945_v23 = vsub.f32 %v35050_v63, %v10944_v5 }
 0xb18   : > { %v32303_v48 = vpop.eup %32302  ;;  %31521 = vmatpush3.bf16.msra.mxu0 %v35068_v34 }
 0xb19   : > { %v10705_v17 = vpop.f32.mrb[50].mxu0  ;;  %v10792_v7 = vadd.f32 1.0, %v32303_v48  ;;  %31522 = vmatprep.subr.bf16.mxu0 %v36810_v19  ;;  %v10946_v48 = vand.u32 4294901760, %v10945_v23 }
 0xb1a   : > { %v10706_v16 = vadd.f32 %v10705_v17, %v10632_v10  ;;  %v29206_v21 = vpop.f32.mrb[51].mxu0  ;;  %v10938_v10 = vsub.f32 %v35048_v3, %v10937_v58 }
 0xb1b   : > { %32304 = vrcp.f32 %v10792_v7  ;;  %v10958_v21 = vand.u32 4294901760, %v35056_v59 }
 0xb1c   : > { %v10939_v17 = vand.u32 4294901760, %v10938_v10  ;;  %v26163_v10 = vld [vmem:[%s36979_s12 + $0x48] sm:$0xff] }
 0xb1d   : > { %v10777_v18 = vpop.f32.mrb[52].mxu0 }
 0xb1e   : > { %v10778_v30 = vadd.f32 %v10777_v18, %v10706_v16  ;;  %v29211_v53 = vpop.f32.mrb[53].mxu0  ;;  %v10951_v16 = vand.u32 4294901760, %v35054_v22 }
 0xb1f   : > { %v31523_v53 = vpack.c.bf16 %v10946_v48, %v10939_v17  ;;  %v11403_v17 = vand.u32 4294901760, %v26163_v10 }
 0xb20   : > { %v10781_v14 = vadd.f32 %v10778_v30, %v34980_v9  ;;  %v10952_v18 = vsub.f32 %v35054_v22, %v10951_v16  ;;  %v10959_v30 = vsub.f32 %v35056_v59, %v10958_v21  ;;  %v31562_v52 = vpack.c.bf16 %v10958_v21, %v10951_v16  ;;  %v26165_v16 = vld [vmem:[%s36979_s12 + $0x58] sm:$0xff] }
 0xb21   : > { %v35164_v48 = vsub.f32 %v26163_v10, %v11403_v17 }
 0xb22   : > { %v10801_v43 = vadd.f32 %v10799_v49, %v10781_v14  ;;  %v10953_v7 = vand.u32 4294901760, %v10952_v18  ;;  %v10960_v49 = vand.u32 4294901760, %v10959_v30  ;;  %v10965_v14 = vand.u32 4294901760, %v35058_v0 }
 0xb23   : > { %v11409_v30 = vand.u32 4294901760, %v26165_v16 }
 0xb24   : > { %32306 = vtanh.f32 %v10801_v43  ;;  %v10972_v43 = vand.u32 4294901760, %v35060_v11 }
 0xb25   : > { %v32305_v13 = vpop.eup %32304 }
 0xb26   : > { %v31565_v24 = vpack.c.bf16 %v10972_v43, %v10965_v14 }
 0xb2e   : > { %v32307_v55 = vpop.eup %32306 }
 0xb2f   : > { %v10803_v35 = vmul.f32 %v32307_v55, %v32305_v13  ;;  %v31526_v13 = vpack.c.bf16 %v10960_v49, %v10953_v7  ;;  %v10966_v55 = vsub.f32 %v35058_v0, %v10965_v14  ;;  %v35175_v49 = vsub.f32 %v26165_v16, %v11409_v30  ;;  %v26168_v14 = vld [vmem:[%s36979_s12 + $0x70] sm:$0xff] }
 0xb31   : > { %v10805_v46 = vsel %vm10804_vm5, %v10803_v35, 0.0 }
 0xb32   : > { %10806 = vadd.xlane.f32.xlu0 %v10805_v46  ;;  %v10967_v46 = vand.u32 4294901760, %v10966_v55 }
 0xb48   : > { %15198 = vperm.xlu0 %32292, %v15195_v31  }
 0xbbf   : > { %v10807_v26 = vpop.xlane.xlu0 %10806 }
 0xbc0   : > { %v10808_v6 = vrot.slane %v10807_v26, 4 }
 0xbc2   : > { %v10809_v8 = vadd.f32 %v10808_v6, %v10807_v26  ;;  %v10979_v26 = vand.u32 4294901760, %v35070_v56  ;;  %v10986_v6 = vand.u32 4294901760, %v35072_v12 }
 0xbc4   : > { %v10810_v36 = vrot.slane %v10809_v8, 2  ;;  %v31568_v45 = vpack.c.bf16 %v10986_v6, %v10979_v26 }
 0xbc6   : > { %v10811_v9 = vadd.f32 %v10810_v36, %v10809_v8  ;;  %v10980_v36 = vsub.f32 %v35070_v56, %v10979_v26 }
 0xbc8   : > { %v10812_v40 = vrot.slane %v10811_v9, 1 }
 0xbca   : > { %v10813_v15 = vadd.f32 %v10812_v40, %v10811_v9  ;;  %v10987_v9 = vsub.f32 %v35072_v12, %v10986_v6  ;;  %v10981_v40 = vand.u32 4294901760, %v10980_v36 }
 0xbcc   : > { %32189 = vpush %v10813_v15  ;;  %v10988_v15 = vand.u32 4294901760, %v10987_v9  ;;  %v11506_v9 = vand.u32 4294901760, %v35175_v49 }
 0xbfd   : > { %s32190_s22 = spop %32189 }
 0xbfe   : > { %v10815_v51 = vstv %s32190_s22 }
 0xbff   : > { %v10817_v28 = vmul.f32 0.00390625, %v10815_v51  ;;  %v31532_v51 = vpack.c.bf16 %v10988_v15, %v10981_v40 }
 0xc01   : > { %v35028_v2 = vsub.f32 %v10803_v35, %v10817_v28  ;;  %v10973_v35 = vsub.f32 %v35060_v11, %v10972_v43  ;;  %v31535_v28 = vpack.c.bf16 %v35050_v63, %v35048_v3  ;;  %v26169_v43 = vld [vmem:[%s36979_s12 + $0x78] sm:$0xff] }
 0xc02   : > { %v11421_v26 = vand.u32 4294901760, %v26169_v43 }
 0xc03   : > { %v10819_v25 = vmul.f32 %v35028_v2, %v35028_v2  ;;  %v10974_v31 = vand.u32 4294901760, %v10973_v35 }
 0xc05   : > { %v10820_v60 = vsel %vm10804_vm5, %v10819_v25, 0.0  ;;  %v31529_v8 = vpack.c.bf16 %v10974_v31, %v10967_v46  ;;  %v31538_v25 = vpack.c.bf16 %v35056_v59, %v35054_v22  ;;  %v10835_v59 = vld [vmem:[%s36980_s2] sm:$0xf]  ;;  %v11418_v31 = vand.u32 4294901760, %v26168_v14  ;;  %s36982_s2 = sld [smem:[#allocation15_spill]] }
 0xc06   : > { %10821 = vadd.xlane.f32.xlu1 %v10820_v60  ;;  %v31541_v60 = vpack.c.bf16 %v35060_v11, %v35058_v0  ;;  %v10837_v11 = vld [vmem:[%s36981_s15] sm:$0xf]  ;;  %s36983_s15 = sld [smem:[#allocation17_spill]] }
 0xc17   : > { %15211 = vperm.xlu1 %32293, %v15208_v47   ;;  %v31544_v47 = vpack.c.bf16 %v35072_v12, %v35070_v56  ;;  %v26162_v12 = vld [vmem:[%s36979_s12 + $0x40] sm:$0xff] }
 0xc18   : > { %v11400_v23 = vand.u32 4294901760, %v26162_v12 }
 0xc1a   : > { %v35162_v21 = vsub.f32 %v26162_v12, %v11400_v23 }
 0xc1c   : > { %v31607_v12 = vpack.c.bf16 %v35164_v48, %v35162_v21 }
 0xc93   : > { %v10822_v27 = vpop.xlane.xlu1 %10821 }
 0xc94   : > { %v10823_v42 = vrot.slane %v10822_v27, 4 }
 0xc96   : > { %v10824_v57 = vadd.f32 %v10823_v42, %v10822_v27  ;;  %v11507_v27 = vsub.f32 %v35175_v49, %v11506_v9  ;;  %v35212_v42 = vsub.f32 %v26168_v14, %v11418_v31 }
 0xc98   : > { %v10825_v4 = vrot.slane %v10824_v57, 2 }
 0xc9a   : > { %v10826_v32 = vadd.f32 %v10825_v4, %v10824_v57  ;;  %v35214_v57 = vsub.f32 %v26169_v43, %v11421_v26 }
 0xc9c   : > { %v10827_v39 = vrot.slane %v10826_v32, 1 }
 0xc9e   : > { %v10828_v1 = vadd.f32 %v10827_v39, %v10826_v32 }
 0xca0   : > { %32191 = vpush %v10828_v1 }
 0xcd1   : > { %s32192_s22 = spop %32191 }
 0xcd2   : > { %v10830_v62 = vstv %s32192_s22  ;;  %s36984_s22 = sld [smem:[#allocation23_spill]] }
 0xcd3   : > { %v10831_v3 = vmul.f32 0.00390625, %v10830_v62  ;;  %v11534_v62 = vand.u32 4294901760, %v35214_v57 }
 0xcd5   : > { %v10832_v63 = vadd.f32 1e-05, %v10831_v3 }
 0xcd7   : > { %32308 = vrsqrt.f32 %v10832_v63 }
 0xce1   : > { %v32309_v22 = vpop.eup %32308 }
 0xce2   : > { %v10834_v0 = vmul.f32 %v32309_v22, %v35028_v2 }
 0xce4   : > { %v10836_v44 = vmul.f32 %v10835_v59, %v10834_v0  ;;  %v11535_v0 = vsub.f32 %v35214_v57, %v11534_v62 }
 0xce6   : > { %v35101_v38 = vadd.f32 %v10837_v11, %v10836_v44 }
 0xce8   : > { %v10849_v29 = vsel %vm10847_vm6, %v35101_v38, 0 }
 0xce9   : > { %v35105_v20 = vand.u32 4294901760, %v10849_v29 }
 0xceb   : > { %v35108_v58 = vsub.f32 %v10849_v29, %v35105_v20  ;;  %v11536_v29 = vand.u32 4294901760, %v11535_v0 }
 0xced   : > { %v35111_v5 = vand.u32 4294901760, %v35108_v58 }
 0xcef   : > { %v10927_v56 = vsub.f32 %v35108_v58, %v35111_v5 }
 0xcf1   : > { %v35115_v2 = vand.u32 4294901760, %v10927_v56 }
 0xcf3   : > { %29229 = vmatmul.mubr.f32.vlgmr.msra.gmra.mrb[54].mxu0 %v35115_v2 }
 0xcf4   : > { %31524 = vmatpush3.bf16.msra.mxu0 %v31523_v53  ;;  %29247 = vmatprep.mubr.msk.f32.mxu0 %vm32444_vm0, %v36864_v33  ;;  %v26167_v53 = vld [vmem:[%s36979_s12 + $0x68] sm:$0xff] }
 0xcf5   : > { %31525 = vmatprep.subr.bf16.mxu0 %v36810_v19  ;;  %v11415_v46 = vand.u32 4294901760, %v26167_v53 }
 0xcf8   : > { %31527 = vmatpush3.bf16.msra.mxu0 %v31526_v13  ;;  %v11485_v13 = vand.u32 4294901760, %v35162_v21 }
 0xcf9   : > { %31528 = vmatprep.subr.bf16.mxu0 %v36810_v19 }
 0xcfa   : > { %v11486_v6 = vsub.f32 %v35162_v21, %v11485_v13 }
 0xcfc   : > { %31530 = vmatpush3.bf16.msra.mxu0 %v31529_v8 }
 0xcfd   : > { %31531 = vmatprep.subr.bf16.mxu0 %v36810_v19 }
 0xd00   : > { %31533 = vmatpush3.bf16.msra.mxu0 %v31532_v51  ;;  %v35200_v51 = vsub.f32 %v26167_v53, %v11415_v46 }
 0xd01   : > { %31534 = vmatprep.subr.bf16.mxu0 %v36810_v19 }
 0xd02   : > { %v11520_v32 = vand.u32 4294901760, %v35200_v51 }
 0xd03   : > { %29248 = vmatmul.mubr.f32.vlgmr.msra.gmra.mrb[54].mxu0 %v35105_v20 }
 0xd04   : > { %31536 = vmatpush3.bf16.msra.mxu0 %v31535_v28  ;;  %29266 = vmatprep.mubr.msk.f32.mxu0 %vm32444_vm0, %v36864_v33  ;;  %v35203_v28 = vpack.c.bf16 %v11421_v26, %v11418_v31  ;;  %v26178_v26 = vld [vmem:[%s36979_s12 + $0xb0] sm:$0xff] }
 0xd05   : > { %31537 = vmatprep.subr.bf16.mxu0 %v36810_v19 }
 0xd08   : > { %31539 = vmatpush3.bf16.msra.mxu0 %v31538_v25  ;;  %v11487_v25 = vand.u32 4294901760, %v11486_v6  ;;  %v26179_v6 = vld [vmem:[%s36979_s12 + $0xb8] sm:$0xff] }
 0xd09   : > { %31540 = vmatprep.subr.bf16.mxu0 %v36810_v19 }
 0xd0c   : > { %31542 = vmatpush3.bf16.msra.mxu0 %v31541_v60 }
 0xd0d   : > { %31543 = vmatprep.subr.bf16.mxu0 %v36810_v19 }
 0xd10   : > { %31545 = vmatpush3.bf16.msra.mxu0 %v31544_v47 }
 0xd11   : > { %31546 = vmatprep.subr.bf16.mxu0 %v36810_v19 }
 0xd13   : > { %29267 = vmatmul.mubr.f32.vlgmr.msra.gmra.mrb[54].mxu0 %v35108_v58 }
 0xd14   : > { %31548 = vmatpush3.bf16.msra.mxu0 %v35036_v41  ;;  %29285 = vmatprep.mubr.msk.f32.mxu0 %vm32444_vm0, %v36864_v33 }
 0xd15   : > { %31549 = vmatprep.subr.bf16.mxu0 %v36810_v19 }
 0xd18   : > { %31551 = vmatpush3.bf16.msra.mxu0 %v35042_v50 }
 0xd19   : > { %31552 = vmatprep.subr.bf16.mxu0 %v36810_v19 }
 0xd1c   : > { %31554 = vmatpush3.bf16.msra.mxu0 %v35052_v37 }
 0xd1d   : > { %31555 = vmatprep.subr.bf16.mxu0 %v36810_v19 }
 0xd20   : > { %31557 = vmatpush3.bf16.msra.mxu0 %v35068_v34 }
 0xd21   : > { %31558 = vmatprep.subr.bf16.mxu0 %v36810_v19 }
 0xd23   : > { %29286 = vmatmul.mubr.f32.vlgmr.msra.gmra.mrb[54].mxu0 %v35111_v5 }
 0xd24   : > { %31560 = vmatpush3.bf16.msra.mxu0 %v31559_v61  ;;  %29304 = vmatprep.mubr.msk.f32.mxu0 %vm32444_vm0, %v36864_v33  ;;  %v11508_v61 = vand.u32 4294901760, %v11507_v27 }
 0xd25   : > { %31561 = vmatprep.subr.bf16.mxu0 %v36810_v19 }
 0xd28   : > { %31563 = vmatpush3.bf16.msra.mxu0 %v31562_v52 }
 0xd29   : > { %31564 = vmatprep.subr.bf16.mxu0 %v36810_v19 }
 0xd2c   : > { %31566 = vmatpush3.bf16.msra.mxu0 %v31565_v24  ;;  %v11521_v24 = vsub.f32 %v35200_v51, %v11520_v32 }
 0xd2d   : > { %31567 = vmatprep.subr.bf16.mxu0 %v36810_v19 }
 0xd2e   : > { %v11522_v22 = vand.u32 4294901760, %v11521_v24 }
 0xd30   : > { %31569 = vmatpush3.bf16.msra.mxu0 %v31568_v45  ;;  %v11527_v45 = vand.u32 4294901760, %v35212_v42 }
 0xd31   : > { %31570 = vmatprep.subr.bf16.mxu0 %v36810_v19 }
 0xd32   : > { %v11528_v59 = vsub.f32 %v35212_v42, %v11527_v45 }
 0xd33   : > { %29305 = vmatmul.mubr.f32.vlgmr.msra.gmra.mrb[54].mxu0 %v35105_v20 }
 0xd34   : > { %31572 = vmatpush3.bf16.msra.mxu0 %v35036_v41  ;;  %29323 = vmatprep.mubr.msk.f32.mxu0 %vm32444_vm0, %v36864_v33  ;;  %v26164_v41 = vld [vmem:[%s36979_s12 + $0x50] sm:$0xff]  ;;  %v11529_v44 = vand.u32 4294901760, %v11528_v59 }
 0xd35   : > { %31573 = vmatprep.subr.bf16.mxu0 %v36810_v19  ;;  %v11406_v18 = vand.u32 4294901760, %v26164_v41 }
 0xd36   : > { %v31604_v56 = vpack.c.bf16 %v11536_v29, %v11529_v44 }
 0xd37   : > { %v35173_v7 = vsub.f32 %v26164_v41, %v11406_v18  ;;  %v35182_v55 = vpack.c.bf16 %v11409_v30, %v11406_v18  ;;  %v26172_v18 = vld [vmem:[%s36979_s12 + $0x80] sm:$0xff]  ;;  %v26173_v30 = vld [vmem:[%s36979_s12 + $0x88] sm:$0xff] }
 0xd38   : > { %31575 = vmatpush3.bf16.msra.mxu0 %v35042_v50  ;;  %v35167_v50 = vpack.c.bf16 %v11403_v17, %v11400_v23  ;;  %v31616_v17 = vpack.c.bf16 %v35214_v57, %v35212_v42  ;;  %v13755_v53 = vand.u32 4294901760, %v26173_v30 }
 0xd39   : > { %31576 = vmatprep.subr.bf16.mxu0 %v36810_v19  ;;  %v11499_v36 = vand.u32 4294901760, %v35173_v7  ;;  %v31610_v10 = vpack.c.bf16 %v35175_v49, %v35173_v7 }
 0xd3a   : > { %v35290_v14 = vsub.f32 %v26173_v30, %v13755_v53 }
 0xd3b   : > { %v11500_v47 = vsub.f32 %v35173_v7, %v11499_v36  ;;  %v31634_v16 = vpack.c.bf16 %v11506_v9, %v11499_v36  ;;  %v26175_v7 = vld [vmem:[%s36979_s12 + $0x98] sm:$0xff] }
 0xd3c   : > { %31578 = vmatpush3.bf16.msra.mxu0 %v35052_v37  ;;  %v26166_v37 = vld [vmem:[%s36979_s12 + $0x60] sm:$0xff]  ;;  %v13844_v36 = vand.u32 4294901760, %v35290_v14 }
 0xd3d   : > { %31579 = vmatprep.subr.bf16.mxu0 %v36810_v19  ;;  %v11412_v35 = vand.u32 4294901760, %v26166_v37  ;;  %v11501_v1 = vand.u32 4294901760, %v11500_v47 }
 0xd3f   : > { %v35196_v40 = vpack.c.bf16 %v11415_v46, %v11412_v35  ;;  %v35198_v15 = vsub.f32 %v26166_v37, %v11412_v35  ;;  %v31598_v3 = vpack.c.bf16 %v11508_v61, %v11501_v1  ;;  %v13752_v37 = vand.u32 4294901760, %v26172_v18  ;;  %v26177_v35 = vld [vmem:[%s36979_s12 + $0xa8] sm:$0xff] }
 0xd40   : > { %31581 = vmatpush3.bf16.msra.mxu0 %v35068_v34  ;;  %v11492_v34 = vand.u32 4294901760, %v35164_v48 }
 0xd41   : > { %31582 = vmatprep.subr.bf16.mxu0 %v36810_v19  ;;  %v11513_v4 = vand.u32 4294901760, %v35198_v15  ;;  %v31613_v23 = vpack.c.bf16 %v35200_v51, %v35198_v15  ;;  %v35288_v49 = vsub.f32 %v26172_v18, %v13752_v37  ;;  %v35293_v43 = vpack.c.bf16 %v13755_v53, %v13752_v37 }
 0xd42   : > { %v11493_v8 = vsub.f32 %v35164_v48, %v11492_v34  ;;  %v31631_v41 = vpack.c.bf16 %v11492_v34, %v11485_v13  ;;  %v31640_v48 = vpack.c.bf16 %v11534_v62, %v11527_v45  ;;  %v13761_v34 = vand.u32 4294901760, %v26175_v7 }
 0xd43   : > { %29324 = vmatmul.mubr.f32.vlgmr.msra.gmra.mrb[54].mxu0 %v35105_v20  ;;  %v11514_v52 = vsub.f32 %v35198_v15, %v11513_v4  ;;  %v31637_v21 = vpack.c.bf16 %v11520_v32, %v11513_v4  ;;  %v13767_v15 = vand.u32 4294901760, %v26177_v35  ;;  %v13770_v51 = vand.u32 4294901760, %v26178_v26 }
 0xd44   : > { %31584 = vmatpush3.bf16.msra.mxu0 %v35167_v50  ;;  %29342 = vmatprep.mubr.msk.f32.mxu0 %vm32444_vm0, %v36864_v33  ;;  %v11494_v60 = vand.u32 4294901760, %v11493_v8  ;;  %v35301_v31 = vsub.f32 %v26175_v7, %v13761_v34  ;;  %v13837_v8 = vand.u32 4294901760, %v35288_v49 }
 0xd45   : > { %31585 = vmatprep.subr.bf16.mxu0 %v36810_v19  ;;  %v11515_v63 = vand.u32 4294901760, %v11514_v52  ;;  %v35326_v4 = vsub.f32 %v26177_v35, %v13767_v15  ;;  %v35338_v24 = vsub.f32 %v26178_v26, %v13770_v51 }
 0xd46   : > { %v31595_v39 = vpack.c.bf16 %v11494_v60, %v11487_v25  ;;  %v13838_v25 = vsub.f32 %v35288_v49, %v13837_v8  ;;  %v13845_v60 = vsub.f32 %v35290_v14, %v13844_v36  ;;  %v13858_v27 = vand.u32 4294901760, %v35301_v31 }
 0xd47   : > { %v31601_v11 = vpack.c.bf16 %v11522_v22, %v11515_v63  ;;  %v13879_v44 = vand.u32 4294901760, %v35338_v24 }
 0xd48   : > { %31587 = vmatpush3.bf16.msra.mxu0 %v35182_v55  ;;  %v13846_v1 = vand.u32 4294901760, %v13845_v60  ;;  %v13859_v52 = vsub.f32 %v35301_v31, %v13858_v27 }
 0xd49   : > { %31588 = vmatprep.subr.bf16.mxu0 %v36810_v19 }
 0xd4a   : > { %v13860_v59 = vand.u32 4294901760, %v13859_v52 }
 0xd4c   : > { %31590 = vmatpush3.bf16.msra.mxu0 %v35196_v40 }
 0xd4d   : > { %31591 = vmatprep.subr.bf16.mxu0 %v36810_v19 }
 0xd50   : > { %31593 = vmatpush3.bf16.msra.mxu0 %v35203_v28 }
 0xd51   : > { %31594 = vmatprep.subr.bf16.mxu0 %v36810_v19 }
 0xd53   : > { %29343 = vmatmul.mubr.f32.vlgmr.msra.gmra.mrb[56].mxu0 %v35115_v2 }
 0xd54   : > { %31596 = vmatpush3.bf16.msra.mxu0 %v31595_v39  ;;  %29361 = vmatprep.mubr.msk.f32.mxu0 %vm32444_vm0, %v36864_v33  ;;  %v13839_v39 = vand.u32 4294901760, %v13838_v25 }
 0xd55   : > { %31597 = vmatprep.subr.bf16.mxu0 %v36810_v19 }
 0xd56   : > { %v31667_v63 = vpack.c.bf16 %v13846_v1, %v13839_v39  ;;  %v26171_v1 = vld [vmem:[%s36983_s15 + $0x4] sm:$0xf] }
 0xd57   : > { %v12845_v52 = vsel %vm7412_vm4, %v26171_v1, 0 }
 0xd58   : > { %31599 = vmatpush3.bf16.msra.mxu0 %v31598_v3  ;;  %v13872_v3 = vand.u32 4294901760, %v35326_v4 }
 0xd59   : > { %31600 = vmatprep.subr.bf16.mxu0 %v36810_v19 }
 0xd5c   : > { %31602 = vmatpush3.bf16.msra.mxu0 %v31601_v11  ;;  %v13873_v11 = vsub.f32 %v35326_v4, %v13872_v3 }
 0xd5d   : > { %31603 = vmatprep.subr.bf16.mxu0 %v36810_v19 }
 0xd60   : > { %31605 = vmatpush3.bf16.msra.mxu0 %v31604_v56 }
 0xd61   : > { %31606 = vmatprep.subr.bf16.mxu0 %v36810_v19 }
 0xd63   : > { %29362 = vmatmul.mubr.f32.vlgmr.msra.gmra.mrb[56].mxu0 %v35105_v20 }
 0xd64   : > { %31608 = vmatpush3.bf16.msra.mxu0 %v31607_v12  ;;  %29380 = vmatprep.mubr.msk.f32.mxu0 %vm32444_vm0, %v36864_v33 }
 0xd65   : > { %31609 = vmatprep.subr.bf16.mxu0 %v36810_v19 }
 0xd68   : > { %31611 = vmatpush3.bf16.msra.mxu0 %v31610_v10  ;;  %v13874_v10 = vand.u32 4294901760, %v13873_v11 }
 0xd69   : > { %31612 = vmatprep.subr.bf16.mxu0 %v36810_v19 }
 0xd6c   : > { %31614 = vmatpush3.bf16.msra.mxu0 %v31613_v23  ;;  %v13880_v23 = vsub.f32 %v35338_v24, %v13879_v44 }
 0xd6d   : > { %31615 = vmatprep.subr.bf16.mxu0 %v36810_v19 }
 0xd70   : > { %31617 = vmatpush3.bf16.msra.mxu0 %v31616_v17 }
 0xd71   : > { %31618 = vmatprep.subr.bf16.mxu0 %v36810_v19 }
 0xd73   : > { %29381 = vmatmul.mubr.f32.vlgmr.msra.gmra.mrb[56].mxu0 %v35108_v58 }
 0xd74   : > { %31620 = vmatpush3.bf16.msra.mxu0 %v35167_v50  ;;  %29399 = vmatprep.mubr.msk.f32.mxu0 %vm32444_vm0, %v36864_v33 }
 0xd75   : > { %31621 = vmatprep.subr.bf16.mxu0 %v36810_v19 }
 0xd78   : > { %31623 = vmatpush3.bf16.msra.mxu0 %v35182_v55 }
 0xd79   : > { %31624 = vmatprep.subr.bf16.mxu0 %v36810_v19 }
 0xd7c   : > { %31626 = vmatpush3.bf16.msra.mxu0 %v35196_v40 }
 0xd7d   : > { %31627 = vmatprep.subr.bf16.mxu0 %v36810_v19 }
 0xd80   : > { %31629 = vmatpush3.bf16.msra.mxu0 %v35203_v28 }
 0xd81   : > { %31630 = vmatprep.subr.bf16.mxu0 %v36810_v19 }
 0xd83   : > { %29400 = vmatmul.mubr.f32.vlgmr.msra.gmra.mrb[56].mxu0 %v35111_v5 }
 0xd84   : > { %31632 = vmatpush3.bf16.msra.mxu0 %v31631_v41  ;;  %29418 = vmatprep.mubr.msk.f32.mxu0 %vm32444_vm0, %v36864_v33 }
 0xd85   : > { %31633 = vmatprep.subr.bf16.mxu0 %v36810_v19 }
 0xd88   : > { %31635 = vmatpush3.bf16.msra.mxu0 %v31634_v16  ;;  %v13881_v16 = vand.u32 4294901760, %v13880_v23 }
 0xd89   : > { %31636 = vmatprep.subr.bf16.mxu0 %v36810_v19 }
 0xd8c   : > { %31638 = vmatpush3.bf16.msra.mxu0 %v31637_v21 }
 0xd8d   : > { %31639 = vmatprep.subr.bf16.mxu0 %v36810_v19 }
 0xd90   : > { %31641 = vmatpush3.bf16.msra.mxu0 %v31640_v48  ;;  %v31679_v48 = vpack.c.bf16 %v35290_v14, %v35288_v49  ;;  %v26170_v14 = vld [vmem:[%s36982_s2 + $0x4] sm:$0xf] }
 0xd91   : > { %31642 = vmatprep.subr.bf16.mxu0 %v36810_v19 }
 0xd93   : > { %29419 = vmatmul.mubr.f32.vlgmr.msra.gmra.mrb[56].mxu0 %v35105_v20 }
 0xd94   : > { %31644 = vmatpush3.bf16.msra.mxu0 %v35167_v50  ;;  %29437 = vmatprep.mubr.msk.f32.mxu0 %vm32444_vm0, %v36864_v33  ;;  %v26174_v50 = vld [vmem:[%s36979_s12 + $0x90] sm:$0xff] }
 0xd95   : > { %31645 = vmatprep.subr.bf16.mxu0 %v36810_v19  ;;  %v13758_v13 = vand.u32 4294901760, %v26174_v50 }
 0xd97   : > { %v35299_v46 = vsub.f32 %v26174_v50, %v13758_v13  ;;  %v35308_v9 = vpack.c.bf16 %v13761_v34, %v13758_v13 }
 0xd98   : > { %31647 = vmatpush3.bf16.msra.mxu0 %v35182_v55  ;;  %v26176_v55 = vld [vmem:[%s36979_s12 + $0xa0] sm:$0xff] }
 0xd99   : > { %31648 = vmatprep.subr.bf16.mxu0 %v36810_v19  ;;  %v13851_v47 = vand.u32 4294901760, %v35299_v46  ;;  %v31682_v18 = vpack.c.bf16 %v35301_v31, %v35299_v46 }
 0xd9b   : > { %v13852_v61 = vsub.f32 %v35299_v46, %v13851_v47  ;;  %v31706_v53 = vpack.c.bf16 %v13858_v27, %v13851_v47 }
 0xd9c   : > { %31650 = vmatpush3.bf16.msra.mxu0 %v35196_v40  ;;  %v13764_v40 = vand.u32 4294901760, %v26176_v55 }
 0xd9d   : > { %31651 = vmatprep.subr.bf16.mxu0 %v36810_v19  ;;  %v13853_v22 = vand.u32 4294901760, %v13852_v61 }
 0xd9e   : > { %v35322_v42 = vpack.c.bf16 %v13767_v15, %v13764_v40  ;;  %v35324_v57 = vsub.f32 %v26176_v55, %v13764_v40 }
 0xd9f   : > { %v31670_v56 = vpack.c.bf16 %v13860_v59, %v13853_v22  ;;  %v11389_v22 = vld [vmem:[%s36983_s15] sm:$0xf] }
 0xda0   : > { %31653 = vmatpush3.bf16.msra.mxu0 %v35203_v28  ;;  %v13773_v28 = vand.u32 4294901760, %v26179_v6  ;;  %v13865_v62 = vand.u32 4294901760, %v35324_v57  ;;  %v31685_v30 = vpack.c.bf16 %v35326_v4, %v35324_v57  ;;  %v13294_v59 = vsel %vm7412_vm4, %v11389_v22, 0 }
 0xda1   : > { %31654 = vmatprep.subr.bf16.mxu0 %v36810_v19 }
 0xda2   : > { %v35329_v32 = vpack.c.bf16 %v13773_v28, %v13770_v51  ;;  %v35340_v45 = vsub.f32 %v26179_v6, %v13773_v28  ;;  %v13866_v0 = vsub.f32 %v35324_v57, %v13865_v62  ;;  %v31709_v50 = vpack.c.bf16 %v13872_v3, %v13865_v62 }
 0xda3   : > { %29438 = vmatmul.mubr.f32.vlgmr.msra.gmra.mrb[56].mxu0 %v35105_v20 }
 0xda4   : > { %31656 = vmatpush3.bf16.msra.mxu0 %v35293_v43  ;;  %29576 = vmatprep.mubr.msk.f32.mxu0 %vm32444_vm0, %v36864_v33  ;;  %v13886_v29 = vand.u32 4294901760, %v35340_v45  ;;  %v13867_v12 = vand.u32 4294901760, %v13866_v0  ;;  %v31688_v37 = vpack.c.bf16 %v35340_v45, %v35338_v24  ;;  %v12913_v24 = vand.u32 4294901760, %v12845_v52 }
 0xda5   : > { %31657 = vmatprep.subr.bf16.mxu0 %v36810_v19  ;;  %v13362_v0 = vand.u32 4294901760, %v13294_v59 }
 0xda6   : > { %v13887_v17 = vsub.f32 %v35340_v45, %v13886_v29  ;;  %v31673_v41 = vpack.c.bf16 %v13874_v10, %v13867_v12  ;;  %v31712_v7 = vpack.c.bf16 %v13886_v29, %v13879_v44  ;;  %v12914_v45 = vsub.f32 %v12845_v52, %v12913_v24  ;;  %v26180_v12 = vld [vmem:[%s36982_s2 + $0x8] sm:$0xf] }
 0xda7   : > { %v13363_v11 = vsub.f32 %v13294_v59, %v13362_v0  ;;  %v14291_v10 = vsel %vm7412_vm4, %v26180_v12, 0 }
 0xda8   : > { %31659 = vmatpush3.bf16.msra.mxu0 %v35308_v9  ;;  %v13888_v21 = vand.u32 4294901760, %v13887_v17  ;;  %v12915_v62 = vand.u32 4294901760, %v12914_v45  ;;  %v14362_v23 = vand.u32 4294901760, %v14291_v10 }
 0xda9   : > { %31660 = vmatprep.subr.bf16.mxu0 %v36810_v19  ;;  %v13364_v44 = vand.u32 4294901760, %v13363_v11 }
 0xdaa   : > { %v12916_v3 = vsub.f32 %v12914_v45, %v12915_v62  ;;  %v14363_v17 = vsub.f32 %v14291_v10, %v14362_v23 }
 0xdab   : > { %v13365_v29 = vsub.f32 %v13363_v11, %v13364_v44 }
 0xdac   : > { %31662 = vmatpush3.bf16.msra.mxu0 %v35322_v42 }
 0xdad   : > { %31663 = vmatprep.subr.bf16.mxu0 %v36810_v19 }
 0xdb0   : > { %31665 = vmatpush3.bf16.msra.mxu0 %v35329_v32 }
 0xdb1   : > { %31666 = vmatprep.subr.bf16.mxu0 %v36810_v19 }
 0xdb3   : > { %29577 = vmatmul.mubr.f32.vlgmr.msra.gmra.mrb[58].mxu0 %v35115_v2  ;;  %v31676_v2 = vpack.c.bf16 %v13888_v21, %v13881_v16 }
 0xdb4   : > { %31668 = vmatpush3.bf16.msra.mxu0 %v31667_v63  ;;  %29595 = vmatprep.mubr.msk.f32.mxu0 %vm32444_vm0, %v36864_v33  ;;  %v12917_v63 = vand.u32 4294901760, %v12916_v3 }
 0xdb5   : > { %31669 = vmatprep.subr.bf16.mxu0 %v36810_v19 }
 0xdb8   : > { %31671 = vmatpush3.bf16.msra.mxu0 %v31670_v56  ;;  %v13366_v56 = vand.u32 4294901760, %v13365_v29 }
 0xdb9   : > { %31672 = vmatprep.subr.bf16.mxu0 %v36810_v19 }
 0xdbc   : > { %31674 = vmatpush3.bf16.msra.mxu0 %v31673_v41  ;;  %v14364_v41 = vand.u32 4294901760, %v14363_v17 }
 0xdbd   : > { %31675 = vmatprep.subr.bf16.mxu0 %v36810_v19 }
 0xdc0   : > { %31677 = vmatpush3.bf16.msra.mxu0 %v31676_v2 }
 0xdc1   : > { %31678 = vmatprep.subr.bf16.mxu0 %v36810_v19 }
 0xdc3   : > { %29596 = vmatmul.mubr.f32.vlgmr.msra.gmra.mrb[58].mxu0 %v35105_v20 }
 0xdc4   : > { %31680 = vmatpush3.bf16.msra.mxu0 %v31679_v48  ;;  %29614 = vmatprep.mubr.msk.f32.mxu0 %vm32444_vm0, %v36864_v33  ;;  %v14365_v48 = vsub.f32 %v14363_v17, %v14364_v41 }
 0xdc5   : > { %31681 = vmatprep.subr.bf16.mxu0 %v36810_v19 }
 0xdc8   : > { %31683 = vmatpush3.bf16.msra.mxu0 %v31682_v18 }
 0xdc9   : > { %31684 = vmatprep.subr.bf16.mxu0 %v36810_v19 }
 0xdcc   : > { %31686 = vmatpush3.bf16.msra.mxu0 %v31685_v30 }
 0xdcd   : > { %31687 = vmatprep.subr.bf16.mxu0 %v36810_v19 }
 0xdd0   : > { %31689 = vmatpush3.bf16.msra.mxu0 %v31688_v37  ;;  %v14366_v37 = vand.u32 4294901760, %v14365_v48 }
 0xdd1   : > { %31690 = vmatprep.subr.bf16.mxu0 %v36810_v19 }
 0xdd3   : > { %29615 = vmatmul.mubr.f32.vlgmr.msra.gmra.mrb[58].mxu0 %v35108_v58  ;;  %v31703_v58 = vpack.c.bf16 %v13844_v36, %v13837_v8 }
 0xdd4   : > { %31692 = vmatpush3.bf16.msra.mxu0 %v35293_v43  ;;  %29633 = vmatprep.mubr.msk.f32.mxu0 %vm32444_vm0, %v36864_v33 }
 0xdd5   : > { %31693 = vmatprep.subr.bf16.mxu0 %v36810_v19 }
 0xdd8   : > { %31695 = vmatpush3.bf16.msra.mxu0 %v35308_v9 }
 0xdd9   : > { %31696 = vmatprep.subr.bf16.mxu0 %v36810_v19 }
 0xddc   : > { %31698 = vmatpush3.bf16.msra.mxu0 %v35322_v42 }
 0xddd   : > { %31699 = vmatprep.subr.bf16.mxu0 %v36810_v19 }
 0xde0   : > { %31701 = vmatpush3.bf16.msra.mxu0 %v35329_v32 }
 0xde1   : > { %31702 = vmatprep.subr.bf16.mxu0 %v36810_v19 }
 0xde3   : > { %29634 = vmatmul.mubr.f32.vlgmr.msra.gmra.mrb[58].mxu0 %v35111_v5 }
 0xde4   : > { %31704 = vmatpush3.bf16.msra.mxu0 %v31703_v58  ;;  %29652 = vmatprep.mubr.msk.f32.mxu0 %vm32444_vm0, %v36864_v33 }
 0xde5   : > { %31705 = vmatprep.subr.bf16.mxu0 %v36810_v19 }
 0xde8   : > { %31707 = vmatpush3.bf16.msra.mxu0 %v31706_v53  ;;  %v26181_v53 = vld [vmem:[%s36983_s15 + $0x8] sm:$0xf] }
 0xde9   : > { %31708 = vmatprep.subr.bf16.mxu0 %v36810_v19 }
 0xdec   : > { %31710 = vmatpush3.bf16.msra.mxu0 %v31709_v50 }
 0xded   : > { %31711 = vmatprep.subr.bf16.mxu0 %v36810_v19 }
 0xdf0   : > { %31713 = vmatpush3.bf16.msra.mxu0 %v31712_v7 }
 0xdf1   : > { %31714 = vmatprep.subr.bf16.mxu0 %v36810_v19 }
 0xdf3   : > { %29653 = vmatmul.mubr.f32.vlgmr.msra.gmra.mrb[58].mxu0 %v35105_v20 }
 0xdf4   : > { %31716 = vmatpush3.bf16.msra.mxu0 %v35293_v43  ;;  %29671 = vmatprep.mubr.msk.f32.mxu0 %vm32444_vm0, %v36864_v33  ;;  %v11939_v43 = vsel %vm7412_vm4, %v26170_v14, 0 }
 0xdf5   : > { %31717 = vmatprep.subr.bf16.mxu0 %v36810_v19  ;;  %v12010_v13 = vand.u32 4294901760, %v11939_v43 }
 0xdf7   : > { %v12011_v34 = vsub.f32 %v11939_v43, %v12010_v13 }
 0xdf8   : > { %31719 = vmatpush3.bf16.msra.mxu0 %v35308_v9  ;;  %v11388_v9 = vld [vmem:[%s36982_s2] sm:$0xf]  ;;  %s36985_s2 = sld [smem:[#allocation25_spill]] }
 0xdf9   : > { %31720 = vmatprep.subr.bf16.mxu0 %v36810_v19  ;;  %v12012_v55 = vand.u32 4294901760, %v12011_v34  ;;  %v12391_v51 = vsel %vm7412_vm4, %v11388_v9, 0 }
 0xdfa   : > { %v12462_v25 = vand.u32 4294901760, %v12391_v51 }
 0xdfb   : > { %v12013_v35 = vsub.f32 %v12011_v34, %v12012_v55 }
 0xdfc   : > { %31722 = vmatpush3.bf16.msra.mxu0 %v35322_v42  ;;  %v12463_v47 = vsub.f32 %v12391_v51, %v12462_v25 }
 0xdfd   : > { %31723 = vmatprep.subr.bf16.mxu0 %v36810_v19  ;;  %v12014_v6 = vand.u32 4294901760, %v12013_v35 }
 0xdfe   : > { %v12464_v42 = vand.u32 4294901760, %v12463_v47 }
 0xe00   : > { %31725 = vmatpush3.bf16.msra.mxu0 %v35329_v32  ;;  %v12465_v4 = vsub.f32 %v12463_v47, %v12464_v42 }
 0xe01   : > { %31762 = vmatprep.subr.bf16.mxu0 %v36810_v19 }
 0xe02   : > { %v12466_v39 = vand.u32 4294901760, %v12465_v4 }
 0xe03   : > { %29672 = vmatmul.mubr.f32.vlgmr.msra.gmra.mrb[58].mxu0 %v35105_v20 }
 0xe04   : > { %29808 = vmatprep.mubr.msk.f32.mxu0 %vm32444_vm0, %v36864_v33 }
 0xe16   : > { %v11384_v5 = vpop.f32.mrb[54].mxu0 }
 0xe17   : > { %v29325_v49 = vpop.f32.mrb[55].mxu0  ;;  %v12394_v28 = vsel %vm6058_vm3, %v11384_v5, 0  ;;  %v14746_v5 = vsel %vm7412_vm4, %v26181_v53, 0 }
 0xe18   : > { %v35443_v60 = vand.u32 4294901760, %v12394_v28  ;;  %v14814_v49 = vand.u32 4294901760, %v14746_v5 }
 0xe1a   : > { %v35450_v27 = vsub.f32 %v12394_v28, %v35443_v60  ;;  %v14815_v14 = vsub.f32 %v14746_v5, %v14814_v49 }
 0xe1c   : > { %v35457_v57 = vand.u32 4294901760, %v35450_v27  ;;  %v14816_v43 = vand.u32 4294901760, %v14815_v14 }
 0xe1e   : > { %v12476_v32 = vsub.f32 %v35450_v27, %v35457_v57 }
 0xe20   : > { %v35470_v61 = vand.u32 4294901760, %v12476_v32 }
 0xe76   : > { %v11932_v46 = vpop.f32.mrb[56].mxu0 }
 0xe77   : > { %v11942_v31 = vsel %vm6058_vm3, %v11932_v46, 0  ;;  %v29439_v26 = vpop.f32.mrb[57].mxu0 }
 0xe78   : > { %v35418_v8 = vand.u32 4294901760, %v11942_v31 }
 0xe7a   : > { %v35421_v20 = vsub.f32 %v11942_v31, %v35418_v8  ;;  %29441 = vmatpush3.msra.mxu1 %v35418_v8 }
 0xe7b   : > { %29443 = vmatmul.mubr.f32.vlgmr.msra.gmra.mrb[102].mxu1 %v12014_v6  ;;  %29445 = vmatprep.subr.mxu1 %v36864_v33 }
 0xe7c   : > { %v35426_v36 = vand.u32 4294901760, %v35421_v20  ;;  %29447 = vmatprep.mubr.msk.f32.mxu1 %vm32444_vm0, %v36864_v33 }
 0xe7e   : > { %v12024_v40 = vsub.f32 %v35421_v20, %v35426_v36 }
 0xe80   : > { %v35433_v15 = vand.u32 4294901760, %v12024_v40 }
 0xe82   : > { %29446 = vmatpush3.msra.mxu1 %v35433_v15 }
 0xe83   : > { %29448 = vmatmul.mubr.f32.vlgmr.msra.gmra.mrb[104].mxu1 %v12010_v13  ;;  %29450 = vmatprep.subr.mxu1 %v36864_v33 }
 0xe84   : > { %29451 = vmatpush3.msra.mxu1 %v35421_v20  ;;  %29452 = vmatprep.mubr.msk.f32.mxu1 %vm32444_vm0, %v36864_v33 }
 0xe85   : > { %29455 = vmatprep.subr.mxu1 %v36864_v33 }
 0xe87   : > { %29453 = vmatmul.mubr.f32.vlgmr.msra.gmra.mrb[106].mxu1 %v12011_v34 }
 0xe88   : > { %29456 = vmatpush3.msra.mxu1 %v35418_v8  ;;  %29457 = vmatprep.mubr.msk.f32.mxu1 %vm32444_vm0, %v36864_v33 }
 0xe89   : > { %29460 = vmatprep.subr.mxu1 %v36864_v33 }
 0xe8b   : > { %29458 = vmatmul.mubr.f32.vlgmr.msra.gmra.mrb[108].mxu1 %v12012_v55 }
 0xe8c   : > { %29461 = vmatpush3.msra.mxu1 %v35426_v36  ;;  %29462 = vmatprep.mubr.msk.f32.mxu1 %vm32444_vm0, %v36864_v33 }
 0xe8d   : > { %29465 = vmatprep.subr.mxu1 %v36864_v33 }
 0xe8f   : > { %29463 = vmatmul.mubr.f32.vlgmr.msra.gmra.mrb[110].mxu1 %v12010_v13 }
 0xe90   : > { %29466 = vmatpush3.msra.mxu1 %v35418_v8  ;;  %29467 = vmatprep.mubr.msk.f32.mxu1 %vm32444_vm0, %v36864_v33 }
 0xe91   : > { %29470 = vmatprep.subr.mxu1 %v36864_v33 }
 0xe93   : > { %29468 = vmatmul.mubr.f32.vlgmr.msra.gmra.mrb[112].mxu1 %v12010_v13  ;;  %v14817_v13 = vsub.f32 %v14815_v14, %v14816_v43 }
 0xe94   : > { %29471 = vmatpush3.msra.mxu1 %v35443_v60  ;;  %29472 = vmatprep.mubr.msk.f32.mxu1 %vm32444_vm0, %v36864_v33 }
 0xe95   : > { %29475 = vmatprep.subr.mxu1 %v36864_v33  ;;  %v14818_v34 = vand.u32 4294901760, %v14817_v13 }
 0xe97   : > { %29473 = vmatmul.mubr.f32.vlgmr.msra.gmra.mrb[114].mxu1 %v12466_v39 }
 0xe98   : > { %29476 = vmatpush3.msra.mxu1 %v35470_v61  ;;  %29477 = vmatprep.mubr.msk.f32.mxu1 %vm32444_vm0, %v36864_v33 }
 0xe99   : > { %29480 = vmatprep.subr.mxu1 %v36864_v33 }
 0xe9b   : > { %29478 = vmatmul.mubr.f32.vlgmr.msra.gmra.mrb[116].mxu1 %v12462_v25 }
 0xe9c   : > { %29481 = vmatpush3.msra.mxu1 %v35450_v27  ;;  %29482 = vmatprep.mubr.msk.f32.mxu1 %vm32444_vm0, %v36864_v33 }
 0xe9d   : > { %29485 = vmatprep.subr.mxu1 %v36864_v33 }
 0xe9f   : > { %29483 = vmatmul.mubr.f32.vlgmr.msra.gmra.mrb[118].mxu1 %v12463_v47 }
 0xea0   : > { %29486 = vmatpush3.msra.mxu1 %v35443_v60  ;;  %29487 = vmatprep.mubr.msk.f32.mxu1 %vm32444_vm0, %v36864_v33 }
 0xea1   : > { %29490 = vmatprep.subr.mxu1 %v36864_v33 }
 0xea3   : > { %29488 = vmatmul.mubr.f32.vlgmr.msra.gmra.mrb[120].mxu1 %v12464_v42 }
 0xea4   : > { %29491 = vmatpush3.msra.mxu1 %v35457_v57  ;;  %29492 = vmatprep.mubr.msk.f32.mxu1 %vm32444_vm0, %v36864_v33 }
 0xea5   : > { %29495 = vmatprep.subr.mxu1 %v36864_v33 }
 0xea7   : > { %29493 = vmatmul.mubr.f32.vlgmr.msra.gmra.mrb[122].mxu1 %v12462_v25 }
 0xea8   : > { %29496 = vmatpush3.msra.mxu1 %v35443_v60  ;;  %29497 = vmatprep.mubr.msk.f32.mxu1 %vm32444_vm0, %v36864_v33 }
 0xea9   : > { %29500 = vmatprep.subr.mxu1 %v36864_v33 }
 0xeab   : > { %29498 = vmatmul.mubr.f32.vlgmr.msra.gmra.mrb[124].mxu1 %v12462_v25 }
 0xeac   : > { %29501 = vmatpush3.msra.mxu1 %v35418_v8  ;;  %29502 = vmatprep.mubr.msk.f32.mxu1 %vm32444_vm0, %v36864_v33 }
 0xead   : > { %29505 = vmatprep.subr.mxu1 %v36864_v33 }
 0xeaf   : > { %29503 = vmatmul.mubr.f32.vlgmr.msra.gmra.mrb[126].mxu1 %v12917_v63 }
 0xeb0   : > { %29506 = vmatpush3.msra.mxu1 %v35433_v15  ;;  %29507 = vmatprep.mubr.msk.f32.mxu1 %vm32444_vm0, %v36864_v33 }
 0xeb1   : > { %29510 = vmatprep.subr.mxu1 %v36864_v33 }
 0xeb3   : > { %29508 = vmatmul.mubr.f32.vlgmr.msra.gmra.mrb[128].mxu1 %v12913_v24 }
 0xeb4   : > { %29511 = vmatpush3.msra.mxu1 %v35421_v20  ;;  %29512 = vmatprep.mubr.msk.f32.mxu1 %vm32444_vm0, %v36864_v33 }
 0xeb5   : > { %29515 = vmatprep.subr.mxu1 %v36864_v33 }
 0xeb7   : > { %29513 = vmatmul.mubr.f32.vlgmr.msra.gmra.mrb[130].mxu1 %v12914_v45 }
 0xeb8   : > { %29516 = vmatpush3.msra.mxu1 %v35418_v8  ;;  %29517 = vmatprep.mubr.msk.f32.mxu1 %vm32444_vm0, %v36864_v33 }
 0xeb9   : > { %29520 = vmatprep.subr.mxu1 %v36864_v33 }
 0xebb   : > { %29518 = vmatmul.mubr.f32.vlgmr.msra.gmra.mrb[132].mxu1 %v12915_v62 }
 0xebc   : > { %29521 = vmatpush3.msra.mxu1 %v35426_v36  ;;  %29522 = vmatprep.mubr.msk.f32.mxu1 %vm32444_vm0, %v36864_v33 }
 0xebd   : > { %29525 = vmatprep.subr.mxu1 %v36864_v33 }
 0xebf   : > { %29523 = vmatmul.mubr.f32.vlgmr.msra.gmra.mrb[134].mxu1 %v12913_v24 }
 0xec0   : > { %29526 = vmatpush3.msra.mxu1 %v35418_v8  ;;  %29527 = vmatprep.mubr.msk.f32.mxu1 %vm32444_vm0, %v36864_v33 }
 0xec1   : > { %29530 = vmatprep.subr.mxu1 %v36864_v33 }
 0xec3   : > { %29528 = vmatmul.mubr.f32.vlgmr.msra.gmra.mrb[136].mxu1 %v12913_v24 }
 0xec4   : > { %29531 = vmatpush3.msra.mxu1 %v35443_v60  ;;  %29532 = vmatprep.mubr.msk.f32.mxu1 %vm32444_vm0, %v36864_v33 }
 0xec5   : > { %29535 = vmatprep.subr.mxu1 %v36864_v33 }
 0xec7   : > { %29533 = vmatmul.mubr.f32.vlgmr.msra.gmra.mrb[138].mxu1 %v13366_v56 }
 0xec8   : > { %29536 = vmatpush3.msra.mxu1 %v35470_v61  ;;  %29537 = vmatprep.mubr.msk.f32.mxu1 %vm32444_vm0, %v36864_v33 }
 0xec9   : > { %29540 = vmatprep.subr.mxu1 %v36864_v33 }
 0xecb   : > { %29538 = vmatmul.mubr.f32.vlgmr.msra.gmra.mrb[140].mxu1 %v13362_v0 }
 0xecc   : > { %29541 = vmatpush3.msra.mxu1 %v35450_v27  ;;  %29542 = vmatprep.mubr.msk.f32.mxu1 %vm32444_vm0, %v36864_v33 }
 0xecd   : > { %29545 = vmatprep.subr.mxu1 %v36864_v33 }
 0xecf   : > { %29543 = vmatmul.mubr.f32.vlgmr.msra.gmra.mrb[142].mxu1 %v13363_v11 }
 0xed0   : > { %29546 = vmatpush3.msra.mxu1 %v35443_v60  ;;  %29547 = vmatprep.mubr.msk.f32.mxu1 %vm32444_vm0, %v36864_v33 }
 0xed1   : > { %29550 = vmatprep.subr.mxu1 %v36864_v33 }
 0xed3   : > { %29548 = vmatmul.mubr.f32.vlgmr.msra.gmra.mrb[144].mxu1 %v13364_v44 }
 0xed4   : > { %29551 = vmatpush3.msra.mxu1 %v35457_v57  ;;  %29552 = vmatprep.mubr.msk.f32.mxu1 %vm32444_vm0, %v36864_v33 }
 0xed5   : > { %29555 = vmatprep.subr.mxu1 %v36864_v33 }
 0xed6   : > { %v14284_v16 = vpop.f32.mrb[58].mxu0 }
 0xed7   : > { %v14294_v21 = vsel %vm6058_vm3, %v14284_v16, 0  ;;  %29553 = vmatmul.mubr.f32.vlgmr.msra.gmra.mrb[146].mxu1 %v13362_v0  ;;  %v29673_v2 = vpop.f32.mrb[59].mxu0 }
 0xed8   : > { %v14297_v18 = vand.u32 4294901760, %v14294_v21  ;;  %29556 = vmatpush3.msra.mxu1 %v35443_v60  ;;  %29557 = vmatprep.mubr.msk.f32.mxu1 %vm32444_vm0, %v36864_v33 }
 0xed9   : > { %29674 = vmatprep.subr.mxu1 %v36864_v33 }
 0xeda   : > { %v14374_v30 = vsub.f32 %v14294_v21, %v14297_v18 }
 0xedb   : > { %29558 = vmatmul.mubr.f32.vlgmr.msra.gmra.mrb[148].mxu1 %v13362_v0 }
 0xedc   : > { %v14375_v58 = vand.u32 4294901760, %v14374_v30  ;;  %29675 = vmatpush3.msra.mxu1 %v14297_v18  ;;  %29676 = vmatprep.mubr.msk.f32.mxu1 %vm32444_vm0, %v36864_v33 }
 0xedd   : > { %29679 = vmatprep.subr.mxu1 %v36864_v33 }
 0xede   : > { %v14376_v50 = vsub.f32 %v14374_v30, %v14375_v58 }
 0xedf   : > { %29677 = vmatmul.mubr.f32.vlgmr.msra.gmra.mrb[150].mxu1 %v14366_v37 }
 0xee0   : > { %v14377_v7 = vand.u32 4294901760, %v14376_v50  ;;  %29681 = vmatprep.mubr.msk.f32.mxu1 %vm32444_vm0, %v36864_v33 }
 0xee2   : > { %29680 = vmatpush3.msra.mxu1 %v14377_v7 }
 0xee3   : > { %29682 = vmatmul.mubr.f32.vlgmr.msra.gmra.mrb[152].mxu1 %v14362_v23  ;;  %29684 = vmatprep.subr.mxu1 %v36864_v33 }
 0xee4   : > { %29685 = vmatpush3.msra.mxu1 %v14374_v30  ;;  %29686 = vmatprep.mubr.msk.f32.mxu1 %vm32444_vm0, %v36864_v33 }
 0xee5   : > { %29689 = vmatprep.subr.mxu1 %v36864_v33 }
 0xee7   : > { %29687 = vmatmul.mubr.f32.vlgmr.msra.gmra.mrb[154].mxu1 %v14363_v17 }
 0xee8   : > { %29690 = vmatpush3.msra.mxu1 %v14297_v18  ;;  %29691 = vmatprep.mubr.msk.f32.mxu1 %vm32444_vm0, %v36864_v33 }
 0xee9   : > { %29694 = vmatprep.subr.mxu1 %v36864_v33 }
 0xeeb   : > { %29692 = vmatmul.mubr.f32.vlgmr.msra.gmra.mrb[156].mxu1 %v14364_v41 }
 0xeec   : > { %29695 = vmatpush3.msra.mxu1 %v14375_v58  ;;  %29696 = vmatprep.mubr.msk.f32.mxu1 %vm32444_vm0, %v36864_v33 }
 0xeed   : > { %29699 = vmatprep.subr.mxu1 %v36864_v33 }
 0xeef   : > { %29697 = vmatmul.mubr.f32.vlgmr.msra.gmra.mrb[158].mxu1 %v14362_v23 }
 0xef0   : > { %29700 = vmatpush3.msra.mxu1 %v14297_v18  ;;  %29701 = vmatprep.mubr.msk.f32.mxu1 %vm32444_vm0, %v36864_v33 }
 0xef1   : > { %29704 = vmatprep.subr.mxu1 %v36864_v33 }
 0xef3   : > { %29702 = vmatmul.mubr.f32.vlgmr.msra.gmra.mrb[160].mxu1 %v14362_v23 }
 0xef4   : > { %29705 = vmatpush3.msra.mxu1 %v14297_v18  ;;  %29706 = vmatprep.mubr.msk.f32.mxu1 %vm32444_vm0, %v36864_v33 }
 0xef5   : > { %29709 = vmatprep.subr.mxu1 %v36864_v33 }
 0xef7   : > { %29707 = vmatmul.mubr.f32.vlgmr.msra.gmra.mrb[162].mxu1 %v14818_v34 }
 0xef8   : > { %29710 = vmatpush3.msra.mxu1 %v14377_v7  ;;  %29711 = vmatprep.mubr.msk.f32.mxu1 %vm32444_vm0, %v36864_v33 }
 0xef9   : > { %29714 = vmatprep.subr.mxu1 %v36864_v33 }
 0xefb   : > { %29712 = vmatmul.mubr.f32.vlgmr.msra.gmra.mrb[164].mxu1 %v14814_v49 }
 0xefc   : > { %29715 = vmatpush3.msra.mxu1 %v14374_v30  ;;  %29716 = vmatprep.mubr.msk.f32.mxu1 %vm32444_vm0, %v36864_v33 }
 0xefd   : > { %29719 = vmatprep.subr.mxu1 %v36864_v33 }
 0xeff   : > { %29717 = vmatmul.mubr.f32.vlgmr.msra.gmra.mrb[166].mxu1 %v14815_v14 }
 0xf00   : > { %29720 = vmatpush3.msra.mxu1 %v14297_v18  ;;  %29721 = vmatprep.mubr.msk.f32.mxu1 %vm32444_vm0, %v36864_v33 }
 0xf01   : > { %29724 = vmatprep.subr.mxu1 %v36864_v33 }
 0xf03   : > { %29722 = vmatmul.mubr.f32.vlgmr.msra.gmra.mrb[168].mxu1 %v14816_v43 }
 0xf04   : > { %29725 = vmatpush3.msra.mxu1 %v14375_v58  ;;  %29726 = vmatprep.mubr.msk.f32.mxu1 %vm32444_vm0, %v36864_v33 }
 0xf05   : > { %29729 = vmatprep.subr.mxu1 %v36864_v33 }
 0xf07   : > { %29727 = vmatmul.mubr.f32.vlgmr.msra.gmra.mrb[170].mxu1 %v14814_v49 }
 0xf08   : > { %29730 = vmatpush3.msra.mxu1 %v14297_v18  ;;  %29731 = vmatprep.mubr.msk.f32.mxu1 %vm32444_vm0, %v36864_v33 }
 0xf09   : > { %31726 = vmatprep.subr.bf16.mxu1 %v36810_v19 }
 0xf0b   : > { %29732 = vmatmul.mubr.f32.vlgmr.msra.gmra.mrb[172].mxu1 %v14814_v49 }
 0xf0c   : > { %29742 = vmatprep.mubr.msk.f32.mxu1 %vm32444_vm0, %v36864_v33 }
 0xf4e   : > { %v12016_v55 = vpop.f32.mrb[102].mxu1 }
 0xf4f   : > { %v29444_v35 = vpop.f32.mrb[103].mxu1 }
 0xf56   : > { %v12092_v46 = vpop.f32.mrb[104].mxu1 }
 0xf57   : > { %v12093_v31 = vadd.f32 %v12092_v46, %v12016_v55  ;;  %v29449_v26 = vpop.f32.mrb[105].mxu1 }
 0xf5a   : > { %v12166_v6 = vpop.f32.mrb[106].mxu1 }
 0xf5b   : > { %v12167_v8 = vadd.f32 %v12166_v6, %v12093_v31  ;;  %v29454_v20 = vpop.f32.mrb[107].mxu1 }
 0xf5e   : > { %v12240_v36 = vpop.f32.mrb[108].mxu1 }
 0xf5f   : > { %v12241_v9 = vadd.f32 %v12240_v36, %v12167_v8  ;;  %v29459_v40 = vpop.f32.mrb[109].mxu1 }
 0xf62   : > { %v12314_v15 = vpop.f32.mrb[110].mxu1 }
 0xf63   : > { %v12315_v51 = vadd.f32 %v12314_v15, %v12241_v9  ;;  %v29464_v28 = vpop.f32.mrb[111].mxu1 }
 0xf66   : > { %v12386_v25 = vpop.f32.mrb[112].mxu1 }
 0xf67   : > { %v12387_v60 = vadd.f32 %v12386_v25, %v12315_v51  ;;  %v29469_v47 = vpop.f32.mrb[113].mxu1 }
 0xf6a   : > { %v12468_v27 = vpop.f32.mrb[114].mxu1 }
 0xf6b   : > { %v12469_v42 = vadd.f32 %v12468_v27, %v12387_v60  ;;  %v29474_v57 = vpop.f32.mrb[115].mxu1 }
 0xf6e   : > { %v12544_v4 = vpop.f32.mrb[116].mxu1 }
 0xf6f   : > { %v12545_v32 = vadd.f32 %v12544_v4, %v12469_v42  ;;  %v29479_v39 = vpop.f32.mrb[117].mxu1 }
 0xf72   : > { %v12618_v1 = vpop.f32.mrb[118].mxu1 }
 0xf73   : > { %v12619_v61 = vadd.f32 %v12618_v1, %v12545_v32  ;;  %v29484_v52 = vpop.f32.mrb[119].mxu1 }
 0xf76   : > { %v12692_v24 = vpop.f32.mrb[120].mxu1 }
 0xf77   : > { %v12693_v45 = vadd.f32 %v12692_v24, %v12619_v61  ;;  %v29489_v62 = vpop.f32.mrb[121].mxu1 }
 0xf78   : > { %v15199_v62 = vpop.permute.xlu0 %15198 }
 0xf7a   : > { %v12766_v3 = vpop.f32.mrb[122].mxu1 }
 0xf7b   : > { %v12767_v63 = vadd.f32 %v12766_v3, %v12693_v45  ;;  %v29494_v22 = vpop.f32.mrb[123].mxu1 }
 0xf7e   : > { %v12838_v59 = vpop.f32.mrb[124].mxu1 }
 0xf7f   : > { %v12839_v0 = vadd.f32 %v12838_v59, %v12767_v63  ;;  %v29499_v11 = vpop.f32.mrb[125].mxu1 }
 0xf82   : > { %v12919_v44 = vpop.f32.mrb[126].mxu1 }
 0xf83   : > { %v29504_v29 = vpop.f32.mrb[127].mxu1 }
 0xf86   : > { %v12995_v56 = vpop.f32.mrb[128].mxu1 }
 0xf87   : > { %v12996_v12 = vadd.f32 %v12995_v56, %v12919_v44  ;;  %v29509_v10 = vpop.f32.mrb[129].mxu1 }
 0xf8a   : > { %v13069_v23 = vpop.f32.mrb[130].mxu1 }
 0xf8b   : > { %v13070_v17 = vadd.f32 %v13069_v23, %v12996_v12  ;;  %v29514_v41 = vpop.f32.mrb[131].mxu1 }
 0xf8e   : > { %v13143_v16 = vpop.f32.mrb[132].mxu1 }
 0xf8f   : > { %v13144_v21 = vadd.f32 %v13143_v16, %v13070_v17  ;;  %v29519_v2 = vpop.f32.mrb[133].mxu1 }
 0xf92   : > { %v13217_v48 = vpop.f32.mrb[134].mxu1 }
 0xf93   : > { %v13218_v18 = vadd.f32 %v13217_v48, %v13144_v21  ;;  %v29524_v30 = vpop.f32.mrb[135].mxu1 }
 0xf96   : > { %v13289_v37 = vpop.f32.mrb[136].mxu1 }
 0xf97   : > { %v13290_v58 = vadd.f32 %v13289_v37, %v13218_v18  ;;  %v29529_v53 = vpop.f32.mrb[137].mxu1 }
 0xf98   : > { %v15212_v53 = vpop.permute.xlu1 %15211 }
 0xf9a   : > { %v13368_v50 = vpop.f32.mrb[138].mxu1 }
 0xf9b   : > { %v13369_v7 = vadd.f32 %v13368_v50, %v13290_v58  ;;  %v29534_v5 = vpop.f32.mrb[139].mxu1 }
 0xf9e   : > { %v13444_v49 = vpop.f32.mrb[140].mxu1 }
 0xf9f   : > { %v13445_v14 = vadd.f32 %v13444_v49, %v13369_v7  ;;  %v29539_v43 = vpop.f32.mrb[141].mxu1 }
 0xfa0   : > { %v19440_v43 = vld [vmem:[%s36984_s22] sm:$0xf] }
 0xfa2   : > { %v13518_v13 = vpop.f32.mrb[142].mxu1 }
 0xfa3   : > { %v13519_v34 = vadd.f32 %v13518_v13, %v13445_v14  ;;  %v29544_v55 = vpop.f32.mrb[143].mxu1 }
 0xfa6   : > { %v13592_v35 = vpop.f32.mrb[144].mxu1 }
 0xfa7   : > { %v13593_v46 = vadd.f32 %v13592_v35, %v13519_v34  ;;  %v29549_v31 = vpop.f32.mrb[145].mxu1 }
 0xfaa   : > { %v13666_v26 = vpop.f32.mrb[146].mxu1 }
 0xfab   : > { %v13667_v6 = vadd.f32 %v13666_v26, %v13593_v46  ;;  %v29554_v8 = vpop.f32.mrb[147].mxu1 }
 0xfae   : > { %v13738_v20 = vpop.f32.mrb[148].mxu1 }
 0xfaf   : > { %v13739_v36 = vadd.f32 %v13738_v20, %v13667_v6  ;;  %v29559_v9 = vpop.f32.mrb[149].mxu1 }
 0xfb2   : > { %v14368_v40 = vpop.f32.mrb[150].mxu1 }
 0xfb3   : > { %v29678_v15 = vpop.f32.mrb[151].mxu1 }
 0xfb4   : > { %v15252_v15 = vld [vmem:[%s36986_s3] sm:$0xff] }
 0xfb6   : > { %v14444_v51 = vpop.f32.mrb[152].mxu1 }
 0xfb7   : > { %v14445_v28 = vadd.f32 %v14444_v51, %v14368_v40  ;;  %v29683_v25 = vpop.f32.mrb[153].mxu1  ;;  %v19453_v40 = vld [vmem:[%s36985_s2] sm:$0xf]  ;;  %v15253_v51 = vld [vmem:[%s36986_s3 + $0x8] sm:$0xff]  ;;  %s36988_s2 = sld [smem:[#allocation20_spill]] }
 0xfb8   : > { %v15261_v25 = vand.u32 4294901760, %v15252_v15 }
 0xfba   : > { %v14518_v60 = vpop.f32.mrb[154].mxu1 }
 0xfbb   : > { %v14519_v47 = vadd.f32 %v14518_v60, %v14445_v28  ;;  %v29688_v27 = vpop.f32.mrb[155].mxu1  ;;  %v26183_v28 = vld [vmem:[%s36986_s3 + $0x20] sm:$0xff]  ;;  %v15264_v60 = vand.u32 4294901760, %v15253_v51 }
 0xfbc   : > { %v15753_v27 = vand.u32 4294901760, %v26183_v28 }
 0xfbe   : > { %v14592_v42 = vpop.f32.mrb[156].mxu1 }
 0xfbf   : > { %v14593_v57 = vadd.f32 %v14592_v42, %v14519_v47  ;;  %v29693_v4 = vpop.f32.mrb[157].mxu1  ;;  %v26184_v47 = vld [vmem:[%s36986_s3 + $0x28] sm:$0xff] }
 0xfc0   : > { %v15756_v42 = vand.u32 4294901760, %v26184_v47  ;;  %v35600_v4 = vsub.f32 %v15252_v15, %v15261_v25 }
 0xfc2   : > { %v14666_v32 = vpop.f32.mrb[158].mxu1 }
 0xfc3   : > { %v14667_v39 = vadd.f32 %v14666_v32, %v14593_v57  ;;  %v29698_v1 = vpop.f32.mrb[159].mxu1  ;;  %v35598_v57 = vpack.c.bf16 %v15264_v60, %v15261_v25  ;;  %v35602_v32 = vsub.f32 %v15253_v51, %v15264_v60 }
 0xfc4   : > { %v15254_v1 = vld [vmem:[%s36986_s3 + $0x10] sm:$0xff] }
 0xfc5   : > { %31728 = vmatpush3.bf16.msra.mxu1 %v35598_v57 }
 0xfc6   : > { %v14738_v61 = vpop.f32.mrb[160].mxu1  ;;  %31729 = vmatprep.subr.bf16.mxu1 %v36810_v19 }
 0xfc7   : > { %v14739_v52 = vadd.f32 %v14738_v61, %v14667_v39  ;;  %v29703_v24 = vpop.f32.mrb[161].mxu1  ;;  %v35604_v39 = vsub.f32 %v26183_v28, %v15753_v27  ;;  %v15255_v61 = vld [vmem:[%s36986_s3 + $0x18] sm:$0xff] }
 0xfc8   : > { %v35609_v24 = vpack.c.bf16 %v15756_v42, %v15753_v27 }
 0xfc9   : > { %v14742_v45 = vadd.f32 %v14739_v52, %v12839_v0  ;;  %v26185_v52 = vld [vmem:[%s36986_s3 + $0x30] sm:$0xff] }
 0xfca   : > { %v14820_v3 = vpop.f32.mrb[162].mxu1  ;;  %31764 = vmatpush3.bf16.msra.mxu0 %v35609_v24 }
 0xfcb   : > { %v15201_v63 = vadd.f32 %v15199_v62, %v14742_v45  ;;  %v29708_v22 = vpop.f32.mrb[163].mxu1  ;;  %v35611_v45 = vsub.f32 %v26184_v47, %v15756_v42  ;;  %v15267_v62 = vand.u32 4294901760, %v15254_v1  ;;  %31765 = vmatprep.subr.bf16.mxu0 %v36810_v19 }
 0xfcc   : > { %v15759_v22 = vand.u32 4294901760, %v26185_v52 }
 0xfcd   : > { %v26182_v11 = vmul.f32 -1.442695, %v15201_v63  ;;  %v26186_v63 = vld [vmem:[%s36986_s3 + $0x38] sm:$0xff] }
 0xfce   : > { %v14896_v59 = vpop.f32.mrb[164].mxu1 }
 0xfcf   : > { %v14897_v44 = vadd.f32 %v14896_v59, %v14820_v3  ;;  %v29713_v29 = vpop.f32.mrb[165].mxu1  ;;  %32310 = vpow2.f32 %v26182_v11  ;;  %v15270_v3 = vand.u32 4294901760, %v15255_v61  ;;  %v15762_v59 = vand.u32 4294901760, %v26186_v63 }
 0xfd0   : > { %v15342_v11 = vand.u32 4294901760, %v35600_v4 }
 0xfd1   : > { %v35619_v29 = vpack.c.bf16 %v15270_v3, %v15267_v62 }
 0xfd2   : > { %v14970_v56 = vpop.f32.mrb[166].mxu1 }
 0xfd3   : > { %v14971_v12 = vadd.f32 %v14970_v56, %v14897_v44  ;;  %v29718_v10 = vpop.f32.mrb[167].mxu1  ;;  %v15349_v44 = vand.u32 4294901760, %v35602_v32  ;;  %v35621_v56 = vsub.f32 %v15254_v1, %v15267_v62  ;;  %31731 = vmatpush3.bf16.msra.mxu1 %v35619_v29 }
 0xfd4   : > { %v15834_v10 = vand.u32 4294901760, %v35604_v39  ;;  %31732 = vmatprep.subr.bf16.mxu1 %v36810_v19 }
 0xfd5   : > { %v35658_v51 = vpack.c.bf16 %v15349_v44, %v15342_v11 }
 0xfd6   : > { %v15044_v23 = vpop.f32.mrb[168].mxu1 }
 0xfd7   : > { %v15045_v17 = vadd.f32 %v15044_v23, %v14971_v12  ;;  %v29723_v41 = vpop.f32.mrb[169].mxu1  ;;  %v35623_v12 = vsub.f32 %v15255_v61, %v15270_v3  ;;  %v35627_v23 = vpack.c.bf16 %v15762_v59, %v15759_v22 }
 0xfd8   : > { %v35631_v41 = vsub.f32 %v26186_v63, %v15762_v59 }
 0xfd9   : > { %v32311_v48 = vpop.eup %32310  ;;  %31767 = vmatpush3.bf16.msra.mxu0 %v35627_v23 }
 0xfda   : > { %v15118_v16 = vpop.f32.mrb[170].mxu1  ;;  %v15205_v37 = vadd.f32 1.0, %v32311_v48  ;;  %v15841_v48 = vand.u32 4294901760, %v35611_v45  ;;  %31768 = vmatprep.subr.bf16.mxu0 %v36810_v19 }
 0xfdb   : > { %v15119_v21 = vadd.f32 %v15118_v16, %v15045_v17  ;;  %v29728_v2 = vpop.f32.mrb[171].mxu1  ;;  %v35629_v17 = vsub.f32 %v26185_v52, %v15759_v22  ;;  %v15343_v16 = vsub.f32 %v35600_v4, %v15342_v11  ;;  %v15250_v22 = vld [vmem:[%s36988_s2] sm:$0xf]  ;;  %s36990_s2 = sld [smem:[#allocation22_spill]] }
 0xfdc   : > { %32312 = vrcp.f32 %v15205_v37  ;;  %v15835_v2 = vsub.f32 %v35604_v39, %v15834_v10  ;;  %v35660_v28 = vpack.c.bf16 %v15841_v48, %v15834_v10 }
 0xfdd   : > { %v15848_v37 = vand.u32 4294901760, %v35629_v17  ;;  %v31778_v15 = vpack.c.bf16 %v35631_v41, %v35629_v17 }
 0xfde   : > { %v15190_v0 = vpop.f32.mrb[172].mxu1 }
 0xfdf   : > { %v15191_v18 = vadd.f32 %v15190_v0, %v15119_v21  ;;  %v29733_v30 = vpop.f32.mrb[173].mxu1  ;;  %v15350_v21 = vsub.f32 %v35602_v32, %v15349_v44  ;;  %v15344_v0 = vand.u32 4294901760, %v15343_v16 }
 0xfe0   : > { %v15363_v30 = vand.u32 4294901760, %v35623_v12 }
 0xfe1   : > { %v15194_v58 = vadd.f32 %v15191_v18, %v13739_v36  ;;  %v15356_v18 = vand.u32 4294901760, %v35621_v56 }
 0xfe3   : > { %v15214_v50 = vadd.f32 %v15212_v53, %v15194_v58  ;;  %v15351_v58 = vand.u32 4294901760, %v15350_v21  ;;  %v15836_v53 = vand.u32 4294901760, %v15835_v2  ;;  %v35662_v25 = vpack.c.bf16 %v15363_v30, %v15356_v18 }
 0xfe5   : > { %32314 = vtanh.f32 %v15214_v50  ;;  %v15842_v50 = vsub.f32 %v35611_v45, %v15841_v48 }
 0xfe6   : > { %v32313_v7 = vpop.eup %32312 }
 0xfef   : > { %v32315_v5 = vpop.eup %32314 }
 0xff0   : > { %v15216_v49 = vmul.f32 %v32315_v5, %v32313_v7  ;;  %v15855_v7 = vand.u32 4294901760, %v35631_v41  ;;  %v15357_v5 = vsub.f32 %v35621_v56, %v15356_v18 }
 0xff2   : > { %v15218_v14 = vsel %vm15217_vm7, %v15216_v49, 0.0  ;;  %v35664_v60 = vpack.c.bf16 %v15855_v7, %v15848_v37 }
 0xff3   : > { %15219 = vadd.xlane.f32.xlu0 %v15218_v14  ;;  %v15849_v14 = vsub.f32 %v35629_v17, %v15848_v37 }
0x1009   : > { %19443 = vperm.xlu0 %32292, %v19440_v43   ;;  %v31733_v43 = vpack.c.bf16 %v15351_v58, %v15344_v0 }
0x1080   : > { %v15220_v13 = vpop.xlane.xlu0 %15219 }
0x1081   : > { %v15221_v34 = vrot.slane %v15220_v13, 4 }
0x1083   : > { %v15222_v55 = vadd.f32 %v15221_v34, %v15220_v13  ;;  %v15843_v13 = vand.u32 4294901760, %v15842_v50  ;;  %v15856_v34 = vsub.f32 %v35631_v41, %v15855_v7 }
0x1085   : > { %v15223_v35 = vrot.slane %v15222_v55, 2 }
0x1087   : > { %v15224_v46 = vadd.f32 %v15223_v35, %v15222_v55  ;;  %v15358_v55 = vand.u32 4294901760, %v15357_v5 }
0x1089   : > { %v15225_v31 = vrot.slane %v15224_v46, 1 }
0x108b   : > { %v15226_v26 = vadd.f32 %v15225_v31, %v15224_v46  ;;  %v15850_v46 = vand.u32 4294901760, %v15849_v14  ;;  %v31769_v31 = vpack.c.bf16 %v15843_v13, %v15836_v53 }
0x108d   : > { %32193 = vpush %v15226_v26  ;;  %v15857_v26 = vand.u32 4294901760, %v15856_v34 }
0x10be   : > { %s32194_s5 = spop %32193 }
0x10bf   : > { %v15228_v6 = vstv %s32194_s5  ;;  %s36987_s5 = sld [smem:[#allocation19_spill]] }
0x10c0   : > { %v15230_v8 = vmul.f32 0.0078125, %v15228_v6 }
0x10c2   : > { %v35588_v20 = vsub.f32 %v15216_v49, %v15230_v8  ;;  %v15364_v49 = vsub.f32 %v35623_v12, %v15363_v30  ;;  %v31772_v8 = vpack.c.bf16 %v15857_v26, %v15850_v46  ;;  %v15745_v26 = vld [vmem:[%s36990_s2] sm:$0xf] }
0x10c4   : > { %v15232_v36 = vmul.f32 %v35588_v20, %v35588_v20  ;;  %v15365_v35 = vand.u32 4294901760, %v15364_v49 }
0x10c5   : > { %v15248_v3 = vld [vmem:[%s36987_s5] sm:$0xf]  ;;  %s36989_s5 = sld [smem:[#allocation24_spill]] }
0x10c6   : > { %v15233_v9 = vsel %vm15217_vm7, %v15232_v36, 0.0  ;;  %v31736_v6 = vpack.c.bf16 %v15365_v35, %v15358_v55  ;;  %v31739_v36 = vpack.c.bf16 %v35602_v32, %v35600_v4 }
0x10c7   : > { %15234 = vadd.xlane.f32.xlu1 %v15233_v9  ;;  %v31775_v9 = vpack.c.bf16 %v35611_v45, %v35604_v39 }
0x10cb   : > { %v15746_v48 = vld [vmem:[%s36989_s5] sm:$0xf] }
0x10cc   : > { %v17595_v30 = vsel %vm7412_vm4, %v15746_v48, 0 }
0x10cd   : > { %v35774_v58 = vand.u32 4294901760, %v17595_v30 }
0x10cf   : > { %v35783_v34 = vsub.f32 %v17595_v30, %v35774_v58 }
0x10d8   : > { %19456 = vperm.xlu1 %32293, %v19453_v40   ;;  %v31742_v40 = vpack.c.bf16 %v35623_v12, %v35621_v56 }
0x1154   : > { %v15235_v47 = vpop.xlane.xlu1 %15234 }
0x1155   : > { %v15236_v27 = vrot.slane %v15235_v47, 4 }
0x1157   : > { %v15237_v42 = vadd.f32 %v15236_v27, %v15235_v47  ;;  %v26192_v47 = vld [vmem:[%s36986_s3 + $0x58] sm:$0xff] }
0x1159   : > { %v15238_v4 = vrot.slane %v15237_v42, 2 }
0x115b   : > { %v15239_v32 = vadd.f32 %v15238_v4, %v15237_v42 }
0x115d   : > { %v15240_v39 = vrot.slane %v15239_v32, 1 }
0x115f   : > { %v15241_v1 = vadd.f32 %v15240_v39, %v15239_v32 }
0x1161   : > { %32195 = vpush %v15241_v1 }
0x1192   : > { %s32196_s22 = spop %32195 }
0x1193   : > { %v15243_v61 = vstv %s32196_s22 }
0x1194   : > { %v15244_v52 = vmul.f32 0.0078125, %v15243_v61  ;;  %v18058_v61 = vand.u32 4294901760, %v26192_v47 }
0x1196   : > { %v15245_v45 = vadd.f32 1e-05, %v15244_v52 }
0x1198   : > { %32316 = vrsqrt.f32 %v15245_v45 }
0x11a2   : > { %v32317_v62 = vpop.eup %32316 }
0x11a3   : > { %v15247_v63 = vmul.f32 %v32317_v62, %v35588_v20 }
0x11a5   : > { %v15249_v59 = vmul.f32 %v15248_v3, %v15247_v63  ;;  %v35844_v3 = vsub.f32 %v26192_v47, %v18058_v61 }
0x11a7   : > { %v35669_v11 = vadd.f32 %v15250_v22, %v15249_v59 }
0x11a9   : > { %v15258_v44 = vsel %vm15256_vm8, %v35669_v11, 0 }
0x11aa   : > { %v35673_v56 = vand.u32 4294901760, %v15258_v44 }
0x11ac   : > { %v35676_v12 = vsub.f32 %v15258_v44, %v35673_v56 }
0x11ae   : > { %v35679_v10 = vand.u32 4294901760, %v35676_v12 }
0x11b0   : > { %v15332_v17 = vsub.f32 %v35676_v12, %v35679_v10 }
0x11b2   : > { %v35683_v20 = vand.u32 4294901760, %v15332_v17 }
0x11b4   : > { %29743 = vmatmul.mubr.f32.vlgmr.msra.gmra.mrb[174].mxu1 %v35683_v20  ;;  %29809 = vmatmul.mubr.f32.vlgmr.msra.gmra.mrb[60].mxu0 %v35683_v20 }
0x11b5   : > { %31734 = vmatpush3.bf16.msra.mxu1 %v31733_v43  ;;  %31770 = vmatpush3.bf16.msra.mxu0 %v31769_v31  ;;  %v17665_v31 = vand.u32 4294901760, %v35783_v34 }
0x11b6   : > { %31735 = vmatprep.subr.bf16.mxu1 %v36810_v19  ;;  %31771 = vmatprep.subr.bf16.mxu0 %v36810_v19 }
0x11b7   : > { %29753 = vmatprep.mubr.msk.f32.mxu1 %vm32444_vm0, %v36864_v33  ;;  %29819 = vmatprep.mubr.msk.f32.mxu0 %vm32444_vm0, %v36864_v33 }
0x11b9   : > { %31737 = vmatpush3.bf16.msra.mxu1 %v31736_v6  ;;  %31773 = vmatpush3.bf16.msra.mxu0 %v31772_v8  ;;  %v26189_v8 = vld [vmem:[%s36986_s3 + $0x40] sm:$0xff] }
0x11ba   : > { %31738 = vmatprep.subr.bf16.mxu1 %v36810_v19  ;;  %31774 = vmatprep.subr.bf16.mxu0 %v36810_v19 }
0x11bc   : > { %29754 = vmatmul.mubr.f32.vlgmr.msra.gmra.mrb[174].mxu1 %v35673_v56  ;;  %29820 = vmatmul.mubr.f32.vlgmr.msra.gmra.mrb[60].mxu0 %v35673_v56 }
0x11bd   : > { %31740 = vmatpush3.bf16.msra.mxu1 %v31739_v36  ;;  %31776 = vmatpush3.bf16.msra.mxu0 %v31775_v9  ;;  %v26190_v36 = vld [vmem:[%s36986_s3 + $0x48] sm:$0xff] }
0x11be   : > { %31741 = vmatprep.subr.bf16.mxu1 %v36810_v19  ;;  %31777 = vmatprep.subr.bf16.mxu0 %v36810_v19 }
0x11bf   : > { %29764 = vmatprep.mubr.msk.f32.mxu1 %vm32444_vm0, %v36864_v33  ;;  %29830 = vmatprep.mubr.msk.f32.mxu0 %vm32444_vm0, %v36864_v33 }
0x11c1   : > { %31743 = vmatpush3.bf16.msra.mxu1 %v31742_v40  ;;  %31779 = vmatpush3.bf16.msra.mxu0 %v31778_v15  ;;  %v17666_v15 = vsub.f32 %v35783_v34, %v17665_v31 }
0x11c2   : > { %31744 = vmatprep.subr.bf16.mxu1 %v36810_v19  ;;  %31780 = vmatprep.subr.bf16.mxu0 %v36810_v19 }
0x11c3   : > { %v17667_v4 = vand.u32 4294901760, %v17666_v15 }
0x11c4   : > { %29765 = vmatmul.mubr.f32.vlgmr.msra.gmra.mrb[174].mxu1 %v35676_v12  ;;  %29831 = vmatmul.mubr.f32.vlgmr.msra.gmra.mrb[60].mxu0 %v35676_v12 }
0x11c5   : > { %31746 = vmatpush3.bf16.msra.mxu1 %v35598_v57  ;;  %31782 = vmatpush3.bf16.msra.mxu0 %v35609_v24 }
0x11c6   : > { %31747 = vmatprep.subr.bf16.mxu1 %v36810_v19  ;;  %31783 = vmatprep.subr.bf16.mxu0 %v36810_v19 }
0x11c7   : > { %29775 = vmatprep.mubr.msk.f32.mxu1 %vm32444_vm0, %v36864_v33  ;;  %29841 = vmatprep.mubr.msk.f32.mxu0 %vm32444_vm0, %v36864_v33 }
0x11c9   : > { %31749 = vmatpush3.bf16.msra.mxu1 %v35619_v29  ;;  %31785 = vmatpush3.bf16.msra.mxu0 %v35627_v23 }
0x11ca   : > { %31750 = vmatprep.subr.bf16.mxu1 %v36810_v19  ;;  %31786 = vmatprep.subr.bf16.mxu0 %v36810_v19 }
0x11cc   : > { %29776 = vmatmul.mubr.f32.vlgmr.msra.gmra.mrb[174].mxu1 %v35679_v10  ;;  %29842 = vmatmul.mubr.f32.vlgmr.msra.gmra.mrb[60].mxu0 %v35679_v10 }
0x11cd   : > { %31752 = vmatpush3.bf16.msra.mxu1 %v35658_v51  ;;  %31788 = vmatpush3.bf16.msra.mxu0 %v35660_v28  ;;  %v16692_v51 = vsel %vm7412_vm4, %v15745_v26, 0  ;;  %v18049_v28 = vand.u32 4294901760, %v26189_v8 }
0x11ce   : > { %31753 = vmatprep.subr.bf16.mxu1 %v36810_v19  ;;  %31789 = vmatprep.subr.bf16.mxu0 %v36810_v19  ;;  %v35817_v42 = vand.u32 4294901760, %v16692_v51 }
0x11cf   : > { %29786 = vmatprep.mubr.msk.f32.mxu1 %vm32444_vm0, %v36864_v33  ;;  %29852 = vmatprep.mubr.msk.f32.mxu0 %vm32444_vm0, %v36864_v33  ;;  %v35823_v32 = vsub.f32 %v26189_v8, %v18049_v28 }
0x11d0   : > { %v35836_v45 = vsub.f32 %v16692_v51, %v35817_v42 }
0x11d1   : > { %31755 = vmatpush3.bf16.msra.mxu1 %v35662_v25  ;;  %31791 = vmatpush3.bf16.msra.mxu0 %v35664_v60  ;;  %v18052_v25 = vand.u32 4294901760, %v26190_v36  ;;  %v26191_v60 = vld [vmem:[%s36986_s3 + $0x50] sm:$0xff]  ;;  %v18130_v63 = vand.u32 4294901760, %v35823_v32  ;;  %s36992_s3 = sld [smem:[#allocation26_spill]] }
0x11d2   : > { %31756 = vmatprep.subr.bf16.mxu1 %v36810_v19  ;;  %31792 = vmatprep.subr.bf16.mxu0 %v36810_v19  ;;  %v18055_v1 = vand.u32 4294901760, %v26191_v60  ;;  %v16765_v44 = vand.u32 4294901760, %v35836_v45 }
0x11d3   : > { %v35825_v39 = vsub.f32 %v26190_v36, %v18052_v25  ;;  %v35859_v17 = vpack.c.bf16 %v18052_v25, %v18049_v28 }
0x11d4   : > { %29787 = vmatmul.mubr.f32.vlgmr.msra.gmra.mrb[174].mxu1 %v35673_v56  ;;  %29853 = vmatmul.mubr.f32.vlgmr.msra.gmra.mrb[60].mxu0 %v35673_v56  ;;  %v35842_v62 = vsub.f32 %v26191_v60, %v18055_v1  ;;  %v35880_v48 = vpack.c.bf16 %v18058_v61, %v18055_v1 }
0x11d5   : > { %31758 = vmatpush3.bf16.msra.mxu1 %v35598_v57  ;;  %31794 = vmatpush3.bf16.msra.mxu0 %v35609_v24  ;;  %v26188_v57 = vld [vmem:[%s36989_s5 + $0x4] sm:$0xf]  ;;  %v18137_v22 = vand.u32 4294901760, %v35825_v39 }
0x11d6   : > { %31759 = vmatprep.subr.bf16.mxu1 %v36810_v19  ;;  %31795 = vmatprep.subr.bf16.mxu0 %v36810_v19  ;;  %v26187_v24 = vld [vmem:[%s36990_s2 + $0x4] sm:$0xf] }
0x11d7   : > { %29797 = vmatprep.mubr.msk.f32.mxu1 %vm32444_vm0, %v36864_v33  ;;  %29863 = vmatprep.mubr.msk.f32.mxu0 %vm32444_vm0, %v36864_v33 }
0x11d9   : > { %31761 = vmatpush3.bf16.msra.mxu1 %v35619_v29  ;;  %31797 = vmatpush3.bf16.msra.mxu0 %v35627_v23  ;;  %v17146_v29 = vsel %vm7412_vm4, %v26188_v57, 0  ;;  %v16240_v23 = vsel %vm7412_vm4, %v26187_v24, 0  ;;  %v18131_v57 = vsub.f32 %v35823_v32, %v18130_v63  ;;  %v18138_v24 = vsub.f32 %v35825_v39, %v18137_v22 }
0x11da   : > { %29866 = vmatprep.subr.mxu1 %v36864_v33  ;;  %29926 = vmatprep.subr.mxu0 %v36864_v33  ;;  %v35757_v41 = vand.u32 4294901760, %v17146_v29  ;;  %v35759_v16 = vand.u32 4294901760, %v16240_v23 }
0x11db   : > { %v18139_v30 = vand.u32 4294901760, %v18138_v24 }
0x11dc   : > { %29798 = vmatmul.mubr.f32.vlgmr.msra.gmra.mrb[174].mxu1 %v35673_v56  ;;  %29864 = vmatmul.mubr.f32.vlgmr.msra.gmra.mrb[60].mxu0 %v35673_v56  ;;  %v35762_v21 = vsub.f32 %v17146_v29, %v35757_v41  ;;  %v35765_v2 = vsub.f32 %v16240_v23, %v35759_v16  ;;  %v18144_v29 = vand.u32 4294901760, %v35842_v62  ;;  %v18151_v23 = vand.u32 4294901760, %v35844_v3 }
0x11dd   : > { %29928 = vmatprep.mubr.msk.f32.mxu0 %vm32444_vm0, %v36864_v33  ;;  %29868 = vmatprep.mubr.msk.f32.mxu1 %vm32444_vm0, %v36864_v33 }
0x11de   : > { %v17216_v0 = vand.u32 4294901760, %v35762_v21  ;;  %v16313_v18 = vand.u32 4294901760, %v35765_v2 }
0x11e0   : > { %v17217_v37 = vsub.f32 %v35762_v21, %v17216_v0  ;;  %v16314_v53 = vsub.f32 %v35765_v2, %v16313_v18 }
0x11e2   : > { %v17218_v43 = vand.u32 4294901760, %v17217_v37  ;;  %v16315_v55 = vand.u32 4294901760, %v16314_v53  ;;  %v18145_v37 = vsub.f32 %v35842_v62, %v18144_v29  ;;  %v18152_v53 = vsub.f32 %v35844_v3, %v18151_v23 }
0x12af   : > { %v15741_v50 = vpop.f32.mrb[174].mxu1  ;;  %v16233_v7 = vpop.f32.mrb[60].mxu0 }
0x12b0   : > { %v16243_v5 = vsel %vm6058_vm3, %v16233_v7, 0  ;;  %v29799_v49 = vpop.f32.mrb[175].mxu1  ;;  %v29865_v14 = vpop.f32.mrb[61].mxu0  ;;  %v16695_v9 = vsel %vm6058_vm3, %v15741_v50, 0 }
0x12b1   : > { %v35780_v13 = vand.u32 4294901760, %v16243_v5  ;;  %v35813_v27 = vand.u32 4294901760, %v16695_v9  ;;  %v18146_v49 = vand.u32 4294901760, %v18145_v37  ;;  %v18153_v14 = vand.u32 4294901760, %v18152_v53 }
0x12b3   : > { %v16323_v35 = vsub.f32 %v16243_v5, %v35780_v13  ;;  %29867 = vmatpush3.msra.mxu1 %v35780_v13  ;;  %29927 = vmatpush3.msra.mxu0 %v35780_v13  ;;  %v35831_v52 = vsub.f32 %v16695_v9, %v35813_v27 }
0x12b4   : > { %29929 = vmatmul.mubr.f32.vlgmr.msra.gmra.mrb[62].mxu0 %v17218_v43  ;;  %29936 = vmatprep.subr.mxu0 %v36864_v33 }
0x12b5   : > { %29937 = vmatpush3.msra.mxu0 %v16323_v35  ;;  %29938 = vmatprep.mubr.msk.f32.mxu0 %vm32444_vm0, %v36864_v33  ;;  %v16324_v46 = vand.u32 4294901760, %v16323_v35  ;;  %v35855_v59 = vand.u32 4294901760, %v35831_v52 }
0x12b6   : > { %29946 = vmatprep.subr.mxu0 %v36864_v33  ;;  %29869 = vmatmul.mubr.f32.vlgmr.msra.gmra.mrb[176].mxu1 %v16315_v55  ;;  %v31814_v55 = vpack.c.bf16 %v35844_v3, %v35842_v62 }
0x12b7   : > { %29871 = vmatprep.subr.mxu1 %v36864_v33  ;;  %v16325_v6 = vsub.f32 %v16323_v35, %v16324_v46  ;;  %29873 = vmatprep.mubr.msk.f32.mxu1 %vm32444_vm0, %v36864_v33  ;;  %v16777_v50 = vsub.f32 %v35831_v52, %v35855_v59 }
0x12b8   : > { %29939 = vmatmul.mubr.f32.vlgmr.msra.gmra.mrb[64].mxu0 %v35762_v21 }
0x12b9   : > { %29947 = vmatpush3.msra.mxu0 %v16324_v46  ;;  %v35801_v40 = vand.u32 4294901760, %v16325_v6  ;;  %29948 = vmatprep.mubr.msk.f32.mxu0 %vm32444_vm0, %v36864_v33  ;;  %v35904_v43 = vand.u32 4294901760, %v16777_v50 }
0x12ba   : > { %29956 = vmatprep.subr.mxu0 %v36864_v33 }
0x12bb   : > { %29872 = vmatpush3.msra.mxu1 %v35801_v40 }
0x12bc   : > { %29874 = vmatmul.mubr.f32.vlgmr.msra.gmra.mrb[178].mxu1 %v35759_v16  ;;  %29876 = vmatprep.subr.mxu1 %v36864_v33 }
0x12bd   : > { %29949 = vmatmul.mubr.f32.vlgmr.msra.gmra.mrb[66].mxu0 %v35757_v41  ;;  %29877 = vmatpush3.msra.mxu1 %v16323_v35  ;;  %v31826_v35 = vpack.c.bf16 %v18151_v23, %v18144_v29 }
0x12be   : > { %29957 = vmatpush3.msra.mxu0 %v35813_v27  ;;  %29878 = vmatprep.mubr.msk.f32.mxu1 %vm32444_vm0, %v36864_v33 }
0x12bf   : > { %29881 = vmatprep.subr.mxu1 %v36864_v33  ;;  %29958 = vmatprep.mubr.msk.f32.mxu0 %vm32444_vm0, %v36864_v33 }
0x12c0   : > { %29966 = vmatprep.subr.mxu0 %v36864_v33  ;;  %29879 = vmatmul.mubr.f32.vlgmr.msra.gmra.mrb[180].mxu1 %v35765_v2  ;;  %v16766_v2 = vsub.f32 %v35836_v45, %v16765_v44 }
0x12c1   : > { %29882 = vmatpush3.msra.mxu1 %v35780_v13  ;;  %29959 = vmatmul.mubr.f32.vlgmr.msra.gmra.mrb[68].mxu0 %v17667_v4 }
0x12c2   : > { %29967 = vmatpush3.msra.mxu0 %v35831_v52  ;;  %29883 = vmatprep.mubr.msk.f32.mxu1 %vm32444_vm0, %v36864_v33  ;;  %v16767_v7 = vand.u32 4294901760, %v16766_v2 }
0x12c3   : > { %29886 = vmatprep.subr.mxu1 %v36864_v33  ;;  %29968 = vmatprep.mubr.msk.f32.mxu0 %vm32444_vm0, %v36864_v33 }
0x12c4   : > { %29976 = vmatprep.subr.mxu0 %v36864_v33  ;;  %29884 = vmatmul.mubr.f32.vlgmr.msra.gmra.mrb[182].mxu1 %v16313_v18  ;;  %v18132_v18 = vand.u32 4294901760, %v18131_v57 }
0x12c5   : > { %29887 = vmatpush3.msra.mxu1 %v16324_v46  ;;  %29969 = vmatmul.mubr.f32.vlgmr.msra.gmra.mrb[70].mxu0 %v35783_v34 }
0x12c6   : > { %29977 = vmatpush3.msra.mxu0 %v35855_v59  ;;  %29888 = vmatprep.mubr.msk.f32.mxu1 %vm32444_vm0, %v36864_v33  ;;  %v31805_v5 = vpack.c.bf16 %v18139_v30, %v18132_v18  ;;  %v26193_v30 = vld [vmem:[%s36990_s2 + $0x8] sm:$0xf]  ;;  %s36991_s2 = sld [smem:[#allocation28_spill]] }
0x12c7   : > { %29891 = vmatprep.subr.mxu1 %v36864_v33  ;;  %29978 = vmatprep.mubr.msk.f32.mxu0 %vm32444_vm0, %v36864_v33  ;;  %v18536_v50 = vsel %vm7412_vm4, %v26193_v30, 0 }
0x12c8   : > { %31798 = vmatprep.subr.bf16.mxu0 %v36810_v19  ;;  %29889 = vmatmul.mubr.f32.vlgmr.msra.gmra.mrb[184].mxu1 %v35759_v16 }
0x12c9   : > { %29892 = vmatpush3.msra.mxu1 %v35780_v13  ;;  %29979 = vmatmul.mubr.f32.vlgmr.msra.gmra.mrb[72].mxu0 %v35774_v58 }
0x12ca   : > { %31800 = vmatpush3.bf16.msra.mxu0 %v35859_v17  ;;  %29893 = vmatprep.mubr.msk.f32.mxu1 %vm32444_vm0, %v36864_v33 }
0x12cb   : > { %29896 = vmatprep.subr.mxu1 %v36864_v33  ;;  %31801 = vmatprep.subr.bf16.mxu0 %v36810_v19 }
0x12cc   : > { %29894 = vmatmul.mubr.f32.vlgmr.msra.gmra.mrb[186].mxu1 %v35759_v16  ;;  %29994 = vmatprep.mubr.msk.f32.mxu0 %vm32444_vm0, %v36864_v33  ;;  %v31808_v16 = vpack.c.bf16 %v18153_v14, %v18146_v49  ;;  %v18607_v14 = vand.u32 4294901760, %v18536_v50 }
0x12cd   : > { %29897 = vmatpush3.msra.mxu1 %v35813_v27  ;;  %29898 = vmatprep.mubr.msk.f32.mxu1 %vm32444_vm0, %v36864_v33 }
0x12ce   : > { %31803 = vmatpush3.bf16.msra.mxu0 %v35880_v48  ;;  %29901 = vmatprep.subr.mxu1 %v36864_v33 }
0x12cf   : > { %31804 = vmatprep.subr.bf16.mxu0 %v36810_v19 }
0x12d0   : > { %29899 = vmatmul.mubr.f32.vlgmr.msra.gmra.mrb[188].mxu1 %v16767_v7 }
0x12d1   : > { %29995 = vmatmul.mubr.f32.vlgmr.msra.gmra.mrb[74].mxu0 %v35683_v20  ;;  %29902 = vmatpush3.msra.mxu1 %v35904_v43  ;;  %v31811_v20 = vpack.c.bf16 %v35825_v39, %v35823_v32 }
0x12d2   : > { %31806 = vmatpush3.bf16.msra.mxu0 %v31805_v5  ;;  %29903 = vmatprep.mubr.msk.f32.mxu1 %vm32444_vm0, %v36864_v33 }
0x12d3   : > { %29906 = vmatprep.subr.mxu1 %v36864_v33  ;;  %31807 = vmatprep.subr.bf16.mxu0 %v36810_v19 }
0x12d4   : > { %29904 = vmatmul.mubr.f32.vlgmr.msra.gmra.mrb[190].mxu1 %v35817_v42  ;;  %30005 = vmatprep.mubr.msk.f32.mxu0 %vm32444_vm0, %v36864_v33 }
0x12d5   : > { %29907 = vmatpush3.msra.mxu1 %v35831_v52  ;;  %29908 = vmatprep.mubr.msk.f32.mxu1 %vm32444_vm0, %v36864_v33 }
0x12d6   : > { %31809 = vmatpush3.bf16.msra.mxu0 %v31808_v16  ;;  %29911 = vmatprep.subr.mxu1 %v36864_v33 }
0x12d7   : > { %31810 = vmatprep.subr.bf16.mxu0 %v36810_v19 }
0x12d8   : > { %29909 = vmatmul.mubr.f32.vlgmr.msra.gmra.mrb[192].mxu1 %v35836_v45 }
0x12d9   : > { %30006 = vmatmul.mubr.f32.vlgmr.msra.gmra.mrb[74].mxu0 %v35673_v56  ;;  %29912 = vmatpush3.msra.mxu1 %v35813_v27 }
0x12da   : > { %31812 = vmatpush3.bf16.msra.mxu0 %v31811_v20  ;;  %29913 = vmatprep.mubr.msk.f32.mxu1 %vm32444_vm0, %v36864_v33 }
0x12db   : > { %29916 = vmatprep.subr.mxu1 %v36864_v33  ;;  %31813 = vmatprep.subr.bf16.mxu0 %v36810_v19 }
0x12dc   : > { %29914 = vmatmul.mubr.f32.vlgmr.msra.gmra.mrb[194].mxu1 %v16765_v44  ;;  %30016 = vmatprep.mubr.msk.f32.mxu0 %vm32444_vm0, %v36864_v33 }
0x12dd   : > { %29917 = vmatpush3.msra.mxu1 %v35855_v59  ;;  %29918 = vmatprep.mubr.msk.f32.mxu1 %vm32444_vm0, %v36864_v33 }
0x12de   : > { %31815 = vmatpush3.bf16.msra.mxu0 %v31814_v55  ;;  %29921 = vmatprep.subr.mxu1 %v36864_v33 }
0x12df   : > { %31816 = vmatprep.subr.bf16.mxu0 %v36810_v19 }
0x12e0   : > { %29919 = vmatmul.mubr.f32.vlgmr.msra.gmra.mrb[196].mxu1 %v35817_v42 }
0x12e1   : > { %30017 = vmatmul.mubr.f32.vlgmr.msra.gmra.mrb[74].mxu0 %v35676_v12  ;;  %29922 = vmatpush3.msra.mxu1 %v35813_v27  ;;  %v31823_v12 = vpack.c.bf16 %v18137_v22, %v18130_v63 }
0x12e2   : > { %31818 = vmatpush3.bf16.msra.mxu0 %v35859_v17  ;;  %29923 = vmatprep.mubr.msk.f32.mxu1 %vm32444_vm0, %v36864_v33 }
0x12e3   : > { %29931 = vmatprep.subr.mxu1 %v36864_v33  ;;  %31819 = vmatprep.subr.bf16.mxu0 %v36810_v19 }
0x12e4   : > { %29924 = vmatmul.mubr.f32.vlgmr.msra.gmra.mrb[198].mxu1 %v35817_v42  ;;  %30027 = vmatprep.mubr.msk.f32.mxu0 %vm32444_vm0, %v36864_v33 }
0x12e5   : > { %29932 = vmatpush3.msra.mxu1 %v35801_v40  ;;  %29933 = vmatprep.mubr.msk.f32.mxu1 %vm32444_vm0, %v36864_v33 }
0x12e6   : > { %31821 = vmatpush3.bf16.msra.mxu0 %v35880_v48  ;;  %29941 = vmatprep.subr.mxu1 %v36864_v33 }
0x12e7   : > { %31822 = vmatprep.subr.bf16.mxu0 %v36810_v19 }
0x12e8   : > { %29934 = vmatmul.mubr.f32.vlgmr.msra.gmra.mrb[200].mxu1 %v35757_v41 }
0x12e9   : > { %30028 = vmatmul.mubr.f32.vlgmr.msra.gmra.mrb[74].mxu0 %v35679_v10  ;;  %29942 = vmatpush3.msra.mxu1 %v35780_v13 }
0x12ea   : > { %31824 = vmatpush3.bf16.msra.mxu0 %v31823_v12  ;;  %29943 = vmatprep.mubr.msk.f32.mxu1 %vm32444_vm0, %v36864_v33  ;;  %v18608_v12 = vsub.f32 %v18536_v50, %v18607_v14 }
0x12eb   : > { %29951 = vmatprep.subr.mxu1 %v36864_v33  ;;  %31825 = vmatprep.subr.bf16.mxu0 %v36810_v19 }
0x12ec   : > { %29944 = vmatmul.mubr.f32.vlgmr.msra.gmra.mrb[202].mxu1 %v17216_v0  ;;  %30038 = vmatprep.mubr.msk.f32.mxu0 %vm32444_vm0, %v36864_v33 }
0x12ed   : > { %29952 = vmatpush3.msra.mxu1 %v35780_v13  ;;  %29953 = vmatprep.mubr.msk.f32.mxu1 %vm32444_vm0, %v36864_v33 }
0x12ee   : > { %31827 = vmatpush3.bf16.msra.mxu0 %v31826_v35  ;;  %29961 = vmatprep.subr.mxu1 %v36864_v33 }
0x12ef   : > { %31828 = vmatprep.subr.bf16.mxu0 %v36810_v19 }
0x12f0   : > { %29954 = vmatmul.mubr.f32.vlgmr.msra.gmra.mrb[204].mxu1 %v35757_v41 }
0x12f1   : > { %30039 = vmatmul.mubr.f32.vlgmr.msra.gmra.mrb[74].mxu0 %v35673_v56  ;;  %29962 = vmatpush3.msra.mxu1 %v35904_v43 }
0x12f2   : > { %31830 = vmatpush3.bf16.msra.mxu0 %v35859_v17  ;;  %29963 = vmatprep.mubr.msk.f32.mxu1 %vm32444_vm0, %v36864_v33 }
0x12f3   : > { %29971 = vmatprep.subr.mxu1 %v36864_v33  ;;  %31831 = vmatprep.subr.bf16.mxu0 %v36810_v19 }
0x12f4   : > { %29964 = vmatmul.mubr.f32.vlgmr.msra.gmra.mrb[206].mxu1 %v35774_v58  ;;  %30049 = vmatprep.mubr.msk.f32.mxu0 %vm32444_vm0, %v36864_v33 }
0x12f5   : > { %29972 = vmatpush3.msra.mxu1 %v35813_v27  ;;  %29973 = vmatprep.mubr.msk.f32.mxu1 %vm32444_vm0, %v36864_v33 }
0x12f6   : > { %31833 = vmatpush3.bf16.msra.mxu0 %v35880_v48  ;;  %29981 = vmatprep.subr.mxu1 %v36864_v33 }
0x12f7   : > { %30112 = vmatprep.subr.mxu0 %v36864_v33 }
0x12f8   : > { %29974 = vmatmul.mubr.f32.vlgmr.msra.gmra.mrb[208].mxu1 %v17665_v31 }
0x12f9   : > { %30050 = vmatmul.mubr.f32.vlgmr.msra.gmra.mrb[74].mxu0 %v35673_v56  ;;  %29982 = vmatpush3.msra.mxu1 %v35813_v27 }
0x12fa   : > { %29983 = vmatprep.mubr.msk.f32.mxu1 %vm32444_vm0, %v36864_v33  ;;  %30052 = vmatprep.subr.mxu1 %v36864_v33 }
0x12fb   : > { %30114 = vmatprep.mubr.msk.f32.mxu0 %vm32444_vm0, %v36864_v33 }
0x12fc   : > { %29984 = vmatmul.mubr.f32.vlgmr.msra.gmra.mrb[210].mxu1 %v35774_v58 }
0x12fd   : > { %30054 = vmatprep.mubr.msk.f32.mxu1 %vm32444_vm0, %v36864_v33 }
0x1387   : > { %v17220_v10 = vpop.f32.mrb[62].mxu0 }
0x1388   : > { %v29930_v41 = vpop.f32.mrb[63].mxu0 }
0x1389   : > { %v16317_v21 = vpop.f32.mrb[176].mxu1 }
0x138a   : > { %v29870_v0 = vpop.f32.mrb[177].mxu1 }
0x138b   : > { %v17370_v56 = vpop.f32.mrb[64].mxu0 }
0x138c   : > { %v29940_v13 = vpop.f32.mrb[65].mxu0 }
0x138d   : > { %v18609_v13 = vand.u32 4294901760, %v18608_v12 }
0x138f   : > { %v16393_v34 = vpop.f32.mrb[178].mxu1 }
0x1390   : > { %v17518_v46 = vpop.f32.mrb[66].mxu0  ;;  %v16394_v31 = vadd.f32 %v16393_v34, %v16317_v21  ;;  %v29875_v26 = vpop.f32.mrb[179].mxu1 }
0x1391   : > { %v29950_v6 = vpop.f32.mrb[67].mxu0 }
0x1393   : > { %v16467_v8 = vpop.f32.mrb[180].mxu1 }
0x1394   : > { %v17669_v36 = vpop.f32.mrb[68].mxu0  ;;  %v16468_v9 = vadd.f32 %v16467_v8, %v16394_v31  ;;  %v29880_v40 = vpop.f32.mrb[181].mxu1  ;;  %v18610_v8 = vsub.f32 %v18608_v12, %v18609_v13 }
0x1395   : > { %v29960_v15 = vpop.f32.mrb[69].mxu0 }
0x1397   : > { %v16541_v58 = vpop.f32.mrb[182].mxu1 }
0x1398   : > { %v17819_v51 = vpop.f32.mrb[70].mxu0  ;;  %v16542_v28 = vadd.f32 %v16541_v58, %v16468_v9  ;;  %v29885_v25 = vpop.f32.mrb[183].mxu1 }
0x1399   : > { %v29970_v60 = vpop.f32.mrb[71].mxu0  ;;  %v18611_v25 = vand.u32 4294901760, %v18610_v8 }
0x139b   : > { %v16615_v47 = vpop.f32.mrb[184].mxu1 }
0x139c   : > { %v17967_v27 = vpop.f32.mrb[72].mxu0  ;;  %v16616_v42 = vadd.f32 %v16615_v47, %v16542_v28  ;;  %v29890_v4 = vpop.f32.mrb[185].mxu1 }
0x139d   : > { %v29980_v32 = vpop.f32.mrb[73].mxu0 }
0x139e   : > { %v26194_v32 = vld [vmem:[%s36989_s5 + $0x8] sm:$0xf]  ;;  %s36993_s5 = sld [smem:[#allocation27_spill]] }
0x139f   : > { %v16687_v39 = vpop.f32.mrb[186].mxu1 }
0x13a0   : > { %v16688_v1 = vadd.f32 %v16687_v39, %v16616_v42  ;;  %v29895_v61 = vpop.f32.mrb[187].mxu1 }
0x13a1   : > { %v18991_v61 = vsel %vm7412_vm4, %v26194_v32, 0 }
0x13a3   : > { %v16769_v52 = vpop.f32.mrb[188].mxu1 }
0x13a4   : > { %v16770_v45 = vadd.f32 %v16769_v52, %v16688_v1  ;;  %v29900_v62 = vpop.f32.mrb[189].mxu1 }
0x13a7   : > { %v16845_v3 = vpop.f32.mrb[190].mxu1 }
0x13a8   : > { %v16846_v63 = vadd.f32 %v16845_v3, %v16770_v45  ;;  %v29905_v22 = vpop.f32.mrb[191].mxu1 }
0x13ab   : > { %v16919_v59 = vpop.f32.mrb[192].mxu1 }
0x13ac   : > { %v16920_v44 = vadd.f32 %v16919_v59, %v16846_v63  ;;  %v29910_v17 = vpop.f32.mrb[193].mxu1 }
0x13af   : > { %v16993_v57 = vpop.f32.mrb[194].mxu1 }
0x13b0   : > { %v16994_v24 = vadd.f32 %v16993_v57, %v16920_v44  ;;  %v29915_v29 = vpop.f32.mrb[195].mxu1 }
0x13b3   : > { %v17067_v23 = vpop.f32.mrb[196].mxu1 }
0x13b4   : > { %v17068_v2 = vadd.f32 %v17067_v23, %v16994_v24  ;;  %v29920_v48 = vpop.f32.mrb[197].mxu1 }
0x13b7   : > { %v17139_v18 = vpop.f32.mrb[198].mxu1 }
0x13b8   : > { %v36009_v37 = vadd.f32 %v17139_v18, %v17068_v2  ;;  %v29925_v53 = vpop.f32.mrb[199].mxu1 }
0x13bb   : > { %v17296_v7 = vpop.f32.mrb[200].mxu1 }
0x13bc   : > { %v17297_v5 = vadd.f32 %v17296_v7, %v17220_v10  ;;  %v29935_v49 = vpop.f32.mrb[201].mxu1 }
0x13be   : > { %v17371_v43 = vadd.f32 %v17370_v56, %v17297_v5 }
0x13bf   : > { %v17444_v16 = vpop.f32.mrb[202].mxu1 }
0x13c0   : > { %v17445_v20 = vadd.f32 %v17444_v16, %v17371_v43  ;;  %v29945_v55 = vpop.f32.mrb[203].mxu1 }
0x13c2   : > { %v17519_v35 = vadd.f32 %v17518_v46, %v17445_v20 }
0x13c3   : > { %v17590_v41 = vpop.f32.mrb[204].mxu1 }
0x13c4   : > { %v17591_v21 = vadd.f32 %v17590_v41, %v17519_v35  ;;  %v29955_v0 = vpop.f32.mrb[205].mxu1 }
0x13c6   : > { %v17670_v34 = vadd.f32 %v17669_v36, %v17591_v21 }
0x13c7   : > { %v17745_v31 = vpop.f32.mrb[206].mxu1 }
0x13c8   : > { %v17746_v26 = vadd.f32 %v17745_v31, %v17670_v34  ;;  %v29965_v6 = vpop.f32.mrb[207].mxu1 }
0x13ca   : > { %v17820_v9 = vadd.f32 %v17819_v51, %v17746_v26 }
0x13cb   : > { %v17893_v40 = vpop.f32.mrb[208].mxu1 }
0x13cc   : > { %v18529_v10 = vpop.f32.mrb[74].mxu0  ;;  %v17894_v15 = vadd.f32 %v17893_v40, %v17820_v9  ;;  %v29975_v56 = vpop.f32.mrb[209].mxu1 }
0x13cd   : > { %v18539_v58 = vsel %vm6058_vm3, %v18529_v10, 0  ;;  %v30051_v28 = vpop.f32.mrb[75].mxu0 }
0x13ce   : > { %v18542_v46 = vand.u32 4294901760, %v18539_v58  ;;  %v17968_v60 = vadd.f32 %v17967_v27, %v17894_v15  ;;  %v19059_v27 = vand.u32 4294901760, %v18991_v61  ;;  %v19457_v28 = vpop.permute.xlu1 %19456 }
0x13cf   : > { %v18039_v47 = vpop.f32.mrb[210].mxu1 }
0x13d0   : > { %v18619_v42 = vsub.f32 %v18539_v58, %v18542_v46  ;;  %30053 = vmatpush3.msra.mxu1 %v18542_v46  ;;  %v36013_v36 = vadd.f32 %v18039_v47, %v17968_v60  ;;  %v29985_v4 = vpop.f32.mrb[211].mxu1  ;;  %v19060_v52 = vsub.f32 %v18991_v61, %v19059_v27 }
0x13d1   : > { %30055 = vmatmul.mubr.f32.vlgmr.msra.gmra.mrb[212].mxu1 %v18611_v25  ;;  %30057 = vmatprep.subr.mxu1 %v36864_v33  ;;  %v19498_v4 = vld [vmem:[#allocation2] sm:$0x1] }
0x13d2   : > { %v18620_v51 = vand.u32 4294901760, %v18619_v42  ;;  %30059 = vmatprep.mubr.msk.f32.mxu1 %vm32444_vm0, %v36864_v33  ;;  %v19061_v45 = vand.u32 4294901760, %v19060_v52 }
0x13d4   : > { %v18621_v39 = vsub.f32 %v18619_v42, %v18620_v51  ;;  %v19062_v62 = vsub.f32 %v19060_v52, %v19061_v45 }
0x13d6   : > { %v18622_v1 = vand.u32 4294901760, %v18621_v39  ;;  %v19063_v3 = vand.u32 4294901760, %v19062_v62 }
0x13d8   : > { %30058 = vmatpush3.msra.mxu1 %v18622_v1 }
0x13d9   : > { %30060 = vmatmul.mubr.f32.vlgmr.msra.gmra.mrb[214].mxu1 %v18607_v14  ;;  %30062 = vmatprep.subr.mxu1 %v36864_v33 }
0x13da   : > { %30063 = vmatpush3.msra.mxu1 %v18619_v42  ;;  %30064 = vmatprep.mubr.msk.f32.mxu1 %vm32444_vm0, %v36864_v33 }
0x13db   : > { %30067 = vmatprep.subr.mxu1 %v36864_v33 }
0x13dd   : > { %30065 = vmatmul.mubr.f32.vlgmr.msra.gmra.mrb[216].mxu1 %v18608_v12 }
0x13de   : > { %30068 = vmatpush3.msra.mxu1 %v18542_v46  ;;  %30069 = vmatprep.mubr.msk.f32.mxu1 %vm32444_vm0, %v36864_v33 }
0x13df   : > { %30072 = vmatprep.subr.mxu1 %v36864_v33 }
0x13e1   : > { %30070 = vmatmul.mubr.f32.vlgmr.msra.gmra.mrb[218].mxu1 %v18609_v13 }
0x13e2   : > { %30073 = vmatpush3.msra.mxu1 %v18620_v51  ;;  %30074 = vmatprep.mubr.msk.f32.mxu1 %vm32444_vm0, %v36864_v33 }
0x13e3   : > { %30077 = vmatprep.subr.mxu1 %v36864_v33 }
0x13e5   : > { %30075 = vmatmul.mubr.f32.vlgmr.msra.gmra.mrb[220].mxu1 %v18607_v14 }
0x13e6   : > { %30078 = vmatpush3.msra.mxu1 %v18542_v46  ;;  %30079 = vmatprep.mubr.msk.f32.mxu1 %vm32444_vm0, %v36864_v33 }
0x13e7   : > { %30082 = vmatprep.subr.mxu1 %v36864_v33 }
0x13e9   : > { %30080 = vmatmul.mubr.f32.vlgmr.msra.gmra.mrb[222].mxu1 %v18607_v14  ;;  %v19444_v14 = vpop.permute.xlu0 %19443 }
0x13ea   : > { %30083 = vmatpush3.msra.mxu1 %v18542_v46  ;;  %30084 = vmatprep.mubr.msk.f32.mxu1 %vm32444_vm0, %v36864_v33 }
0x13eb   : > { %30087 = vmatprep.subr.mxu1 %v36864_v33 }
0x13ed   : > { %30085 = vmatmul.mubr.f32.vlgmr.msra.gmra.mrb[224].mxu1 %v19063_v3 }
0x13ee   : > { %30088 = vmatpush3.msra.mxu1 %v18622_v1  ;;  %30089 = vmatprep.mubr.msk.f32.mxu1 %vm32444_vm0, %v36864_v33 }
0x13ef   : > { %30092 = vmatprep.subr.mxu1 %v36864_v33 }
0x13f1   : > { %30090 = vmatmul.mubr.f32.vlgmr.msra.gmra.mrb[226].mxu1 %v19059_v27 }
0x13f2   : > { %30093 = vmatpush3.msra.mxu1 %v18619_v42  ;;  %30094 = vmatprep.mubr.msk.f32.mxu1 %vm32444_vm0, %v36864_v33 }
0x13f3   : > { %30097 = vmatprep.subr.mxu1 %v36864_v33 }
0x13f5   : > { %30095 = vmatmul.mubr.f32.vlgmr.msra.gmra.mrb[228].mxu1 %v19060_v52 }
0x13f6   : > { %30098 = vmatpush3.msra.mxu1 %v18542_v46  ;;  %30099 = vmatprep.mubr.msk.f32.mxu1 %vm32444_vm0, %v36864_v33 }
0x13f7   : > { %30102 = vmatprep.subr.mxu1 %v36864_v33 }
0x13f9   : > { %30100 = vmatmul.mubr.f32.vlgmr.msra.gmra.mrb[230].mxu1 %v19061_v45 }
0x13fa   : > { %30103 = vmatpush3.msra.mxu1 %v18620_v51  ;;  %30104 = vmatprep.mubr.msk.f32.mxu1 %vm32444_vm0, %v36864_v33 }
0x13fb   : > { %30107 = vmatprep.subr.mxu1 %v36864_v33 }
0x13fd   : > { %30105 = vmatmul.mubr.f32.vlgmr.msra.gmra.mrb[232].mxu1 %v19059_v27 }
0x13fe   : > { %30108 = vmatpush3.msra.mxu1 %v18542_v46  ;;  %30109 = vmatprep.mubr.msk.f32.mxu1 %vm32444_vm0, %v36864_v33 }
0x1401   : > { %30110 = vmatmul.mubr.f32.vlgmr.msra.gmra.mrb[234].mxu1 %v19059_v27 }
0x14a4   : > { %v18613_v63 = vpop.f32.mrb[212].mxu1 }
0x14a5   : > { %v30056_v22 = vpop.f32.mrb[213].mxu1 }
0x14ac   : > { %v18689_v59 = vpop.f32.mrb[214].mxu1 }
0x14ad   : > { %v18690_v44 = vadd.f32 %v18689_v59, %v18613_v63  ;;  %v30061_v17 = vpop.f32.mrb[215].mxu1 }
0x14b0   : > { %v18763_v57 = vpop.f32.mrb[216].mxu1 }
0x14b1   : > { %v18764_v24 = vadd.f32 %v18763_v57, %v18690_v44  ;;  %v30066_v29 = vpop.f32.mrb[217].mxu1 }
0x14b4   : > { %v18837_v23 = vpop.f32.mrb[218].mxu1 }
0x14b5   : > { %v18838_v2 = vadd.f32 %v18837_v23, %v18764_v24  ;;  %v30071_v48 = vpop.f32.mrb[219].mxu1 }
0x14b8   : > { %v18911_v18 = vpop.f32.mrb[220].mxu1 }
0x14b9   : > { %v18912_v30 = vadd.f32 %v18911_v18, %v18838_v2  ;;  %v30076_v53 = vpop.f32.mrb[221].mxu1  ;;  %v19497_v2 = vld [vmem:[%s36991_s2] sm:$0x1]  ;;  %s36996_s2 = sld [smem:[#allocation36_spill]] }
0x14bc   : > { %v18983_v50 = vpop.f32.mrb[222].mxu1 }
0x14bd   : > { %v18984_v7 = vadd.f32 %v18983_v50, %v18912_v30  ;;  %v30081_v5 = vpop.f32.mrb[223].mxu1  ;;  %v19509_v30 = vsel %vm7412_vm4, %v19497_v2, 0 }
0x14be   : > { %v19580_v53 = vand.u32 4294901760, %v19509_v30 }
0x14bf   : > { %v18987_v49 = vadd.f32 %v18984_v7, %v36009_v37 }
0x14c0   : > { %v19065_v43 = vpop.f32.mrb[224].mxu1  ;;  %v19581_v50 = vsub.f32 %v19509_v30, %v19580_v53 }
0x14c1   : > { %v19446_v16 = vadd.f32 %v19444_v14, %v18987_v49  ;;  %v30086_v20 = vpop.f32.mrb[225].mxu1  ;;  %v19493_v49 = vld [vmem:[%s36992_s3] sm:$0xf] }
0x14c2   : > { %v19582_v7 = vand.u32 4294901760, %v19581_v50 }
0x14c3   : > { %v26195_v12 = vmul.f32 -1.442695, %v19446_v16 }
0x14c4   : > { %v19141_v55 = vpop.f32.mrb[226].mxu1  ;;  %v19583_v20 = vsub.f32 %v19581_v50, %v19582_v7 }
0x14c5   : > { %v19142_v35 = vadd.f32 %v19141_v55, %v19065_v43  ;;  %v30091_v41 = vpop.f32.mrb[227].mxu1  ;;  %32318 = vpow2.f32 %v26195_v12  ;;  %v19495_v43 = vld [vmem:[%s36993_s5] sm:$0xf]  ;;  %s36995_s5 = sld [smem:[#allocation34_spill]] }
0x14c8   : > { %v19215_v21 = vpop.f32.mrb[228].mxu1 }
0x14c9   : > { %v19216_v0 = vadd.f32 %v19215_v21, %v19142_v35  ;;  %v30096_v13 = vpop.f32.mrb[229].mxu1  ;;  %v19584_v35 = vand.u32 4294901760, %v19583_v20 }
0x14cc   : > { %v19289_v34 = vpop.f32.mrb[230].mxu1 }
0x14cd   : > { %v19290_v31 = vadd.f32 %v19289_v34, %v19216_v0  ;;  %v30101_v26 = vpop.f32.mrb[231].mxu1 }
0x14cf   : > { %v32319_v40 = vpop.eup %32318 }
0x14d0   : > { %v19363_v6 = vpop.f32.mrb[232].mxu1  ;;  %v19450_v56 = vadd.f32 1.0, %v32319_v40 }
0x14d1   : > { %v19364_v8 = vadd.f32 %v19363_v6, %v19290_v31  ;;  %v30106_v9 = vpop.f32.mrb[233].mxu1  ;;  %v19504_v31 = vlaneseq }
0x14d2   : > { %32320 = vrcp.f32 %v19450_v56 }
0x14d3   : > { %v36099_v26 = vshrl.u32 %v19504_v31, 7 }
0x14d4   : > { %v19435_v37 = vpop.f32.mrb[234].mxu1 }
0x14d5   : > { %v19436_v10 = vadd.f32 %v19435_v37, %v19364_v8  ;;  %v30111_v15 = vpop.f32.mrb[235].mxu1  ;;  %v36102_v6 = vsub.s32 0, %v36099_v26 }
0x14d7   : > { %v19439_v58 = vadd.f32 %v19436_v10, %v36013_v36 }
0x14d9   : > { %v19459_v25 = vadd.f32 %v19457_v28, %v19439_v58 }
0x14db   : > { %32322 = vtanh.f32 %v19459_v25 }
0x14dc   : > { %v32321_v46 = vpop.eup %32320 }
0x14e5   : > { %v32323_v60 = vpop.eup %32322 }
0x14e6   : > { %v19461_v47 = vmul.f32 %v32323_v60, %v32321_v46 }
0x14e8   : > { %v19463_v42 = vsel %vm19462_vm9, %v19461_v47, 0.0 }
0x14e9   : > { %19464 = vadd.xlane.f32.xlu0 %v19463_v42 }
0x14ff   : > { %19501 = vperm.xlu0 %32292, %v19498_v4   ;;  %v20574_v4 = vsub.s32 1, %v36099_v26 }
0x1576   : > { %v19465_v51 = vpop.xlane.xlu0 %19464 }
0x1577   : > { %v19466_v32 = vrot.slane %v19465_v51, 4 }
0x1579   : > { %v19467_v39 = vadd.f32 %v19466_v32, %v19465_v51  ;;  %v20585_v32 = vsub.s32 2, %v36099_v26 }
0x157b   : > { %v19468_v1 = vrot.slane %v19467_v39, 2 }
0x157d   : > { %v19469_v61 = vadd.f32 %v19468_v1, %v19467_v39  ;;  %v20596_v1 = vsub.s32 3, %v36099_v26 }
0x157e   : > { %v19502_v8 = vpop.permute.xlu0 %19501 }
0x157f   : > { %v19470_v27 = vrot.slane %v19469_v61, 1  ;;  %v19507_v9 = vrot.slane %v19502_v8, %v36102_v6 }
0x1581   : > { %v19471_v36 = vadd.f32 %v19470_v27, %v19469_v61 }
0x1583   : > { %32197 = vpush %v19471_v36 }
0x15b4   : > { %s32198_s22 = spop %32197 }
0x15b5   : > { %v19473_v52 = vstv %s32198_s22  ;;  %s36997_s22 = sld [smem:[#allocation29_spill]] }
0x15b6   : > { %v19475_v45 = vmul.f32 0.015625, %v19473_v52 }
0x15b8   : > { %v19476_v62 = vsub.f32 %v19461_v47, %v19475_v45 }
0x15ba   : > { %v19477_v3 = vmul.f32 %v19476_v62, %v19476_v62 }
0x15bc   : > { %v19478_v63 = vsel %vm19462_vm9, %v19477_v3, 0.0 }
0x15bd   : > { %19479 = vadd.xlane.f32.xlu1 %v19478_v63 }
0x164a   : > { %v19480_v22 = vpop.xlane.xlu1 %19479 }
0x164b   : > { %v19481_v59 = vrot.slane %v19480_v22, 4 }
0x164d   : > { %v19482_v44 = vadd.f32 %v19481_v59, %v19480_v22 }
0x164f   : > { %v19483_v17 = vrot.slane %v19482_v44, 2 }
0x1651   : > { %v19484_v57 = vadd.f32 %v19483_v17, %v19482_v44 }
0x1653   : > { %v19485_v24 = vrot.slane %v19484_v57, 1 }
0x1655   : > { %v19486_v29 = vadd.f32 %v19485_v24, %v19484_v57 }
0x1657   : > { %32199 = vpush %v19486_v29 }
0x1688   : > { %s32200_s8 = spop %32199 }
0x1689   : > { %v19488_v23 = vstv %s32200_s8  ;;  %s36994_s8 = sld [smem:[#allocation32_spill]] }
0x168a   : > { %v19489_v48 = vmul.f32 0.015625, %v19488_v23 }
0x168c   : > { %v19490_v18 = vadd.f32 1e-05, %v19489_v48 }
0x168e   : > { %32324 = vrsqrt.f32 %v19490_v18 }
0x1698   : > { %v32325_v5 = vpop.eup %32324 }
0x1699   : > { %v19492_v14 = vmul.f32 %v32325_v5, %v19476_v62 }
0x169b   : > { %v19494_v16 = vmul.f32 %v19493_v49, %v19492_v14 }
0x169d   : > { %v36058_v55 = vadd.f32 %v19495_v43, %v19494_v16 }
0x169f   : > { %v19512_v12 = vsel %vm6058_vm3, %v36058_v55, 0  ;;  %v20564_v42 = vrot.slane %v36058_v55, %v36102_v6  ;;  %v20575_v51 = vrot.slane %v36058_v55, %v20574_v4  ;;  %v20586_v39 = vrot.slane %v36058_v55, %v20585_v32 }
0x16a0   : > { %v36062_v41 = vand.u32 4294901760, %v19512_v12  ;;  %v20597_v61 = vrot.slane %v36058_v55, %v20596_v1 }
0x16a2   : > { %30113 = vmatpush3.msra.mxu0 %v36062_v41  ;;  %v36066_v21 = vsub.f32 %v19512_v12, %v36062_v41 }
0x16a3   : > { %30115 = vmatmul.mubr.f32.vlgmr.msra.gmra.mrb[76].mxu0 %v19584_v35  ;;  %30117 = vmatprep.subr.mxu0 %v36864_v33 }
0x16a4   : > { %v36070_v0 = vand.u32 4294901760, %v36066_v21  ;;  %30119 = vmatprep.mubr.msk.f32.mxu0 %vm32444_vm0, %v36864_v33 }
0x16a6   : > { %v19594_v13 = vsub.f32 %v36066_v21, %v36070_v0 }
0x16a8   : > { %v36076_v34 = vand.u32 4294901760, %v19594_v13 }
0x16aa   : > { %30118 = vmatpush3.msra.mxu0 %v36076_v34 }
0x16ab   : > { %30120 = vmatmul.mubr.f32.vlgmr.msra.gmra.mrb[76].mxu0 %v19580_v53  ;;  %30122 = vmatprep.subr.mxu0 %v36864_v33 }
0x16ac   : > { %30123 = vmatpush3.msra.mxu0 %v36066_v21  ;;  %30124 = vmatprep.mubr.msk.f32.mxu0 %vm32444_vm0, %v36864_v33 }
0x16ad   : > { %30127 = vmatprep.subr.mxu0 %v36864_v33 }
0x16b3   : > { %30125 = vmatmul.mubr.f32.vlgmr.msra.gmra.mrb[76].mxu0 %v19581_v50 }
0x16b4   : > { %30128 = vmatpush3.msra.mxu0 %v36062_v41  ;;  %30129 = vmatprep.mubr.msk.f32.mxu0 %vm32444_vm0, %v36864_v33 }
0x16b5   : > { %30132 = vmatprep.subr.mxu0 %v36864_v33 }
0x16bb   : > { %30130 = vmatmul.mubr.f32.vlgmr.msra.gmra.mrb[76].mxu0 %v19582_v7  ;;  %v26196_v7 = vld [vmem:[%s36789_s6 + $0xc] sm:$0xf] }
0x16bc   : > { %30133 = vmatpush3.msra.mxu0 %v36070_v0  ;;  %30134 = vmatprep.mubr.msk.f32.mxu0 %vm32444_vm0, %v36864_v33  ;;  %v21251_v5 = vsel %vm7412_vm4, %v26196_v7, 0 }
0x16bd   : > { %30137 = vmatprep.subr.mxu0 %v36864_v33  ;;  %v21319_v49 = vand.u32 4294901760, %v21251_v5 }
0x16bf   : > { %v21320_v14 = vsub.f32 %v21251_v5, %v21319_v49 }
0x16c1   : > { %v21321_v43 = vand.u32 4294901760, %v21320_v14 }
0x16c3   : > { %30135 = vmatmul.mubr.f32.vlgmr.msra.gmra.mrb[76].mxu0 %v19580_v53  ;;  %v21322_v16 = vsub.f32 %v21320_v14, %v21321_v43 }
0x16c4   : > { %30138 = vmatpush3.msra.mxu0 %v36062_v41  ;;  %30139 = vmatprep.mubr.msk.f32.mxu0 %vm32444_vm0, %v36864_v33 }
0x16c5   : > { %30172 = vmatprep.subr.mxu0 %v36864_v33  ;;  %v21323_v20 = vand.u32 4294901760, %v21322_v16 }
0x16cb   : > { %30140 = vmatmul.mubr.f32.vlgmr.msra.gmra.mrb[76].mxu0 %v19580_v53 }
0x16cc   : > { %30174 = vmatprep.mubr.msk.f32.mxu0 %vm32444_vm0, %v36864_v33 }
0x179e   : > { %v19956_v40 = vpop.f32.mrb[76].mxu0 }
0x179f   : > { %v31978_v37 = vadd.f32 %v19956_v40, %v19507_v9  ;;  %v30141_v10 = vpop.f32.mrb[77].mxu0 }
0x17a1   : > { %v20014_v15 = vsel %vm2669_vm2, %v31978_v37, 0  ;;  %19975 = vxpose.xlu1.b32.start.end [1/1] (short) (narrow) %v31978_v37, 16  ;;  %v19960_v56 = vmul.f32 %v31978_v37, %v31978_v37  ;;  %vm20692_vm2 = vcmask 1043459  }
0x17a2   : > { %v36106_v58 = vand.u32 4294901760, %v20014_v15 }
0x17a3   : > { %v19962_v28 = vsel %vm19961_vm10, %v19960_v56, 0.0 }
0x17a4   : > { %v20104_v25 = vsub.f32 %v20014_v15, %v36106_v58  ;;  %30142 = vmatprep.subr.mxu1 %v36106_v58  ;;  %19963 = vadd.xlane.f32.xlu0 %v19962_v28 }
0x17a5   : > { %30143 = vmatpush3.msra.mxu1 %v36106_v58 }
0x17a6   : > { %v20105_v46 = vand.u32 4294901760, %v20104_v25 }
0x17a8   : > { %v20106_v60 = vsub.f32 %v20104_v25, %v20105_v46 }
0x17aa   : > { %v20107_v47 = vand.u32 4294901760, %v20106_v60 }
0x17ac   : > { %30147 = vmatprep.subr.mxu1 %v20107_v47 }
0x17ba   : > { %20566 = vbcast.lane.b32.xlu0 %v20564_v42, 256 }
0x17be   : > { %20577 = vbcast.lane.b32.xlu0 %v20575_v51, 256 }
0x17c2   : > { %20581 = vbcast.lane.b32.xlu0 %v20575_v51, 264 }
0x17c3   : > { %20570 = vbcast.lane.b32.xlu1 %v20564_v42, 264 }
0x17c6   : > { %20588 = vbcast.lane.b32.xlu0 %v20586_v39, 256 }
0x17ca   : > { %20592 = vbcast.lane.b32.xlu0 %v20586_v39, 264 }
0x17ce   : > { %20599 = vbcast.lane.b32.xlu0 %v20597_v61, 256 }
0x17d2   : > { %20603 = vbcast.lane.b32.xlu0 %v20597_v61, 264 }
0x1821   : > { %v19991_v27 = vpop.trf.xlu1 }
0x1822   : > { %v20008_v36 = vsel %vm2665_vm1, %v19991_v27, 0 }
0x1823   : > { %v20082_v52 = vand.u32 4294901760, %v20008_v36 }
0x1825   : > { %v20083_v45 = vsub.f32 %v20008_v36, %v20082_v52  ;;  %v19992_v62 = vpop.trf.xlu1 }
0x1826   : > { %v20011_v3 = vsel %vm2665_vm1, %v19992_v62, 0  ;;  %vm20689_vm1 = vcmask 1042434  }
0x1827   : > { %v20084_v63 = vand.u32 4294901760, %v20083_v45  ;;  %v20092_v22 = vand.u32 4294901760, %v20011_v3 }
0x1829   : > { %v20093_v59 = vsub.f32 %v20011_v3, %v20092_v22  ;;  %v20085_v44 = vsub.f32 %v20083_v45, %v20084_v63 }
0x182b   : > { %v20094_v17 = vand.u32 4294901760, %v20093_v59  ;;  %v20086_v57 = vand.u32 4294901760, %v20085_v44 }
0x182d   : > { %v20095_v24 = vsub.f32 %v20093_v59, %v20094_v17  ;;  %30144 = vmatprep.mubr.f32.mxu1 %v20086_v57 }
0x182f   : > { %v20096_v29 = vand.u32 4294901760, %v20095_v24 }
0x1831   : > { %30145 = vmatmul.mubr.f32.vlgmr.msra.gmra.mrb[236].mxu1 %v20096_v29  ;;  %v19964_v23 = vpop.xlane.xlu0 %19963 }
0x1832   : > { %30148 = vmatpush3.msra.mxu1 %v20107_v47  ;;  %32326 = vrsqrt.f32 %v19964_v23  ;;  %30149 = vmatprep.mubr.f32.mxu1 %v20082_v52  ;;  %vm19967_vm11 = vcmp.eq.f32.partialorder %v19964_v23, inf  ;;  %v19970_v18 = vand.u32 2147483648, %v19964_v23  ;;  %vm19969_vm12 = vcmp.eq.f32.partialorder %v19964_v23, 0.0 }
0x1833   : > { %30152 = vmatprep.subr.mxu1 %v20104_v25 }
0x1835   : > { %v20567_v12 = vpop.permute.xlu0 %20566  ;;  %v20571_v51 = vpop.permute.xlu1 %20570 }
0x1839   : > { %30150 = vmatmul.mubr.f32.vlgmr.msra.gmra.mrb[236].mxu1 %v20092_v22  ;;  %v20578_v35 = vpop.permute.xlu0 %20577 }
0x183a   : > { %30153 = vmatpush3.msra.mxu1 %v20104_v25  ;;  %30154 = vmatprep.mubr.f32.mxu1 %v20083_v45 }
0x183b   : > { %30157 = vmatprep.subr.mxu1 %v36106_v58 }
0x183c   : > { %v32327_v2 = vpop.eup %32326 }
0x183d   : > { %v19966_v48 = vmul.f32 %v32327_v2, %v19964_v23  ;;  %v20582_v13 = vpop.permute.xlu0 %20581 }
0x183f   : > { %v19968_v30 = vsel %vm19967_vm11, %v19964_v23, %v19966_v48 }
0x1840   : > { %v19971_v53 = vsel %vm19969_vm12, %v19970_v18, %v19968_v30 }
0x1841   : > { %30155 = vmatmul.mubr.f32.vlgmr.msra.gmra.mrb[236].mxu1 %v20093_v59  ;;  %v19972_v50 = vmul.f32 %v19971_v53, %v19971_v53  ;;  %v20589_v9 = vpop.permute.xlu0 %20588 }
0x1842   : > { %30158 = vmatpush3.msra.mxu1 %v36106_v58  ;;  %30159 = vmatprep.mubr.f32.mxu1 %v20084_v63 }
0x1843   : > { %30162 = vmatprep.subr.mxu1 %v20105_v46  ;;  %32201 = vpush %v19972_v50 }
0x1845   : > { %v20593_v37 = vpop.permute.xlu0 %20592 }
0x1849   : > { %30160 = vmatmul.mubr.f32.vlgmr.msra.gmra.mrb[236].mxu1 %v20094_v17 }
0x184a   : > { %30163 = vmatpush3.msra.mxu1 %v20105_v46  ;;  %30164 = vmatprep.mubr.f32.mxu1 %v20082_v52 }
0x184b   : > { %30167 = vmatprep.subr.mxu1 %v36106_v58 }
0x1851   : > { %30165 = vmatmul.mubr.f32.vlgmr.msra.gmra.mrb[236].mxu1 %v20092_v22 }
0x1852   : > { %30168 = vmatpush3.msra.mxu1 %v36106_v58  ;;  %30169 = vmatprep.mubr.f32.mxu1 %v20082_v52  ;;  %v20600_v58 = vpop.permute.xlu0 %20599 }
0x1853   : > { %30202 = vmatprep.subr.mxu1 %v36864_v33 }
0x1856   : > { %v20604_v36 = vpop.permute.xlu0 %20603 }
0x1859   : > { %30170 = vmatmul.mubr.f32.vlgmr.msra.gmra.mrb[236].mxu1 %v20092_v22 }
0x185a   : > { %30203 = vmatpush3.msra.mxu1 %v36062_v41  ;;  %30204 = vmatprep.mubr.msk.f32.mxu1 %vm32444_vm0, %v36864_v33 }
0x185b   : > { %30207 = vmatprep.subr.mxu1 %v36864_v33 }
0x185d   : > { %30205 = vmatmul.mubr.f32.vlgmr.msra.gmra.mrb[238].mxu1 %v21323_v20 }
0x185e   : > { %30208 = vmatpush3.msra.mxu1 %v36076_v34  ;;  %30209 = vmatprep.mubr.msk.f32.mxu1 %vm32444_vm0, %v36864_v33 }
0x185f   : > { %30212 = vmatprep.subr.mxu1 %v36864_v33 }
0x1865   : > { %30210 = vmatmul.mubr.f32.vlgmr.msra.gmra.mrb[238].mxu1 %v21319_v49 }
0x1866   : > { %30213 = vmatpush3.msra.mxu1 %v36066_v21  ;;  %30214 = vmatprep.mubr.msk.f32.mxu1 %vm32444_vm0, %v36864_v33  ;;  %v32447_v21 = vmov 1966171168  }
0x1867   : > { %30217 = vmatprep.subr.mxu1 %v36864_v33 }
0x186d   : > { %30215 = vmatmul.mubr.f32.vlgmr.msra.gmra.mrb[238].mxu1 %v21320_v14 }
0x186e   : > { %30218 = vmatpush3.msra.mxu1 %v36062_v41  ;;  %30219 = vmatprep.mubr.msk.f32.mxu1 %vm32444_vm0, %v36864_v33 }
0x186f   : > { %30222 = vmatprep.subr.mxu1 %v36864_v33 }
0x1874   : > { %s32202_s3 = spop %32201 }
0x1875   : > { %30220 = vmatmul.mubr.f32.vlgmr.msra.gmra.mrb[238].mxu1 %v21321_v43 }
0x1876   : > { %30223 = vmatpush3.msra.mxu1 %v36070_v0  ;;  %30224 = vmatprep.mubr.msk.f32.mxu1 %vm32444_vm0, %v36864_v33  ;;  %v20510_v0 = vunpack.c.l.s4 %v32447_v21 }
0x1877   : > { %30227 = vmatprep.subr.mxu1 %v36864_v33 }
0x1878   : > { %v20511_v34 = vunpack.c.0.s8 %v20510_v0 }
0x187a   : > { %v20514_v8 = vsub.s32 %v20511_v34, %v36099_v26 }
0x187c   : > { %v20515_v40 = vrot.slane %v36058_v55, %v20514_v8 }
0x187d   : > { %30225 = vmatmul.mubr.f32.vlgmr.msra.gmra.mrb[238].mxu1 %v21319_v49 }
0x187e   : > { %30228 = vmatpush3.msra.mxu1 %v36062_v41  ;;  %30229 = vmatprep.mubr.msk.f32.mxu1 %vm32444_vm0, %v36864_v33  ;;  %v20505_v41 = vstv %s32202_s3  ;;  %v20516_v10 = vcombine.high %v20515_v40, %v20515_v40  ;;  %v20523_v15 = vrot.slane %v20515_v40, %v20514_v8  ;;  %s36998_s3 = sld [smem:[#allocation31_spill]] }
0x187f   : > { %31837 = vmatprep.subr.bf16.mxu1 %v36810_v19  ;;  %32328 = vrcp.f32 %v20505_v41 }
0x1880   : > { %v20530_v56 = vrot.slane %v20516_v10, %v20514_v8  ;;  %v20531_v28 = vcombine.high %v20523_v15, %v20523_v15  ;;  %v20536_v39 = vrot.slane %v20523_v15, %v36102_v6 }
0x1882   : > { %v20532_v60 = vcombine.high %v20530_v56, %v20530_v56  ;;  %v20540_v4 = vrot.slane %v20530_v56, %v36102_v6  ;;  %v20544_v27 = vrot.slane %v20531_v28, %v36102_v6  ;;  %v20781_v56 = vld [vmem:[%s36994_s8] sm:$0xf]  ;;  %s36999_s8 = sld [smem:[#allocation30_spill]] }
0x1883   : > { %v25041_v28 = vld [vmem:[%s36995_s5] sm:$0xf] }
0x1884   : > { %v20548_v3 = vrot.slane %v20532_v60, %v36102_v6 }
0x1885   : > { %30230 = vmatmul.mubr.f32.vlgmr.msra.gmra.mrb[238].mxu1 %v21319_v49 }
0x1886   : > { %30243 = vmatprep.mubr.msk.f32.mxu1 %vm32444_vm0, %v36864_v33 }
0x1889   : > { %v32329_v25 = vpop.eup %32328 }
0x192c   : > { %v30171_v46 = vpop.f32.mrb[236].mxu1 }
0x192d   : > { %v20508_v47 = vmul.f32 %v32329_v25, %v30171_v46  ;;  %v20495_v42 = vpop.f32.mrb[237].mxu1  ;;  %v21700_v46 = vld [vmem:[%s36996_s2 + $0x8] sm:$0xff] }
0x192e   : > { %v20507_v32 = vmul.f32 %v32329_v25, %v20495_v42  ;;  %v21699_v25 = vld [vmem:[%s36996_s2] sm:$0xff]  ;;  %s37002_s2 = sld [smem:[#allocation38_spill]] }
0x192f   : > { %v20556_v1 = vmul.f32 %v20540_v4, %v20508_v47  ;;  %v20606_v55 = vmul.f32 %v20571_v51, %v20508_v47  ;;  %v20608_v61 = vmul.f32 %v20582_v13, %v20508_v47  ;;  %v20554_v52 = vmul.f32 %v20536_v39, %v20508_v47  ;;  %v25509_v51 = vld [vmem:[%s32675_s28] sm:$0x3] }
0x1930   : > { %v20553_v45 = vmul.f32 %v20536_v39, %v20507_v32  ;;  %v20605_v62 = vmul.f32 %v20567_v12, %v20507_v32  ;;  %v20610_v63 = vmul.f32 %v20593_v37, %v20508_v47  ;;  %v20612_v22 = vmul.f32 %v20604_v36, %v20508_v47 }
0x1931   : > { %v20614_v59 = vmax.f32 %v20606_v55, %v20608_v61  ;;  %v20607_v44 = vmul.f32 %v20578_v35, %v20507_v32  ;;  %v20558_v17 = vmul.f32 %v20544_v27, %v20508_v47  ;;  %v20555_v57 = vmul.f32 %v20540_v4, %v20507_v32 }
0x1932   : > { %v20560_v24 = vmul.f32 %v20548_v3, %v20508_v47  ;;  %v20557_v29 = vmul.f32 %v20544_v27, %v20507_v32  ;;  %v20609_v2 = vmul.f32 %v20589_v9, %v20507_v32  ;;  %v20559_v18 = vmul.f32 %v20548_v3, %v20507_v32 }
0x1933   : > { %v20616_v23 = vmax.f32 %v20614_v59, %v20610_v63  ;;  %v20613_v48 = vmax.f32 %v20605_v62, %v20607_v44  ;;  %v20611_v53 = vmul.f32 %v20600_v58, %v20507_v32  ;;  %v26199_v58 = vld [vmem:[%s36995_s5 + $0x8] sm:$0xf]  ;;  %v21705_v60 = vand.u32 4294901760, %v21699_v25  ;;  %v26197_v32 = vld [vmem:[%s36995_s5 + $0xc] sm:$0xf] }
0x1934   : > { %v21708_v47 = vand.u32 4294901760, %v21700_v46  ;;  %v25049_v63 = vld [vmem:[%s32665_s16] sm:$0xf] }
0x1935   : > { %v20618_v30 = vmax.f32 %v20616_v23, %v20612_v22  ;;  %v20615_v50 = vmax.f32 %v20613_v48, %v20609_v2  ;;  %v36173_v42 = vsub.f32 %v21699_v25, %v21705_v60 }
0x1936   : > { %v36175_v4 = vsub.f32 %v21700_v46, %v21708_v47  ;;  %v36187_v22 = vpack.c.bf16 %v21708_v47, %v21705_v60 }
0x1937   : > { %32330 = vtanh.f32 %v20618_v30  ;;  %v20617_v7 = vmax.f32 %v20615_v50, %v20611_v53  ;;  %v21784_v39 = vand.u32 4294901760, %v36173_v42  ;;  %v20657_v30 = vld [vmem:[%s36997_s22 + $0x4] sm:$0xf]  ;;  %v20658_v53 = vld [vmem:[%s36997_s22 + $0x8] sm:$0xf] }
0x1938   : > { %v31841_v59 = vpack.c.bf16 %v36175_v4, %v36173_v42 }
0x1939   : > { %32332 = vtanh.f32 %v20617_v7  ;;  %v21785_v61 = vsub.f32 %v36173_v42, %v21784_v39  ;;  %v20780_v7 = vld [vmem:[%s36998_s3] sm:$0xf]  ;;  %s37000_s3 = sld [smem:[#allocation35_spill]] }
0x193f   : > { %v21240_v42 = vld [vmem:[%s37000_s3 + $0x8] sm:$0xff] }
0x1941   : > { %v32331_v5 = vpop.eup %32330 }
0x1942   : > { %v20622_v6 = vmax.f32 %v32331_v5, 0.0 }
0x1943   : > { %v32333_v49 = vpop.eup %32332 }
0x1944   : > { %v20626_v14 = vmul.f32 %v20622_v6, %v20556_v1  ;;  %v20624_v43 = vmul.f32 %v20622_v6, %v20554_v52  ;;  %v20621_v16 = vmax.f32 %v32333_v49, 0.0  ;;  %v20628_v20 = vmul.f32 %v20622_v6, %v20558_v17  ;;  %v26201_v52 = vld [vmem:[%s36995_s5 + $0x4] sm:$0xf]  ;;  %s26203_s5 = sshll.u32 %s32703_s0, 5  ;;  %s32448_s0 = smov [#allocation3]  }
0x1945   : > { %v20630_v12 = vmul.f32 %v20622_v6, %v20560_v24  ;;  %v21791_v1 = vand.u32 4294901760, %v36175_v4  ;;  %v20664_v17 = vand.u32 127, %v19504_v31  ;;  %v20656_v6 = vld [vmem:[%s36997_s22] sm:$0xf]  ;;  %s36560_s9 = scalar_lea.hbm %s32680_s27, %s26203_s5 }
0x1946   : > { %v20641_v35 = vsel %vm20631_vm13, %v20626_v14, 0.0  ;;  %v20635_v21 = vsel %vm20631_vm13, %v20624_v43, 0.0  ;;  %v20623_v0 = vmul.f32 %v20621_v16, %v20553_v45  ;;  %v20625_v13 = vmul.f32 %v20621_v16, %v20555_v57 }
0x1947   : > { %20642 = vadd.xlane.f32.xlu0 %v20641_v35  ;;  %20636 = vadd.xlane.f32.xlu1 %v20635_v21  ;;  %v20627_v34 = vmul.f32 %v20621_v16, %v20557_v29  ;;  %v20629_v8 = vmul.f32 %v20621_v16, %v20559_v18  ;;  %v20647_v41 = vsel %vm20631_vm13, %v20628_v20, 0.0  ;;  %v20653_v37 = vsel %vm20631_vm13, %v20630_v12, 0.0  ;;  %v20659_v12 = vld [vmem:[%s36997_s22 + $0xc] sm:$0xf] }
0x1948   : > { %v20632_v9 = vsel %vm20631_vm13, %v20623_v0, 0.0  ;;  %v20638_v40 = vsel %vm20631_vm13, %v20625_v13, 0.0  ;;  %v21792_v27 = vsub.f32 %v36175_v4, %v21791_v1  ;;  %v21786_v45 = vand.u32 4294901760, %v21785_v61 }
0x1949   : > { %v20644_v10 = vsel %vm20631_vm13, %v20627_v34, 0.0  ;;  %v20650_v15 = vsel %vm20631_vm13, %v20629_v8, 0.0  ;;  %v36192_v44 = vpack.c.bf16 %v21791_v1, %v21784_v39  ;;  %v20669_v57 = vadd.s32 4294967288, %v20664_v17 }
0x194a   : > { %v21793_v62 = vand.u32 4294901760, %v21792_v27  ;;  %v20667_v2 = vsub.s32 %v20664_v17, %v36099_v26  ;;  %v20788_v16 = vsel %vm7412_vm4, %v20780_v7, 0 }
0x194b   : > { %20633 = vadd.xlane.f32.xlu0 %v20632_v9  ;;  %20648 = vadd.xlane.f32.xlu1 %v20647_v41  ;;  %v20672_v23 = vsub.s32 %v20669_v57, %v36099_v26  ;;  %v36205_v34 = vand.u32 4294901760, %v20788_v16 }
0x194c   : > { %v31838_v3 = vpack.c.bf16 %v21793_v62, %v21786_v45 }
0x194e   : > { %31839 = vmatpush3.bf16.msra.mxu1 %v31838_v3 }
0x194f   : > { %20639 = vadd.xlane.f32.xlu0 %v20638_v40  ;;  %20654 = vadd.xlane.f32.xlu1 %v20653_v37 }
0x1950   : > { %31843 = vmatprep.subr.bf16.mxu1 %v36810_v19 }
0x1953   : > { %20645 = vadd.xlane.f32.xlu0 %v20644_v10 }
0x1957   : > { %20651 = vadd.xlane.f32.xlu0 %v20650_v15 }
0x1958   : > { %v36181_v55 = vpop.f32.mrb[238].mxu1 }
0x1959   : > { %v30231_v36 = vpop.f32.mrb[239].mxu1 }
0x1960   : > { %20784 = vperm.xlu1 %32293, %v20781_v56  }
0x1964   : > { %22631 = vperm.xlu1 %32293, %v26199_v58  }
0x1968   : > { %25044 = vperm.xlu1 %32293, %v25041_v28  }
0x196c   : > { %25512 = vperm.xlu1 %32293, %v25509_v51  }
0x196d   : > { %21247 = vperm.xlu0 %32292, %v26197_v32   ;;  %v36211_v32 = vsub.f32 %v20788_v16, %v36205_v34 }
0x1971   : > { %23584 = vperm.xlu0 %32292, %v26201_v52  }
0x1975   : > { %25052 = vperm.xlu0 %32292, %v25049_v63   ;;  %v20660_v63 = vld [vmem:[%s36999_s8] sm:$0xf]  ;;  %s37001_s8 = sld [smem:[#allocation37_spill]] }
0x19d4   : > { %v20643_v24 = vpop.xlane.xlu0 %20642  ;;  %v20637_v29 = vpop.xlane.xlu1 %20636 }
0x19d5   : > { %v20673_v18 = vrot.slane %v20637_v29, %v20672_v23  ;;  %v20705_v20 = vrot.slane %v20643_v24, %v20672_v23 }
0x19d8   : > { %v20634_v48 = vpop.xlane.xlu0 %20633  ;;  %v20649_v5 = vpop.xlane.xlu1 %20648 }
0x19d9   : > { %v20668_v50 = vrot.slane %v20634_v48, %v20667_v2  ;;  %v20733_v15 = vrot.slane %v20649_v5, %v20672_v23 }
0x19db   : > { %v20675_v49 = vsel %vm20674_vm14, %v20673_v18, %v20668_v50 }
0x19dc   : > { %v20678_v31 = vmul.f32 %v20675_v49, %v20657_v30  ;;  %v20679_v14 = vmul.f32 %v20675_v49, %v20658_v53  ;;  %v20640_v43 = vpop.xlane.xlu0 %20639  ;;  %v20677_v35 = vmul.f32 %v20675_v49, %v20656_v6  ;;  %v20680_v8 = vmul.f32 %v20675_v49, %v20659_v12  ;;  %v20655_v37 = vpop.xlane.xlu1 %20654 }
0x19dd   : > { %v20701_v26 = vrot.slane %v20640_v43, %v20667_v2  ;;  %v20761_v47 = vrot.slane %v20655_v37, %v20672_v23 }
0x19de   : > { %v20685_v21 = vrot.slane %v20678_v31, 7  ;;  %v20688_v0 = vrot.slane %v20679_v14, 6  ;;  %v20691_v39 = vrot.slane %v20680_v8, 5 }
0x19df   : > { %v20706_v13 = vsel %vm20674_vm14, %v20705_v20, %v20701_v26 }
0x19e0   : > { %v20687_v9 = vsel %vm20686_vm15, %v20685_v21, %v20677_v35  ;;  %v20708_v41 = vmul.f32 %v20706_v13, %v20656_v6  ;;  %v20710_v40 = vmul.f32 %v20706_v13, %v20658_v53  ;;  %v20646_v10 = vpop.xlane.xlu0 %20645  ;;  %v20711_v56 = vmul.f32 %v20706_v13, %v20659_v12 }
0x19e1   : > { %v20729_v58 = vrot.slane %v20646_v10, %v20667_v2  ;;  %v20709_v28 = vmul.f32 %v20706_v13, %v20657_v30  ;;  %v20690_v60 = vsel %vm20689_vm1, %v20688_v0, %v20687_v9 }
0x19e2   : > { %v20716_v25 = vrot.slane %v20708_v41, 1  ;;  %v20718_v46 = vrot.slane %v20710_v40, 7  ;;  %v20720_v45 = vrot.slane %v20711_v56, 6  ;;  %v20693_v17 = vsel %vm20692_vm2, %v20691_v39, %v20690_v60 }
0x19e3   : > { %v20734_v51 = vsel %vm20674_vm14, %v20733_v15, %v20729_v58  ;;  %v20695_v31 = vadd.f32 %v20693_v17, %v20660_v63 }
0x19e4   : > { %v20717_v1 = vsel %vm20686_vm15, %v20709_v28, %v20716_v25  ;;  %v20736_v61 = vmul.f32 %v20734_v51, %v20656_v6  ;;  %v20737_v27 = vmul.f32 %v20734_v51, %v20657_v30  ;;  %v20652_v36 = vpop.xlane.xlu0 %20651  ;;  %v20739_v62 = vmul.f32 %v20734_v51, %v20659_v12 }
0x19e5   : > { %v20719_v52 = vsel %vm20689_vm1, %v20718_v46, %v20717_v1  ;;  %v20757_v3 = vrot.slane %v20652_v36, %v20667_v2  ;;  %v20738_v23 = vmul.f32 %v20734_v51, %v20658_v53  ;;  %v20861_v2 = vand.u32 4294901760, %v36211_v32 }
0x19e6   : > { %v20744_v57 = vrot.slane %v20736_v61, 2  ;;  %v20745_v24 = vrot.slane %v20737_v27, 1  ;;  %v20721_v29 = vsel %vm20692_vm2, %v20720_v45, %v20719_v52  ;;  %v20748_v48 = vrot.slane %v20739_v62, 7 }
0x19e7   : > { %v20762_v18 = vsel %vm20674_vm14, %v20761_v47, %v20757_v3  ;;  %v20723_v35 = vadd.f32 %v20721_v29, %v20695_v31 }
0x19e8   : > { %v20746_v50 = vsel %vm20686_vm15, %v20745_v24, %v20744_v57  ;;  %v20764_v7 = vmul.f32 %v20762_v18, %v20656_v6  ;;  %v20765_v5 = vmul.f32 %v20762_v18, %v20657_v30  ;;  %v20766_v49 = vmul.f32 %v20762_v18, %v20658_v53 }
0x19e9   : > { %v20747_v14 = vsel %vm20689_vm1, %v20738_v23, %v20746_v50  ;;  %v20767_v21 = vmul.f32 %v20762_v18, %v20659_v12  ;;  %v20862_v53 = vsub.f32 %v36211_v32, %v20861_v2  ;;  %v20785_v23 = vpop.permute.xlu1 %20784  ;;  %v26198_v18 = vld [vmem:[%s36789_s6 + $0x8] sm:$0xf] }
0x19ea   : > { %v20772_v43 = vrot.slane %v20764_v7, 3  ;;  %v20773_v16 = vrot.slane %v20765_v5, 2  ;;  %v20775_v20 = vrot.slane %v20766_v49, 1  ;;  %v20749_v26 = vsel %vm20692_vm2, %v20748_v48, %v20747_v14 }
0x19eb   : > { %v20751_v6 = vadd.f32 %v20749_v26, %v20723_v35  ;;  %v20863_v15 = vand.u32 4294901760, %v20862_v53  ;;  %v22635_v49 = vsel %vm7412_vm4, %v26198_v18, 0 }
0x19ec   : > { %v20774_v0 = vsel %vm20686_vm15, %v20773_v16, %v20772_v43  ;;  %v21248_v13 = vpop.permute.xlu0 %21247  ;;  %v22705_v26 = vand.u32 4294901760, %v22635_v49 }
0x19ed   : > { %v31980_v8 = vadd.f32 %v36181_v55, %v21248_v13  ;;  %v20776_v30 = vsel %vm20689_vm1, %v20775_v20, %v20774_v0  ;;  %v22637_v20 = vsel %vm6058_vm3, %v35669_v11, 0 }
0x19ee   : > { %v20777_v9 = vsel %vm20692_vm2, %v20767_v21, %v20776_v30  ;;  %v22706_v30 = vsub.f32 %v22635_v49, %v22705_v26 }
0x19ef   : > { %v21702_v41 = vsel %vm20631_vm13, %v31980_v8, 0  ;;  %v20779_v40 = vadd.f32 %v20777_v9, %v20751_v6  ;;  %v22640_v8 = vand.u32 4294901760, %v22637_v20 }
0x19f0   : > { %v21771_v37 = vand.u32 4294901760, %v21702_v41 }
0x19f1   : > { %v20791_v10 = vsel %vm6058_vm3, %v20779_v40, 0 }
0x19f2   : > { %v21772_v12 = vsub.f32 %v21702_v41, %v21771_v37  ;;  %30244 = vmatmul.mubr.f32.vlgmr.msra.gmra.mrb[240].mxu1 %v21771_v37  ;;  %v20794_v56 = vand.u32 4294901760, %v20791_v10 }
0x19f3   : > { %31845 = vmatpush3.bf16.msra.mxu1 %v36187_v22  ;;  %30257 = vmatprep.mubr.msk.f32.mxu1 %vm32444_vm0, %v36864_v33 }
0x19f4   : > { %30173 = vmatpush3.msra.mxu0 %v20794_v56  ;;  %v20871_v55 = vsub.f32 %v20791_v10, %v20794_v56  ;;  %v21773_v58 = vand.u32 4294901760, %v21772_v12  ;;  %31849 = vmatprep.subr.bf16.mxu1 %v36810_v19  ;;  %v22707_v10 = vand.u32 4294901760, %v22706_v30 }
0x19f5   : > { %30175 = vmatmul.mubr.f32.vlgmr.msra.gmra.mrb[78].mxu0 %v20863_v15  ;;  %30177 = vmatprep.subr.mxu0 %v36864_v33 }
0x19f6   : > { %30258 = vmatmul.mubr.f32.vlgmr.msra.gmra.mrb[242].mxu1 %v21773_v58  ;;  %v20872_v28 = vand.u32 4294901760, %v20871_v55  ;;  %30179 = vmatprep.mubr.msk.f32.mxu0 %vm32444_vm0, %v36864_v33  ;;  %v21774_v60 = vsub.f32 %v21772_v12, %v21773_v58 }
0x19f7   : > { %31851 = vmatpush3.bf16.msra.mxu1 %v36187_v22  ;;  %30271 = vmatprep.mubr.msk.f32.mxu1 %vm32444_vm0, %v36864_v33 }
0x19f8   : > { %v20873_v25 = vsub.f32 %v20871_v55, %v20872_v28  ;;  %31855 = vmatprep.subr.bf16.mxu1 %v36810_v19  ;;  %v21775_v47 = vand.u32 4294901760, %v21774_v60 }
0x19fa   : > { %30272 = vmatmul.mubr.f32.vlgmr.msra.gmra.mrb[244].mxu1 %v21771_v37  ;;  %v20874_v46 = vand.u32 4294901760, %v20873_v25  ;;  %v23085_v25 = vld [vmem:[%s37001_s8] sm:$0xff] }
0x19fb   : > { %30285 = vmatprep.mubr.msk.f32.mxu1 %vm32444_vm0, %v36864_v33  ;;  %v23093_v60 = vand.u32 4294901760, %v23085_v25 }
0x19fc   : > { %30178 = vmatpush3.msra.mxu0 %v20874_v46  ;;  %v23086_v46 = vld [vmem:[%s37001_s8 + $0x8] sm:$0xff] }
0x19fd   : > { %30180 = vmatmul.mubr.f32.vlgmr.msra.gmra.mrb[78].mxu0 %v36205_v34  ;;  %30182 = vmatprep.subr.mxu0 %v36864_v33 }
0x19fe   : > { %30183 = vmatpush3.msra.mxu0 %v20871_v55  ;;  %30184 = vmatprep.mubr.msk.f32.mxu0 %vm32444_vm0, %v36864_v33 }
0x19ff   : > { %30187 = vmatprep.subr.mxu0 %v36864_v33 }
0x1a05   : > { %30185 = vmatmul.mubr.f32.vlgmr.msra.gmra.mrb[78].mxu0 %v36211_v32 }
0x1a06   : > { %30188 = vmatpush3.msra.mxu0 %v20794_v56  ;;  %30189 = vmatprep.mubr.msk.f32.mxu0 %vm32444_vm0, %v36864_v33 }
0x1a07   : > { %30192 = vmatprep.subr.mxu0 %v36864_v33 }
0x1a0d   : > { %30190 = vmatmul.mubr.f32.vlgmr.msra.gmra.mrb[78].mxu0 %v20861_v2 }
0x1a0e   : > { %30193 = vmatpush3.msra.mxu0 %v20872_v28  ;;  %30194 = vmatprep.mubr.msk.f32.mxu0 %vm32444_vm0, %v36864_v33 }
0x1a0f   : > { %30197 = vmatprep.subr.mxu0 %v36864_v33 }
0x1a15   : > { %30195 = vmatmul.mubr.f32.vlgmr.msra.gmra.mrb[78].mxu0 %v36205_v34 }
0x1a16   : > { %30198 = vmatpush3.msra.mxu0 %v20794_v56  ;;  %30199 = vmatprep.mubr.msk.f32.mxu0 %vm32444_vm0, %v36864_v33  ;;  %v22708_v56 = vsub.f32 %v22706_v30, %v22707_v10 }
0x1a17   : > { %31834 = vmatprep.subr.bf16.mxu0 %v36810_v19 }
0x1a18   : > { %v22709_v58 = vand.u32 4294901760, %v22708_v56 }
0x1a1d   : > { %30200 = vmatmul.mubr.f32.vlgmr.msra.gmra.mrb[78].mxu0 %v36205_v34 }
0x1a1e   : > { %31836 = vmatpush3.bf16.msra.mxu0 %v36187_v22  ;;  %30236 = vmatprep.mubr.msk.f32.mxu0 %vm32444_vm0, %v36864_v33  ;;  %v21239_v22 = vld [vmem:[%s37000_s3] sm:$0xff] }
0x1a1f   : > { %31840 = vmatprep.subr.bf16.mxu0 %v36810_v19  ;;  %v22167_v4 = vand.u32 4294901760, %v21239_v22 }
0x1a21   : > { %30237 = vmatmul.mubr.f32.vlgmr.msra.gmra.mrb[80].mxu0 %v21775_v47  ;;  %v22245_v34 = vsub.f32 %v21239_v22, %v22167_v4  ;;  %v23096_v47 = vand.u32 4294901760, %v23086_v46 }
0x1a22   : > { %31842 = vmatpush3.bf16.msra.mxu0 %v31841_v59  ;;  %30250 = vmatprep.mubr.msk.f32.mxu0 %vm32444_vm0, %v36864_v33  ;;  %v22170_v59 = vand.u32 4294901760, %v21240_v42 }
0x1a23   : > { %31846 = vmatprep.subr.bf16.mxu0 %v36810_v19  ;;  %v22246_v32 = vand.u32 4294901760, %v22245_v34  ;;  %v36323_v22 = vpack.c.bf16 %v23096_v47, %v23093_v60 }
0x1a24   : > { %v22252_v51 = vsub.f32 %v21240_v42, %v22170_v59  ;;  %v31853_v52 = vpack.c.bf16 %v22170_v59, %v22167_v4  ;;  %v23087_v42 = vld [vmem:[%s37001_s8 + $0x10] sm:$0xff]  ;;  %v23088_v4 = vld [vmem:[%s37001_s8 + $0x18] sm:$0xff] }
0x1a25   : > { %30251 = vmatmul.mubr.f32.vlgmr.msra.gmra.mrb[82].mxu0 %v21772_v12  ;;  %v22247_v1 = vsub.f32 %v22245_v34, %v22246_v32  ;;  %v23099_v59 = vand.u32 4294901760, %v23087_v42 }
0x1a26   : > { %31848 = vmatpush3.bf16.msra.mxu0 %v36192_v44  ;;  %30264 = vmatprep.mubr.msk.f32.mxu0 %vm32444_vm0, %v36864_v33  ;;  %v22253_v39 = vand.u32 4294901760, %v22252_v51  ;;  %v31859_v45 = vpack.c.bf16 %v22252_v51, %v22245_v34  ;;  %v23102_v34 = vand.u32 4294901760, %v23088_v4 }
0x1a27   : > { %31852 = vmatprep.subr.bf16.mxu0 %v36810_v19  ;;  %v22248_v44 = vand.u32 4294901760, %v22247_v1  ;;  %v36335_v1 = vsub.f32 %v23087_v42, %v23099_v59 }
0x1a28   : > { %v22254_v61 = vsub.f32 %v22252_v51, %v22253_v39  ;;  %v31865_v62 = vpack.c.bf16 %v22253_v39, %v22246_v32  ;;  %v36329_v51 = vsub.f32 %v23085_v25, %v23093_v60  ;;  %v36331_v32 = vsub.f32 %v23086_v46, %v23096_v47  ;;  %v26200_v25 = vld [vmem:[%s36789_s6 + $0x4] sm:$0xf] }
0x1a29   : > { %30265 = vmatmul.mubr.f32.vlgmr.msra.gmra.mrb[84].mxu0 %v21771_v37  ;;  %v22717_v37 = vsub.f32 %v22637_v20, %v22640_v8  ;;  %v31874_v39 = vpack.c.bf16 %v23102_v34, %v23099_v59  ;;  %v23588_v46 = vsel %vm7412_vm4, %v26200_v25, 0  ;;  %v23590_v60 = vsel %vm6058_vm3, %v35101_v38, 0 }
0x1a2a   : > { %30278 = vmatprep.mubr.msk.f32.mxu0 %vm32444_vm0, %v36864_v33  ;;  %v22255_v27 = vand.u32 4294901760, %v22254_v61  ;;  %31854 = vmatpush3.bf16.msra.mxu0 %v31853_v52  ;;  %v36337_v61 = vsub.f32 %v23088_v4, %v23102_v34  ;;  %v31883_v18 = vpack.c.bf16 %v36331_v32, %v36329_v51  ;;  %v23658_v47 = vand.u32 4294901760, %v23588_v46 }
0x1a2b   : > { %31858 = vmatprep.subr.bf16.mxu0 %v36810_v19  ;;  %v22718_v12 = vand.u32 4294901760, %v22717_v37 }
0x1a2c   : > { %v31856_v36 = vpack.c.bf16 %v22255_v27, %v22248_v44  ;;  %v23174_v44 = vand.u32 4294901760, %v36329_v51  ;;  %v23181_v27 = vand.u32 4294901760, %v36331_v32  ;;  %v23659_v42 = vsub.f32 %v23588_v46, %v23658_v47 }
0x1a2d   : > { %v22719_v55 = vsub.f32 %v22717_v37, %v22718_v12 }
0x1a2e   : > { %31857 = vmatpush3.bf16.msra.mxu1 %v31856_v36  ;;  %v23175_v36 = vsub.f32 %v36329_v51, %v23174_v44  ;;  %v23660_v59 = vand.u32 4294901760, %v23659_v42 }
0x1a2f   : > { %31861 = vmatprep.subr.bf16.mxu1 %v36810_v19  ;;  %v22720_v28 = vand.u32 4294901760, %v22719_v55 }
0x1a30   : > { %v23661_v34 = vsub.f32 %v23659_v42, %v23660_v59 }
0x1ac5   : > { %v21858_v3 = vpop.f32.mrb[240].mxu1 }
0x1ac6   : > { %v30245_v63 = vpop.f32.mrb[241].mxu1 }
0x1ac7   : > { %v23195_v63 = vand.u32 4294901760, %v36337_v61 }
0x1ac9   : > { %v22009_v17 = vpop.f32.mrb[242].mxu1 }
0x1aca   : > { %v30259_v57 = vpop.f32.mrb[243].mxu1 }
0x1acd   : > { %v22159_v24 = vpop.f32.mrb[244].mxu1 }
0x1ace   : > { %v30273_v29 = vpop.f32.mrb[245].mxu1 }
0x1af0   : > { %v21235_v48 = vpop.f32.mrb[78].mxu0 }
0x1af1   : > { %v31979_v50 = vadd.f32 %v21235_v48, %v20785_v23  ;;  %v30201_v7 = vpop.f32.mrb[79].mxu0 }
0x1af2   : > { %v31895_v7 = vpack.c.bf16 %v23181_v27, %v23174_v44  ;;  %v24040_v44 = vld [vmem:[%s37002_s2 + $0x10] sm:$0xff] }
0x1af3   : > { %v22164_v5 = vsel %vm20631_vm13, %v31979_v50, 0  ;;  %v31886_v50 = vpack.c.bf16 %v36337_v61, %v36335_v1 }
0x1af4   : > { %v22233_v31 = vand.u32 4294901760, %v22164_v5  ;;  %v21777_v14 = vpop.f32.mrb[80].mxu0 }
0x1af5   : > { %v21859_v2 = vadd.f32 %v21858_v3, %v21777_v14  ;;  %v30238_v43 = vpop.f32.mrb[81].mxu0  ;;  %v23188_v3 = vand.u32 4294901760, %v36335_v1 }
0x1af6   : > { %v22234_v16 = vsub.f32 %v22164_v5, %v22233_v31  ;;  %30286 = vmatmul.mubr.f32.vlgmr.msra.gmra.mrb[246].mxu1 %v22233_v31 }
0x1af7   : > { %31863 = vmatpush3.bf16.msra.mxu1 %v31853_v52  ;;  %30299 = vmatprep.mubr.msk.f32.mxu1 %vm32444_vm0, %v36864_v33  ;;  %v23189_v57 = vsub.f32 %v36335_v1, %v23188_v3  ;;  %v36353_v5 = vpack.c.bf16 %v23195_v63, %v23188_v3  ;;  %v24038_v1 = vld [vmem:[%s37002_s2] sm:$0xff] }
0x1af8   : > { %v21934_v35 = vpop.f32.mrb[82].mxu0  ;;  %v22235_v21 = vand.u32 4294901760, %v22234_v16  ;;  %31867 = vmatprep.subr.bf16.mxu1 %v36810_v19 }
0x1af9   : > { %v21935_v0 = vadd.f32 %v21934_v35, %v21859_v2  ;;  %v30252_v13 = vpop.f32.mrb[83].mxu0  ;;  %v23190_v29 = vand.u32 4294901760, %v23189_v57 }
0x1afa   : > { %30300 = vmatmul.mubr.f32.vlgmr.msra.gmra.mrb[248].mxu1 %v22235_v21  ;;  %v22236_v6 = vsub.f32 %v22234_v16, %v22235_v21 }
0x1afb   : > { %31869 = vmatpush3.bf16.msra.mxu1 %v31853_v52  ;;  %v22010_v53 = vadd.f32 %v22009_v17, %v21935_v0  ;;  %30313 = vmatprep.mubr.msk.f32.mxu1 %vm32444_vm0, %v36864_v33  ;;  %v23182_v52 = vsub.f32 %v36331_v32, %v23181_v27  ;;  %v23662_v32 = vand.u32 4294901760, %v23661_v34  ;;  %v24050_v27 = vand.u32 4294901760, %v24038_v1 }
0x1afc   : > { %v22086_v11 = vpop.f32.mrb[84].mxu0  ;;  %v22237_v9 = vand.u32 4294901760, %v22236_v6  ;;  %31870 = vmatprep.subr.bf16.mxu1 %v36810_v19 }
0x1afd   : > { %v22087_v41 = vadd.f32 %v22086_v11, %v22010_v53  ;;  %v30266_v40 = vpop.f32.mrb[85].mxu0  ;;  %v24134_v3 = vsub.f32 %v24038_v1, %v24050_v27 }
0x1afe   : > { %30279 = vmatmul.mubr.f32.vlgmr.msra.gmra.mrb[86].mxu0 %v22237_v9  ;;  %30314 = vmatmul.mubr.f32.vlgmr.msra.gmra.mrb[250].mxu1 %v22233_v31 }
0x1aff   : > { %31860 = vmatpush3.bf16.msra.mxu0 %v31859_v45  ;;  %30292 = vmatprep.mubr.msk.f32.mxu0 %vm32444_vm0, %v36864_v33  ;;  %v36293_v15 = vadd.f32 %v22159_v24, %v22087_v41  ;;  %v23176_v45 = vand.u32 4294901760, %v23175_v36  ;;  %v23196_v24 = vsub.f32 %v36337_v61, %v23195_v63  ;;  %v22632_v41 = vpop.permute.xlu1 %22631  ;;  %v24039_v61 = vld [vmem:[%s37002_s2 + $0x8] sm:$0xff] }
0x1b00   : > { %31864 = vmatprep.subr.bf16.mxu0 %v36810_v19  ;;  %30354 = vmatprep.mubr.msk.f32.mxu1 %vm32444_vm0, %v36864_v33  ;;  %v24053_v36 = vand.u32 4294901760, %v24039_v61 }
0x1b01   : > { %31872 = vmatpush3.bf16.msra.mxu1 %v36323_v22  ;;  %v23197_v23 = vand.u32 4294901760, %v23196_v24 }
0x1b02   : > { %30293 = vmatmul.mubr.f32.vlgmr.msra.gmra.mrb[88].mxu0 %v22234_v16  ;;  %31873 = vmatprep.subr.bf16.mxu1 %v36810_v19  ;;  %v24141_v63 = vsub.f32 %v24039_v61, %v24053_v36  ;;  %v36407_v57 = vpack.c.bf16 %v24053_v36, %v24050_v27 }
0x1b03   : > { %31866 = vmatpush3.bf16.msra.mxu0 %v31865_v62  ;;  %30306 = vmatprep.mubr.msk.f32.mxu0 %vm32444_vm0, %v36864_v33  ;;  %v23183_v62 = vand.u32 4294901760, %v23182_v52  ;;  %v31880_v48 = vpack.c.bf16 %v23197_v23, %v23190_v29  ;;  %v24041_v52 = vld [vmem:[%s37002_s2 + $0x18] sm:$0xff] }
0x1b04   : > { %30316 = vmatprep.subr.mxu0 %v36864_v33  ;;  %v31931_v29 = vpack.c.bf16 %v24141_v63, %v24134_v3 }
0x1b05   : > { %31875 = vmatpush3.bf16.msra.mxu1 %v31874_v39  ;;  %v31877_v17 = vpack.c.bf16 %v23183_v62, %v23176_v45  ;;  %v24056_v45 = vand.u32 4294901760, %v24040_v44  ;;  %v24059_v62 = vand.u32 4294901760, %v24041_v52 }
0x1b06   : > { %30307 = vmatmul.mubr.f32.vlgmr.msra.gmra.mrb[90].mxu0 %v22233_v31  ;;  %31876 = vmatprep.subr.bf16.mxu1 %v36810_v19 }
0x1b07   : > { %30317 = vmatpush3.msra.mxu0 %v22640_v8  ;;  %30318 = vmatprep.mubr.msk.f32.mxu0 %vm32444_vm0, %v36864_v33  ;;  %v24155_v24 = vsub.f32 %v24041_v52, %v24059_v62 }
0x1b08   : > { %30321 = vmatprep.subr.mxu0 %v36864_v33 }
0x1b0a   : > { %30319 = vmatmul.mubr.f32.vlgmr.msra.gmra.mrb[92].mxu0 %v22709_v58 }
0x1b0b   : > { %30322 = vmatpush3.msra.mxu0 %v22720_v28  ;;  %30323 = vmatprep.mubr.msk.f32.mxu0 %vm32444_vm0, %v36864_v33 }
0x1b0c   : > { %30326 = vmatprep.subr.mxu0 %v36864_v33 }
0x1b12   : > { %30324 = vmatmul.mubr.f32.vlgmr.msra.gmra.mrb[92].mxu0 %v22705_v26 }
0x1b13   : > { %30327 = vmatpush3.msra.mxu0 %v22717_v37  ;;  %30328 = vmatprep.mubr.msk.f32.mxu0 %vm32444_vm0, %v36864_v33 }
0x1b14   : > { %30331 = vmatprep.subr.mxu0 %v36864_v33 }
0x1b1a   : > { %30329 = vmatmul.mubr.f32.vlgmr.msra.gmra.mrb[92].mxu0 %v22706_v30 }
0x1b1b   : > { %30332 = vmatpush3.msra.mxu0 %v22640_v8  ;;  %30333 = vmatprep.mubr.msk.f32.mxu0 %vm32444_vm0, %v36864_v33 }
0x1b1c   : > { %30336 = vmatprep.subr.mxu0 %v36864_v33 }
0x1b22   : > { %30334 = vmatmul.mubr.f32.vlgmr.msra.gmra.mrb[92].mxu0 %v22707_v10 }
0x1b23   : > { %30337 = vmatpush3.msra.mxu0 %v22718_v12  ;;  %30338 = vmatprep.mubr.msk.f32.mxu0 %vm32444_vm0, %v36864_v33 }
0x1b24   : > { %30341 = vmatprep.subr.mxu0 %v36864_v33 }
0x1b2a   : > { %30339 = vmatmul.mubr.f32.vlgmr.msra.gmra.mrb[92].mxu0 %v22705_v26 }
0x1b2b   : > { %30342 = vmatpush3.msra.mxu0 %v22640_v8  ;;  %30343 = vmatprep.mubr.msk.f32.mxu0 %vm32444_vm0, %v36864_v33 }
0x1b2c   : > { %31888 = vmatprep.subr.bf16.mxu0 %v36810_v19 }
0x1b32   : > { %30344 = vmatmul.mubr.f32.vlgmr.msra.gmra.mrb[92].mxu0 %v22705_v26 }
0x1b33   : > { %30387 = vmatprep.mubr.msk.f32.mxu0 %vm32444_vm0, %v36864_v33  ;;  %31890 = vmatpush3.bf16.msra.mxu0 %v36323_v22 }
0x1b34   : > { %31891 = vmatprep.subr.bf16.mxu0 %v36810_v19 }
0x1b37   : > { %31893 = vmatpush3.bf16.msra.mxu0 %v31874_v39 }
0x1b38   : > { %31900 = vmatprep.subr.bf16.mxu0 %v36810_v19 }
0x1bc9   : > { %v22320_v49 = vpop.f32.mrb[246].mxu1 }
0x1bca   : > { %v30287_v31 = vpop.f32.mrb[247].mxu1 }
0x1bcb   : > { %v24044_v31 = vld [vmem:[%s37002_s2 + $0x30] sm:$0xff] }
0x1bcd   : > { %v22471_v14 = vpop.f32.mrb[248].mxu1 }
0x1bce   : > { %v30301_v2 = vpop.f32.mrb[249].mxu1 }
0x1bd1   : > { %v22239_v43 = vpop.f32.mrb[86].mxu0  ;;  %v22621_v16 = vpop.f32.mrb[250].mxu1 }
0x1bd2   : > { %v22240_v20 = vadd.f32 %v22239_v43, %v36293_v15  ;;  %v30280_v26 = vpop.f32.mrb[87].mxu0  ;;  %v30315_v35 = vpop.f32.mrb[251].mxu1  ;;  %v24068_v43 = vand.u32 4294901760, %v24044_v31 }
0x1bd4   : > { %v22321_v21 = vadd.f32 %v22320_v49, %v22240_v20  ;;  %v36417_v20 = vpack.c.bf16 %v24059_v62, %v24056_v45  ;;  %v24176_v26 = vsub.f32 %v24044_v31, %v24068_v43 }
0x1bd5   : > { %v22396_v0 = vpop.f32.mrb[88].mxu0 }
0x1bd6   : > { %v22397_v13 = vadd.f32 %v22396_v0, %v22321_v21  ;;  %v30294_v8 = vpop.f32.mrb[89].mxu0 }
0x1bd7   : > { %v24142_v8 = vand.u32 4294901760, %v24141_v63 }
0x1bd8   : > { %v22472_v6 = vadd.f32 %v22471_v14, %v22397_v13  ;;  %v24045_v14 = vld [vmem:[%s37002_s2 + $0x38] sm:$0xff]  ;;  %v24135_v13 = vand.u32 4294901760, %v24134_v3 }
0x1bd9   : > { %v22548_v30 = vpop.f32.mrb[90].mxu0 }
0x1bda   : > { %v22549_v53 = vadd.f32 %v22548_v30, %v22472_v6  ;;  %v30308_v11 = vpop.f32.mrb[91].mxu0  ;;  %v36426_v6 = vpack.c.bf16 %v24142_v8, %v24135_v13 }
0x1bdb   : > { %v24156_v11 = vand.u32 4294901760, %v24155_v24 }
0x1bdc   : > { %v36356_v9 = vadd.f32 %v22621_v16, %v22549_v53  ;;  %v24071_v16 = vand.u32 4294901760, %v24045_v14 }
0x1bde   : > { %v24183_v35 = vsub.f32 %v24045_v14, %v24071_v16  ;;  %v36429_v30 = vpack.c.bf16 %v24071_v16, %v24068_v43 }
0x1be0   : > { %v31940_v21 = vpack.c.bf16 %v24183_v35, %v24176_v26 }
0x1c05   : > { %v23081_v40 = vpop.f32.mrb[92].mxu0 }
0x1c06   : > { %v31981_v37 = vadd.f32 %v23081_v40, %v22632_v41  ;;  %v30345_v10 = vpop.f32.mrb[93].mxu0  ;;  %v24136_v41 = vsub.f32 %v24134_v3, %v24135_v13  ;;  %v24143_v40 = vsub.f32 %v24141_v63, %v24142_v8 }
0x1c08   : > { %v23090_v12 = vsel %vm15256_vm8, %v31981_v37, 0  ;;  %v24137_v10 = vand.u32 4294901760, %v24136_v41 }
0x1c09   : > { %v23161_v15 = vand.u32 4294901760, %v23090_v12 }
0x1c0b   : > { %v23162_v56 = vsub.f32 %v23090_v12, %v23161_v15  ;;  %v24144_v12 = vand.u32 4294901760, %v24143_v40 }
0x1c0d   : > { %v23163_v55 = vand.u32 4294901760, %v23162_v56 }
0x1c0f   : > { %30388 = vmatmul.mubr.f32.vlgmr.msra.gmra.mrb[94].mxu0 %v23163_v55  ;;  %v23164_v58 = vsub.f32 %v23162_v56, %v23163_v55 }
0x1c10   : > { %31902 = vmatpush3.bf16.msra.mxu0 %v36323_v22  ;;  %30409 = vmatprep.mubr.msk.f32.mxu0 %vm32444_vm0, %v36864_v33  ;;  %v23593_v22 = vand.u32 4294901760, %v23590_v60 }
0x1c11   : > { %31903 = vmatprep.subr.bf16.mxu0 %v36810_v19  ;;  %v23165_v28 = vand.u32 4294901760, %v23164_v58 }
0x1c12   : > { %v23670_v4 = vsub.f32 %v23590_v60, %v23593_v22 }
0x1c13   : > { %30355 = vmatmul.mubr.f32.vlgmr.msra.gmra.mrb[252].mxu1 %v23165_v28  ;;  %v24157_v28 = vsub.f32 %v24155_v24, %v24156_v11 }
0x1c14   : > { %31878 = vmatpush3.bf16.msra.mxu1 %v31877_v17  ;;  %31905 = vmatpush3.bf16.msra.mxu0 %v31874_v39  ;;  %v23671_v38 = vand.u32 4294901760, %v23670_v4  ;;  %v24148_v17 = vsub.f32 %v24040_v44, %v24056_v45 }
0x1c15   : > { %31879 = vmatprep.subr.bf16.mxu1 %v36810_v19  ;;  %30365 = vmatprep.mubr.msk.f32.mxu1 %vm32444_vm0, %v36864_v33  ;;  %v24158_v60 = vand.u32 4294901760, %v24157_v28 }
0x1c16   : > { %31906 = vmatprep.subr.bf16.mxu0 %v36810_v19  ;;  %v23672_v51 = vsub.f32 %v23670_v4, %v23671_v38  ;;  %v31934_v23 = vpack.c.bf16 %v24155_v24, %v24148_v17  ;;  %v24149_v53 = vand.u32 4294901760, %v24148_v17 }
0x1c17   : > { %30410 = vmatmul.mubr.f32.vlgmr.msra.gmra.mrb[96].mxu0 %v23161_v15 }
0x1c18   : > { %31881 = vmatpush3.bf16.msra.mxu1 %v31880_v48  ;;  %30458 = vmatprep.mubr.msk.f32.mxu0 %vm32444_vm0, %v36864_v33  ;;  %v23673_v39 = vand.u32 4294901760, %v23672_v51  ;;  %v24042_v48 = vld [vmem:[%s37002_s2 + $0x20] sm:$0xff]  ;;  %v36432_v37 = vpack.c.bf16 %v24156_v11, %v24149_v53  ;;  %v24150_v58 = vsub.f32 %v24148_v17, %v24149_v53 }
0x1c19   : > { %31882 = vmatprep.subr.bf16.mxu1 %v36810_v19  ;;  %31908 = vmatpush3.bf16.msra.mxu0 %v36407_v57 }
0x1c1a   : > { %31909 = vmatprep.subr.bf16.mxu0 %v36810_v19  ;;  %v24151_v46 = vand.u32 4294901760, %v24150_v58 }
0x1c1b   : > { %30366 = vmatmul.mubr.f32.vlgmr.msra.gmra.mrb[254].mxu1 %v23161_v15 }
0x1c1c   : > { %31884 = vmatpush3.bf16.msra.mxu1 %v31883_v18  ;;  %30376 = vmatprep.mubr.msk.f32.mxu1 %vm32444_vm0, %v36864_v33  ;;  %v24043_v18 = vld [vmem:[%s37002_s2 + $0x28] sm:$0xff]  ;;  %s37003_s2 = sld [smem:[#allocation39_spill]] }
0x1c1d   : > { %31885 = vmatprep.subr.bf16.mxu1 %v36810_v19  ;;  %31911 = vmatpush3.bf16.msra.mxu0 %v36417_v20 }
0x1c1e   : > { %31912 = vmatprep.subr.bf16.mxu0 %v36810_v19 }
0x1c20   : > { %31887 = vmatpush3.bf16.msra.mxu1 %v31886_v50  ;;  %v24062_v50 = vand.u32 4294901760, %v24042_v48 }
0x1c21   : > { %31894 = vmatprep.subr.bf16.mxu1 %v36810_v19 }
0x1c23   : > { %30377 = vmatmul.mubr.f32.vlgmr.msra.gmra.mrb[0].mxu1 %v23162_v56 }
0x1c24   : > { %31896 = vmatpush3.bf16.msra.mxu1 %v31895_v7  ;;  %30398 = vmatprep.mubr.msk.f32.mxu1 %vm32444_vm0, %v36864_v33  ;;  %v24065_v7 = vand.u32 4294901760, %v24043_v18 }
0x1c25   : > { %31897 = vmatprep.subr.bf16.mxu1 %v36810_v19 }
0x1c26   : > { %v24169_v49 = vsub.f32 %v24043_v18, %v24065_v7  ;;  %v36422_v0 = vpack.c.bf16 %v24065_v7, %v24062_v50 }
0x1c28   : > { %31899 = vmatpush3.bf16.msra.mxu1 %v36353_v5  ;;  %v24162_v5 = vsub.f32 %v24042_v48, %v24062_v50  ;;  %31914 = vmatpush3.bf16.msra.mxu0 %v36422_v0  ;;  %v24170_v55 = vand.u32 4294901760, %v24169_v49 }
0x1c29   : > { %30412 = vmatprep.subr.mxu1 %v36864_v33  ;;  %31915 = vmatprep.subr.bf16.mxu0 %v36810_v19 }
0x1c2a   : > { %v31937_v2 = vpack.c.bf16 %v24169_v49, %v24162_v5  ;;  %v24163_v56 = vand.u32 4294901760, %v24162_v5 }
0x1c2b   : > { %30399 = vmatmul.mubr.f32.vlgmr.msra.gmra.mrb[2].mxu1 %v23161_v15  ;;  %v31919_v15 = vpack.c.bf16 %v24144_v12, %v24137_v10 }
0x1c2c   : > { %30413 = vmatpush3.msra.mxu1 %v23593_v22  ;;  %30414 = vmatprep.mubr.msk.f32.mxu1 %vm32444_vm0, %v36864_v33  ;;  %v31961_v25 = vpack.c.bf16 %v24170_v55, %v24163_v56 }
0x1c2d   : > { %30417 = vmatprep.subr.mxu1 %v36864_v33  ;;  %31917 = vmatpush3.bf16.msra.mxu0 %v36429_v30 }
0x1c2e   : > { %31918 = vmatprep.subr.bf16.mxu0 %v36810_v19 }
0x1c2f   : > { %30415 = vmatmul.mubr.f32.vlgmr.msra.gmra.mrb[4].mxu1 %v23662_v32 }
0x1c30   : > { %30418 = vmatpush3.msra.mxu1 %v23673_v39  ;;  %30419 = vmatprep.mubr.msk.f32.mxu1 %vm32444_vm0, %v36864_v33 }
0x1c31   : > { %30422 = vmatprep.subr.mxu1 %v36864_v33 }
0x1c37   : > { %30420 = vmatmul.mubr.f32.vlgmr.msra.gmra.mrb[4].mxu1 %v23658_v47 }
0x1c38   : > { %30423 = vmatpush3.msra.mxu1 %v23670_v4  ;;  %30424 = vmatprep.mubr.msk.f32.mxu1 %vm32444_vm0, %v36864_v33  ;;  %v24171_v4 = vsub.f32 %v24169_v49, %v24170_v55 }
0x1c39   : > { %30427 = vmatprep.subr.mxu1 %v36864_v33 }
0x1c3a   : > { %v24172_v51 = vand.u32 4294901760, %v24171_v4 }
0x1c3f   : > { %30425 = vmatmul.mubr.f32.vlgmr.msra.gmra.mrb[4].mxu1 %v23659_v42  ;;  %v24164_v42 = vsub.f32 %v24162_v5, %v24163_v56 }
0x1c40   : > { %30428 = vmatpush3.msra.mxu1 %v23593_v22  ;;  %30429 = vmatprep.mubr.msk.f32.mxu1 %vm32444_vm0, %v36864_v33 }
0x1c41   : > { %30432 = vmatprep.subr.mxu1 %v36864_v33  ;;  %v24165_v34 = vand.u32 4294901760, %v24164_v42 }
0x1c43   : > { %v31925_v32 = vpack.c.bf16 %v24172_v51, %v24165_v34 }
0x1c47   : > { %30430 = vmatmul.mubr.f32.vlgmr.msra.gmra.mrb[4].mxu1 %v23660_v59  ;;  %v31922_v59 = vpack.c.bf16 %v24158_v60, %v24151_v46 }
0x1c48   : > { %30433 = vmatpush3.msra.mxu1 %v23671_v38  ;;  %30434 = vmatprep.mubr.msk.f32.mxu1 %vm32444_vm0, %v36864_v33 }
0x1c49   : > { %30437 = vmatprep.subr.mxu1 %v36864_v33 }
0x1c4f   : > { %30435 = vmatmul.mubr.f32.vlgmr.msra.gmra.mrb[4].mxu1 %v23658_v47 }
0x1c50   : > { %30438 = vmatpush3.msra.mxu1 %v23593_v22  ;;  %30439 = vmatprep.mubr.msk.f32.mxu1 %vm32444_vm0, %v36864_v33  ;;  %v24184_v22 = vand.u32 4294901760, %v24183_v35 }
0x1c51   : > { %31930 = vmatprep.subr.bf16.mxu1 %v36810_v19 }
0x1c52   : > { %v24185_v1 = vsub.f32 %v24183_v35, %v24184_v22  ;;  %v24587_v35 = vld [vmem:[%s36789_s6] sm:$0xf] }
0x1c53   : > { %v24589_v8 = vsel %vm7412_vm4, %v24587_v35, 0 }
0x1c54   : > { %v24186_v44 = vand.u32 4294901760, %v24185_v1  ;;  %v36450_v41 = vand.u32 4294901760, %v24589_v8 }
0x1c56   : > { %v24661_v56 = vsub.f32 %v24589_v8, %v36450_v41 }
0x1c57   : > { %30440 = vmatmul.mubr.f32.vlgmr.msra.gmra.mrb[4].mxu1 %v23658_v47  ;;  %v24177_v47 = vand.u32 4294901760, %v24176_v26 }
0x1c58   : > { %30496 = vmatprep.mubr.msk.f32.mxu1 %vm32444_vm0, %v36864_v33  ;;  %31932 = vmatpush3.bf16.msra.mxu1 %v31931_v29 }
0x1c59   : > { %31933 = vmatprep.subr.bf16.mxu1 %v36810_v19  ;;  %v31964_v38 = vpack.c.bf16 %v24184_v22, %v24177_v47  ;;  %v24178_v39 = vsub.f32 %v24176_v26, %v24177_v47 }
0x1c5b   : > { %v24179_v61 = vand.u32 4294901760, %v24178_v39 }
0x1c5c   : > { %31935 = vmatpush3.bf16.msra.mxu1 %v31934_v23 }
0x1c5d   : > { %31936 = vmatprep.subr.bf16.mxu1 %v36810_v19  ;;  %v31928_v27 = vpack.c.bf16 %v24186_v44, %v24179_v61 }
0x1c60   : > { %31938 = vmatpush3.bf16.msra.mxu1 %v31937_v2  ;;  %v23585_v2 = vpop.permute.xlu0 %23584 }
0x1c61   : > { %31939 = vmatprep.subr.bf16.mxu1 %v36810_v19 }
0x1c64   : > { %31941 = vmatpush3.bf16.msra.mxu1 %v31940_v21 }
0x1c65   : > { %31954 = vmatprep.subr.bf16.mxu1 %v36810_v19 }
0x1ce2   : > { %v23415_v36 = vpop.f32.mrb[94].mxu0 }
0x1ce3   : > { %v30389_v52 = vpop.f32.mrb[95].mxu0 }
0x1ce6   : > { %v23167_v45 = vpop.f32.mrb[252].mxu1 }
0x1ce7   : > { %v30356_v62 = vpop.f32.mrb[253].mxu1 }
0x1cea   : > { %v23573_v3 = vpop.f32.mrb[96].mxu0 }
0x1ceb   : > { %v30411_v63 = vpop.f32.mrb[97].mxu0 }
0x1cec   : > { %v25048_v63 = vld [vmem:[%s37003_s2] sm:$0xf]  ;;  %s1339_s2 = sand.u32 1, %s32388_s10  }
0x1ced   : > { %s26087_s3 = sshll.u32 %s1339_s2, 1  ;;  %s25969_s12 = scalar_lea.sflag [#allocation4], %s1339_s2 }
0x1cee   : > { %v23258_v17 = vpop.f32.mrb[254].mxu1  ;;  %s1341_s6 = scalar_lea.vmem [#allocation3], %s26087_s3  ;;  %s32338_s3 = sshll.u32 %s32448_s0, 4  ;;  %s32339_s3 = int_to_ptr.vmem [resolvable:$false] %s32338_s3 }
0x1cef   : > { %v23259_v24 = vadd.f32 %v23258_v17, %v23167_v45  ;;  %v30367_v29 = vpop.f32.mrb[255].mxu1  ;;  %v25056_v17 = vsel %vm7412_vm4, %v25048_v63, 0  ;;  %s25982_s8 = sshll.u32 %s1341_s6, 4  ;;  %s32340_s14 = scalar_lea.vmem %s32339_s3, 64  ;;  %s36562_s8 = int_to_ptr.vmem [resolvable:$true] %s25982_s8 }
0x1cf0   : > { %s32334_s13 = scalar_lea.vmem %s36562_s8, 32  ;;  %p32341_p0 = scmp.lt.s32.totalorder %s36562_s8, %s32339_s3 }
0x1cf1   : > { %p32335_p11 = scmp.ne.s32.totalorder %s36562_s8, %s32334_s13  ;;  %p32342_p1 = scmp.lt.s32.totalorder %s32340_s14, %s32334_s13 }
0x1cf3   : > { %p32336_p12 = pnand %p32335_p11, %p32720_p5  ;;  %p32343_p2 = por %p32342_p1, %p32341_p0 }
0x1cf5   : > { %p32337_p13 = pneg %p32336_p12 }
0x1cf6   : > { %v23338_v23 = vpop.f32.mrb[0].mxu1 }
0x1cf7   : > { %v23339_v48 = vadd.f32 %v23338_v23, %v23259_v24  ;;  %v30378_v18 = vpop.f32.mrb[1].mxu1  ;;  %v25127_v24 = vand.u32 4294901760, %v25056_v17  ;;  %p32344_p3 = pnand %p32343_p2, %p32337_p13 }
0x1cf9   : > { %v23416_v50 = vadd.f32 %v23415_v36, %v23339_v48  ;;  %v25128_v18 = vsub.f32 %v25056_v17, %v25127_v24 }
0x1cfe   : > { %v23498_v7 = vpop.f32.mrb[2].mxu1 }
0x1cff   : > { %v23499_v5 = vadd.f32 %v23498_v7, %v23416_v50  ;;  %v30400_v49 = vpop.f32.mrb[3].mxu1 }
0x1d01   : > { %v23574_v31 = vadd.f32 %v23573_v3, %v23499_v5 }
0x1d03   : > { %v36436_v14 = vadd.f32 %v23574_v31, %v36356_v9  ;;  %v24592_v9 = vsel %vm6058_vm3, %v34286_v54, 0  ;;  %v25129_v31 = vand.u32 4294901760, %v25128_v18 }
0x1d04   : > { %v24595_v10 = vand.u32 4294901760, %v24592_v9 }
0x1d06   : > { %v24672_v54 = vsub.f32 %v24592_v9, %v24595_v10 }
0x1d08   : > { %v24673_v55 = vand.u32 4294901760, %v24672_v54 }
0x1d2a   : > { %v24034_v43 = vpop.f32.mrb[4].mxu1 }
0x1d2b   : > { %v31982_v16 = vadd.f32 %v24034_v43, %v23585_v2  ;;  %v30441_v26 = vpop.f32.mrb[5].mxu1 }
0x1d2c   : > { %v25045_v26 = vpop.permute.xlu1 %25044 }
0x1d2d   : > { %v24047_v21 = vsel %vm10847_vm6, %v31982_v16, 0  ;;  %v25130_v16 = vsub.f32 %v25128_v18, %v25129_v31 }
0x1d2e   : > { %v36440_v13 = vand.u32 4294901760, %v24047_v21 }
0x1d30   : > { %v36444_v53 = vsub.f32 %v24047_v21, %v36440_v13 }
0x1d32   : > { %v24124_v11 = vand.u32 4294901760, %v36444_v53  ;;  %30497 = vmatmul.mubr.f32.vlgmr.msra.gmra.mrb[6].mxu1 %v36444_v53 }
0x1d33   : > { %31956 = vmatpush3.bf16.msra.mxu1 %v36426_v6  ;;  %30534 = vmatprep.mubr.msk.f32.mxu1 %vm32444_vm0, %v36864_v33  ;;  %v24662_v6 = vand.u32 4294901760, %v24661_v56 }
0x1d34   : > { %31957 = vmatprep.subr.bf16.mxu1 %v36810_v19  ;;  %v24125_v40 = vsub.f32 %v36444_v53, %v24124_v11 }
0x1d35   : > { %v24663_v58 = vsub.f32 %v24661_v56, %v24662_v6 }
0x1d36   : > { %v24126_v12 = vand.u32 4294901760, %v24125_v40 }
0x1d37   : > { %31959 = vmatpush3.bf16.msra.mxu1 %v36432_v37  ;;  %v24674_v37 = vsub.f32 %v24672_v54, %v24673_v55 }
0x1d38   : > { %30459 = vmatmul.mubr.f32.vlgmr.msra.gmra.mrb[98].mxu0 %v24126_v12  ;;  %31960 = vmatprep.subr.bf16.mxu1 %v36810_v19 }
0x1d39   : > { %31920 = vmatpush3.bf16.msra.mxu0 %v31919_v15  ;;  %30477 = vmatprep.mubr.msk.f32.mxu0 %vm32444_vm0, %v36864_v33  ;;  %v24664_v15 = vand.u32 4294901760, %v24663_v58  ;;  %v24675_v28 = vand.u32 4294901760, %v24674_v37 }
0x1d3a   : > { %31921 = vmatprep.subr.bf16.mxu0 %v36810_v19 }
0x1d3b   : > { %31962 = vmatpush3.bf16.msra.mxu1 %v31961_v25 }
0x1d3c   : > { %31963 = vmatprep.subr.bf16.mxu1 %v36810_v19 }
0x1d3d   : > { %31923 = vmatpush3.bf16.msra.mxu0 %v31922_v59 }
0x1d3e   : > { %31924 = vmatprep.subr.bf16.mxu0 %v36810_v19 }
0x1d3f   : > { %31965 = vmatpush3.bf16.msra.mxu1 %v31964_v38 }
0x1d40   : > { %30556 = vmatprep.subr.mxu1 %v36864_v33 }
0x1d41   : > { %31926 = vmatpush3.bf16.msra.mxu0 %v31925_v32 }
0x1d42   : > { %30535 = vmatmul.mubr.f32.vlgmr.msra.gmra.mrb[8].mxu1 %v36440_v13  ;;  %31927 = vmatprep.subr.bf16.mxu0 %v36810_v19 }
0x1d43   : > { %30557 = vmatpush3.msra.mxu1 %v24595_v10  ;;  %30558 = vmatprep.mubr.msk.f32.mxu1 %vm32444_vm0, %v36864_v33 }
0x1d44   : > { %30561 = vmatprep.subr.mxu1 %v36864_v33 }
0x1d45   : > { %31929 = vmatpush3.bf16.msra.mxu0 %v31928_v27 }
0x1d46   : > { %30559 = vmatmul.mubr.f32.vlgmr.msra.gmra.mrb[10].mxu1 %v24664_v15  ;;  %31942 = vmatprep.subr.bf16.mxu0 %v36810_v19 }
0x1d47   : > { %30562 = vmatpush3.msra.mxu1 %v24675_v28  ;;  %30563 = vmatprep.mubr.msk.f32.mxu1 %vm32444_vm0, %v36864_v33 }
0x1d48   : > { %30478 = vmatmul.mubr.f32.vlgmr.msra.gmra.mrb[100].mxu0 %v36440_v13  ;;  %30566 = vmatprep.subr.mxu1 %v36864_v33 }
0x1d49   : > { %31944 = vmatpush3.bf16.msra.mxu0 %v36407_v57  ;;  %30515 = vmatprep.mubr.msk.f32.mxu0 %vm32444_vm0, %v36864_v33 }
0x1d4a   : > { %30564 = vmatmul.mubr.f32.vlgmr.msra.gmra.mrb[12].mxu1 %v36450_v41  ;;  %31945 = vmatprep.subr.bf16.mxu0 %v36810_v19 }
0x1d4b   : > { %30567 = vmatpush3.msra.mxu1 %v24672_v54  ;;  %30568 = vmatprep.mubr.msk.f32.mxu1 %vm32444_vm0, %v36864_v33  ;;  %v25053_v54 = vpop.permute.xlu0 %25052 }
0x1d4c   : > { %30571 = vmatprep.subr.mxu1 %v36864_v33 }
0x1d4d   : > { %31947 = vmatpush3.bf16.msra.mxu0 %v36417_v20 }
0x1d4e   : > { %30569 = vmatmul.mubr.f32.vlgmr.msra.gmra.mrb[14].mxu1 %v24661_v56  ;;  %31948 = vmatprep.subr.bf16.mxu0 %v36810_v19 }
0x1d4f   : > { %30572 = vmatpush3.msra.mxu1 %v24595_v10  ;;  %30573 = vmatprep.mubr.msk.f32.mxu1 %vm32444_vm0, %v36864_v33 }
0x1d50   : > { %30581 = vmatprep.subr.mxu1 %v36864_v33 }
0x1d51   : > { %31950 = vmatpush3.bf16.msra.mxu0 %v36422_v0 }
0x1d52   : > { %30574 = vmatmul.mubr.f32.vlgmr.msra.gmra.mrb[16].mxu1 %v24662_v6  ;;  %31951 = vmatprep.subr.bf16.mxu0 %v36810_v19 }
0x1d53   : > { %30582 = vmatpush3.msra.mxu1 %v24595_v10  ;;  %30583 = vmatprep.mubr.msk.f32.mxu1 %vm32444_vm0, %v36864_v33 }
0x1d54   : > { %30616 = vmatprep.subr.mxu1 %v36864_v33 }
0x1d55   : > { %31953 = vmatpush3.bf16.msra.mxu0 %v36429_v30 }
0x1d56   : > { %31966 = vmatprep.subr.bf16.mxu0 %v36810_v19  ;;  %30584 = vmatmul.mubr.f32.vlgmr.msra.gmra.mrb[18].mxu1 %v36450_v41 }
0x1d57   : > { %30618 = vmatprep.mubr.msk.f32.mxu1 %vm32444_vm0, %v36864_v33 }
0x1d58   : > { %30516 = vmatmul.mubr.f32.vlgmr.msra.gmra.mrb[102].mxu0 %v24124_v11 }
0x1d59   : > { %31968 = vmatpush3.bf16.msra.mxu0 %v36407_v57  ;;  %30553 = vmatprep.mubr.msk.f32.mxu0 %vm32444_vm0, %v36864_v33 }
0x1d5a   : > { %31969 = vmatprep.subr.bf16.mxu0 %v36810_v19 }
0x1d5d   : > { %31971 = vmatpush3.bf16.msra.mxu0 %v36417_v20 }
0x1d5e   : > { %31972 = vmatprep.subr.bf16.mxu0 %v36810_v19 }
0x1d61   : > { %31974 = vmatpush3.bf16.msra.mxu0 %v36422_v0 }
0x1d62   : > { %31975 = vmatprep.subr.bf16.mxu0 %v36810_v19 }
0x1d65   : > { %31977 = vmatpush3.bf16.msra.mxu0 %v36429_v30 }
0x1d66   : > { %30576 = vmatprep.subr.mxu0 %v36864_v33 }
0x1d68   : > { %30554 = vmatmul.mubr.f32.vlgmr.msra.gmra.mrb[104].mxu0 %v36440_v13  ;;  %v25131_v13 = vand.u32 4294901760, %v25130_v16 }
0x1d69   : > { %30577 = vmatpush3.msra.mxu0 %v24673_v55  ;;  %30578 = vmatprep.mubr.msk.f32.mxu0 %vm32444_vm0, %v36864_v33 }
0x1d6a   : > { %30586 = vmatprep.subr.mxu0 %v36864_v33 }
0x1d6c   : > { %30579 = vmatmul.mubr.f32.vlgmr.msra.gmra.mrb[106].mxu0 %v36450_v41  ;;  %v25508_v41 = vld [vmem:[%s32670_s23] sm:$0x3] }
0x1d6d   : > { %30588 = vmatprep.mubr.msk.f32.mxu0 %vm32444_vm0, %v36864_v33  ;;  %v25516_v40 = vsel %vm7412_vm4, %v25508_v41, 0 }
0x1d6e   : > { %v25587_v10 = vand.u32 4294901760, %v25516_v40 }
0x1d70   : > { %v25588_v12 = vsub.f32 %v25516_v40, %v25587_v10 }
0x1d72   : > { %v25589_v56 = vand.u32 4294901760, %v25588_v12 }
0x1d74   : > { %v25590_v37 = vsub.f32 %v25588_v12, %v25589_v56 }
0x1e05   : > { %v24327_v57 = vpop.f32.mrb[6].mxu1 }
0x1e06   : > { %v30498_v20 = vpop.f32.mrb[7].mxu1 }
0x1e0b   : > { %v24128_v19 = vpop.f32.mrb[98].mxu0 }
0x1e0c   : > { %v30460_v0 = vpop.f32.mrb[99].mxu0 }
0x1e15   : > { %v24503_v30 = vpop.f32.mrb[8].mxu1 }
0x1e16   : > { %v30536_v25 = vpop.f32.mrb[9].mxu1 }
0x1e19   : > { %v24666_v46 = vpop.f32.mrb[10].mxu1 }
0x1e1a   : > { %v30560_v60 = vpop.f32.mrb[11].mxu1 }
0x1e1b   : > { %v24239_v47 = vpop.f32.mrb[100].mxu0 }
0x1e1c   : > { %v24240_v22 = vadd.f32 %v24239_v47, %v24128_v19  ;;  %v30479_v42 = vpop.f32.mrb[101].mxu0 }
0x1e1d   : > { %v24742_v4 = vpop.f32.mrb[12].mxu1 }
0x1e1e   : > { %v24328_v59 = vadd.f32 %v24327_v57, %v24240_v22  ;;  %v24743_v38 = vadd.f32 %v24742_v4, %v24666_v46  ;;  %v30565_v34 = vpop.f32.mrb[13].mxu1  ;;  %v25591_v57 = vand.u32 4294901760, %v25590_v37  ;;  %v25513_v46 = vpop.permute.xlu1 %25512 }
0x1e21   : > { %v24816_v51 = vpop.f32.mrb[14].mxu1 }
0x1e22   : > { %v24817_v32 = vadd.f32 %v24816_v51, %v24743_v38  ;;  %v30570_v39 = vpop.f32.mrb[15].mxu1 }
0x1e25   : > { %v24890_v1 = vpop.f32.mrb[16].mxu1 }
0x1e26   : > { %v24891_v61 = vadd.f32 %v24890_v1, %v24817_v32  ;;  %v30575_v44 = vpop.f32.mrb[17].mxu1 }
0x1e29   : > { %v25036_v27 = vpop.f32.mrb[18].mxu1 }
0x1e2a   : > { %v30585_v36 = vpop.f32.mrb[19].mxu1 }
0x1e2b   : > { %v24408_v52 = vpop.f32.mrb[102].mxu0 }
0x1e2c   : > { %v24409_v45 = vadd.f32 %v24408_v52, %v24328_v59  ;;  %v30517_v62 = vpop.f32.mrb[103].mxu0 }
0x1e2e   : > { %v24504_v3 = vadd.f32 %v24503_v30, %v24409_v45 }
0x1e3b   : > { %v24582_v29 = vpop.f32.mrb[104].mxu0 }
0x1e3c   : > { %v24583_v23 = vadd.f32 %v24582_v29, %v24504_v3  ;;  %v30555_v48 = vpop.f32.mrb[105].mxu0 }
0x1e3e   : > { %v24586_v50 = vadd.f32 %v24583_v23, %v36436_v14 }
0x1e3f   : > { %v24964_v7 = vpop.f32.mrb[106].mxu0 }
0x1e40   : > { %v24965_v5 = vadd.f32 %v24964_v7, %v24891_v61  ;;  %v30580_v49 = vpop.f32.mrb[107].mxu0 }
0x1e42   : > { %v25037_v2 = vadd.f32 %v25036_v27, %v24965_v5 }
0x1e44   : > { %v25040_v43 = vadd.f32 %v25037_v2, %v24586_v50 }
0x1e46   : > { %v25047_v35 = vadd.f32 %v25045_v26, %v25040_v43 }
0x1e48   : > { %v25059_v21 = vsel %vm6058_vm3, %v25047_v35, 0 }
0x1e49   : > { %v25062_v8 = vand.u32 4294901760, %v25059_v21 }
0x1e4b   : > { %v25139_v53 = vsub.f32 %v25059_v21, %v25062_v8  ;;  %30587 = vmatpush3.msra.mxu0 %v25062_v8 }
0x1e4c   : > { %30589 = vmatmul.mubr.f32.vlgmr.msra.gmra.mrb[108].mxu0 %v25131_v13  ;;  %30591 = vmatprep.subr.mxu0 %v36864_v33 }
0x1e4d   : > { %v25140_v11 = vand.u32 4294901760, %v25139_v53  ;;  %30593 = vmatprep.mubr.msk.f32.mxu0 %vm32444_vm0, %v36864_v33 }
0x1e4f   : > { %v25141_v14 = vsub.f32 %v25139_v53, %v25140_v11 }
0x1e51   : > { %v25142_v9 = vand.u32 4294901760, %v25141_v14 }
0x1e53   : > { %30592 = vmatpush3.msra.mxu0 %v25142_v9 }
0x1e54   : > { %30594 = vmatmul.mubr.f32.vlgmr.msra.gmra.mrb[108].mxu0 %v25127_v24  ;;  %30596 = vmatprep.subr.mxu0 %v36864_v33 }
0x1e55   : > { %30597 = vmatpush3.msra.mxu0 %v25139_v53  ;;  %30598 = vmatprep.mubr.msk.f32.mxu0 %vm32444_vm0, %v36864_v33 }
0x1e56   : > { %30601 = vmatprep.subr.mxu0 %v36864_v33 }
0x1e5c   : > { %30599 = vmatmul.mubr.f32.vlgmr.msra.gmra.mrb[108].mxu0 %v25128_v18 }
0x1e5d   : > { %30602 = vmatpush3.msra.mxu0 %v25062_v8  ;;  %30603 = vmatprep.mubr.msk.f32.mxu0 %vm32444_vm0, %v36864_v33 }
0x1e5e   : > { %30606 = vmatprep.subr.mxu0 %v36864_v33 }
0x1e64   : > { %30604 = vmatmul.mubr.f32.vlgmr.msra.gmra.mrb[108].mxu0 %v25129_v31 }
0x1e65   : > { %30607 = vmatpush3.msra.mxu0 %v25140_v11  ;;  %30608 = vmatprep.mubr.msk.f32.mxu0 %vm32444_vm0, %v36864_v33 }
0x1e66   : > { %30611 = vmatprep.subr.mxu0 %v36864_v33 }
0x1e6c   : > { %30609 = vmatmul.mubr.f32.vlgmr.msra.gmra.mrb[108].mxu0 %v25127_v24 }
0x1e6d   : > { %30612 = vmatpush3.msra.mxu0 %v25062_v8  ;;  %30613 = vmatprep.mubr.msk.f32.mxu0 %vm32444_vm0, %v36864_v33 }
0x1e74   : > { %30614 = vmatmul.mubr.f32.vlgmr.msra.gmra.mrb[108].mxu0 %v25127_v24 }
0x1f47   : > { %v25503_v6 = vpop.f32.mrb[108].mxu0 }
0x1f48   : > { %v31983_v55 = vadd.f32 %v25503_v6, %v25053_v54  ;;  %v30615_v58 = vpop.f32.mrb[109].mxu0 }
0x1f4a   : > { %v25507_v15 = vmax.f32 %v31983_v55, 0.0 }
0x1f4c   : > { %v25519_v28 = vsel %vm6058_vm3, %v25507_v15, 0 }
0x1f4d   : > { %v25522_v20 = vand.u32 4294901760, %v25519_v28 }
0x1f4f   : > { %v25599_v19 = vsub.f32 %v25519_v28, %v25522_v20  ;;  %30617 = vmatpush3.msra.mxu1 %v25522_v20 }
0x1f50   : > { %30619 = vmatmul.mubr.f32.vlgmr.msra.gmra.mrb[20].mxu1 %v25591_v57  ;;  %30621 = vmatprep.subr.mxu1 %v36864_v33 }
0x1f51   : > { %v25600_v0 = vand.u32 4294901760, %v25599_v19  ;;  %30623 = vmatprep.mubr.msk.f32.mxu1 %vm32444_vm0, %v36864_v33 }
0x1f53   : > { %v25601_v30 = vsub.f32 %v25599_v19, %v25600_v0 }
0x1f55   : > { %v25602_v25 = vand.u32 4294901760, %v25601_v30 }
0x1f57   : > { %30622 = vmatpush3.msra.mxu1 %v25602_v25 }
0x1f58   : > { %30624 = vmatmul.mubr.f32.vlgmr.msra.gmra.mrb[20].mxu1 %v25587_v10  ;;  %30626 = vmatprep.subr.mxu1 %v36864_v33 }
0x1f59   : > { %30627 = vmatpush3.msra.mxu1 %v25599_v19  ;;  %30628 = vmatprep.mubr.msk.f32.mxu1 %vm32444_vm0, %v36864_v33 }
0x1f5a   : > { %30631 = vmatprep.subr.mxu1 %v36864_v33 }
0x1f60   : > { %30629 = vmatmul.mubr.f32.vlgmr.msra.gmra.mrb[20].mxu1 %v25588_v12 }
0x1f61   : > { %30632 = vmatpush3.msra.mxu1 %v25522_v20  ;;  %30633 = vmatprep.mubr.msk.f32.mxu1 %vm32444_vm0, %v36864_v33 }
0x1f62   : > { %30636 = vmatprep.subr.mxu1 %v36864_v33 }
0x1f68   : > { %30634 = vmatmul.mubr.f32.vlgmr.msra.gmra.mrb[20].mxu1 %v25589_v56 }
0x1f69   : > { %30637 = vmatpush3.msra.mxu1 %v25600_v0  ;;  %30638 = vmatprep.mubr.msk.f32.mxu1 %vm32444_vm0, %v36864_v33 }
0x1f6a   : > { %30641 = vmatprep.subr.mxu1 %v36864_v33 }
0x1f70   : > { %30639 = vmatmul.mubr.f32.vlgmr.msra.gmra.mrb[20].mxu1 %v25587_v10 }
0x1f71   : > { %30642 = vmatpush3.msra.mxu1 %v25522_v20  ;;  %30643 = vmatprep.mubr.msk.f32.mxu1 %vm32444_vm0, %v36864_v33 }
0x1f78   : > { %30644 = vmatmul.mubr.f32.vlgmr.msra.gmra.mrb[20].mxu1 %v25587_v10 }
0x204b   : > { %v25963_v60 = vpop.f32.mrb[20].mxu1 }
0x204c   : > { %v31984_v47 = vadd.f32 %v25963_v60, %v25513_v46  ;;  %v30645_v22 = vpop.f32.mrb[21].mxu1 }
0x204e   : > { %25967 = vst [vmem:[%s1341_s6] sm:$0x3] %v31984_v47 }
0x204f   : > { %32347 = shalt.err (!%p32344_p3)
}
0x2050   : > { %s32348_s6 = scalar_lea.hbm %s36560_s9, 32  ;;  %s32352_s5 = scalar_lea.hbm %s32680_s27, 64 }
0x2051   : > { %p32349_p4 = scmp.ne.s32.totalorder %s36560_s9, %s32348_s6  ;;  %p32353_p9 = scmp.lt.u32.totalorder %s36560_s9, %s32680_s27 }
0x2052   : > { %p32354_p10 = scmp.lt.u32.totalorder %s32352_s5, %s32348_s6  ;;  %p32356_p12 = scmp.lt.u32.totalorder %s32348_s6, %s36560_s9 }
0x2053   : > { %p32350_p7 = pnand %p32349_p4, %p32720_p5 }
0x2054   : > { %p32355_p11 = por %p32354_p10, %p32353_p9 }
0x2055   : > { %p32351_p8 = pneg %p32350_p7 }
0x2056   : > { %p32357_p0 = por %p32356_p12, %p32355_p11 }
0x2058   : > { %p32358_p13 = pnand %p32357_p0, %p32351_p8 }
0x205a   : > { %32361 = shalt.err (!%p32358_p13)
}
0x205b   : > { %32203 = dma.vmem_to_hbm [thread:$0]  (%p32720_p5), %s36562_s8, 32, %s36560_s9, %s25969_s12  }
0x205c PF: > { %p32209_p1 = scmp.ge.s32.totalorder %s32396_s4, 2  ;;  %s25994_s13 = sand.u32 1, %s32384_s20  }
0x205d   : > { %s25995_s14 = scalar_lea.sflag [#allocation4], %s25994_s13 }
0x205e   : > { %p32206_p2 = pnand %p32209_p1, %p32724_p6 }
0x2060   : > { %32379 = dma.done.wait (!%p32206_p2), %s25995_s14, 32  }
0x2061   : > { %32381 = vsyncadd (!%p32206_p2), %s25995_s14, 4294967264  ;;  %p103_p3 = scmp.ge.s32.totalorder %s32707_s18, 4   ;;  %s37004_s20 = smov %s32388_s10 }
0x2062   : > { %s37005_s10 = smov %s32392_s11  ;;  %s37006_s11 = smov %s32718_s26 }
0x2063   : > { %s37007_s4 = smov %s32707_s18  ;;  %105 = sbr.rel (!%p103_p3) target bundleno = 91 (0x5b), region = 310 }
0x206a   :  { %26000 = vsyncpa [#allocation4], 1 }
0x206b   :  { %26002 = vsyncpa [#allocation4 + $0x1], 1 }

</bundles_post_ra>
